<compile_context>
chip_gen: v5e
topology: v5e:2x2
jax: 0.10.0
libtpu: 0.0.40
codegen_flags: <defaults>
</compile_context>

<pallas_src>
import jax
import jax.numpy as jnp
from jax.experimental import pallas as pl
from jax.experimental.pallas import tpu as pltpu

LN_EPS = 0.1     # nn.LayerNorm(hidden_dim, eps=0.1) in the Encoder
L2_EPS = 1e-24   # clamp on ||x||^2 -> min norm 1e-12 (F.normalize-style guard)


def _swish(v):
    return v * jax.nn.sigmoid(v)


def _layernorm(v, gamma, beta):
    # One-pass LayerNorm: var = E[x^2] - mean^2 (safe with eps = 0.1).
    inv_n = 1.0 / v.shape[-1]
    mean = jnp.sum(v, axis=-1, keepdims=True) * inv_n
    mean_sq = jnp.sum(v * v, axis=-1, keepdims=True) * inv_n
    var = mean_sq - mean * mean
    # rsqrt goes to the EUP slot; fold gamma into the scale.
    scale = gamma * jax.lax.rsqrt(var + LN_EPS)
    return (v - mean) * scale + beta


def _dense(v_f32, w_ref, b_ref):
    # bf16 operands on the MXU, f32 accumulation; bias add stays f32.
    return (
        jnp.dot(v_f32.astype(jnp.bfloat16), w_ref[...],
                preferred_element_type=jnp.float32)
        + b_ref[...]
    )


# Grid-invariant params held whole-array in VMEM (single copy, no pipelining).
RESIDENT_PARAMS = [
    "b1", "w2", "b2", "w3", "b3", "w4", "b4", "w5", "b5",
    "g1", "be1", "g2", "be2", "g3", "be3", "g4", "be4", "g5", "be5",
    "wmd", "bmd",
]


def recvae_kernel(
    x_ref, w1_ref,
    b1, w2, b2, w3, b3, w4, b4, w5, b5,
    g1, be1, g2, be2, g3, be3, g4, be4, g5, be5,
    wmd, bmd,
    out_ref,
    acc_ref, ssq_ref,
):
    k = pl.program_id(1)

    @pl.when(k == 0)
    def _():
        acc_ref[...] = jnp.zeros_like(acc_ref)
        ssq_ref[...] = jnp.zeros_like(ssq_ref)

    # Partial fc1 (unnormalized ratings straight to the MXU) + partial ||x||^2.
    x_bf = x_ref[...]                          # bf16 (batch_tile, k_tile)
    x_f = x_bf.astype(jnp.float32)
    ssq_ref[...] += jnp.sum(x_f * x_f, axis=-1, keepdims=True)
    acc_ref[...] += jnp.dot(x_bf, w1_ref[...], preferred_element_type=jnp.float32)

    @pl.when(k == pl.num_programs(1) - 1)
    def _():
        # fc1(x / ||x||) == inv_norm * (x @ w1)  (scalar commutes with the map).
        inv_norm = jax.lax.rsqrt(jnp.maximum(ssq_ref[...], L2_EPS))
        # dropout(p, training=False) == identity in eval mode.
        h1 = _layernorm(_swish(acc_ref[...] * inv_norm + b1[...]),
                        g1[...], be1[...])
        res = h1
        h2 = _layernorm(_swish(_dense(h1, w2, b2) + res), g2[...], be2[...])
        res = res + h2
        h3 = _layernorm(_swish(_dense(h2, w3, b3) + res), g3[...], be3[...])
        res = res + h3
        h4 = _layernorm(_swish(_dense(h3, w4, b4) + res), g4[...], be4[...])
        res = res + h4
        h5 = _layernorm(_swish(_dense(h4, w5, b5) + res), g5[...], be5[...])

        # Fused fc_mu + decoder: x_pred = (h5 @ wmu + bmu) @ wdec + bdec
        #                               = h5 @ (wmu @ wdec) + (bmu @ wdec + bdec)
        x_pred = _dense(h5, wmd, bmd)
        out_ref[...] = x_pred.astype(out_ref.dtype)


def _pick_batch_tile(B):
    # >=4 grid steps on the parallel axis (>=2 per v7x TC) when possible.
    for t in (128, 64, 32, 16, 8):
        if B % t == 0 and B // t >= 4:
            return t
    for t in (128, 64, 32, 16, 8):
        if B % t == 0:
            return t
    return B


def _pick_k_tile(input_dim):
    for t in (1024, 512, 256, 128):
        if input_dim % t == 0:
            return t
    return input_dim


def recvae_forward(x, params, *, batch_tile=None, k_tile=None,
                   out_dtype=jnp.bfloat16):
    """x: (B, input_dim) ratings (any float dtype; cast to bf16 for the DMA).
    params: dict from to_kernel_params (bf16 weight matrices, f32 the rest)."""
    B, input_dim = x.shape
    hidden = params["w2"].shape[0]

    batch_tile = _pick_batch_tile(B) if batch_tile is None else min(batch_tile, B)
    k_tile = _pick_k_tile(input_dim) if k_tile is None else k_tile
    assert B % batch_tile == 0, (B, batch_tile)
    assert batch_tile % 8 == 0 or batch_tile == B, batch_tile
    assert input_dim % k_tile == 0, (input_dim, k_tile)
    assert k_tile % 128 == 0 or k_tile == input_dim, k_tile

    x_bf = x.astype(jnp.bfloat16)  # halves the largest pipelined DMA

    resident = [params[name] for name in RESIDENT_PARAMS]
    resident_spec = pl.BlockSpec(memory_space=pltpu.MemorySpace.VMEM)

    in_specs = (
        [pl.BlockSpec((batch_tile, k_tile), lambda i, k: (i, k)),   # x
         pl.BlockSpec((k_tile, hidden), lambda i, k: (k, 0))]       # w1
        + [resident_spec] * len(RESIDENT_PARAMS)
    )
    out_spec = pl.BlockSpec((batch_tile, input_dim), lambda i, k: (i, 0))

    # Scoped-VMEM budget from the actual tile footprint, with headroom.
    resident_bytes = sum(int(a.size) * a.dtype.itemsize for a in resident)
    out_itemsize = jnp.dtype(out_dtype).itemsize
    pipelined_bytes = 2 * (batch_tile * k_tile * 2        # x bf16, double-buffered
                           + k_tile * hidden * 2          # w1 bf16
                           + batch_tile * input_dim * out_itemsize)
    scratch_bytes = batch_tile * (hidden + 1) * 4
    vmem_limit = int(1.5 * (resident_bytes + pipelined_bytes + scratch_bytes))
    vmem_limit = min(max(vmem_limit + (4 << 20), 16 << 20), 64 << 20)

    return pl.pallas_call(
        recvae_kernel,
        out_shape=jax.ShapeDtypeStruct((B, input_dim), out_dtype),
        grid_spec=pltpu.PrefetchScalarGridSpec(
            num_scalar_prefetch=0,
            grid=(B // batch_tile, input_dim // k_tile),
            in_specs=in_specs,
            out_specs=out_spec,
            scratch_shapes=[pltpu.VMEM((batch_tile, hidden), jnp.float32),
                            pltpu.VMEM((batch_tile, 1), jnp.float32)],
        ),
        compiler_params=pltpu.CompilerParams(
            dimension_semantics=("parallel", "arbitrary"),
            vmem_limit_bytes=vmem_limit,
        ),
    )(x_bf, params["w1"], *resident)


def make_params(key, input_dim, hidden_dim, latent_dim):
    """Deterministic synthetic f32 parameters (PyTorch nn.Linear-like scale).
    Linear weights are stored already transposed to (in_dim, out_dim)."""
    ks = iter(jax.random.split(key, 14))

    def linear(in_dim, out_dim):
        bound = 1.0 / (float(in_dim) ** 0.5)
        w = jax.random.uniform(next(ks), (in_dim, out_dim), jnp.float32,
                               -bound, bound)
        b = jax.random.uniform(next(ks), (1, out_dim), jnp.float32,
                               -bound, bound)
        return w, b

    p = {}
    p["w1"], p["b1"] = linear(input_dim, hidden_dim)
    p["w2"], p["b2"] = linear(hidden_dim, hidden_dim)
    p["w3"], p["b3"] = linear(hidden_dim, hidden_dim)
    p["w4"], p["b4"] = linear(hidden_dim, hidden_dim)
    p["w5"], p["b5"] = linear(hidden_dim, hidden_dim)
    p["wmu"], p["bmu"] = linear(hidden_dim, latent_dim)
    p["wdec"], p["bdec"] = linear(latent_dim, input_dim)
    # LayerNorm init: gamma = 1, beta = 0 (PyTorch default)
    for i in range(1, 6):
        p[f"g{i}"] = jnp.ones((1, hidden_dim), jnp.float32)
        p[f"be{i}"] = jnp.zeros((1, hidden_dim), jnp.float32)
    return p


def to_kernel_params(p):
    """Weight matrices -> bf16; fuse fc_mu + decoder (eval: z = mu).
    The wmu @ wdec product is done in f32 BEFORE the bf16 cast."""
    kp = {}
    for name in ("w1", "w2", "w3", "w4", "w5"):
        kp[name] = p[name].astype(jnp.bfloat16)
    for name in ("b1", "b2", "b3", "b4", "b5"):
        kp[name] = p[name]
    for i in range(1, 6):
        kp[f"g{i}"] = p[f"g{i}"]
        kp[f"be{i}"] = p[f"be{i}"]
    wmd = jnp.dot(p["wmu"], p["wdec"], preferred_element_type=jnp.float32)
    bmd = jnp.dot(p["bmu"], p["wdec"], preferred_element_type=jnp.float32) + p["bdec"]
    kp["wmd"] = wmd.astype(jnp.bfloat16)
    kp["bmd"] = bmd
    return kp


def recvae_forward_ref(x, p, matmul_dtype=jnp.float32):
    """Pure-JAX reference of the module-exact eval-mode forward pass
    (normalize-then-fc1, separate fc_mu / decoder matmuls)."""
    x = x.astype(jnp.float32)
    norm = jnp.sqrt(jnp.maximum(jnp.sum(x * x, axis=-1, keepdims=True), L2_EPS))
    xn = x / norm

    def dense(v, w, b):
        return jnp.dot(v.astype(matmul_dtype), w.astype(matmul_dtype),
                       preferred_element_type=jnp.float32) + b.astype(jnp.float32)

    h1 = _layernorm(_swish(dense(xn, p["w1"], p["b1"])), p["g1"], p["be1"])
    h2 = _layernorm(_swish(dense(h1, p["w2"], p["b2"]) + h1), p["g2"], p["be2"])
    h3 = _layernorm(_swish(dense(h2, p["w3"], p["b3"]) + h1 + h2),
                    p["g3"], p["be3"])
    h4 = _layernorm(_swish(dense(h3, p["w4"], p["b4"]) + h1 + h2 + h3),
                    p["g4"], p["be4"])
    h5 = _layernorm(_swish(dense(h4, p["w5"], p["b5"]) + h1 + h2 + h3 + h4),
                    p["g5"], p["be5"])
    mu = dense(h5, p["wmu"], p["bmu"])
    return dense(mu, p["wdec"], p["bdec"])


if __name__ == "__main__":
    # Small synthetic shapes consistent with the module:
    #   batch of users B=256, num_items (input_dim)=512, hidden=256, latent=128.
    # batch_tile auto-picks 64 -> 4 parallel grid steps (>=2 per v7x TC);
    # k_tile=256 -> 2 accumulation steps over the item axis for fc1.
    B, INPUT_DIM, HIDDEN_DIM, LATENT_DIM = 256, 512, 256, 128

    key = jax.random.PRNGKey(0)
    kx, kp = jax.random.split(key)

    # Sparse-ish nonnegative "user ratings" (implicit feedback style),
    # with at least one positive per row.
    ratings = (jax.random.uniform(kx, (B, INPUT_DIM)) < 0.05).astype(jnp.float32)
    ratings = ratings.at[:, 0].set(1.0)

    params_f32 = make_params(kp, INPUT_DIM, HIDDEN_DIM, LATENT_DIM)
    params_kernel = to_kernel_params(params_f32)

    out = recvae_forward(ratings, params_kernel, k_tile=256)
    out = jax.block_until_ready(out)
    assert out.shape == (B, INPUT_DIM)
    out_f32 = out.astype(jnp.float32)

    # Check vs. a JAX reference using bf16 matmul operands (same MXU boundary)
    # and, loosely, vs. the all-f32 module-exact reference.
    ref_bf16 = recvae_forward_ref(ratings, params_f32, matmul_dtype=jnp.bfloat16)
    ref_f32 = recvae_forward_ref(ratings, params_f32, matmul_dtype=jnp.float32)

    assert jnp.allclose(out_f32, ref_bf16, atol=3e-2, rtol=3e-2), float(
        jnp.max(jnp.abs(out_f32 - ref_bf16)))
    assert jnp.allclose(out_f32, ref_f32, atol=1e-1, rtol=1e-1), float(
        jnp.max(jnp.abs(out_f32 - ref_f32)))

    print("KERNEL_OK")
</pallas_src>

<mosaic_0001>
module attributes {stable_mosaic.version = 11 : i64} {
  func.func @recvae_kernel(%arg0: i32, %arg1: i32, %arg2: memref<64x256xbf16, #tpu.memory_space<vmem>>, %arg3: memref<256x256xbf16, #tpu.memory_space<vmem>>, %arg4: memref<1x256xf32, #tpu.memory_space<vmem>>, %arg5: memref<256x256xbf16, #tpu.memory_space<vmem>>, %arg6: memref<1x256xf32, #tpu.memory_space<vmem>>, %arg7: memref<256x256xbf16, #tpu.memory_space<vmem>>, %arg8: memref<1x256xf32, #tpu.memory_space<vmem>>, %arg9: memref<256x256xbf16, #tpu.memory_space<vmem>>, %arg10: memref<1x256xf32, #tpu.memory_space<vmem>>, %arg11: memref<256x256xbf16, #tpu.memory_space<vmem>>, %arg12: memref<1x256xf32, #tpu.memory_space<vmem>>, %arg13: memref<1x256xf32, #tpu.memory_space<vmem>>, %arg14: memref<1x256xf32, #tpu.memory_space<vmem>>, %arg15: memref<1x256xf32, #tpu.memory_space<vmem>>, %arg16: memref<1x256xf32, #tpu.memory_space<vmem>>, %arg17: memref<1x256xf32, #tpu.memory_space<vmem>>, %arg18: memref<1x256xf32, #tpu.memory_space<vmem>>, %arg19: memref<1x256xf32, #tpu.memory_space<vmem>>, %arg20: memref<1x256xf32, #tpu.memory_space<vmem>>, %arg21: memref<1x256xf32, #tpu.memory_space<vmem>>, %arg22: memref<1x256xf32, #tpu.memory_space<vmem>>, %arg23: memref<256x512xbf16, #tpu.memory_space<vmem>>, %arg24: memref<1x512xf32, #tpu.memory_space<vmem>>, %arg25: memref<64x512xbf16, #tpu.memory_space<vmem>>, %arg26: memref<64x256xf32, #tpu.memory_space<vmem>>, %arg27: memref<64x1xf32, #tpu.memory_space<vmem>>) attributes {dimension_semantics = [#tpu.dimension_semantics<parallel>, #tpu.dimension_semantics<arbitrary>], iteration_bounds = array<i64: 4, 2>, scalar_prefetch = 0 : i64, scratch_operands = 2 : i64, tpu.core_type = #tpu.core_type<tc>, window_params = [{transform_indices = @transform_0, window_bounds = array<i64: 64, 256>}, {transform_indices = @transform_1, window_bounds = array<i64: 256, 256>}, {pipeline_mode = #tpu.pipeline_mode<synchronous>, transform_indices = @transform_2, window_bounds = array<i64: 1, 256>}, {pipeline_mode = #tpu.pipeline_mode<synchronous>, transform_indices = @transform_3, window_bounds = array<i64: 256, 256>}, {pipeline_mode = #tpu.pipeline_mode<synchronous>, transform_indices = @transform_4, window_bounds = array<i64: 1, 256>}, {pipeline_mode = #tpu.pipeline_mode<synchronous>, transform_indices = @transform_5, window_bounds = array<i64: 256, 256>}, {pipeline_mode = #tpu.pipeline_mode<synchronous>, transform_indices = @transform_6, window_bounds = array<i64: 1, 256>}, {pipeline_mode = #tpu.pipeline_mode<synchronous>, transform_indices = @transform_7, window_bounds = array<i64: 256, 256>}, {pipeline_mode = #tpu.pipeline_mode<synchronous>, transform_indices = @transform_8, window_bounds = array<i64: 1, 256>}, {pipeline_mode = #tpu.pipeline_mode<synchronous>, transform_indices = @transform_9, window_bounds = array<i64: 256, 256>}, {pipeline_mode = #tpu.pipeline_mode<synchronous>, transform_indices = @transform_10, window_bounds = array<i64: 1, 256>}, {pipeline_mode = #tpu.pipeline_mode<synchronous>, transform_indices = @transform_11, window_bounds = array<i64: 1, 256>}, {pipeline_mode = #tpu.pipeline_mode<synchronous>, transform_indices = @transform_12, window_bounds = array<i64: 1, 256>}, {pipeline_mode = #tpu.pipeline_mode<synchronous>, transform_indices = @transform_13, window_bounds = array<i64: 1, 256>}, {pipeline_mode = #tpu.pipeline_mode<synchronous>, transform_indices = @transform_14, window_bounds = array<i64: 1, 256>}, {pipeline_mode = #tpu.pipeline_mode<synchronous>, transform_indices = @transform_15, window_bounds = array<i64: 1, 256>}, {pipeline_mode = #tpu.pipeline_mode<synchronous>, transform_indices = @transform_16, window_bounds = array<i64: 1, 256>}, {pipeline_mode = #tpu.pipeline_mode<synchronous>, transform_indices = @transform_17, window_bounds = array<i64: 1, 256>}, {pipeline_mode = #tpu.pipeline_mode<synchronous>, transform_indices = @transform_18, window_bounds = array<i64: 1, 256>}, {pipeline_mode = #tpu.pipeline_mode<synchronous>, transform_indices = @transform_19, window_bounds = array<i64: 1, 256>}, {pipeline_mode = #tpu.pipeline_mode<synchronous>, transform_indices = @transform_20, window_bounds = array<i64: 1, 256>}, {pipeline_mode = #tpu.pipeline_mode<synchronous>, transform_indices = @transform_21, window_bounds = array<i64: 256, 512>}, {pipeline_mode = #tpu.pipeline_mode<synchronous>, transform_indices = @transform_22, window_bounds = array<i64: 1, 512>}, {transform_indices = @transform_23, window_bounds = array<i64: 64, 512>}]} {
    %c0_i32 = arith.constant 0 : i32
    %0 = arith.cmpi eq, %arg1, %c0_i32 : i32
    %1 = arith.extui %0 : i1 to i32
    %c0_i32_0 = arith.constant 0 : i32
    %2 = arith.cmpi ne, %1, %c0_i32_0 : i32
    scf.if %2 {
      %cst_14 = arith.constant 0.000000e+00 : f32
      %19 = vector.broadcast %cst_14 : f32 to vector<64x256xf32>
      %c0_15 = arith.constant 0 : index
      %c0_16 = arith.constant 0 : index
      %20 = vector.load %arg26[%c0_15, %c0_16] : memref<64x256xf32, #tpu.memory_space<vmem>>, vector<64x256xf32>
      tpu.vector_store %arg26[%c0_15, %c0_16], %19 {strides = array<i32>} : memref<64x256xf32, #tpu.memory_space<vmem>>, vector<64x256xf32>,
      %cst_17 = arith.constant 0.000000e+00 : f32
      %21 = vector.broadcast %cst_17 : f32 to vector<64x1xf32>
      %c0_18 = arith.constant 0 : index
      %c0_19 = arith.constant 0 : index
      %22 = vector.load %arg27[%c0_18, %c0_19] : memref<64x1xf32, #tpu.memory_space<vmem>>, vector<64x1xf32>
      tpu.vector_store %arg27[%c0_18, %c0_19], %21 {strides = array<i32>} : memref<64x1xf32, #tpu.memory_space<vmem>>, vector<64x1xf32>,
    } else {
    }
    %c0 = arith.constant 0 : index
    %c0_1 = arith.constant 0 : index
    %3 = vector.load %arg2[%c0, %c0_1] : memref<64x256xbf16, #tpu.memory_space<vmem>>, vector<64x256xbf16>
    %4 = arith.extf %3 : vector<64x256xbf16> to vector<64x256xf32>
    %c0_2 = arith.constant 0 : index
    %c0_3 = arith.constant 0 : index
    %5 = vector.load %arg27[%c0_2, %c0_3] : memref<64x1xf32, #tpu.memory_space<vmem>>, vector<64x1xf32>
    %6 = arith.mulf %4, %4 : vector<64x256xf32>
    %cst = arith.constant dense<0.000000e+00> : vector<64xf32>
    %7 = vector.multi_reduction <add>, %6, %cst [1] : vector<64x256xf32> to vector<64xf32>
    %8 = vector.shape_cast %7 : vector<64xf32> to vector<64x1xf32>
    %9 = arith.addf %5, %8 : vector<64x1xf32>
    %c0_4 = arith.constant 0 : index
    %c0_5 = arith.constant 0 : index
    %10 = vector.load %arg27[%c0_4, %c0_5] : memref<64x1xf32, #tpu.memory_space<vmem>>, vector<64x1xf32>
    tpu.vector_store %arg27[%c0_4, %c0_5], %9 {strides = array<i32>} : memref<64x1xf32, #tpu.memory_space<vmem>>, vector<64x1xf32>,
    %c0_6 = arith.constant 0 : index
    %c0_7 = arith.constant 0 : index
    %11 = vector.load %arg26[%c0_6, %c0_7] : memref<64x256xf32, #tpu.memory_space<vmem>>, vector<64x256xf32>
    %c0_8 = arith.constant 0 : index
    %c0_9 = arith.constant 0 : index
    %12 = vector.load %arg3[%c0_8, %c0_9] : memref<256x256xbf16, #tpu.memory_space<vmem>>, vector<256x256xbf16>
    %cst_10 = arith.constant dense<0.000000e+00> : vector<64x256xf32>
    %13 = tpu.matmul %3, %12, %cst_10 {dimension_numbers = #tpu.dot_dimension_numbers<[1], [0], [0], [1], [0, 0, 1, 1], [], []>} : vector<64x256xbf16>, vector<256x256xbf16>, vector<64x256xf32> -> vector<64x256xf32>
    %14 = arith.addf %11, %13 : vector<64x256xf32>
    %c0_11 = arith.constant 0 : index
    %c0_12 = arith.constant 0 : index
    %15 = vector.load %arg26[%c0_11, %c0_12] : memref<64x256xf32, #tpu.memory_space<vmem>>, vector<64x256xf32>
    tpu.vector_store %arg26[%c0_11, %c0_12], %14 {strides = array<i32>} : memref<64x256xf32, #tpu.memory_space<vmem>>, vector<64x256xf32>,
    %c1_i32 = arith.constant 1 : i32
    %16 = arith.cmpi eq, %arg1, %c1_i32 : i32
    %17 = arith.extui %16 : i1 to i32
    %c0_i32_13 = arith.constant 0 : i32
    %18 = arith.cmpi ne, %17, %c0_i32_13 : i32
    scf.if %18 {
      %c0_14 = arith.constant 0 : index
      %c0_15 = arith.constant 0 : index
      %19 = vector.load %arg27[%c0_14, %c0_15] : memref<64x1xf32, #tpu.memory_space<vmem>>, vector<64x1xf32>
      %cst_16 = arith.constant 1.000000e-24 : f32
      %20 = vector.broadcast %cst_16 : f32 to vector<64x1xf32>
      %21 = arith.maximumf %19, %20 : vector<64x1xf32>
      %22 = math.rsqrt %21 : vector<64x1xf32>
      %c0_17 = arith.constant 0 : index
      %c0_18 = arith.constant 0 : index
      %23 = vector.load %arg26[%c0_17, %c0_18] : memref<64x256xf32, #tpu.memory_space<vmem>>, vector<64x256xf32>
      %24 = vector.broadcast %22 : vector<64x1xf32> to vector<64x256xf32>
      %25 = arith.mulf %23, %24 : vector<64x256xf32>
      %c0_19 = arith.constant 0 : index
      %c0_20 = arith.constant 0 : index
      %26 = vector.load %arg4[%c0_19, %c0_20] : memref<1x256xf32, #tpu.memory_space<vmem>>, vector<1x256xf32>
      %27 = vector.broadcast %26 : vector<1x256xf32> to vector<64x256xf32>
      %28 = arith.addf %25, %27 : vector<64x256xf32>
      %29 = arith.negf %28 : vector<64x256xf32>
      %30 = math.exp %29 : vector<64x256xf32>
      %cst_21 = arith.constant 1.000000e+00 : f32
      %31 = vector.broadcast %cst_21 : f32 to vector<64x256xf32>
      %32 = arith.addf %31, %30 : vector<64x256xf32>
      %33 = arith.divf %31, %32 : vector<64x256xf32>
      %34 = arith.mulf %28, %33 : vector<64x256xf32>
      %c0_22 = arith.constant 0 : index
      %c0_23 = arith.constant 0 : index
      %35 = vector.load %arg13[%c0_22, %c0_23] : memref<1x256xf32, #tpu.memory_space<vmem>>, vector<1x256xf32>
      %c0_24 = arith.constant 0 : index
      %c0_25 = arith.constant 0 : index
      %36 = vector.load %arg14[%c0_24, %c0_25] : memref<1x256xf32, #tpu.memory_space<vmem>>, vector<1x256xf32>
      %cst_26 = arith.constant dense<0.000000e+00> : vector<64xf32>
      %37 = vector.multi_reduction <add>, %34, %cst_26 [1] : vector<64x256xf32> to vector<64xf32>
      %38 = vector.shape_cast %37 : vector<64xf32> to vector<64x1xf32>
      %cst_27 = arith.constant 3.906250e-03 : f32
      %39 = vector.broadcast %cst_27 : f32 to vector<64x1xf32>
      %40 = arith.mulf %38, %39 : vector<64x1xf32>
      %41 = arith.mulf %34, %34 : vector<64x256xf32>
      %cst_28 = arith.constant dense<0.000000e+00> : vector<64xf32>
      %42 = vector.multi_reduction <add>, %41, %cst_28 [1] : vector<64x256xf32> to vector<64xf32>
      %43 = vector.shape_cast %42 : vector<64xf32> to vector<64x1xf32>
      %cst_29 = arith.constant 3.906250e-03 : f32
      %44 = vector.broadcast %cst_29 : f32 to vector<64x1xf32>
      %45 = arith.mulf %43, %44 : vector<64x1xf32>
      %46 = arith.mulf %40, %40 : vector<64x1xf32>
      %47 = arith.subf %45, %46 : vector<64x1xf32>
      %cst_30 = arith.constant 1.000000e-01 : f32
      %48 = vector.broadcast %cst_30 : f32 to vector<64x1xf32>
      %49 = arith.addf %47, %48 : vector<64x1xf32>
      %50 = math.rsqrt %49 : vector<64x1xf32>
      %51 = vector.broadcast %35 : vector<1x256xf32> to vector<64x256xf32>
      %52 = vector.broadcast %50 : vector<64x1xf32> to vector<64x256xf32>
      %53 = arith.mulf %51, %52 : vector<64x256xf32>
      %54 = vector.broadcast %40 : vector<64x1xf32> to vector<64x256xf32>
      %55 = arith.subf %34, %54 : vector<64x256xf32>
      %56 = arith.mulf %55, %53 : vector<64x256xf32>
      %57 = vector.broadcast %36 : vector<1x256xf32> to vector<64x256xf32>
      %58 = arith.addf %56, %57 : vector<64x256xf32>
      %59 = arith.truncf %58 : vector<64x256xf32> to vector<64x256xbf16>
      %c0_31 = arith.constant 0 : index
      %c0_32 = arith.constant 0 : index
      %60 = vector.load %arg5[%c0_31, %c0_32] : memref<256x256xbf16, #tpu.memory_space<vmem>>, vector<256x256xbf16>
      %cst_33 = arith.constant dense<0.000000e+00> : vector<64x256xf32>
      %61 = tpu.matmul %59, %60, %cst_33 {dimension_numbers = #tpu.dot_dimension_numbers<[1], [0], [0], [1], [0, 0, 1, 1], [], []>} : vector<64x256xbf16>, vector<256x256xbf16>, vector<64x256xf32> -> vector<64x256xf32>
      %c0_34 = arith.constant 0 : index
      %c0_35 = arith.constant 0 : index
      %62 = vector.load %arg6[%c0_34, %c0_35] : memref<1x256xf32, #tpu.memory_space<vmem>>, vector<1x256xf32>
      %63 = vector.broadcast %62 : vector<1x256xf32> to vector<64x256xf32>
      %64 = arith.addf %61, %63 : vector<64x256xf32>
      %65 = arith.addf %64, %58 : vector<64x256xf32>
      %66 = arith.negf %65 : vector<64x256xf32>
      %67 = math.exp %66 : vector<64x256xf32>
      %cst_36 = arith.constant 1.000000e+00 : f32
      %68 = vector.broadcast %cst_36 : f32 to vector<64x256xf32>
      %69 = arith.addf %68, %67 : vector<64x256xf32>
      %70 = arith.divf %68, %69 : vector<64x256xf32>
      %71 = arith.mulf %65, %70 : vector<64x256xf32>
      %c0_37 = arith.constant 0 : index
      %c0_38 = arith.constant 0 : index
      %72 = vector.load %arg15[%c0_37, %c0_38] : memref<1x256xf32, #tpu.memory_space<vmem>>, vector<1x256xf32>
      %c0_39 = arith.constant 0 : index
      %c0_40 = arith.constant 0 : index
      %73 = vector.load %arg16[%c0_39, %c0_40] : memref<1x256xf32, #tpu.memory_space<vmem>>, vector<1x256xf32>
      %cst_41 = arith.constant dense<0.000000e+00> : vector<64xf32>
      %74 = vector.multi_reduction <add>, %71, %cst_41 [1] : vector<64x256xf32> to vector<64xf32>
      %75 = vector.shape_cast %74 : vector<64xf32> to vector<64x1xf32>
      %cst_42 = arith.constant 3.906250e-03 : f32
      %76 = vector.broadcast %cst_42 : f32 to vector<64x1xf32>
      %77 = arith.mulf %75, %76 : vector<64x1xf32>
      %78 = arith.mulf %71, %71 : vector<64x256xf32>
      %cst_43 = arith.constant dense<0.000000e+00> : vector<64xf32>
      %79 = vector.multi_reduction <add>, %78, %cst_43 [1] : vector<64x256xf32> to vector<64xf32>
      %80 = vector.shape_cast %79 : vector<64xf32> to vector<64x1xf32>
      %cst_44 = arith.constant 3.906250e-03 : f32
      %81 = vector.broadcast %cst_44 : f32 to vector<64x1xf32>
      %82 = arith.mulf %80, %81 : vector<64x1xf32>
      %83 = arith.mulf %77, %77 : vector<64x1xf32>
      %84 = arith.subf %82, %83 : vector<64x1xf32>
      %cst_45 = arith.constant 1.000000e-01 : f32
      %85 = vector.broadcast %cst_45 : f32 to vector<64x1xf32>
      %86 = arith.addf %84, %85 : vector<64x1xf32>
      %87 = math.rsqrt %86 : vector<64x1xf32>
      %88 = vector.broadcast %72 : vector<1x256xf32> to vector<64x256xf32>
      %89 = vector.broadcast %87 : vector<64x1xf32> to vector<64x256xf32>
      %90 = arith.mulf %88, %89 : vector<64x256xf32>
      %91 = vector.broadcast %77 : vector<64x1xf32> to vector<64x256xf32>
      %92 = arith.subf %71, %91 : vector<64x256xf32>
      %93 = arith.mulf %92, %90 : vector<64x256xf32>
      %94 = vector.broadcast %73 : vector<1x256xf32> to vector<64x256xf32>
      %95 = arith.addf %93, %94 : vector<64x256xf32>
      %96 = arith.addf %58, %95 : vector<64x256xf32>
      %97 = arith.truncf %95 : vector<64x256xf32> to vector<64x256xbf16>
      %c0_46 = arith.constant 0 : index
      %c0_47 = arith.constant 0 : index
      %98 = vector.load %arg7[%c0_46, %c0_47] : memref<256x256xbf16, #tpu.memory_space<vmem>>, vector<256x256xbf16>
      %cst_48 = arith.constant dense<0.000000e+00> : vector<64x256xf32>
      %99 = tpu.matmul %97, %98, %cst_48 {dimension_numbers = #tpu.dot_dimension_numbers<[1], [0], [0], [1], [0, 0, 1, 1], [], []>} : vector<64x256xbf16>, vector<256x256xbf16>, vector<64x256xf32> -> vector<64x256xf32>
      %c0_49 = arith.constant 0 : index
      %c0_50 = arith.constant 0 : index
      %100 = vector.load %arg8[%c0_49, %c0_50] : memref<1x256xf32, #tpu.memory_space<vmem>>, vector<1x256xf32>
      %101 = vector.broadcast %100 : vector<1x256xf32> to vector<64x256xf32>
      %102 = arith.addf %99, %101 : vector<64x256xf32>
      %103 = arith.addf %102, %96 : vector<64x256xf32>
      %104 = arith.negf %103 : vector<64x256xf32>
      %105 = math.exp %104 : vector<64x256xf32>
      %cst_51 = arith.constant 1.000000e+00 : f32
      %106 = vector.broadcast %cst_51 : f32 to vector<64x256xf32>
      %107 = arith.addf %106, %105 : vector<64x256xf32>
      %108 = arith.divf %106, %107 : vector<64x256xf32>
      %109 = arith.mulf %103, %108 : vector<64x256xf32>
      %c0_52 = arith.constant 0 : index
      %c0_53 = arith.constant 0 : index
      %110 = vector.load %arg17[%c0_52, %c0_53] : memref<1x256xf32, #tpu.memory_space<vmem>>, vector<1x256xf32>
      %c0_54 = arith.constant 0 : index
      %c0_55 = arith.constant 0 : index
      %111 = vector.load %arg18[%c0_54, %c0_55] : memref<1x256xf32, #tpu.memory_space<vmem>>, vector<1x256xf32>
      %cst_56 = arith.constant dense<0.000000e+00> : vector<64xf32>
      %112 = vector.multi_reduction <add>, %109, %cst_56 [1] : vector<64x256xf32> to vector<64xf32>
      %113 = vector.shape_cast %112 : vector<64xf32> to vector<64x1xf32>
      %cst_57 = arith.constant 3.906250e-03 : f32
      %114 = vector.broadcast %cst_57 : f32 to vector<64x1xf32>
      %115 = arith.mulf %113, %114 : vector<64x1xf32>
      %116 = arith.mulf %109, %109 : vector<64x256xf32>
      %cst_58 = arith.constant dense<0.000000e+00> : vector<64xf32>
      %117 = vector.multi_reduction <add>, %116, %cst_58 [1] : vector<64x256xf32> to vector<64xf32>
      %118 = vector.shape_cast %117 : vector<64xf32> to vector<64x1xf32>
      %cst_59 = arith.constant 3.906250e-03 : f32
      %119 = vector.broadcast %cst_59 : f32 to vector<64x1xf32>
      %120 = arith.mulf %118, %119 : vector<64x1xf32>
      %121 = arith.mulf %115, %115 : vector<64x1xf32>
      %122 = arith.subf %120, %121 : vector<64x1xf32>
      %cst_60 = arith.constant 1.000000e-01 : f32
      %123 = vector.broadcast %cst_60 : f32 to vector<64x1xf32>
      %124 = arith.addf %122, %123 : vector<64x1xf32>
      %125 = math.rsqrt %124 : vector<64x1xf32>
      %126 = vector.broadcast %110 : vector<1x256xf32> to vector<64x256xf32>
      %127 = vector.broadcast %125 : vector<64x1xf32> to vector<64x256xf32>
      %128 = arith.mulf %126, %127 : vector<64x256xf32>
      %129 = vector.broadcast %115 : vector<64x1xf32> to vector<64x256xf32>
      %130 = arith.subf %109, %129 : vector<64x256xf32>
      %131 = arith.mulf %130, %128 : vector<64x256xf32>
      %132 = vector.broadcast %111 : vector<1x256xf32> to vector<64x256xf32>
      %133 = arith.addf %131, %132 : vector<64x256xf32>
      %134 = arith.addf %96, %133 : vector<64x256xf32>
      %135 = arith.truncf %133 : vector<64x256xf32> to vector<64x256xbf16>
      %c0_61 = arith.constant 0 : index
      %c0_62 = arith.constant 0 : index
      %136 = vector.load %arg9[%c0_61, %c0_62] : memref<256x256xbf16, #tpu.memory_space<vmem>>, vector<256x256xbf16>
      %cst_63 = arith.constant dense<0.000000e+00> : vector<64x256xf32>
      %137 = tpu.matmul %135, %136, %cst_63 {dimension_numbers = #tpu.dot_dimension_numbers<[1], [0], [0], [1], [0, 0, 1, 1], [], []>} : vector<64x256xbf16>, vector<256x256xbf16>, vector<64x256xf32> -> vector<64x256xf32>
      %c0_64 = arith.constant 0 : index
      %c0_65 = arith.constant 0 : index
      %138 = vector.load %arg10[%c0_64, %c0_65] : memref<1x256xf32, #tpu.memory_space<vmem>>, vector<1x256xf32>
      %139 = vector.broadcast %138 : vector<1x256xf32> to vector<64x256xf32>
      %140 = arith.addf %137, %139 : vector<64x256xf32>
      %141 = arith.addf %140, %134 : vector<64x256xf32>
      %142 = arith.negf %141 : vector<64x256xf32>
      %143 = math.exp %142 : vector<64x256xf32>
      %cst_66 = arith.constant 1.000000e+00 : f32
      %144 = vector.broadcast %cst_66 : f32 to vector<64x256xf32>
      %145 = arith.addf %144, %143 : vector<64x256xf32>
      %146 = arith.divf %144, %145 : vector<64x256xf32>
      %147 = arith.mulf %141, %146 : vector<64x256xf32>
      %c0_67 = arith.constant 0 : index
      %c0_68 = arith.constant 0 : index
      %148 = vector.load %arg19[%c0_67, %c0_68] : memref<1x256xf32, #tpu.memory_space<vmem>>, vector<1x256xf32>
      %c0_69 = arith.constant 0 : index
      %c0_70 = arith.constant 0 : index
      %149 = vector.load %arg20[%c0_69, %c0_70] : memref<1x256xf32, #tpu.memory_space<vmem>>, vector<1x256xf32>
      %cst_71 = arith.constant dense<0.000000e+00> : vector<64xf32>
      %150 = vector.multi_reduction <add>, %147, %cst_71 [1] : vector<64x256xf32> to vector<64xf32>
      %151 = vector.shape_cast %150 : vector<64xf32> to vector<64x1xf32>
      %cst_72 = arith.constant 3.906250e-03 : f32
      %152 = vector.broadcast %cst_72 : f32 to vector<64x1xf32>
      %153 = arith.mulf %151, %152 : vector<64x1xf32>
      %154 = arith.mulf %147, %147 : vector<64x256xf32>
      %cst_73 = arith.constant dense<0.000000e+00> : vector<64xf32>
      %155 = vector.multi_reduction <add>, %154, %cst_73 [1] : vector<64x256xf32> to vector<64xf32>
      %156 = vector.shape_cast %155 : vector<64xf32> to vector<64x1xf32>
      %cst_74 = arith.constant 3.906250e-03 : f32
      %157 = vector.broadcast %cst_74 : f32 to vector<64x1xf32>
      %158 = arith.mulf %156, %157 : vector<64x1xf32>
      %159 = arith.mulf %153, %153 : vector<64x1xf32>
      %160 = arith.subf %158, %159 : vector<64x1xf32>
      %cst_75 = arith.constant 1.000000e-01 : f32
      %161 = vector.broadcast %cst_75 : f32 to vector<64x1xf32>
      %162 = arith.addf %160, %161 : vector<64x1xf32>
      %163 = math.rsqrt %162 : vector<64x1xf32>
      %164 = vector.broadcast %148 : vector<1x256xf32> to vector<64x256xf32>
      %165 = vector.broadcast %163 : vector<64x1xf32> to vector<64x256xf32>
      %166 = arith.mulf %164, %165 : vector<64x256xf32>
      %167 = vector.broadcast %153 : vector<64x1xf32> to vector<64x256xf32>
      %168 = arith.subf %147, %167 : vector<64x256xf32>
      %169 = arith.mulf %168, %166 : vector<64x256xf32>
      %170 = vector.broadcast %149 : vector<1x256xf32> to vector<64x256xf32>
      %171 = arith.addf %169, %170 : vector<64x256xf32>
      %172 = arith.addf %134, %171 : vector<64x256xf32>
      %173 = arith.truncf %171 : vector<64x256xf32> to vector<64x256xbf16>
      %c0_76 = arith.constant 0 : index
      %c0_77 = arith.constant 0 : index
      %174 = vector.load %arg11[%c0_76, %c0_77] : memref<256x256xbf16, #tpu.memory_space<vmem>>, vector<256x256xbf16>
      %cst_78 = arith.constant dense<0.000000e+00> : vector<64x256xf32>
      %175 = tpu.matmul %173, %174, %cst_78 {dimension_numbers = #tpu.dot_dimension_numbers<[1], [0], [0], [1], [0, 0, 1, 1], [], []>} : vector<64x256xbf16>, vector<256x256xbf16>, vector<64x256xf32> -> vector<64x256xf32>
      %c0_79 = arith.constant 0 : index
      %c0_80 = arith.constant 0 : index
      %176 = vector.load %arg12[%c0_79, %c0_80] : memref<1x256xf32, #tpu.memory_space<vmem>>, vector<1x256xf32>
      %177 = vector.broadcast %176 : vector<1x256xf32> to vector<64x256xf32>
      %178 = arith.addf %175, %177 : vector<64x256xf32>
      %179 = arith.addf %178, %172 : vector<64x256xf32>
      %180 = arith.negf %179 : vector<64x256xf32>
      %181 = math.exp %180 : vector<64x256xf32>
      %cst_81 = arith.constant 1.000000e+00 : f32
      %182 = vector.broadcast %cst_81 : f32 to vector<64x256xf32>
      %183 = arith.addf %182, %181 : vector<64x256xf32>
      %184 = arith.divf %182, %183 : vector<64x256xf32>
      %185 = arith.mulf %179, %184 : vector<64x256xf32>
      %c0_82 = arith.constant 0 : index
      %c0_83 = arith.constant 0 : index
      %186 = vector.load %arg21[%c0_82, %c0_83] : memref<1x256xf32, #tpu.memory_space<vmem>>, vector<1x256xf32>
      %c0_84 = arith.constant 0 : index
      %c0_85 = arith.constant 0 : index
      %187 = vector.load %arg22[%c0_84, %c0_85] : memref<1x256xf32, #tpu.memory_space<vmem>>, vector<1x256xf32>
      %cst_86 = arith.constant dense<0.000000e+00> : vector<64xf32>
      %188 = vector.multi_reduction <add>, %185, %cst_86 [1] : vector<64x256xf32> to vector<64xf32>
      %189 = vector.shape_cast %188 : vector<64xf32> to vector<64x1xf32>
      %cst_87 = arith.constant 3.906250e-03 : f32
      %190 = vector.broadcast %cst_87 : f32 to vector<64x1xf32>
      %191 = arith.mulf %189, %190 : vector<64x1xf32>
      %192 = arith.mulf %185, %185 : vector<64x256xf32>
      %cst_88 = arith.constant dense<0.000000e+00> : vector<64xf32>
      %193 = vector.multi_reduction <add>, %192, %cst_88 [1] : vector<64x256xf32> to vector<64xf32>
      %194 = vector.shape_cast %193 : vector<64xf32> to vector<64x1xf32>
      %cst_89 = arith.constant 3.906250e-03 : f32
      %195 = vector.broadcast %cst_89 : f32 to vector<64x1xf32>
      %196 = arith.mulf %194, %195 : vector<64x1xf32>
      %197 = arith.mulf %191, %191 : vector<64x1xf32>
      %198 = arith.subf %196, %197 : vector<64x1xf32>
      %cst_90 = arith.constant 1.000000e-01 : f32
      %199 = vector.broadcast %cst_90 : f32 to vector<64x1xf32>
      %200 = arith.addf %198, %199 : vector<64x1xf32>
      %201 = math.rsqrt %200 : vector<64x1xf32>
      %202 = vector.broadcast %186 : vector<1x256xf32> to vector<64x256xf32>
      %203 = vector.broadcast %201 : vector<64x1xf32> to vector<64x256xf32>
      %204 = arith.mulf %202, %203 : vector<64x256xf32>
      %205 = vector.broadcast %191 : vector<64x1xf32> to vector<64x256xf32>
      %206 = arith.subf %185, %205 : vector<64x256xf32>
      %207 = arith.mulf %206, %204 : vector<64x256xf32>
      %208 = vector.broadcast %187 : vector<1x256xf32> to vector<64x256xf32>
      %209 = arith.addf %207, %208 : vector<64x256xf32>
      %210 = arith.truncf %209 : vector<64x256xf32> to vector<64x256xbf16>
      %c0_91 = arith.constant 0 : index
      %c0_92 = arith.constant 0 : index
      %211 = vector.load %arg23[%c0_91, %c0_92] : memref<256x512xbf16, #tpu.memory_space<vmem>>, vector<256x512xbf16>
      %cst_93 = arith.constant dense<0.000000e+00> : vector<64x512xf32>
      %212 = tpu.matmul %210, %211, %cst_93 {dimension_numbers = #tpu.dot_dimension_numbers<[1], [0], [0], [1], [0, 0, 1, 1], [], []>} : vector<64x256xbf16>, vector<256x512xbf16>, vector<64x512xf32> -> vector<64x512xf32>
      %c0_94 = arith.constant 0 : index
      %c0_95 = arith.constant 0 : index
      %213 = vector.load %arg24[%c0_94, %c0_95] : memref<1x512xf32, #tpu.memory_space<vmem>>, vector<1x512xf32>
      %214 = vector.broadcast %213 : vector<1x512xf32> to vector<64x512xf32>
      %215 = arith.addf %212, %214 : vector<64x512xf32>
      %216 = arith.truncf %215 : vector<64x512xf32> to vector<64x512xbf16>
      %c0_96 = arith.constant 0 : index
      %c0_97 = arith.constant 0 : index
      %217 = vector.load %arg25[%c0_96, %c0_97] : memref<64x512xbf16, #tpu.memory_space<vmem>>, vector<64x512xbf16>
      tpu.vector_store %arg25[%c0_96, %c0_97], %216 {strides = array<i32>} : memref<64x512xbf16, #tpu.memory_space<vmem>>, vector<64x512xbf16>,
    } else {
    }
    return
  }
  func.func @transform_0(%arg0: i32, %arg1: i32) -> (i32, i32) {
    %c0_i32 = arith.constant 0 : i32
    return %arg0, %arg1 : i32, i32
  }
  func.func @transform_1(%arg0: i32, %arg1: i32) -> (i32, i32) {
    %c0_i32 = arith.constant 0 : i32
    %c0_i32_0 = arith.constant 0 : i32
    return %arg1, %c0_i32 : i32, i32
  }
  func.func @transform_2(%arg0: i32, %arg1: i32) -> (i32, i32) {
    %c0_i32 = arith.constant 0 : i32
    %c0_i32_0 = arith.constant 0 : i32
    %c0_i32_1 = arith.constant 0 : i32
    return %c0_i32, %c0_i32_0 : i32, i32
  }
  func.func @transform_3(%arg0: i32, %arg1: i32) -> (i32, i32) {
    %c0_i32 = arith.constant 0 : i32
    %c0_i32_0 = arith.constant 0 : i32
    %c0_i32_1 = arith.constant 0 : i32
    return %c0_i32, %c0_i32_0 : i32, i32
  }
  func.func @transform_4(%arg0: i32, %arg1: i32) -> (i32, i32) {
    %c0_i32 = arith.constant 0 : i32
    %c0_i32_0 = arith.constant 0 : i32
    %c0_i32_1 = arith.constant 0 : i32
    return %c0_i32, %c0_i32_0 : i32, i32
  }
  func.func @transform_5(%arg0: i32, %arg1: i32) -> (i32, i32) {
    %c0_i32 = arith.constant 0 : i32
    %c0_i32_0 = arith.constant 0 : i32
    %c0_i32_1 = arith.constant 0 : i32
    return %c0_i32, %c0_i32_0 : i32, i32
  }
  func.func @transform_6(%arg0: i32, %arg1: i32) -> (i32, i32) {
    %c0_i32 = arith.constant 0 : i32
    %c0_i32_0 = arith.constant 0 : i32
    %c0_i32_1 = arith.constant 0 : i32
    return %c0_i32, %c0_i32_0 : i32, i32
  }
  func.func @transform_7(%arg0: i32, %arg1: i32) -> (i32, i32) {
    %c0_i32 = arith.constant 0 : i32
    %c0_i32_0 = arith.constant 0 : i32
    %c0_i32_1 = arith.constant 0 : i32
    return %c0_i32, %c0_i32_0 : i32, i32
  }
  func.func @transform_8(%arg0: i32, %arg1: i32) -> (i32, i32) {
    %c0_i32 = arith.constant 0 : i32
    %c0_i32_0 = arith.constant 0 : i32
    %c0_i32_1 = arith.constant 0 : i32
    return %c0_i32, %c0_i32_0 : i32, i32
  }
  func.func @transform_9(%arg0: i32, %arg1: i32) -> (i32, i32) {
    %c0_i32 = arith.constant 0 : i32
    %c0_i32_0 = arith.constant 0 : i32
    %c0_i32_1 = arith.constant 0 : i32
    return %c0_i32, %c0_i32_0 : i32, i32
  }
  func.func @transform_10(%arg0: i32, %arg1: i32) -> (i32, i32) {
    %c0_i32 = arith.constant 0 : i32
    %c0_i32_0 = arith.constant 0 : i32
    %c0_i32_1 = arith.constant 0 : i32
    return %c0_i32, %c0_i32_0 : i32, i32
  }
  func.func @transform_11(%arg0: i32, %arg1: i32) -> (i32, i32) {
    %c0_i32 = arith.constant 0 : i32
    %c0_i32_0 = arith.constant 0 : i32
    %c0_i32_1 = arith.constant 0 : i32
    return %c0_i32, %c0_i32_0 : i32, i32
  }
  func.func @transform_12(%arg0: i32, %arg1: i32) -> (i32, i32) {
    %c0_i32 = arith.constant 0 : i32
    %c0_i32_0 = arith.constant 0 : i32
    %c0_i32_1 = arith.constant 0 : i32
    return %c0_i32, %c0_i32_0 : i32, i32
  }
  func.func @transform_13(%arg0: i32, %arg1: i32) -> (i32, i32) {
    %c0_i32 = arith.constant 0 : i32
    %c0_i32_0 = arith.constant 0 : i32
    %c0_i32_1 = arith.constant 0 : i32
    return %c0_i32, %c0_i32_0 : i32, i32
  }
  func.func @transform_14(%arg0: i32, %arg1: i32) -> (i32, i32) {
    %c0_i32 = arith.constant 0 : i32
    %c0_i32_0 = arith.constant 0 : i32
    %c0_i32_1 = arith.constant 0 : i32
    return %c0_i32, %c0_i32_0 : i32, i32
  }
  func.func @transform_15(%arg0: i32, %arg1: i32) -> (i32, i32) {
    %c0_i32 = arith.constant 0 : i32
    %c0_i32_0 = arith.constant 0 : i32
    %c0_i32_1 = arith.constant 0 : i32
    return %c0_i32, %c0_i32_0 : i32, i32
  }
  func.func @transform_16(%arg0: i32, %arg1: i32) -> (i32, i32) {
    %c0_i32 = arith.constant 0 : i32
    %c0_i32_0 = arith.constant 0 : i32
    %c0_i32_1 = arith.constant 0 : i32
    return %c0_i32, %c0_i32_0 : i32, i32
  }
  func.func @transform_17(%arg0: i32, %arg1: i32) -> (i32, i32) {
    %c0_i32 = arith.constant 0 : i32
    %c0_i32_0 = arith.constant 0 : i32
    %c0_i32_1 = arith.constant 0 : i32
    return %c0_i32, %c0_i32_0 : i32, i32
  }
  func.func @transform_18(%arg0: i32, %arg1: i32) -> (i32, i32) {
    %c0_i32 = arith.constant 0 : i32
    %c0_i32_0 = arith.constant 0 : i32
    %c0_i32_1 = arith.constant 0 : i32
    return %c0_i32, %c0_i32_0 : i32, i32
  }
  func.func @transform_19(%arg0: i32, %arg1: i32) -> (i32, i32) {
    %c0_i32 = arith.constant 0 : i32
    %c0_i32_0 = arith.constant 0 : i32
    %c0_i32_1 = arith.constant 0 : i32
    return %c0_i32, %c0_i32_0 : i32, i32
  }
  func.func @transform_20(%arg0: i32, %arg1: i32) -> (i32, i32) {
    %c0_i32 = arith.constant 0 : i32
    %c0_i32_0 = arith.constant 0 : i32
    %c0_i32_1 = arith.constant 0 : i32
    return %c0_i32, %c0_i32_0 : i32, i32
  }
  func.func @transform_21(%arg0: i32, %arg1: i32) -> (i32, i32) {
    %c0_i32 = arith.constant 0 : i32
    %c0_i32_0 = arith.constant 0 : i32
    %c0_i32_1 = arith.constant 0 : i32
    return %c0_i32, %c0_i32_0 : i32, i32
  }
  func.func @transform_22(%arg0: i32, %arg1: i32) -> (i32, i32) {
    %c0_i32 = arith.constant 0 : i32
    %c0_i32_0 = arith.constant 0 : i32
    %c0_i32_1 = arith.constant 0 : i32
    return %c0_i32, %c0_i32_0 : i32, i32
  }
  func.func @transform_23(%arg0: i32, %arg1: i32) -> (i32, i32) {
    %c0_i32 = arith.constant 0 : i32
    %c0_i32_0 = arith.constant 0 : i32
    return %arg0, %c0_i32 : i32, i32
  }
}

</mosaic_0001>

<bundles_post_ra>
// kernel: tpu_custom_call.1
= control target key start
LH: loop header
LB: loop body
LE: loop exit
PB: predicated region body
PF: predicated region fallthrough
CT: control target
= control target key end

     0   :  { %s14342_s0 = inlined_call_operand.hbm [shape: bf16[256,512], index: 0, kind: input, shape index: {}]   ;;  %s14343_s1 = inlined_call_operand.hbm [shape: bf16[512,256], index: 1, kind: input, shape index: {}]   ;;  %s14344_s2 = inlined_call_operand.hbm [shape: f32[1,256], index: 2, kind: input, shape index: {}]   ;;  %s14345_s3 = inlined_call_operand.hbm [shape: bf16[256,256], index: 3, kind: input, shape index: {}]   ;;  %s14346_s4 = inlined_call_operand.vmem [shape: f32[1,256], index: 4, kind: input, shape index: {}]   ;;  %s14347_s5 = inlined_call_operand.hbm [shape: bf16[256,256], index: 5, kind: input, shape index: {}]   ;;  %s14348_s6 = inlined_call_operand.hbm [shape: f32[1,256], index: 6, kind: input, shape index: {}]   ;;  %s14349_s7 = inlined_call_operand.hbm [shape: bf16[256,256], index: 7, kind: input, shape index: {}]   ;;  %s14350_s8 = inlined_call_operand.hbm [shape: f32[1,256], index: 8, kind: input, shape index: {}]   ;;  %s14351_s9 = inlined_call_operand.hbm [shape: bf16[256,256], index: 9, kind: input, shape index: {}]   ;;  %s14352_s10 = inlined_call_operand.vmem [shape: f32[1,256], index: 10, kind: input, shape index: {}]   ;;  %s14353_s11 = inlined_call_operand.vmem [shape: f32[1,256], index: 11, kind: input, shape index: {}]   ;;  %s14354_s12 = inlined_call_operand.hbm [shape: f32[1,256], index: 12, kind: input, shape index: {}]   ;;  %s14355_s13 = inlined_call_operand.vmem [shape: f32[1,256], index: 13, kind: input, shape index: {}]   ;;  %s14356_s14 = inlined_call_operand.hbm [shape: f32[1,256], index: 14, kind: input, shape index: {}]   ;;  %s14357_s15 = inlined_call_operand.vmem [shape: f32[1,256], index: 15, kind: input, shape index: {}]   ;;  %s14358_s16 = inlined_call_operand.hbm [shape: f32[1,256], index: 16, kind: input, shape index: {}]   ;;  %s14359_s17 = inlined_call_operand.vmem [shape: f32[1,256], index: 17, kind: input, shape index: {}]   ;;  %s14360_s18 = inlined_call_operand.hbm [shape: f32[1,256], index: 18, kind: input, shape index: {}]   ;;  %s14361_s19 = inlined_call_operand.vmem [shape: f32[1,256], index: 19, kind: input, shape index: {}]   ;;  %s14362_s20 = inlined_call_operand.hbm [shape: f32[1,256], index: 20, kind: input, shape index: {}]   ;;  %s14363_s21 = inlined_call_operand.hbm [shape: bf16[256,512], index: 21, kind: input, shape index: {}]   ;;  %s14364_s22 = inlined_call_operand.vmem [shape: f32[1,512], index: 22, kind: input, shape index: {}]   ;;  %s14365_s23 = inlined_call_operand.hbm [shape: bf16[256,512], index: 23, kind: output, shape index: {}]  }
   0x1   :  { %14386 = sst [smem:[#allocation53_spill]] %s14342_s0 }
   0x2   :  { %14387 = sst [smem:[#allocation54_spill]] %s14343_s1 }
   0x3   :  { %14388 = sst [smem:[#allocation55_spill]] %s14344_s2 }
   0x4   :  { %14389 = sst [smem:[#allocation56_spill]] %s14345_s3 }
   0x5   :  { %14390 = sst [smem:[#allocation57_spill]] %s14346_s4 }
   0x6   :  { %14391 = sst [smem:[#allocation58_spill]] %s14347_s5 }
   0x7   :  { %14392 = sst [smem:[#allocation59_spill]] %s14348_s6 }
   0x8   :  { %14393 = sst [smem:[#allocation60_spill]] %s14349_s7 }
   0x9   :  { %14394 = sst [smem:[#allocation61_spill]] %s14350_s8 }
   0xa   :  { %14395 = sst [smem:[#allocation62_spill]] %s14351_s9 }
   0xb   :  { %14396 = sst [smem:[#allocation63_spill]] %s14352_s10 }
   0xc   :  { %14397 = sst [smem:[#allocation64_spill]] %s14353_s11 }
   0xd   :  { %14398 = sst [smem:[#allocation65_spill]] %s14354_s12 }
   0xe   :  { %14399 = sst [smem:[#allocation66_spill]] %s14355_s13 }
   0xf   :  { %14400 = sst [smem:[#allocation67_spill]] %s14356_s14 }
  0x10   :  { %14401 = sst [smem:[#allocation68_spill]] %s14357_s15 }
  0x11   :  { %14402 = sst [smem:[#allocation69_spill]] %s14358_s16 }
  0x12   :  { %14403 = sst [smem:[#allocation70_spill]] %s14359_s17 }
  0x13   :  { %14404 = sst [smem:[#allocation71_spill]] %s14360_s18 }
  0x14   :  { %14405 = sst [smem:[#allocation72_spill]] %s14361_s19 }
  0x15   :  { %14406 = sst [smem:[#allocation73_spill]] %s14362_s20 }
  0x16   :  { %14407 = sst [smem:[#allocation74_spill]] %s14363_s21 }
  0x17   :  { %14408 = sst [smem:[#allocation75_spill]] %s14364_s22 }
  0x18   :  { %14409 = sst [smem:[#allocation76_spill]] %s14365_s23 }
  0x19   :  { %28 = vsyncpa [#allocation5], 0 }
  0x1a   :  { %30 = vsyncpa [#allocation5 + $0x1], 0 }
  0x1b   :  { %31 = vsyncpa [#allocation8], 0 }
  0x1c   :  { %33 = vsyncpa [#allocation8 + $0x1], 0 }
  0x1d   :  { %34 = vsyncpa [#allocation11], 0 }
  0x1e   :  { %35 = vsyncpa [#allocation14], 0 }
  0x1f   :  { %36 = vsyncpa [#allocation17], 0 }
  0x20   :  { %37 = vsyncpa [#allocation20], 0 }
  0x21   :  { %38 = vsyncpa [#allocation23], 0 }
  0x22   :  { %39 = vsyncpa [#allocation26], 0 }
  0x23   :  { %40 = vsyncpa [#allocation6], 0 }
  0x24   :  { %42 = vsyncpa [#allocation6 + $0x1], 0  ;;  %s9673_s4 = smov 0   ;;  %s9675_s30 = smov 0  }
  0x25   :  { %s9677_s24 = smov 0   ;;  %s9679_s25 = smov 0  }
  0x26   :  { %s9681_s5 = smov 0   ;;  %s9683_s1 = smov 0  }
  0x27   :  { %s9685_s26 = smov 0   ;;  %s9687_s2 = smov 0  }
  0x28   :  { %s9689_s6 = smov 0   ;;  %s9691_s27 = smov 0  }
  0x29   :  { %s9693_s7 = smov 0   ;;  %s9695_s28 = smov 0  }
  0x2a   :  { %s9697_s29 = smov 0   ;;  %s9699_s3 = smov 0  }
  0x2b LB: > { %14410 = sst [smem:[#allocation39_spill]] %s9478_s4  ;;  %s9744_s0 = sadd.s32 4294967295, %s9530_s3   ;;  %s9530_s3 = sphi %s9699_s3, %s48_s3   ;;  %s9526_s29 = sphi %s9697_s29, %s14742_s29   ;;  %s9522_s28 = sphi %s9695_s28, %s14750_s28   ;;  %s9518_s7 = sphi %s9693_s7, %s14749_s7   ;;  %s9514_s27 = sphi %s9691_s27, %s14748_s27   ;;  %s9510_s6 = sphi %s9689_s6, %s14747_s6   ;;  %s9506_s2 = sphi %s9687_s2, %s14746_s2   ;;  %s9502_s26 = sphi %s9685_s26, %s14745_s26   ;;  %s9498_s1 = sphi %s9683_s1, %s14744_s1   ;;  %s9494_s5 = sphi %s9681_s5, %s14739_s5   ;;  %s9490_s25 = sphi %s9679_s25, %s14738_s25   ;;  %s9486_s24 = sphi %s9677_s24, %s14743_s24   ;;  %s9482_s30 = sphi %s9675_s30, %s14737_s30   ;;  %s9478_s4 = sphi %s9673_s4, %s14736_s4  }
  0x2c   : > { %14411 = sst [smem:[#allocation40_spill]] %s9482_s30  ;;  %p6919_p0 = scmp.ge.s32.totalorder %s9530_s3, 1 }
  0x2d   : > { %14412 = sst [smem:[#allocation41_spill]] %s9486_s24  ;;  %p14381_p1 = scmp.eq.s32.totalorder %s9744_s0, 0 }
  0x2e   : > { %14413 = sst [smem:[#allocation42_spill]] %s9490_s25  ;;  %p586_p2 = scmp.lt.s32.totalorder %s9530_s3, 9 }
  0x2f   : > { %14414 = sst [smem:[#allocation43_spill]] %s9494_s5  ;;  %s9532_s17 = smov [#allocation9]  }
  0x30   : > { %14415 = sst [smem:[#allocation44_spill]] %s9498_s1  ;;  %p9752_p3 = pnand %p6919_p0, %p586_p2 }
  0x31   : > { %14416 = sst [smem:[#allocation45_spill]] %s9514_s27  ;;  %s600_s15 = sshll.u32 %s9532_s17, 4  ;;  %s601_s15 = int_to_ptr.vmem [resolvable:$true] %s600_s15 }
  0x32   : > { %14417 = sst [smem:[#allocation46_spill]] %s9518_s7  ;;  %p8271_p4 = pneg %p9752_p3 }
  0x33   : > { %14418 = sst [smem:[#allocation47_spill]] %s9526_s29  ;;  %s14376_s17 = smov 128  }
  0x34   : > { %14419 = sst [smem:[#allocation48_spill]] %s9744_s0  ;;  %p9763_p5 = pnand %p8271_p4, %p14381_p1 }
  0x35   : > { %s14420_s19 = sld [smem:[#allocation55_spill]]  ;;  %s14379_s23 = smov 8  }
  0x36   : > { %s14421_s10 = scalar_select %p9752_p3, 1, 0 }
  0x37   : > { %s14423_s27 = sld [smem:[#allocation56_spill]]  ;;  %s9536_s1 = smov [#allocation13]  }
  0x38   : > { %14422 = sst [smem:[#allocation49_spill]] %s14421_s10  ;;  %s643_s4 = sshll.u32 %s9536_s1, 4  ;;  %s644_s4 = int_to_ptr.vmem [resolvable:$true] %s643_s4 }
  0x39   : > { %s14426_s8 = sld [smem:[#allocation61_spill]]  ;;  %s9537_s30 = smov [#allocation16]  }
  0x3a   : > { %s669_s0 = sshll.u32 %s9537_s30, 4  ;;  %s14427_s12 = sld [smem:[#allocation65_spill]]  ;;  %s670_s0 = int_to_ptr.vmem [resolvable:$true] %s669_s0 }
  0x3b   : > { %s598_s7 = sshll.u32 %s14420_s19, 4  ;;  %s9533_s19 = smov [#allocation10]   ;;  %s599_s7 = int_to_ptr.hbm [resolvable:$true] %s598_s7 }
  0x3c   : > { %s611_s22 = sshll.u32 %s9533_s19, 4  ;;  %s14428_s16 = sld [smem:[#allocation69_spill]]  ;;  %s612_s22 = int_to_ptr.vmem [resolvable:$true] %s611_s22 }
  0x3d   : > { %s609_s25 = sshll.u32 %s14423_s27, 4  ;;  %s14425_s27 = sld [smem:[#allocation59_spill]]  ;;  %s610_s25 = int_to_ptr.hbm [resolvable:$true] %s609_s25 }
  0x3e   : > { %8274 = dma.hbm_to_vmem [thread:$0]  (!%p9763_p5), %s599_s7, 32, %s601_s15, [#allocation8]  }
  0x3f   : > { %8277 = dma.hbm_to_vmem [thread:$0]  (!%p9763_p5), %s610_s25, 4096, %s612_s22, [#allocation11], %s14376_s17, %s14376_s17, %s14379_s23  }
  0x40   : > { %s667_s7 = sshll.u32 %s14426_s8, 4  ;;  %s699_s22 = sshll.u32 %s14427_s12, 4  ;;  %s668_s7 = int_to_ptr.hbm [resolvable:$true] %s667_s7  ;;  %s700_s22 = int_to_ptr.hbm [resolvable:$true] %s699_s22 }
  0x41   : > { %8289 = dma.hbm_to_vmem [thread:$0]  (!%p9763_p5), %s668_s7, 32, %s670_s0, [#allocation17]  }
  0x42   : > { %s729_s13 = sshll.u32 %s14428_s16, 4  ;;  %s14429_s20 = sld [smem:[#allocation73_spill]]  ;;  %s730_s13 = int_to_ptr.hbm [resolvable:$true] %s729_s13 }
  0x43   : > { %s641_s10 = sshll.u32 %s14425_s27, 4  ;;  %s9538_s27 = smov [#allocation19]   ;;  %s642_s10 = int_to_ptr.hbm [resolvable:$true] %s641_s10 }
  0x44   : > { %8283 = dma.hbm_to_vmem [thread:$0]  (!%p9763_p5), %s642_s10, 32, %s644_s4, [#allocation14]  }
  0x45   : > { %s701_s19 = sshll.u32 %s9538_s27, 4  ;;  %s9539_s10 = smov [#allocation22]   ;;  %s702_s19 = int_to_ptr.vmem [resolvable:$true] %s701_s19 }
  0x46   : > { %8295 = dma.hbm_to_vmem [thread:$0]  (!%p9763_p5), %s700_s22, 32, %s702_s19, [#allocation20]  }
  0x47   : > { %s731_s4 = sshll.u32 %s9539_s10, 4  ;;  %s14430_s25 = sld [smem:[#allocation58_spill]]  ;;  %s732_s4 = int_to_ptr.vmem [resolvable:$true] %s731_s4 }
  0x48   : > { %s759_s15 = sshll.u32 %s14429_s20, 4  ;;  %s9540_s11 = smov [#allocation25]   ;;  %s760_s15 = int_to_ptr.hbm [resolvable:$true] %s759_s15 }
  0x49   : > { %8301 = dma.hbm_to_vmem [thread:$0]  (!%p9763_p5), %s730_s13, 32, %s732_s4, [#allocation23]  }
  0x4a   : > { %s761_s27 = sshll.u32 %s9540_s11, 4  ;;  %s9541_s22 = smov [#allocation12]   ;;  %s762_s27 = int_to_ptr.vmem [resolvable:$true] %s761_s27 }
  0x4b   : > { %8307 = dma.hbm_to_vmem [thread:$0]  (!%p9763_p5), %s760_s15, 32, %s762_s27, [#allocation26]  }
  0x4c   : > { %s628_s19 = sshll.u32 %s9541_s22, 4  ;;  %s14431_s24 = sld [smem:[#allocation60_spill]]  ;;  %s629_s19 = int_to_ptr.vmem [resolvable:$true] %s628_s19 }
  0x4d   : > { %s626_s1 = sshll.u32 %s14430_s25, 4  ;;  %s14432_s13 = smov 128   ;;  %s627_s1 = int_to_ptr.hbm [resolvable:$true] %s626_s1 }
  0x4e   : > { %8280 = dma.hbm_to_vmem [thread:$0]  (!%p9763_p5), %s627_s1, 4096, %s629_s19, [#allocation11], %s14432_s13, %s14432_s13, %s14379_s23  }
  0x4f   : > { %s14433_s9 = sld [smem:[#allocation62_spill]]  ;;  %s9542_s25 = smov [#allocation15]  }
  0x50   : > { %s654_s15 = sshll.u32 %s9542_s25, 4  ;;  %s9543_s11 = smov [#allocation18]   ;;  %s655_s15 = int_to_ptr.vmem [resolvable:$true] %s654_s15 }
  0x51   : > { %s680_s27 = sshll.u32 %s9543_s11, 4  ;;  %s14434_s14 = sld [smem:[#allocation67_spill]]  ;;  %s681_s27 = int_to_ptr.vmem [resolvable:$true] %s680_s27 }
  0x52   : > { %s652_s17 = sshll.u32 %s14431_s24, 4  ;;  %s14435_s18 = sld [smem:[#allocation71_spill]]  ;;  %s653_s17 = int_to_ptr.hbm [resolvable:$true] %s652_s17 }
  0x53   : > { %8286 = dma.hbm_to_vmem [thread:$0]  (!%p9763_p5), %s653_s17, 4096, %s655_s15, [#allocation14], %s14432_s13, %s14432_s13, %s14379_s23  }
  0x54   : > { %s9544_s4 = smov [#allocation21]   ;;  %s9545_s0 = smov [#allocation24]  }
  0x55   : > { %s678_s7 = sshll.u32 %s14433_s9, 4  ;;  %s716_s17 = sshll.u32 %s9544_s4, 4  ;;  %s679_s7 = int_to_ptr.hbm [resolvable:$true] %s678_s7  ;;  %s717_s17 = int_to_ptr.vmem [resolvable:$true] %s716_s17 }
  0x56   : > { %8292 = dma.hbm_to_vmem [thread:$0]  (!%p9763_p5), %s679_s7, 4096, %s681_s27, [#allocation17], %s14432_s13, %s14432_s13, %s14379_s23  }
  0x57   : > { %s714_s1 = sshll.u32 %s14434_s14, 4  ;;  %s746_s25 = sshll.u32 %s9545_s0, 4  ;;  %s715_s1 = int_to_ptr.hbm [resolvable:$true] %s714_s1  ;;  %s747_s25 = int_to_ptr.vmem [resolvable:$true] %s746_s25 }
  0x58   : > { %s744_s24 = sshll.u32 %s14435_s18, 4  ;;  %s14436_s21 = sld [smem:[#allocation74_spill]]  ;;  %s745_s24 = int_to_ptr.hbm [resolvable:$true] %s744_s24 }
  0x59   : > { %8298 = dma.hbm_to_vmem [thread:$0]  (!%p9763_p5), %s715_s1, 32, %s717_s17, [#allocation20]  }
  0x5a   : > { %8304 = dma.hbm_to_vmem [thread:$0]  (!%p9763_p5), %s745_s24, 32, %s747_s25, [#allocation23]  }
  0x5b   : > { %s9546_s27 = smov [#allocation27]   ;;  %s14378_s10 = smov 256  }
  0x5c   : > { %s772_s22 = sshll.u32 %s9546_s27, 4  ;;  %s9548_s1 = smov 16   ;;  %s773_s22 = int_to_ptr.vmem [resolvable:$true] %s772_s22 }
  0x5d   : > { %s14437_s19 = sld [smem:[#allocation41_spill]]  ;;  %s6918_s30 = sadd.s32 4294967294, %s9530_s3  }
  0x5e   : > { %s770_s7 = sshll.u32 %s14436_s21, 4  ;;  %s14438_s4 = sld [smem:[#allocation48_spill]]  ;;  %s771_s7 = int_to_ptr.hbm [resolvable:$true] %s770_s7 }
  0x5f   : > { %8310 = dma.hbm_to_vmem [thread:$0]  (!%p9763_p5), %s771_s7, 8192, %s773_s22, [#allocation26], %s14378_s10, %s14378_s10, %s9548_s1  }
  0x60   : > { %s57_s17 = sadd.s32 1, %s9522_s28  ;;  %s14439_s0 = sld [smem:[#allocation40_spill]] }
  0x61   : > { %s60_s24 = sadd.s32 1, %s9526_s29  ;;  %p58_p6 = scmp.ge.s32.totalorder %s57_s17, 2 }
  0x62   : > { %s69_s25 = sadd.s32 1, %s9510_s6  ;;  %p76_p7 = scmp.ne.s32.totalorder %s9510_s6, %s9506_s2 }
  0x63   : > { %p77_p8 = scmp.eq.s32.totalorder %s9530_s3, 0  ;;  %s14752_s17 = smov (%p58_p6, %s57_s17), 0 }
  0x64   : > { %14440 = sst [smem:[#allocation50_spill]] %s14752_s17  ;;  %s14754_s24 = smov (!%p58_p6, %s60_s24), %s9526_s29 }
  0x65   : > { %s9852_s5 = ssub.s32 %s9522_s28, %s14752_s17  ;;  %p9856_p9 = por %p77_p8, %p76_p7 }
  0x66   : > { %s14442_s11 = sld [smem:[#allocation39_spill]]  ;;  %p62_p10 = scmp.ge.s32.totalorder %s14754_s24, 4 }
  0x67   : > { %p82_p11 = scmp.ne.s32.totalorder %s9506_s2, %s9502_s26  ;;  %p93_p12 = scmp.eq.s32.totalorder %s9852_s5, 0 }
  0x68   : > { %s562_s7 = sadd.s32 1, %s14437_s19  ;;  %s14756_s24 = smov (%p62_p10, %s14754_s24), 0 }
  0x69   : > { %14443 = sst [smem:[#allocation51_spill]] %s14756_s24  ;;  %p9868_p13 = por %p14381_p1, %p82_p11 }
  0x6a   : > { %p572_p0 = scmp.ne.s32.totalorder %s14437_s19, %s14439_s0  ;;  %s64_s22 = ssub.s32 %s9526_s29, %s14756_s24 }
  0x6b   : > { %p573_p2 = scmp.eq.s32.totalorder %s14438_s4, 7  ;;  %s66_s1 = sor.u32 %s9852_s5, %s64_s22 }
  0x6c   : > { %p560_p4 = scmp.eq.s32.totalorder %s64_s22, 0  ;;  %p67_p5 = scmp.eq.s32.totalorder %s66_s1, 0 }
  0x6d   : > { %p9878_p6 = por %p573_p2, %p572_p0  ;;  %p578_p7 = scmp.ne.s32.totalorder %s14439_s0, %s14442_s11 }
  0x6e   : > { %s14758_s19 = smov (!%p560_p4, %s14437_s19), %s562_s7  ;;  %p579_p10 = scmp.eq.s32.totalorder %s6918_s30, 7 }
  0x6f   : > { %s9886_s10 = scalar_select %p67_p5, %s9510_s6, %s69_s25  }
  0x70   : > { %p8335_p11 = scmp.lt.s32.totalorder %s9530_s3, 8  ;;  %s789_s23 = sand.u32 1, %s9510_s6  }
  0x71   : > { %s14446_s8 = sld [smem:[#allocation44_spill]]  ;;  %p9892_p1 = por %p579_p10, %p578_p7 }
  0x72   : > { %s6934_s22 = sshll.u32 %s789_s23, 6  ;;  %s14448_s1 = sld [smem:[#allocation43_spill]] }
  0x73   : > { %s6936_s7 = sshll.u32 %s9522_s28, 1  ;;  %s14449_s12 = sld [smem:[#allocation42_spill]] }
  0x74   : > { %s7976_s14 = sshll.u32 %s9526_s29, 5  ;;  %s793_s30 = scalar_lea.vmem [#allocation4], %s6934_s22 }
  0x75   : > { %s799_s25 = sadd.s32 %s7976_s14, %s6936_s7  ;;  %s804_s0 = sshll.u32 %s793_s30, 4  ;;  %s805_s0 = int_to_ptr.vmem [resolvable:$true] %s804_s0 }
  0x76   : > { %s6938_s11 = sshll.u32 %s799_s25, 2  ;;  %s14450_s20 = sld [smem:[#allocation53_spill]] }
  0x77   : > { %p8312_p0 = pnand %p8335_p11, %p9856_p9  ;;  %s790_s17 = scalar_lea.sflag [#allocation5], %s789_s23 }
  0x78   : > { %s14451_s29 = smov 8   ;;  %s14452_s14 = smov 256  }
  0x79   : > { %s95_s22 = sadd.s32 1, %s14446_s8  ;;  %p102_p2 = scmp.ne.s32.totalorder %s14446_s8, %s14448_s1 }
  0x7a   : > { %s9912_s7 = scalar_select %p93_p12, %s14446_s8, %s95_s22  }
  0x7b   : > { %p108_p4 = scmp.ne.s32.totalorder %s14448_s1, %s14449_s12  ;;  %s814_s16 = sand.u32 1, %s9530_s3  }
  0x7c   : > { %s801_s21 = scalar_lea.hbm %s14450_s20, %s6938_s11  ;;  %s816_s18 = sand.u32 1, %s14446_s8  }
  0x7d   : > { %s802_s24 = sshll.u32 %s801_s21, 4  ;;  %p104_p5 = por %p102_p2, %p77_p8  ;;  %s803_s24 = int_to_ptr.hbm [resolvable:$true] %s802_s24 }
  0x7e   : > { %8314 = dma.hbm_to_vmem [thread:$0]  (!%p8312_p0), %s803_s24, 1024, %s805_s0, %s790_s17, %s14452_s14, %s14432_s13, %s14451_s29  }
  0x7f   : > { %p14453_p7 = scmp.eq.s32.totalorder %s14438_s4, 0  ;;  %s6939_s21 = sshll.u32 %s816_s18, 8 }
  0x80   : > { %s7978_s23 = sshll.u32 %s9522_s28, 8  ;;  %s14455_s24 = sld [smem:[#allocation54_spill]] }
  0x81   : > { %p9924_p9 = por %p108_p4, %p14453_p7  ;;  %s818_s25 = scalar_lea.vmem [#allocation7], %s6939_s21 }
  0x82   : > { %s827_s30 = sshll.u32 %s818_s25, 4  ;;  %p8315_p12 = pnand %p8335_p11, %p104_p5  ;;  %s828_s30 = int_to_ptr.vmem [resolvable:$true] %s827_s30 }
  0x83   : > { %s815_s8 = scalar_lea.sflag [#allocation8], %s814_s16  ;;  %s841_s4 = sand.u32 (!%p9752_p3), 1, %s9506_s2  }
  0x84   : > { %839 = sbr.rel (%p9752_p3) target bundleno = 2450 (0x992), region = 112  ;;  %s6944_s1 = sshll.u32 (!%p9752_p3), %s841_s4, 6 }
  0x85   : > { %s842_s11 = scalar_lea.sflag (!%p9752_p3), [#allocation5], %s841_s4  ;;  %s9940_s14 = scalar_lea.vmem (!%p9752_p3), [#allocation4], %s6944_s1 }
  0x86   : > { %s824_s5 = scalar_lea.hbm %s14455_s24, %s7978_s23 }
  0x87   : > { %s825_s0 = sshll.u32 %s824_s5, 4  ;;  %s826_s0 = int_to_ptr.hbm [resolvable:$true] %s825_s0 }
  0x88   : > { %8317 = dma.hbm_to_vmem [thread:$0]  (!%p8315_p12), %s826_s0, 4096, %s828_s30, %s815_s8, %s14432_s13, %s14432_s13, %s14451_s29  }
  0x89   : > { %9437 = dma.done.wait (%p9868_p13), %s842_s11, 1024  }
  0x8a   : > { %9439 = vsyncadd (%p9868_p13), %s842_s11, 4294966272  ;;  %s14457_s22 = sld [smem:[#allocation48_spill]] }
  0x8b   : > { %s14458_s16 = sld [smem:[#allocation43_spill]] }
  0x90   : > { %s851_s18 = sand.u32 1, %s14457_s22  }
  0x91   : > { %s853_s29 = sand.u32 1, %s14458_s16   ;;  %s852_s21 = scalar_lea.sflag [#allocation8], %s851_s18 }
  0x92   : > { %s6945_s13 = sshll.u32 %s853_s29, 8 }
  0x93   : > { %s9948_s23 = scalar_lea.vmem [#allocation7], %s6945_s13 }
  0x94   : > { %9441 = dma.done.wait (%p9924_p9), %s852_s21, 4096  }
  0x95   : > { %9443 = vsyncadd (%p9924_p9), %s852_s21, 4294963200  ;;  %p14459_p3 = scmp.eq.s32.totalorder %s14457_s22, 0 }
  0x97   : > { %9445 = dma.done.wait (%p14459_p3), [#allocation8], 32   ;;  %p14460_p8 = pmov %p14459_p3 }
  0x98   : > { %p14461_p13 = pmov %p14459_p3 }
  0x99   : > { %9447 = vsyncadd (%p14460_p8), [#allocation8], 4294967264 }
  0x9a   : > { %9449 = dma.done.wait (%p14461_p13), [#allocation11], 8192   ;;  %p14462_p10 = pmov %p14459_p3 }
  0x9b   : > { %p14463_p11 = pmov %p14459_p3 }
  0x9c   : > { %9451 = vsyncadd (%p14462_p10), [#allocation11], 4294959104 }
  0x9d   : > { %9453 = dma.done.wait (%p14463_p11), [#allocation14], 4128   ;;  %p14464_p0 = pmov %p14459_p3 }
  0x9f   : > { %9455 = vsyncadd (%p14464_p0), [#allocation14], 4294963168  ;;  %p14465_p2 = pmov %p14464_p0 }
  0xa0   : > { %p14466_p4 = pmov %p14464_p0 }
  0xa1   : > { %9457 = dma.done.wait (%p14465_p2), [#allocation17], 4128  }
  0xa2   : > { %9459 = vsyncadd (%p14466_p4), [#allocation17], 4294963168  ;;  %p14467_p5 = pmov %p14464_p0 }
  0xa3   : > { %p14468_p7 = pmov %p14464_p0 }
  0xa4   : > { %9461 = dma.done.wait (%p14467_p5), [#allocation20], 64  }
  0xa5   : > { %9463 = vsyncadd (%p14468_p7), [#allocation20], 4294967232  ;;  %p14469_p9 = pmov %p14464_p0 }
  0xa6   : > { %p14470_p12 = pmov %p14464_p0 }
  0xa7   : > { %9465 = dma.done.wait (%p14469_p9), [#allocation23], 64  }
  0xa8   : > { %9467 = vsyncadd (%p14470_p12), [#allocation23], 4294967232  ;;  %p14471_p3 = pmov %p14464_p0 }
  0xa9   : > { %p14472_p8 = pmov %p14464_p0 }
  0xaa   : > { %9469 = dma.done.wait (%p14471_p3), [#allocation26], 8224  }
  0xab   : > { %9471 = vsyncadd (%p14472_p8), [#allocation26], 4294959072  ;;  %s14473_s27 = sld [smem:[#allocation40_spill]] }
  0xac   : > { %s14474_s24 = sld [smem:[#allocation45_spill]] }
  0xb1   : > { %s986_s20 = sand.u32 1, %s14473_s27  }
  0xb2   : > { %s6959_s15 = sshll.u32 %s986_s20, 7  ;;  %p6960_p13 = scmp.ne.s32.totalorder %s14474_s24, 0 }
  0xb3   : > { %s9985_s17 = scalar_lea.vmem [#allocation28], %s6959_s15 }
  0xb4   : > { %996 = sbr.rel (%p6960_p13) target bundleno = 210 (0xd2), region = 176 }
  0xb9   : > { %v9549_v0 = vmov 0.0   ;;  %vm1013_vm0 = vcmask 7168  }
  0xba   : > { %997 = vst [vmem:[#allocation2 + $0x30] sm:$0xff] %v9549_v0 }
  0xbb   : > { %998 = vst [vmem:[#allocation2] sm:$0xff] %v9549_v0 }
  0xbc   : > { %999 = vst [vmem:[#allocation2 + $0x58] sm:$0xff] %v9549_v0 }
  0xbd   : > { %1000 = vst [vmem:[#allocation2 + $0x18] sm:$0xff] %v9549_v0 }
  0xbe   : > { %1001 = vst [vmem:[#allocation2 + $0x50] sm:$0xff] %v9549_v0 }
  0xbf   : > { %1002 = vst [vmem:[#allocation2 + $0x68] sm:$0xff] %v9549_v0 }
  0xc0   : > { %1003 = vst [vmem:[#allocation2 + $0x8] sm:$0xff] %v9549_v0 }
  0xc1   : > { %1004 = vst [vmem:[#allocation2 + $0x48] sm:$0xff] %v9549_v0 }
  0xc2   : > { %1005 = vst [vmem:[#allocation2 + $0x40] sm:$0xff] %v9549_v0 }
  0xc3   : > { %1006 = vst [vmem:[#allocation2 + $0x20] sm:$0xff] %v9549_v0 }
  0xc4   : > { %1007 = vst [vmem:[#allocation2 + $0x10] sm:$0xff] %v9549_v0 }
  0xc5   : > { %1008 = vst [vmem:[#allocation2 + $0x38] sm:$0xff] %v9549_v0 }
  0xc6   : > { %1009 = vst [vmem:[#allocation2 + $0x60] sm:$0xff] %v9549_v0 }
  0xc7   : > { %1010 = vst [vmem:[#allocation2 + $0x70] sm:$0xff] %v9549_v0 }
  0xc8   : > { %1011 = vst [vmem:[#allocation2 + $0x78] sm:$0xff] %v9549_v0 }
  0xc9   : > { %1012 = vst [vmem:[#allocation2 + $0x28] sm:$0xff] %v9549_v0 }
  0xca   : > { %1014 = vst.msk [vmem:[#allocation3] sm:$0xff] %vm1013_vm0, %v9549_v0 }
  0xcb   : > { %1015 = vst.msk [vmem:[#allocation3 + $0x8] sm:$0xff] %vm1013_vm0, %v9549_v0 }
  0xcc   : > { %1016 = vst.msk [vmem:[#allocation3 + $0x10] sm:$0xff] %vm1013_vm0, %v9549_v0 }
  0xcd   : > { %1017 = vst.msk [vmem:[#allocation3 + $0x18] sm:$0xff] %vm1013_vm0, %v9549_v0 }
  0xce   : > { %1018 = vst.msk [vmem:[#allocation3 + $0x20] sm:$0xff] %vm1013_vm0, %v9549_v0 }
  0xcf   : > { %1019 = vst.msk [vmem:[#allocation3 + $0x28] sm:$0xff] %vm1013_vm0, %v9549_v0 }
  0xd0   : > { %1020 = vst.msk [vmem:[#allocation3 + $0x30] sm:$0xff] %vm1013_vm0, %v9549_v0 }
  0xd1   : > { %1021 = vst.msk [vmem:[#allocation3 + $0x38] sm:$0xff] %vm1013_vm0, %v9549_v0 }
  0xd2 PF: > { %v7051_v1 = vld [vmem:[%s9948_s23 + $0x70] sm:$0xf]  ;;  %v8002_v2 = vld [vmem:[%s9948_s23 + $0x74] sm:$0xf0]  ;;  %v8001_v6 = vld [vmem:[%s9948_s23 + $0x74] sm:$0xf] }
  0xd3   : > { %v7115_v3 = vld [vmem:[%s9948_s23 + $0xf0] sm:$0xf]  ;;  %v7052_v4 = vor.u32 %v8002_v2, %v7051_v1  ;;  %v8018_v5 = vld [vmem:[%s9948_s23 + $0xf4] sm:$0xf0]  ;;  %v7053_v7 = vld [vmem:[%s9948_s23 + $0x78] sm:$0xf0] }
  0xd4   : > { %v7116_v8 = vor.u32 %v8018_v5, %v7115_v3  ;;  %v7056_v9 = vor.u32 %v8001_v6, %v7053_v7  ;;  %v8017_v10 = vld [vmem:[%s9948_s23 + $0xf4] sm:$0xf]  ;;  %v7117_v11 = vld [vmem:[%s9948_s23 + $0xf8] sm:$0xf0]  ;;  %v7043_v12 = vld [vmem:[%s9948_s23 + $0x60] sm:$0xf] }
  0xd5   : > { %1359 = vmatpush.bf16.msra.mxu0 %v7052_v4  ;;  %v7120_v13 = vor.u32 %v8017_v10, %v7117_v11  ;;  %v8000_v14 = vld [vmem:[%s9948_s23 + $0x64] sm:$0xf0]  ;;  %v7107_v15 = vld [vmem:[%s9948_s23 + $0xe0] sm:$0xf]  ;;  %v7999_v19 = vld [vmem:[%s9948_s23 + $0x64] sm:$0xf] }
  0xd6   : > { %v8016_v16 = vld [vmem:[%s9948_s23 + $0xe4] sm:$0xf0]  ;;  %1388 = vmatpush.bf16.msra.mxu1 %v7116_v8  ;;  %1417 = vmatpush.bf16.msra.mxu2 %v7056_v9  ;;  %v7044_v17 = vor.u32 %v8000_v14, %v7043_v12  ;;  %v7045_v20 = vld [vmem:[%s9948_s23 + $0x68] sm:$0xf0]  ;;  %v8015_v21 = vld [vmem:[%s9948_s23 + $0xe4] sm:$0xf] }
  0xd7   : > { %v7108_v18 = vor.u32 %v8016_v16, %v7107_v15  ;;  %1446 = vmatpush.bf16.msra.mxu3 %v7120_v13  ;;  %v7048_v22 = vor.u32 %v7999_v19, %v7045_v20  ;;  %v7109_v23 = vld [vmem:[%s9948_s23 + $0xe8] sm:$0xf0]  ;;  %v7035_v24 = vld [vmem:[%s9948_s23 + $0x50] sm:$0xf]  ;;  %v7998_v25 = vld [vmem:[%s9948_s23 + $0x54] sm:$0xf0] }
  0xd8   : > { %v7112_v26 = vor.u32 %v8015_v21, %v7109_v23  ;;  %v7099_v27 = vld [vmem:[%s9948_s23 + $0xd0] sm:$0xf]  ;;  %v8014_v28 = vld [vmem:[%s9948_s23 + $0xd4] sm:$0xf0]  ;;  %v7997_v29 = vld [vmem:[%s9948_s23 + $0x54] sm:$0xf]  ;;  %v7036_v30 = vor.u32 %v7998_v25, %v7035_v24 }
  0xd9   : > { %1360 = vmatpush.bf16.msra.mxu0 %v7044_v17  ;;  %v7037_v31 = vld [vmem:[%s9948_s23 + $0x58] sm:$0xf0]  ;;  %v8013_v32 = vld [vmem:[%s9948_s23 + $0xd4] sm:$0xf]  ;;  %v7100_v34 = vor.u32 %v8014_v28, %v7099_v27  ;;  %v7027_v36 = vld [vmem:[%s9948_s23 + $0x40] sm:$0xf] }
  0xda   : > { %v7101_v33 = vld [vmem:[%s9948_s23 + $0xd8] sm:$0xf0]  ;;  %1389 = vmatpush.bf16.msra.mxu1 %v7108_v18  ;;  %1418 = vmatpush.bf16.msra.mxu2 %v7048_v22  ;;  %v7040_v35 = vor.u32 %v7997_v29, %v7037_v31  ;;  %v7996_v37 = vld [vmem:[%s9948_s23 + $0x44] sm:$0xf0]  ;;  %v7091_v38 = vld [vmem:[%s9948_s23 + $0xc0] sm:$0xf] }
  0xdb   : > { %1447 = vmatpush.bf16.msra.mxu3 %v7112_v26  ;;  %v7104_v39 = vor.u32 %v8013_v32, %v7101_v33  ;;  %v8012_v40 = vld [vmem:[%s9948_s23 + $0xc4] sm:$0xf0]  ;;  %v7995_v41 = vld [vmem:[%s9948_s23 + $0x44] sm:$0xf]  ;;  %v7029_v42 = vld [vmem:[%s9948_s23 + $0x48] sm:$0xf0]  ;;  %v7028_v45 = vor.u32 %v7996_v37, %v7027_v36 }
  0xdc   : > { %v8011_v43 = vld [vmem:[%s9948_s23 + $0xc4] sm:$0xf]  ;;  %v7093_v44 = vld [vmem:[%s9948_s23 + $0xc8] sm:$0xf0]  ;;  %v7092_v46 = vor.u32 %v8012_v40, %v7091_v38  ;;  %v7032_v47 = vor.u32 %v7995_v41, %v7029_v42  ;;  %v7019_v48 = vld [vmem:[%s9948_s23 + $0x30] sm:$0xf] }
  0xdd   : > { %1361 = vmatpush.bf16.msra.mxu0 %v7036_v30  ;;  %v7994_v49 = vld [vmem:[%s9948_s23 + $0x34] sm:$0xf0]  ;;  %v7083_v50 = vld [vmem:[%s9948_s23 + $0xb0] sm:$0xf]  ;;  %v7096_v51 = vor.u32 %v8011_v43, %v7093_v44  ;;  %v7993_v53 = vld [vmem:[%s9948_s23 + $0x34] sm:$0xf] }
  0xde   : > { %1390 = vmatpush.bf16.msra.mxu1 %v7100_v34  ;;  %1419 = vmatpush.bf16.msra.mxu2 %v7040_v35  ;;  %v8010_v52 = vld [vmem:[%s9948_s23 + $0xb4] sm:$0xf0]  ;;  %v7021_v54 = vld [vmem:[%s9948_s23 + $0x38] sm:$0xf0]  ;;  %v8009_v55 = vld [vmem:[%s9948_s23 + $0xb4] sm:$0xf]  ;;  %v7020_v57 = vor.u32 %v7994_v49, %v7019_v48 }
  0xdf   : > { %1448 = vmatpush.bf16.msra.mxu3 %v7104_v39  ;;  %v7085_v56 = vld [vmem:[%s9948_s23 + $0xb8] sm:$0xf0]  ;;  %v7084_v58 = vor.u32 %v8010_v52, %v7083_v50  ;;  %v7024_v59 = vor.u32 %v7993_v53, %v7021_v54  ;;  %v7011_v60 = vld [vmem:[%s9948_s23 + $0x20] sm:$0xf]  ;;  %v7992_v61 = vld [vmem:[%s9948_s23 + $0x24] sm:$0xf0] }
  0xe0   : > { %v7075_v62 = vld [vmem:[%s9948_s23 + $0xa0] sm:$0xf]  ;;  %v7088_v63 = vor.u32 %v8009_v55, %v7085_v56  ;;  %v8008_v0 = vld [vmem:[%s9948_s23 + $0xa4] sm:$0xf0]  ;;  %v7991_v1 = vld [vmem:[%s9948_s23 + $0x24] sm:$0xf]  ;;  %v7012_v5 = vor.u32 %v7992_v61, %v7011_v60 }
  0xe1   : > { %1362 = vmatpush.bf16.msra.mxu0 %v7028_v45  ;;  %v7013_v2 = vld [vmem:[%s9948_s23 + $0x28] sm:$0xf0]  ;;  %v8007_v3 = vld [vmem:[%s9948_s23 + $0xa4] sm:$0xf]  ;;  %v7076_v6 = vor.u32 %v8008_v0, %v7075_v62  ;;  %v7003_v8 = vld [vmem:[%s9948_s23 + $0x10] sm:$0xf] }
  0xe2   : > { %1391 = vmatpush.bf16.msra.mxu1 %v7092_v46  ;;  %1420 = vmatpush.bf16.msra.mxu2 %v7032_v47  ;;  %v7077_v4 = vld [vmem:[%s9948_s23 + $0xa8] sm:$0xf0]  ;;  %v7016_v7 = vor.u32 %v7991_v1, %v7013_v2  ;;  %v7990_v9 = vld [vmem:[%s9948_s23 + $0x14] sm:$0xf0]  ;;  %v7067_v10 = vld [vmem:[%s9948_s23 + $0x90] sm:$0xf] }
  0xe3   : > { %1449 = vmatpush.bf16.msra.mxu3 %v7096_v51  ;;  %v7080_v11 = vor.u32 %v8007_v3, %v7077_v4  ;;  %v8006_v12 = vld [vmem:[%s9948_s23 + $0x94] sm:$0xf0]  ;;  %v7989_v13 = vld [vmem:[%s9948_s23 + $0x14] sm:$0xf]  ;;  %v7005_v14 = vld [vmem:[%s9948_s23 + $0x18] sm:$0xf0]  ;;  %v7004_v17 = vor.u32 %v7990_v9, %v7003_v8 }
  0xe4   : > { %v8005_v15 = vld [vmem:[%s9948_s23 + $0x94] sm:$0xf]  ;;  %v7069_v16 = vld [vmem:[%s9948_s23 + $0x98] sm:$0xf0]  ;;  %v7068_v18 = vor.u32 %v8006_v12, %v7067_v10  ;;  %v7008_v19 = vor.u32 %v7989_v13, %v7005_v14  ;;  %v6995_v20 = vld [vmem:[%s9948_s23] sm:$0xf] }
  0xe5   : > { %1363 = vmatpush.bf16.msra.mxu0 %v7020_v57  ;;  %v7988_v21 = vld [vmem:[%s9948_s23 + $0x4] sm:$0xf0]  ;;  %v7059_v22 = vld [vmem:[%s9948_s23 + $0x80] sm:$0xf]  ;;  %v7072_v23 = vor.u32 %v8005_v15, %v7069_v16  ;;  %v7987_v25 = vld [vmem:[%s9948_s23 + $0x4] sm:$0xf] }
  0xe6   : > { %1392 = vmatpush.bf16.msra.mxu1 %v7084_v58  ;;  %1421 = vmatpush.bf16.msra.mxu2 %v7024_v59  ;;  %v8004_v24 = vld [vmem:[%s9948_s23 + $0x84] sm:$0xf0]  ;;  %v6997_v26 = vld [vmem:[%s9948_s23 + $0x8] sm:$0xf0]  ;;  %v8003_v27 = vld [vmem:[%s9948_s23 + $0x84] sm:$0xf]  ;;  %v6996_v29 = vor.u32 %v7988_v21, %v6995_v20 }
  0xe7   : > { %1450 = vmatpush.bf16.msra.mxu3 %v7088_v63  ;;  %v7061_v28 = vld [vmem:[%s9948_s23 + $0x88] sm:$0xf0]  ;;  %v6963_v30 = vld [vmem:[%s9940_s14] sm:$0xf]  ;;  %v7980_v31 = vld [vmem:[%s9940_s14 + $0x4] sm:$0xf0]  ;;  %v7060_v32 = vor.u32 %v8004_v24, %v7059_v22  ;;  %v7000_v33 = vor.u32 %v7987_v25, %v6997_v26 }
  0xe8   : > { %v7979_v34 = vld [vmem:[%s9940_s14 + $0x4] sm:$0xf]  ;;  %v6965_v35 = vld [vmem:[%s9940_s14 + $0x8] sm:$0xf0]  ;;  %v7064_v36 = vor.u32 %v8003_v27, %v7061_v28  ;;  %v6964_v37 = vor.u32 %v7980_v31, %v6963_v30  ;;  %v6971_v39 = vld [vmem:[%s9940_s14 + $0x10] sm:$0xf] }
  0xe9   : > { %1364 = vmatpush.bf16.msra.mxu0 %v7012_v5  ;;  %v6968_v38 = vor.u32 %v7979_v34, %v6965_v35  ;;  %v7982_v40 = vld [vmem:[%s9940_s14 + $0x14] sm:$0xf0]  ;;  %v7981_v41 = vld [vmem:[%s9940_s14 + $0x14] sm:$0xf]  ;;  %v6973_v42 = vld [vmem:[%s9940_s14 + $0x18] sm:$0xf0] }
  0xea   : > { %1393 = vmatpush.bf16.msra.mxu1 %v7076_v6  ;;  %1422 = vmatpush.bf16.msra.mxu2 %v7016_v7  ;;  %v6972_v43 = vor.u32 %v7982_v40, %v6971_v39  ;;  %v6976_v44 = vor.u32 %v7981_v41, %v6973_v42  ;;  %v1024_v45 = vld [vmem:[%s9940_s14 + $0x10] sm:$0xff]  ;;  %v1022_v46 = vld [vmem:[%s9940_s14] sm:$0xff]  ;;  %v1025_v52 = vld [vmem:[%s9940_s14 + $0x18] sm:$0xff]  ;;  %vm1102_vm1 = vcmask 7168   ;;  %s14475_s5 = sld [smem:[#allocation45_spill]] }
  0xeb   : > { %1451 = vmatpush.bf16.msra.mxu3 %v7080_v11  ;;  %v1026_v47 = vld [vmem:[%s9940_s14 + $0x20] sm:$0xff]  ;;  %v1034_v48 = vunpack.c.l.bf16 %v1024_v45  ;;  %v1035_v49 = vunpack.c.h.bf16 %v1024_v45  ;;  %v1030_v50 = vunpack.c.l.bf16 %v1022_v46  ;;  %v1031_v51 = vunpack.c.h.bf16 %v1022_v46  ;;  %v1023_v55 = vld [vmem:[%s9940_s14 + $0x8] sm:$0xff]  ;;  %v1028_v20 = vld [vmem:[%s9940_s14 + $0x30] sm:$0xff] }
  0xec   : > { %v1038_v53 = vunpack.c.l.bf16 %v1026_v47  ;;  %v1039_v54 = vunpack.c.h.bf16 %v1026_v47  ;;  %v1027_v60 = vld [vmem:[%s9940_s14 + $0x28] sm:$0xff]  ;;  %v1036_v63 = vunpack.c.l.bf16 %v1025_v52  ;;  %v1037_v0 = vunpack.c.h.bf16 %v1025_v52  ;;  %v6979_v8 = vld [vmem:[%s9940_s14 + $0x20] sm:$0xf]  ;;  %v7983_v10 = vld [vmem:[%s9940_s14 + $0x24] sm:$0xf] }
  0xed   : > { %1365 = vmatpush.bf16.msra.mxu0 %v7004_v17  ;;  %v1058_v56 = vmul.f32 %v1034_v48, %v1034_v48  ;;  %v1059_v57 = vmul.f32 %v1035_v49, %v1035_v49  ;;  %v1054_v58 = vmul.f32 %v1030_v50, %v1030_v50  ;;  %v1055_v59 = vmul.f32 %v1031_v51, %v1031_v51  ;;  %v7984_v9 = vld [vmem:[%s9940_s14 + $0x24] sm:$0xf0]  ;;  %v6981_v11 = vld [vmem:[%s9940_s14 + $0x28] sm:$0xf0]  ;;  %v6987_v35 = vld [vmem:[%s9940_s14 + $0x30] sm:$0xf] }
  0xee   : > { %1394 = vmatpush.bf16.msra.mxu1 %v7068_v18  ;;  %1423 = vmatpush.bf16.msra.mxu2 %v7008_v19  ;;  %v1062_v61 = vmul.f32 %v1038_v53, %v1038_v53  ;;  %v1063_v62 = vmul.f32 %v1039_v54, %v1039_v54  ;;  %v1032_v3 = vunpack.c.l.bf16 %v1023_v55  ;;  %v1033_v4 = vunpack.c.h.bf16 %v1023_v55  ;;  %v1029_v18 = vld [vmem:[%s9940_s14 + $0x38] sm:$0xff]  ;;  %v1111_v42 = vld [vmem:[#allocation2 + $0x30] sm:$0xff]  ;;  %v1112_v47 = vld [vmem:[#allocation2] sm:$0xff] }
  0xef   : > { %1452 = vmatpush.bf16.msra.mxu3 %v7072_v23  ;;  %v1076_v1 = vadd.f32 %v1059_v57, %v1058_v56  ;;  %v1070_v2 = vadd.f32 %v1055_v59, %v1054_v58  ;;  %v1040_v6 = vunpack.c.l.bf16 %v1027_v60  ;;  %v1041_v7 = vunpack.c.h.bf16 %v1027_v60  ;;  %v1113_v51 = vld [vmem:[#allocation2 + $0x58] sm:$0xff] }
  0xf0   : > { %v1082_v5 = vadd.f32 %v1063_v62, %v1062_v61  ;;  %v1060_v12 = vmul.f32 %v1036_v63, %v1036_v63  ;;  %v1061_v13 = vmul.f32 %v1037_v0, %v1037_v0  ;;  %v1056_v14 = vmul.f32 %v1032_v3, %v1032_v3  ;;  %v1114_v57 = vld [vmem:[#allocation2 + $0x18] sm:$0xff]  ;;  %v1115_v61 = vld [vmem:[#allocation2 + $0x50] sm:$0xff]  ;;  %p7121_p10 = scmp.ne.s32.totalorder %s14475_s5, 1 }
  0xf1   : > { %1366 = vmatpush.bf16.msra.mxu0 %v6996_v29  ;;  %1077 = vadd.xlane.f32.xlu1 %v1076_v1  ;;  %v1057_v15 = vmul.f32 %v1033_v4, %v1033_v4  ;;  %v1064_v16 = vmul.f32 %v1040_v6, %v1040_v6  ;;  %v1065_v17 = vmul.f32 %v1041_v7, %v1041_v7  ;;  %v1044_v23 = vunpack.c.l.bf16 %v1029_v18  ;;  %v1048_v0 = vld [vmem:[#allocation3 + $0x10] sm:$0xff] }
  0xf2   : > { %1395 = vmatpush.bf16.msra.mxu1 %v7060_v32  ;;  %1424 = vmatpush.bf16.msra.mxu2 %v7000_v33  ;;  %v6980_v19 = vor.u32 %v7984_v9, %v6979_v8  ;;  %v6984_v21 = vor.u32 %v7983_v10, %v6981_v11  ;;  %v1079_v22 = vadd.f32 %v1061_v13, %v1060_v12  ;;  %v1045_v24 = vunpack.c.h.bf16 %v1029_v18  ;;  %v1116_v9 = vld [vmem:[#allocation2 + $0x68] sm:$0xff]  ;;  %v1049_v18 = vld [vmem:[#allocation3 + $0x18] sm:$0xff] }
  0xf3   : > { %1453 = vmatpush.bf16.msra.mxu3 %v7064_v36  ;;  %1071 = vadd.xlane.f32.xlu0 %v1070_v2  ;;  %v1073_v25 = vadd.f32 %v1057_v15, %v1056_v14  ;;  %v1085_v26 = vadd.f32 %v1065_v17, %v1064_v16  ;;  %v1042_v27 = vunpack.c.l.bf16 %v1028_v20  ;;  %v1043_v28 = vunpack.c.h.bf16 %v1028_v20  ;;  %v7986_v36 = vld [vmem:[%s9940_s14 + $0x34] sm:$0xf0]  ;;  %v1046_v2 = vld [vmem:[#allocation3] sm:$0xff]  ;;  %v1117_v13 = vld [vmem:[#allocation2 + $0x8] sm:$0xff] }
  0xf4   : > { %1367 = vmatmul.bf16.vlgmr.msra.gmra.mxu0 %v6964_v37  ;;  %1083 = vadd.xlane.f32.xlu2 %v1082_v5  ;;  %v1068_v29 = vmul.f32 %v1044_v23, %v1044_v23  ;;  %v1069_v30 = vmul.f32 %v1045_v24, %v1045_v24  ;;  %v6988_v39 = vor.u32 %v7986_v36, %v6987_v35  ;;  %v1050_v16 = vld [vmem:[#allocation3 + $0x20] sm:$0xff]  ;;  %v1047_v20 = vld [vmem:[#allocation3 + $0x8] sm:$0xff] }
  0xf5   : > { %1396 = vmatmul.bf16.vlgmr.msra.gmra.mxu1 %v6968_v38  ;;  %1425 = vmatmul.bf16.vlgmr.msra.gmra.mxu2 %v6964_v37  ;;  %v1066_v31 = vmul.f32 %v1042_v27, %v1042_v27  ;;  %v1067_v32 = vmul.f32 %v1043_v28, %v1043_v28  ;;  %v7985_v37 = vld [vmem:[%s9940_s14 + $0x34] sm:$0xf]  ;;  %v1118_v28 = vld [vmem:[#allocation2 + $0x48] sm:$0xff] }
  0xf6   : > { %1454 = vmatmul.bf16.vlgmr.msra.gmra.mxu3 %v6968_v38  ;;  %v1091_v33 = vadd.f32 %v1069_v30, %v1068_v29  ;;  %v6989_v38 = vld [vmem:[%s9940_s14 + $0x38] sm:$0xf0]  ;;  %v1051_v35 = vld [vmem:[#allocation3 + $0x28] sm:$0xff] }
  0xf7   : > { %v1088_v34 = vadd.f32 %v1067_v32, %v1066_v31  ;;  %v6992_v40 = vor.u32 %v7985_v37, %v6989_v38  ;;  %v1119_v32 = vld [vmem:[#allocation2 + $0x40] sm:$0xff]  ;;  %v1053_v37 = vld [vmem:[#allocation3 + $0x38] sm:$0xff] }
  0xf9   : > { %1080 = vadd.xlane.f32.xlu1 %v1079_v22 }
  0xfb   : > { %1074 = vadd.xlane.f32.xlu0 %v1073_v25 }
  0xfc   : > { %1086 = vadd.xlane.f32.xlu2 %v1085_v26 }
 0x101   : > { %1092 = vadd.xlane.f32.xlu1 %v1091_v33 }
 0x103   : > { %1089 = vadd.xlane.f32.xlu0 %v1088_v34 }
 0x104   : > { %1372 = vmatmul.bf16.gmra.mxu0 %v6972_v43 }
 0x105   : > { %1401 = vmatmul.bf16.gmra.mxu1 %v6976_v44  ;;  %1430 = vmatmul.bf16.gmra.mxu2 %v6972_v43 }
 0x106   : > { %1459 = vmatmul.bf16.gmra.mxu3 %v6976_v44 }
 0x114   : > { %1377 = vmatmul.bf16.gmra.mxu0 %v6980_v19 }
 0x115   : > { %1406 = vmatmul.bf16.gmra.mxu1 %v6984_v21  ;;  %1435 = vmatmul.bf16.gmra.mxu2 %v6980_v19 }
 0x116   : > { %1464 = vmatmul.bf16.gmra.mxu3 %v6984_v21 }
 0x124   : > { %1382 = vmatmul.bf16.gmra.mxu0 %v6988_v39 }
 0x125   : > { %1411 = vmatmul.bf16.gmra.mxu1 %v6992_v40  ;;  %1440 = vmatmul.bf16.gmra.mxu2 %v6988_v39  ;;  %v1052_v39 = vld [vmem:[#allocation3 + $0x30] sm:$0xff] }
 0x126   : > { %1469 = vmatmul.bf16.gmra.mxu3 %v6992_v40 }
 0x164   : > { %v1078_v1 = vpop.xlane.xlu1 %1077 }
 0x165   : > { %v1096_v5 = vadd.f32 %v1078_v1, %v1048_v0 }
 0x166   : > { %v1072_v3 = vpop.xlane.xlu0 %1071 }
 0x167   : > { %v1094_v7 = vadd.f32 %v1072_v3, %v1046_v2  ;;  %1105 = vst.msk [vmem:[#allocation3 + $0x10] sm:$0xff] %vm1102_vm1, %v1096_v5  ;;  %v1084_v17 = vpop.xlane.xlu2 %1083  ;;  %v1124_v3 = vld [vmem:[#allocation2 + $0x70] sm:$0xff] }
 0x168   : > { %v1098_v22 = vadd.f32 %v1084_v17, %v1050_v16 }
 0x169   : > { %1103 = vst.msk [vmem:[#allocation3] sm:$0xff] %vm1102_vm1, %v1094_v7  ;;  %v1125_v7 = vld [vmem:[#allocation2 + $0x78] sm:$0xff] }
 0x16a   : > { %1107 = vst.msk [vmem:[#allocation3 + $0x20] sm:$0xff] %vm1102_vm1, %v1098_v22 }
 0x16c   : > { %v1081_v19 = vpop.xlane.xlu1 %1080 }
 0x16d   : > { %v1097_v25 = vadd.f32 %v1081_v19, %v1049_v18 }
 0x16e   : > { %v1075_v23 = vpop.xlane.xlu0 %1074 }
 0x16f   : > { %v1095_v26 = vadd.f32 %v1075_v23, %v1047_v20  ;;  %1106 = vst.msk [vmem:[#allocation3 + $0x18] sm:$0xff] %vm1102_vm1, %v1097_v25  ;;  %v1087_v36 = vpop.xlane.xlu2 %1086 }
 0x171   : > { %v1368_v41 = vpop.f32.mrf.mxu0  ;;  %1104 = vst.msk [vmem:[#allocation3 + $0x8] sm:$0xff] %vm1102_vm1, %v1095_v26 }
 0x172   : > { %v1397_v43 = vpop.f32.mrf.mxu1 }
 0x173   : > { %v1398_v44 = vadd.f32 %v1397_v43, %v1368_v41  ;;  %v1099_v41 = vadd.f32 %v1087_v36, %v1051_v35 }
 0x174   : > { %v1093_v38 = vpop.xlane.xlu1 %1092 }
 0x175   : > { %v1475_v45 = vadd.f32 %v1398_v44, %v1111_v42  ;;  %v1101_v44 = vadd.f32 %v1093_v38, %v1053_v37  ;;  %1108 = vst.msk [vmem:[#allocation3 + $0x28] sm:$0xff] %vm1102_vm1, %v1099_v41 }
 0x176   : > { %v1090_v42 = vpop.xlane.xlu0 %1089 }
 0x177   : > { %1491 = vst [vmem:[#allocation2 + $0x30] sm:$0xff] %v1475_v45  ;;  %v1100_v45 = vadd.f32 %v1090_v42, %v1052_v39 }
 0x178   : > { %v1426_v46 = vpop.f32.mrf.mxu2  ;;  %1110 = vst.msk [vmem:[#allocation3 + $0x38] sm:$0xff] %vm1102_vm1, %v1101_v44 }
 0x179   : > { %v1455_v48 = vpop.f32.mrf.mxu3  ;;  %v1370_v49 = vpop.f32.mrf.mxu0  ;;  %1109 = vst.msk [vmem:[#allocation3 + $0x30] sm:$0xff] %vm1102_vm1, %v1100_v45 }
 0x17a   : > { %v1456_v50 = vadd.f32 %v1455_v48, %v1426_v46  ;;  %v1399_v52 = vpop.f32.mrf.mxu1 }
 0x17b   : > { %v1400_v53 = vadd.f32 %v1399_v52, %v1370_v49 }
 0x17c   : > { %v1476_v54 = vadd.f32 %v1456_v50, %v1112_v47  ;;  %v1120_v47 = vld [vmem:[#allocation2 + $0x20] sm:$0xff] }
 0x17d   : > { %v1477_v55 = vadd.f32 %v1400_v53, %v1113_v51  ;;  %v1121_v51 = vld [vmem:[#allocation2 + $0x10] sm:$0xff] }
 0x17e   : > { %1492 = vst [vmem:[#allocation2] sm:$0xff] %v1476_v54 }
 0x17f   : > { %1493 = vst [vmem:[#allocation2 + $0x58] sm:$0xff] %v1477_v55 }
 0x180   : > { %v1428_v56 = vpop.f32.mrf.mxu2 }
 0x181   : > { %v1457_v58 = vpop.f32.mrf.mxu3  ;;  %v1373_v59 = vpop.f32.mrf.mxu0 }
 0x182   : > { %v1458_v60 = vadd.f32 %v1457_v58, %v1428_v56  ;;  %v1402_v62 = vpop.f32.mrf.mxu1 }
 0x183   : > { %v1403_v63 = vadd.f32 %v1402_v62, %v1373_v59 }
 0x184   : > { %v1478_v4 = vadd.f32 %v1458_v60, %v1114_v57  ;;  %v1122_v57 = vld [vmem:[#allocation2 + $0x38] sm:$0xff] }
 0x185   : > { %v1479_v6 = vadd.f32 %v1403_v63, %v1115_v61  ;;  %v1123_v61 = vld [vmem:[#allocation2 + $0x60] sm:$0xff] }
 0x186   : > { %1494 = vst [vmem:[#allocation2 + $0x18] sm:$0xff] %v1478_v4 }
 0x187   : > { %1495 = vst [vmem:[#allocation2 + $0x50] sm:$0xff] %v1479_v6 }
 0x188   : > { %v1431_v8 = vpop.f32.mrf.mxu2 }
 0x189   : > { %v1460_v10 = vpop.f32.mrf.mxu3  ;;  %v1375_v11 = vpop.f32.mrf.mxu0 }
 0x18a   : > { %v1461_v12 = vadd.f32 %v1460_v10, %v1431_v8  ;;  %v1404_v14 = vpop.f32.mrf.mxu1 }
 0x18b   : > { %v1405_v15 = vadd.f32 %v1404_v14, %v1375_v11 }
 0x18c   : > { %v1480_v21 = vadd.f32 %v1461_v12, %v1116_v9 }
 0x18d   : > { %v1481_v24 = vadd.f32 %v1405_v15, %v1117_v13  ;;  %v1126_v13 = vld [vmem:[#allocation2 + $0x28] sm:$0xff] }
 0x18e   : > { %1496 = vst [vmem:[#allocation2 + $0x68] sm:$0xff] %v1480_v21 }
 0x18f   : > { %1497 = vst [vmem:[#allocation2 + $0x8] sm:$0xff] %v1481_v24 }
 0x190   : > { %v1433_v27 = vpop.f32.mrf.mxu2 }
 0x191   : > { %v1462_v29 = vpop.f32.mrf.mxu3  ;;  %v1378_v30 = vpop.f32.mrf.mxu0 }
 0x192   : > { %v1463_v31 = vadd.f32 %v1462_v29, %v1433_v27  ;;  %v1407_v33 = vpop.f32.mrf.mxu1 }
 0x193   : > { %v1408_v34 = vadd.f32 %v1407_v33, %v1378_v30 }
 0x194   : > { %v1482_v40 = vadd.f32 %v1463_v31, %v1118_v28 }
 0x195   : > { %v1483_v43 = vadd.f32 %v1408_v34, %v1119_v32 }
 0x196   : > { %1498 = vst [vmem:[#allocation2 + $0x48] sm:$0xff] %v1482_v40 }
 0x197   : > { %1499 = vst [vmem:[#allocation2 + $0x40] sm:$0xff] %v1483_v43 }
 0x198   : > { %v1436_v46 = vpop.f32.mrf.mxu2 }
 0x199   : > { %v1465_v48 = vpop.f32.mrf.mxu3  ;;  %v1380_v49 = vpop.f32.mrf.mxu0 }
 0x19a   : > { %v1466_v50 = vadd.f32 %v1465_v48, %v1436_v46  ;;  %v1409_v52 = vpop.f32.mrf.mxu1 }
 0x19b   : > { %v1410_v53 = vadd.f32 %v1409_v52, %v1380_v49 }
 0x19c   : > { %v1484_v54 = vadd.f32 %v1466_v50, %v1120_v47 }
 0x19d   : > { %v1485_v55 = vadd.f32 %v1410_v53, %v1121_v51 }
 0x19e   : > { %1500 = vst [vmem:[#allocation2 + $0x20] sm:$0xff] %v1484_v54 }
 0x19f   : > { %1501 = vst [vmem:[#allocation2 + $0x10] sm:$0xff] %v1485_v55 }
 0x1a0   : > { %v1438_v56 = vpop.f32.mrf.mxu2 }
 0x1a1   : > { %v1467_v58 = vpop.f32.mrf.mxu3  ;;  %v1383_v59 = vpop.f32.mrf.mxu0 }
 0x1a2   : > { %v1468_v60 = vadd.f32 %v1467_v58, %v1438_v56  ;;  %v1412_v62 = vpop.f32.mrf.mxu1 }
 0x1a3   : > { %v1413_v63 = vadd.f32 %v1412_v62, %v1383_v59 }
 0x1a4   : > { %v1486_v0 = vadd.f32 %v1468_v60, %v1122_v57 }
 0x1a5   : > { %v1487_v1 = vadd.f32 %v1413_v63, %v1123_v61 }
 0x1a6   : > { %1502 = vst [vmem:[#allocation2 + $0x38] sm:$0xff] %v1486_v0 }
 0x1a7   : > { %1503 = vst [vmem:[#allocation2 + $0x60] sm:$0xff] %v1487_v1 }
 0x1a8   : > { %v1441_v2 = vpop.f32.mrf.mxu2 }
 0x1a9   : > { %v1470_v4 = vpop.f32.mrf.mxu3  ;;  %v1385_v5 = vpop.f32.mrf.mxu0 }
 0x1aa   : > { %v1471_v6 = vadd.f32 %v1470_v4, %v1441_v2  ;;  %v1414_v8 = vpop.f32.mrf.mxu1 }
 0x1ab   : > { %v1415_v9 = vadd.f32 %v1414_v8, %v1385_v5 }
 0x1ac   : > { %v1488_v10 = vadd.f32 %v1471_v6, %v1124_v3 }
 0x1ad   : > { %v1489_v11 = vadd.f32 %v1415_v9, %v1125_v7 }
 0x1ae   : > { %1504 = vst [vmem:[#allocation2 + $0x70] sm:$0xff] %v1488_v10 }
 0x1af   : > { %1505 = vst [vmem:[#allocation2 + $0x78] sm:$0xff] %v1489_v11 }
 0x1b0   : > { %v1443_v12 = vpop.f32.mrf.mxu2 }
 0x1b1   : > { %v1472_v14 = vpop.f32.mrf.mxu3 }
 0x1b2   : > { %v1473_v15 = vadd.f32 %v1472_v14, %v1443_v12  ;;  %1510 = sbr.rel (%p7121_p10) target bundleno = 2428 (0x97c), region = 180 }
 0x1b4   : > { %v1490_v16 = vadd.f32 %v1473_v15, %v1126_v13 }
 0x1b6   : > { %1506 = vst [vmem:[#allocation2 + $0x28] sm:$0xff] %v1490_v16 }
 0x1b7   : > { %v1513_v17 = vld [vmem:[#allocation3 + $0x10] sm:$0xff]  ;;  %v1511_v18 = vld [vmem:[#allocation3] sm:$0xff]  ;;  %v1514_v19 = vld [vmem:[#allocation3 + $0x18] sm:$0xff]  ;;  %v9550_v20 = vmov 0   ;;  %s14523_s0 = sld [smem:[#allocation64_spill]] }
 0x1b8   : > { %8484 = vset.pattern.permute.xlu1 %v9550_v20  ;;  %8483 = vset.pattern.permute.xlu0 %v9550_v20  ;;  %v1521_v21 = vmax.f32 %v1513_v17, 1e-24  ;;  %v1519_v22 = vmax.f32 %v1511_v18, 1e-24  ;;  %v10085_v23 = vmax.f32 %v1514_v19, 1e-24 }
 0x1b9   : > { %v1512_v24 = vld [vmem:[#allocation3 + $0x8] sm:$0xff]  ;;  %v1518_v25 = vld [vmem:[#allocation3 + $0x38] sm:$0xff]  ;;  %v1517_v26 = vld [vmem:[#allocation3 + $0x30] sm:$0xff]  ;;  %8485 = vset.pattern.permute.xlu2 %v9550_v20  ;;  %s14524_s4 = sld [smem:[#allocation57_spill]] }
 0x1ba   : > { %8486 = vrsqrt.f32 %v1521_v21  ;;  %v1515_v27 = vld [vmem:[#allocation3 + $0x20] sm:$0xff]  ;;  %v1516_v28 = vld [vmem:[#allocation3 + $0x28] sm:$0xff]  ;;  %v10087_v29 = vmax.f32 %v1512_v24, 1e-24  ;;  %v10089_v30 = vmax.f32 %v1518_v25, 1e-24  ;;  %vm1553_vm2 = vweird.f32 %v1521_v21 }
 0x1bb   : > { %8488 = vrsqrt.f32 %v1519_v22  ;;  %v10091_v31 = vmax.f32 %v1517_v26, 1e-24  ;;  %v10094_v32 = vmax.f32 %v1515_v27, 1e-24  ;;  %v10097_v33 = vmax.f32 %v1516_v28, 1e-24 }
 0x1bc   : > { %8490 = vrsqrt.f32 %v10085_v23  ;;  %vm1533_vm3 = vweird.f32 %v1519_v22  ;;  %vm1563_vm7 = vweird.f32 %v10085_v23  ;;  %vm1543_vm12 = vweird.f32 %v10087_v29  ;;  %v1608_v57 = vld [vmem:[#allocation2] sm:$0xff]  ;;  %s14575_s14 = sld [smem:[#allocation66_spill]] }
 0x1bd   : > { %8492 = vrsqrt.f32 %v10087_v29  ;;  %vm1573_vm10 = vweird.f32 %v10094_v32  ;;  %vm1583_vm1 = vweird.f32 %v10097_v33  ;;  %s14625_s18 = sld [smem:[#allocation68_spill]] }
 0x1be   : > { %8494 = vrsqrt.f32 %v10089_v30  ;;  %s14677_s21 = sld [smem:[#allocation70_spill]] }
 0x1bf   : > { %8496 = vrsqrt.f32 %v10091_v31  ;;  %s14678_s15 = sld [smem:[#allocation63_spill]] }
 0x1c0   : > { %v8487_v34 = vpop.eup %8486  ;;  %8498 = vrsqrt.f32 %v10094_v32  ;;  %s14729_s25 = sld [smem:[#allocation72_spill]] }
 0x1c1   : > { %v8489_v35 = vpop.eup %8488  ;;  %v1548_v36 = vmul.f32 %v8487_v34, %v1521_v21  ;;  %8500 = vrsqrt.f32 %v10097_v33  ;;  %vm1554_vm4 = vweird.f32 %v8487_v34  ;;  %s14730_s8 = sld [smem:[#allocation75_spill]] }
 0x1c2   : > { %v10103_v37 = vpop.eup %8490  ;;  %v1528_v38 = vmul.f32 %v8489_v35, %v1519_v22  ;;  %vm1534_vm5 = vweird.f32 %v8489_v35  ;;  %vm10125_vm6 = vmor %vm1553_vm2, %vm1554_vm4 }
 0x1c3   : > { %v10105_v39 = vpop.eup %8492  ;;  %v1549_v40 = vmul.f32 %v8487_v34, %v1548_v36  ;;  %v1558_v41 = vmul.f32 %v10103_v37, %v10085_v23  ;;  %vm1564_vm8 = vweird.f32 %v10103_v37  ;;  %vm10132_vm9 = vmor %vm1533_vm3, %vm1534_vm5  ;;  %vm1603_vm3 = vweird.f32 %v10089_v30 }
 0x1c4   : > { %v10109_v42 = vpop.eup %8494  ;;  %v1529_v43 = vmul.f32 %v8489_v35, %v1528_v38  ;;  %v1538_v44 = vmul.f32 %v10105_v39, %v10087_v29  ;;  %vm1544_vm13 = vweird.f32 %v10105_v39  ;;  %vm10153_vm14 = vmor %vm1563_vm7, %vm1564_vm8  ;;  %vm1593_vm5 = vweird.f32 %v10091_v31 }
 0x1c5   : > { %v10113_v45 = vpop.eup %8496  ;;  %v1550_v46 = vmul.f32 0.5, %v1549_v40  ;;  %v1559_v47 = vmul.f32 %v10103_v37, %v1558_v41  ;;  %v1598_v48 = vmul.f32 %v10109_v42, %v10089_v30  ;;  %vm10158_vm0 = vmor %vm1543_vm12, %vm1544_vm13  ;;  %vm1604_vm4 = vweird.f32 %v10109_v42  ;;  %v1615_v30 = vld [vmem:[#allocation2 + $0x40] sm:$0xff] }
 0x1c6   : > { %v8499_v49 = vpop.eup %8498  ;;  %v1530_v50 = vmul.f32 0.5, %v1529_v43  ;;  %v1539_v51 = vmul.f32 %v10105_v39, %v1538_v44  ;;  %v1588_v52 = vmul.f32 %v10113_v45, %v10091_v31  ;;  %vm1605_vm8 = vmor %vm1603_vm3, %vm1604_vm4  ;;  %v1616_v31 = vld [vmem:[#allocation2 + $0x20] sm:$0xff]  ;;  %v1618_v44 = vld [vmem:[#allocation2 + $0x38] sm:$0xff] }
 0x1c7   : > { %v10121_v53 = vpop.eup %8500  ;;  %v1551_v54 = vsub.f32 1.5, %v1550_v46  ;;  %v1560_v55 = vmul.f32 0.5, %v1559_v47  ;;  %v1568_v56 = vmul.f32 %v8499_v49, %v10094_v32  ;;  %v1599_v63 = vmul.f32 %v10109_v42, %v1598_v48  ;;  %v1679_v32 = vld [vmem:[#allocation9] sm:$0x3] }
 0x1c8   : > { %v1531_v58 = vsub.f32 1.5, %v1530_v50  ;;  %v1540_v59 = vmul.f32 0.5, %v1539_v51  ;;  %v1589_v3 = vmul.f32 %v10113_v45, %v1588_v52  ;;  %v1578_v4 = vmul.f32 %v10121_v53, %v10097_v33  ;;  %v1611_v52 = vld [vmem:[#allocation2 + $0x50] sm:$0xff] }
 0x1c9   : > { %v1552_v60 = vmul.f32 %v8487_v34, %v1551_v54  ;;  %v1561_v62 = vsub.f32 1.5, %v1560_v55  ;;  %v1569_v0 = vmul.f32 %v8499_v49, %v1568_v56  ;;  %vm1574_vm11 = vweird.f32 %v8499_v49  ;;  %v1607_v56 = vld [vmem:[#allocation2 + $0x30] sm:$0xff] }
 0x1ca   : > { %v1532_v1 = vmul.f32 %v8489_v35, %v1531_v58  ;;  %v1541_v2 = vsub.f32 1.5, %v1540_v59  ;;  %v1579_v8 = vmul.f32 %v10121_v53, %v1578_v4  ;;  %v1600_v11 = vmul.f32 0.5, %v1599_v63  ;;  %vm1575_vm15 = vmor %vm1573_vm10, %vm1574_vm11 }
 0x1cb   : > { %v1556_v5 = vsel %vm10125_vm6, %v8487_v34, %v1552_v60  ;;  %v1570_v6 = vmul.f32 0.5, %v1569_v0  ;;  %v1562_v9 = vmul.f32 %v10103_v37, %v1561_v62  ;;  %v1590_v14 = vmul.f32 0.5, %v1589_v3 }
 0x1cc   : > { %1635 = vperm.xlu1 %8484, %v1556_v5   ;;  %v1536_v7 = vsel %vm10132_vm9, %v8489_v35, %v1532_v1  ;;  %v1542_v13 = vmul.f32 %v10105_v39, %v1541_v2  ;;  %v1580_v15 = vmul.f32 0.5, %v1579_v8  ;;  %v1601_v20 = vsub.f32 1.5, %v1600_v11 }
 0x1cd   : > { %1625 = vperm.xlu0 %8483, %v1536_v7   ;;  %v1571_v12 = vsub.f32 1.5, %v1570_v6  ;;  %v1566_v19 = vsel %vm10153_vm14, %v10103_v37, %v1562_v9  ;;  %vm1584_vm2 = vweird.f32 %v10121_v53  ;;  %v1591_v23 = vsub.f32 1.5, %v1590_v14 }
 0x1ce   : > { %v1581_v18 = vsub.f32 1.5, %v1580_v15  ;;  %v1546_v22 = vsel %vm10158_vm0, %v10105_v39, %v1542_v13  ;;  %vm1594_vm6 = vweird.f32 %v10113_v45  ;;  %vm1585_vm7 = vmor %vm1583_vm1, %vm1584_vm2  ;;  %v1602_v25 = vmul.f32 %v10109_v42, %v1601_v20 }
 0x1cf   : > { %v1572_v17 = vmul.f32 %v8499_v49, %v1571_v12  ;;  %v1592_v26 = vmul.f32 %v10113_v45, %v1591_v23  ;;  %vm1595_vm9 = vmor %vm1593_vm5, %vm1594_vm6  ;;  %v10180_v34 = vperm.slane %v1679_v32, 0  ;;  %v10182_v35 = vperm.slane %v1679_v32, 1  ;;  %v1614_v32 = vld [vmem:[#allocation2 + $0x48] sm:$0xff] }
 0x1d0   : > { %v1582_v24 = vmul.f32 %v10121_v53, %v1581_v18  ;;  %v1606_v28 = vsel %vm1605_vm8, %v10109_v42, %v1602_v25  ;;  %v1617_v42 = vld [vmem:[#allocation2 + $0x10] sm:$0xff] }
 0x1d1   : > { %v1576_v21 = vsel %vm1575_vm15, %v8499_v49, %v1572_v17  ;;  %v1596_v29 = vsel %vm1595_vm9, %v10113_v45, %v1592_v26  ;;  %v1613_v26 = vld [vmem:[#allocation2 + $0x8] sm:$0xff] }
 0x1d2   : > { %1645 = vperm.xlu2 %8485, %v1576_v21   ;;  %v1586_v27 = vsel %vm1585_vm7, %v10121_v53, %v1582_v24  ;;  %v1612_v53 = vld [vmem:[#allocation2 + $0x68] sm:$0xff] }
 0x1d4   : > { %1640 = vperm.xlu1 %8484, %v1566_v19  }
 0x1d5   : > { %1630 = vperm.xlu0 %8483, %v1546_v22  }
 0x1da   : > { %1650 = vperm.xlu2 %8485, %v1586_v27  }
 0x1dc   : > { %1660 = vperm.xlu1 %8484, %v1606_v28  }
 0x1dd   : > { %1655 = vperm.xlu0 %8483, %v1596_v29  }
 0x22c   : > { %v1646_v33 = vpop.permute.xlu2 %1645 }
 0x22d   : > { %v1671_v36 = vmul.f32 %v1646_v33, %v1615_v30  ;;  %v1672_v37 = vmul.f32 %v1646_v33, %v1616_v31 }
 0x22f   : > { %v10185_v38 = vadd.f32 %v10180_v34, %v1671_v36  ;;  %v10188_v39 = vadd.f32 %v10182_v35, %v1672_v37 }
 0x231   : > { %v7130_v40 = vmul.f32 -1.442695, %v10185_v38  ;;  %v7131_v41 = vmul.f32 -1.442695, %v10188_v39 }
 0x233   : > { %8502 = vpow2.f32 %v7130_v40 }
 0x234   : > { %8504 = vpow2.f32 %v7131_v41  ;;  %v1651_v43 = vpop.permute.xlu2 %1650 }
 0x235   : > { %v1673_v45 = vmul.f32 %v1651_v43, %v1617_v42  ;;  %v1674_v46 = vmul.f32 %v1651_v43, %v1618_v44 }
 0x237   : > { %v10193_v47 = vadd.f32 %v10180_v34, %v1673_v45  ;;  %v10201_v54 = vadd.f32 %v10182_v35, %v1674_v46 }
 0x239   : > { %v8503_v48 = vpop.eup %8502  ;;  %v7132_v55 = vmul.f32 -1.442695, %v10193_v47  ;;  %v7133_v0 = vmul.f32 -1.442695, %v10201_v54 }
 0x23a   : > { %v8505_v49 = vpop.eup %8504  ;;  %v10195_v50 = vadd.f32 1.0, %v8503_v48 }
 0x23b   : > { %v10197_v51 = vadd.f32 1.0, %v8505_v49 }
 0x23c   : > { %8506 = vrcp.f32 %v10195_v50  ;;  %vm1890_vm10 = vweird.f32 %v10195_v50  ;;  %v1896_v23 = vand.u32 2147483648, %v10195_v50  ;;  %v1894_v30 = vand.u32 2147483647, %v10195_v50 }
 0x23d   : > { %8508 = vrcp.f32 %v10197_v51  ;;  %vm1905_vm12 = vweird.f32 %v10197_v51  ;;  %v1911_v36 = vand.u32 2147483648, %v10197_v51  ;;  %v1909_v44 = vand.u32 2147483647, %v10197_v51 }
 0x23e   : > { %v1636_v58 = vpop.permute.xlu1 %1635  ;;  %8510 = vpow2.f32 %v7132_v55  ;;  %v1897_v43 = vor.u32 1.1754944e-38, %v1896_v23  ;;  %vm10269_vm15 = vcmp.eq.f32.partialorder %v1894_v30, 8.507059e+37 }
 0x23f   : > { %v1667_v59 = vmul.f32 %v1636_v58, %v1611_v52  ;;  %v1668_v60 = vmul.f32 %v1636_v58, %v1612_v53  ;;  %v1626_v61 = vpop.permute.xlu0 %1625  ;;  %8512 = vpow2.f32 %v7133_v0  ;;  %v1610_v52 = vld [vmem:[#allocation2 + $0x18] sm:$0xff] }
 0x240   : > { %v1663_v62 = vmul.f32 %v1626_v61, %v1607_v56  ;;  %v1664_v63 = vmul.f32 %v1626_v61, %v1608_v57  ;;  %v10287_v57 = vor.u32 1.1754944e-38, %v1911_v36 }
 0x241   : > { %v10207_v1 = vadd.f32 %v10180_v34, %v1667_v59  ;;  %v10210_v2 = vadd.f32 %v10182_v35, %v1668_v60 }
 0x242   : > { %v10212_v3 = vpop.eup %8506  ;;  %v10215_v4 = vadd.f32 %v10180_v34, %v1663_v62  ;;  %v10218_v5 = vadd.f32 %v10182_v35, %v1664_v63 }
 0x243   : > { %v10220_v6 = vpop.eup %8508  ;;  %v1886_v7 = vmul.f32 %v10212_v3, %v10195_v50  ;;  %v7126_v8 = vmul.f32 -1.442695, %v10207_v1  ;;  %v7127_v9 = vmul.f32 -1.442695, %v10210_v2  ;;  %vm1891_vm11 = vweird.f32 %v10212_v3  ;;  %v1609_v50 = vld [vmem:[#allocation2 + $0x58] sm:$0xff] }
 0x244   : > { %v7122_v10 = vmul.f32 -1.442695, %v10215_v4  ;;  %v7123_v11 = vmul.f32 -1.442695, %v10218_v5  ;;  %v8511_v12 = vpop.eup %8510  ;;  %v1901_v14 = vmul.f32 %v10220_v6, %v10197_v51  ;;  %vm10251_vm13 = vmor %vm1890_vm10, %vm1891_vm11  ;;  %vm1906_vm14 = vweird.f32 %v10220_v6 }
 0x245   : > { %8514 = vpow2.f32 %v7126_v8  ;;  %v1887_v13 = vsub.f32 1.0, %v1886_v7  ;;  %v10230_v15 = vadd.f32 1.0, %v8511_v12  ;;  %v8513_v16 = vpop.eup %8512  ;;  %vm10283_vm0 = vmor %vm1905_vm12, %vm1906_vm14 }
 0x246   : > { %8516 = vpow2.f32 %v7127_v9  ;;  %v1902_v18 = vsub.f32 1.0, %v1901_v14  ;;  %v10240_v25 = vadd.f32 1.0, %v8513_v16  ;;  %v1641_v27 = vpop.permute.xlu1 %1640 }
 0x247   : > { %8518 = vpow2.f32 %v7122_v10  ;;  %v1888_v17 = vmul.f32 %v10212_v3, %v1887_v13  ;;  %v1926_v37 = vand.u32 2147483648, %v10230_v15  ;;  %v1669_v42 = vmul.f32 %v1641_v27, %v1613_v26  ;;  %v1631_v53 = vpop.permute.xlu0 %1630 }
 0x248   : > { %8520 = vpow2.f32 %v7123_v11  ;;  %v1903_v31 = vmul.f32 %v10220_v6, %v1902_v18  ;;  %v1670_v45 = vmul.f32 %v1641_v27, %v1614_v32  ;;  %v1924_v59 = vand.u32 2147483647, %v10230_v15 }
 0x249   : > { %8522 = vrcp.f32 %v10230_v15  ;;  %v1889_v29 = vadd.f32 %v10212_v3, %v1888_v17  ;;  %v10292_v60 = vor.u32 1.1754944e-38, %v1926_v37  ;;  %v1939_v61 = vand.u32 2147483647, %v10240_v25 }
 0x24a   : > { %v10274_v49 = vadd.f32 %v10220_v6, %v1903_v31  ;;  %v1941_v62 = vand.u32 2147483648, %v10240_v25  ;;  %v10297_v63 = vadd.f32 %v10180_v34, %v1669_v42  ;;  %v10306_v7 = vadd.f32 %v10182_v35, %v1670_v45 }
 0x24b   : > { %v8515_v19 = vpop.eup %8514  ;;  %v1893_v46 = vsel %vm10251_vm13, %v10212_v3, %v1889_v29  ;;  %v1665_v8 = vmul.f32 %v1631_v53, %v1609_v50  ;;  %v1666_v9 = vmul.f32 %v1631_v53, %v1610_v52  ;;  %vm1920_vm11 = vweird.f32 %v10230_v15 }
 0x24c   : > { %v8517_v20 = vpop.eup %8516  ;;  %v10235_v21 = vadd.f32 1.0, %v8515_v19  ;;  %v10303_v3 = vsel %vm10269_vm15, %v1897_v43, %v1893_v46  ;;  %v7128_v26 = vmul.f32 -1.442695, %v10297_v63  ;;  %v7129_v31 = vmul.f32 -1.442695, %v10306_v7 }
 0x24d   : > { %v8519_v22 = vpop.eup %8518  ;;  %v10238_v24 = vadd.f32 1.0, %v8517_v20  ;;  %v10347_v50 = vadd.f32 %v10180_v34, %v1665_v8  ;;  %vm1935_vm12 = vweird.f32 %v10240_v25 }
 0x24e   : > { %v8521_v28 = vpop.eup %8520  ;;  %8524 = vrcp.f32 %v10235_v21  ;;  %v10260_v40 = vadd.f32 1.0, %v8519_v22  ;;  %v1836_v58 = vand.u32 2147483648, %v10235_v21  ;;  %v1834_v12 = vand.u32 2147483647, %v10235_v21 }
 0x24f   : > { %8526 = vrcp.f32 %v10238_v24  ;;  %v10262_v41 = vadd.f32 1.0, %v8521_v28  ;;  %v10277_v55 = vpop.eup %8522  ;;  %v1849_v18 = vand.u32 2147483647, %v10238_v24  ;;  %v1851_v19 = vand.u32 2147483648, %v10238_v24 }
 0x250   : > { %8528 = vrcp.f32 %v10240_v25  ;;  %v1774_v13 = vand.u32 2147483647, %v10260_v40  ;;  %v1916_v14 = vmul.f32 %v10277_v55, %v10230_v15  ;;  %v10320_v17 = vor.u32 1.1754944e-38, %v1836_v58 }
 0x251   : > { %8530 = vrcp.f32 %v10260_v40  ;;  %v1776_v20 = vand.u32 2147483648, %v10260_v40  ;;  %vm1770_vm1 = vweird.f32 %v10260_v40  ;;  %vm1785_vm2 = vweird.f32 %v10262_v41 }
 0x252   : > { %8532 = vrcp.f32 %v10262_v41  ;;  %v1789_v30 = vand.u32 2147483647, %v10262_v41  ;;  %vm10335_vm3 = vcmp.eq.f32.partialorder %v1774_v13, 8.507059e+37  ;;  %v1791_v36 = vand.u32 2147483648, %v10262_v41 }
 0x253   : > { %v1917_v37 = vsub.f32 1.0, %v1916_v14  ;;  %vm1830_vm4 = vweird.f32 %v10235_v21  ;;  %v1777_v43 = vor.u32 1.1754944e-38, %v1776_v20  ;;  %vm1845_vm6 = vweird.f32 %v10238_v24  ;;  %v1621_v14 = vld [vmem:[#allocation2 + $0x78] sm:$0xff]  ;;  %v1622_v20 = vld [vmem:[#allocation2 + $0x28] sm:$0xff] }
 0x254   : > { %v10299_v0 = vpop.eup %8524  ;;  %8534 = vpow2.f32 %v7128_v26  ;;  %vm10350_vm10 = vcmp.eq.f32.partialorder %v1789_v30, 8.507059e+37  ;;  %v1792_v8 = vor.u32 1.1754944e-38, %v1791_v36  ;;  %vm10369_vm15 = vcmp.eq.f32.partialorder %v1834_v12, 8.507059e+37 }
 0x255   : > { %v10308_v10 = vpop.eup %8526  ;;  %v1826_v23 = vmul.f32 %v10299_v0, %v10235_v21  ;;  %vm1831_vm5 = vweird.f32 %v10299_v0  ;;  %8536 = vpow2.f32 %v7129_v31 }
 0x256   : > { %v10318_v16 = vpop.eup %8528  ;;  %v1841_v28 = vmul.f32 %v10308_v10, %v10238_v24  ;;  %vm1846_vm8 = vweird.f32 %v10308_v10 }
 0x257   : > { %v8531_v22 = vpop.eup %8530  ;;  %v1931_v45 = vmul.f32 %v10318_v16, %v10240_v25  ;;  %v1827_v46 = vsub.f32 1.0, %v1826_v23  ;;  %v1661_v23 = vpop.permute.xlu1 %1660  ;;  %v14512_v25 = vsel %vm10283_vm0, %v10220_v6, %v10274_v49 }
 0x258   : > { %v8533_v27 = vpop.eup %8532  ;;  %v1766_v29 = vmul.f32 %v8531_v22, %v10260_v40  ;;  %v1842_v52 = vsub.f32 1.0, %v1841_v28  ;;  %vm1771_vm7 = vweird.f32 %v8531_v22  ;;  %v1918_v28 = vmul.f32 %v10277_v55, %v1917_v37 }
 0x259   : > { %v1781_v33 = vmul.f32 %v8533_v27, %v10262_v41  ;;  %vm1786_vm9 = vweird.f32 %v8533_v27  ;;  %v1828_v31 = vmul.f32 %v10299_v0, %v1827_v46  ;;  %vm1772_vm13 = vmor %vm1770_vm1, %vm1771_vm7  ;;  %v1677_v37 = vmul.f32 %v1661_v23, %v1621_v14  ;;  %v1619_v46 = vld [vmem:[#allocation2 + $0x60] sm:$0xff] }
 0x25a   : > { %v1767_v42 = vsub.f32 1.0, %v1766_v29  ;;  %v1932_v29 = vsub.f32 1.0, %v1931_v45  ;;  %vm1787_vm14 = vmor %vm1785_vm2, %vm1786_vm9  ;;  %v1678_v45 = vmul.f32 %v1661_v23, %v1622_v20  ;;  %v8535_v11 = vpop.eup %8534  ;;  %vm10378_vm1 = vcmp.eq.f32.partialorder %v1909_v44, 8.507059e+37 }
 0x25b   : > { %v1782_v48 = vsub.f32 1.0, %v1781_v33  ;;  %v10362_v33 = vadd.f32 %v10182_v35, %v1666_v9  ;;  %v10385_v20 = vadd.f32 1.0, %v8535_v11  ;;  %v10388_v32 = vadd.f32 %v10180_v34, %v1677_v37 }
 0x25c   : > { %v1768_v53 = vmul.f32 %v8531_v22, %v1767_v42  ;;  %v7124_v42 = vmul.f32 -1.442695, %v10347_v50  ;;  %v1933_v14 = vmul.f32 %v10318_v16, %v1932_v29  ;;  %v1829_v44 = vadd.f32 %v10299_v0, %v1828_v31 }
 0x25d   : > { %v1783_v58 = vmul.f32 %v8533_v27, %v1782_v48  ;;  %v1843_v48 = vmul.f32 %v10308_v10, %v1842_v52  ;;  %v8537_v52 = vpop.eup %8536  ;;  %vm10404_vm2 = vcmp.eq.f32.partialorder %v1924_v59, 8.507059e+37  ;;  %vm10420_vm7 = vcmp.eq.f32.partialorder %v1849_v18, 8.507059e+37 }
 0x25e   : > { %v1769_v26 = vadd.f32 %v8531_v22, %v1768_v53  ;;  %v1656_v53 = vpop.permute.xlu0 %1655  ;;  %8538 = vpow2.f32 %v7124_v42  ;;  %vm1921_vm9 = vweird.f32 %v10277_v55  ;;  %v1852_v59 = vor.u32 1.1754944e-38, %v1851_v19 }
 0x25f   : > { %v1784_v30 = vadd.f32 %v8533_v27, %v1783_v58  ;;  %v1675_v51 = vmul.f32 %v1656_v53, %v1619_v46  ;;  %v7136_v18 = vmul.f32 -1.442695, %v10388_v32  ;;  %v1934_v42 = vadd.f32 %v10318_v16, %v1933_v14 }
 0x260   : > { %v1773_v36 = vsel %vm1772_vm13, %v8531_v22, %v1769_v26  ;;  %v7125_v22 = vmul.f32 -1.442695, %v10362_v33  ;;  %v1620_v26 = vld [vmem:[#allocation2 + $0x70] sm:$0xff]  ;;  %vm1860_vm0 = vweird.f32 %v10385_v20  ;;  %v1866_v11 = vand.u32 2147483648, %v10385_v20 }
 0x261   : > { %v1778_v9 = vsel %vm10335_vm3, %v1777_v43, %v1773_v36  ;;  %v1788_v58 = vsel %vm1787_vm14, %v8533_v27, %v1784_v30  ;;  %v10390_v27 = vadd.f32 1.0, %v8537_v52  ;;  %v10393_v43 = vadd.f32 %v10182_v35, %v1678_v45  ;;  %vm10413_vm3 = vmor %vm1830_vm4, %vm1831_vm5 }
 0x262   : > { %v1793_v12 = vsel %vm10350_vm10, %v1792_v8, %v1788_v58  ;;  %8540 = vpow2.f32 %v7125_v22  ;;  %v10397_v23 = vmul.f32 %v1778_v9, %v10215_v4  ;;  %v1844_v4 = vadd.f32 %v10308_v10, %v1843_v48  ;;  %vm10430_vm4 = vmor %vm1845_vm6, %vm1846_vm8 }
 0x263   : > { %v10400_v13 = vmul.f32 %v1793_v12, %v10218_v5  ;;  %8542 = vrcp.f32 %v10385_v20  ;;  %vm1936_vm5 = vweird.f32 %v10318_v16  ;;  %v7137_v29 = vmul.f32 -1.442695, %v10393_v43  ;;  %vm10449_vm6 = vmor %vm1920_vm11, %vm1921_vm9 }
 0x264   : > { %8544 = vrcp.f32 %v10390_v27  ;;  %v8539_v31 = vpop.eup %8538  ;;  %v1919_v30 = vadd.f32 %v10277_v55, %v1918_v28  ;;  %v1676_v48 = vmul.f32 %v1656_v53, %v1620_v26  ;;  %v10442_v36 = vadd.f32 %v10180_v34, %v1675_v51  ;;  %vm10464_vm8 = vmor %vm1935_vm12, %vm1936_vm5 }
 0x265   : > { %v1833_v24 = vsel %vm10413_vm3, %v10299_v0, %v1829_v44  ;;  %v10453_v37 = vadd.f32 1.0, %v8539_v31  ;;  %8546 = vpow2.f32 %v7136_v18  ;;  %v2023_v28 = vadd.f32 %v10400_v13, %v10397_v23 }
 0x266   : > { %v1848_v34 = vsel %vm10430_vm4, %v10308_v10, %v1844_v4  ;;  %8548 = vpow2.f32 %v7137_v29  ;;  %v7134_v0 = vmul.f32 -1.442695, %v10442_v36  ;;  %v2055_v46 = vmul.f32 %v10397_v23, %v10397_v23 }
 0x267   : > { %8550 = vrcp.f32 %v10453_v37  ;;  %v10477_v10 = vadd.f32 %v10182_v35, %v1676_v48  ;;  %2024 = vadd.xlane.f32.xlu2 %v2023_v28  ;;  %v2056_v58 = vmul.f32 %v10400_v13, %v10400_v13  ;;  %v1923_v52 = vsel %vm10449_vm6, %v10277_v55, %v1919_v30 }
 0x268   : > { %v8541_v45 = vpop.eup %8540  ;;  %vm10488_vm10 = vcmp.eq.f32.partialorder %v1939_v61, 8.507059e+37  ;;  %v1942_v35 = vor.u32 1.1754944e-38, %v1941_v62  ;;  %v1838_v51 = vsel %vm10369_vm15, %v10320_v17, %v1833_v24  ;;  %v1938_v55 = vsel %vm10464_vm8, %v10318_v16, %v1934_v42 }
 0x269   : > { %v10471_v53 = vpop.eup %8542  ;;  %v10473_v9 = vadd.f32 1.0, %v8541_v45  ;;  %v10513_v62 = vsel %vm10378_vm1, %v10287_v57, %v14512_v25  ;;  %v10517_v17 = vmul.f32 %v10303_v3, %v10185_v38  ;;  %v1853_v16 = vsel %vm10420_vm7, %v1852_v59, %v1848_v34 }
 0x26a   : > { %v10481_v22 = vpop.eup %8544  ;;  %v1856_v14 = vmul.f32 %v10471_v53, %v10385_v20  ;;  %v7135_v56 = vmul.f32 -1.442695, %v10477_v10  ;;  %v2071_v8 = vadd.f32 %v2056_v58, %v2055_v46  ;;  %v10523_v49 = vmul.f32 %v1838_v51, %v10207_v1 }
 0x26b   : > { %v1871_v61 = vmul.f32 %v10481_v22, %v10390_v27  ;;  %8552 = vrcp.f32 %v10473_v9  ;;  %v8547_v40 = vpop.eup %8546  ;;  %v10528_v57 = vsel %vm10404_vm2, %v10292_v60, %v1923_v52  ;;  %v10532_v38 = vsel %vm10488_vm10, %v1942_v35, %v1938_v55 }
 0x26c   : > { %8554 = vpow2.f32 %v7134_v0  ;;  %v1857_v44 = vsub.f32 1.0, %v1856_v14  ;;  %v8549_v6 = vpop.eup %8548  ;;  %v10534_v3 = vadd.f32 1.0, %v8547_v40  ;;  %v10537_v4 = vmul.f32 %v1853_v16, %v10210_v2  ;;  %2072 = vadd.xlane.f32.xlu1 %v2071_v8 }
 0x26d   : > { %v1872_v26 = vsub.f32 1.0, %v1871_v61  ;;  %v8551_v41 = vpop.eup %8550  ;;  %v1864_v1 = vand.u32 2147483647, %v10385_v20  ;;  %8556 = vpow2.f32 %v7135_v56  ;;  %vm1875_vm11 = vweird.f32 %v10390_v27 }
 0x26e   : > { %v1796_v60 = vmul.f32 %v8551_v41, %v10453_v37  ;;  %8558 = vrcp.f32 %v10534_v3  ;;  %v1858_v21 = vmul.f32 %v10471_v53, %v1857_v44  ;;  %v1879_v59 = vand.u32 2147483647, %v10390_v27 }
 0x26f   : > { %v1873_v2 = vmul.f32 %v10481_v22, %v1872_v26  ;;  %v10548_v18 = vadd.f32 1.0, %v8549_v6  ;;  %v1881_v31 = vand.u32 2147483648, %v10390_v27  ;;  %vm1800_vm12 = vweird.f32 %v10453_v37 }
 0x270   : > { %v1797_v30 = vsub.f32 1.0, %v1796_v60  ;;  %vm1861_vm13 = vweird.f32 %v10471_v53  ;;  %vm1876_vm14 = vweird.f32 %v10481_v22  ;;  %v1804_v48 = vand.u32 2147483647, %v10453_v37 }
 0x271   : > { %v8553_v5 = vpop.eup %8552  ;;  %v1806_v24 = vand.u32 2147483648, %v10453_v37  ;;  %vm1801_vm15 = vweird.f32 %v8551_v41  ;;  %v1819_v45 = vand.u32 2147483647, %v10473_v9  ;;  %v1859_v15 = vadd.f32 %v10471_v53, %v1858_v21  ;;  %vm10566_vm1 = vmor %vm1860_vm0, %vm1861_vm13 }
 0x272   : > { %v8555_v29 = vpop.eup %8554  ;;  %v1811_v42 = vmul.f32 %v8553_v5, %v10473_v9  ;;  %v1798_v19 = vmul.f32 %v8551_v41, %v1797_v30  ;;  %v1874_v0 = vadd.f32 %v10481_v22, %v1873_v2  ;;  %v1821_v46 = vand.u32 2147483648, %v10473_v9  ;;  %vm1802_vm3 = vmor %vm1800_vm12, %vm1801_vm15 }
 0x273   : > { %v8557_v34 = vpop.eup %8556  ;;  %8560 = vrcp.f32 %v10548_v18  ;;  %vm1816_vm2 = vweird.f32 %v8553_v5  ;;  %v10570_v14 = vadd.f32 1.0, %v8555_v29  ;;  %vm1805_vm7 = vcmp.eq.f32.partialorder %v1804_v48, 8.507059e+37  ;;  %vm10581_vm4 = vmor %vm1875_vm11, %vm1876_vm14 }
 0x274   : > { %v1812_v28 = vsub.f32 1.0, %v1811_v42  ;;  %v10562_v58 = vpop.eup %8558  ;;  %v1799_v12 = vadd.f32 %v8551_v41, %v1798_v19  ;;  %v1807_v51 = vor.u32 1.1754944e-38, %v1806_v24  ;;  %vm1815_vm9 = vweird.f32 %v10473_v9 }
 0x275   : > { %v10575_v55 = vadd.f32 1.0, %v8557_v34  ;;  %vm1820_vm5 = vcmp.eq.f32.partialorder %v1819_v45, 8.507059e+37  ;;  %8562 = vrcp.f32 %v10570_v14  ;;  %v1863_v37 = vsel %vm10566_vm1, %v10471_v53, %v1859_v15  ;;  %vm1817_vm6 = vmor %vm1815_vm9, %vm1816_vm2 }
 0x276   : > { %v1813_v35 = vmul.f32 %v8553_v5, %v1812_v28  ;;  %v1803_v61 = vsel %vm1802_vm3, %v8551_v41, %v1799_v12  ;;  %v1822_v16 = vor.u32 1.1754944e-38, %v1821_v46  ;;  %v1976_v40 = vmul.f32 %v10562_v58, %v10534_v3 }
 0x277   : > { %v1808_v9 = vsel %vm1805_vm7, %v1807_v51, %v1803_v61  ;;  %v1878_v27 = vsel %vm10581_vm4, %v10481_v22, %v1874_v0  ;;  %8564 = vrcp.f32 %v10575_v55  ;;  %vm1865_vm8 = vcmp.eq.f32.partialorder %v1864_v1, 8.507059e+37 }
 0x278   : > { %v1814_v25 = vadd.f32 %v8553_v5, %v1813_v35  ;;  %v10595_v26 = vmul.f32 %v1808_v9, %v10347_v50  ;;  %v1867_v53 = vor.u32 1.1754944e-38, %v1866_v11  ;;  %v1882_v8 = vor.u32 1.1754944e-38, %v1881_v31 }
 0x279   : > { %v10598_v56 = vpop.eup %8560  ;;  %vm1880_vm10 = vcmp.eq.f32.partialorder %v1879_v59, 8.507059e+37  ;;  %v2059_v22 = vmul.f32 %v10523_v49, %v10523_v49  ;;  %v1977_v21 = vsub.f32 1.0, %v1976_v40  ;;  %v2060_v2 = vmul.f32 %v10537_v4, %v10537_v4 }
 0x27a   : > { %v1818_v44 = vsel %vm1817_vm6, %v8553_v5, %v1814_v25  ;;  %v1991_v60 = vmul.f32 %v10598_v56, %v10548_v18  ;;  %v1868_v50 = vsel %vm1865_vm8, %v1867_v53, %v1863_v37  ;;  %v1883_v5 = vsel %vm1880_vm10, %v1882_v8, %v1878_v27  ;;  %v7198_v37 = vld [vmem:[#allocation10 + $0x78] sm:$0xf0] }
 0x27b   : > { %v1823_v6 = vsel %vm1820_vm5, %v1822_v16, %v1818_v44  ;;  %v8563_v1 = vpop.eup %8562  ;;  %v10617_v31 = vmul.f32 %v10528_v57, %v10193_v47  ;;  %v10621_v30 = vmul.f32 %v10532_v38, %v10201_v54  ;;  %vm1980_vm0 = vweird.f32 %v10534_v3 }
 0x27c   : > { %v10601_v41 = vmul.f32 %v1823_v6, %v10362_v33  ;;  %v1992_v11 = vsub.f32 1.0, %v1991_v60  ;;  %v2057_v33 = vmul.f32 %v10595_v26, %v10595_v26  ;;  %v1946_v42 = vmul.f32 %v8563_v1, %v10570_v14  ;;  %v8032_v6 = vld [vmem:[#allocation10 + $0x64] sm:$0xf0] }
 0x27d   : > { %v8565_v48 = vpop.eup %8564  ;;  %v10626_v24 = vmul.f32 %v1868_v50, %v10297_v63  ;;  %v1984_v19 = vand.u32 2147483647, %v10534_v3  ;;  %v1986_v28 = vand.u32 2147483648, %v10534_v3  ;;  %v2077_v45 = vadd.f32 %v2060_v2, %v2059_v22 }
 0x27e   : > { %v2026_v59 = vadd.f32 %v10601_v41, %v10595_v26  ;;  %v2058_v29 = vmul.f32 %v10601_v41, %v10601_v41  ;;  %v10631_v47 = vmul.f32 %v1883_v5, %v10306_v7  ;;  %vm1995_vm11 = vweird.f32 %v10548_v18 }
 0x27f   : > { %v1947_v54 = vsub.f32 1.0, %v1946_v42  ;;  %v1961_v57 = vmul.f32 %v8565_v48, %v10575_v55  ;;  %v1978_v38 = vmul.f32 %v10562_v58, %v1977_v21  ;;  %v1993_v34 = vmul.f32 %v10598_v56, %v1992_v11  ;;  %2078 = vadd.xlane.f32.xlu1 %v2077_v45 }
 0x280   : > { %2027 = vadd.xlane.f32.xlu0 %v2026_v59  ;;  %v2001_v63 = vand.u32 2147483648, %v10548_v18  ;;  %v2074_v15 = vadd.f32 %v2058_v29, %v2057_v33  ;;  %vm1951_vm12 = vweird.f32 %v8563_v1  ;;  %v1956_v46 = vand.u32 2147483648, %v10570_v14 }
 0x281   : > { %v1948_v0 = vmul.f32 %v8563_v1, %v1947_v54  ;;  %v1962_v52 = vsub.f32 1.0, %v1961_v57  ;;  %vm1981_vm13 = vweird.f32 %v10562_v58  ;;  %vm1950_vm14 = vweird.f32 %v10570_v14 }
 0x282   : > { %v1954_v7 = vand.u32 2147483647, %v10570_v14  ;;  %v1971_v12 = vand.u32 2147483648, %v10575_v55  ;;  %2075 = vadd.xlane.f32.xlu2 %v2074_v15  ;;  %vm1966_vm15 = vweird.f32 %v8565_v48  ;;  %v1969_v20 = vand.u32 2147483647, %v10575_v55  ;;  %vm10648_vm2 = vmor %vm1950_vm14, %vm1951_vm12 }
 0x283   : > { %v1949_v35 = vadd.f32 %v8563_v1, %v1948_v0  ;;  %v1963_v51 = vmul.f32 %v8565_v48, %v1962_v52  ;;  %v1979_v61 = vadd.f32 %v10562_v58, %v1978_v38  ;;  %v1994_v25 = vadd.f32 %v10598_v56, %v1993_v34  ;;  %vm10656_vm3 = vmor %vm1980_vm0, %vm1981_vm13 }
 0x284   : > { %vm1996_vm1 = vweird.f32 %v10598_v56  ;;  %v2032_v14 = vadd.f32 %v10631_v47, %v10626_v24  ;;  %v1957_v40 = vor.u32 1.1754944e-38, %v1956_v46  ;;  %vm1965_vm7 = vweird.f32 %v10575_v55 }
 0x285   : > { %v1953_v16 = vsel %vm10648_vm2, %v8563_v1, %v1949_v35  ;;  %v1964_v27 = vadd.f32 %v8565_v48, %v1963_v51  ;;  %v1999_v44 = vand.u32 2147483647, %v10548_v18  ;;  %vm1955_vm9 = vcmp.eq.f32.partialorder %v1954_v7, 8.507059e+37  ;;  %vm1967_vm4 = vmor %vm1965_vm7, %vm1966_vm15  ;;  %v7196_v7 = vld [vmem:[#allocation10 + $0x70] sm:$0xf] }
 0x286   : > { %v1972_v53 = vor.u32 1.1754944e-38, %v1971_v12  ;;  %v2038_v3 = vadd.f32 %v10621_v30, %v10617_v31  ;;  %v10668_v8 = vmul.f32 %v10513_v62, %v10188_v39  ;;  %vm10674_vm5 = vmor %vm1995_vm11, %vm1996_vm1  ;;  %v1958_v55 = vsel %vm1955_vm9, %v1957_v40, %v1953_v16  ;;  %v8034_v12 = vld [vmem:[#allocation10 + $0x74] sm:$0xf0]  ;;  %v7260_v35 = vld [vmem:[#allocation10 + $0xf0] sm:$0xf] }
 0x287   : > { %v1968_v60 = vsel %vm1967_vm4, %v8565_v48, %v1964_v27  ;;  %vm1970_vm6 = vcmp.eq.f32.partialorder %v1969_v20, 8.507059e+37  ;;  %v1983_v22 = vsel %vm10656_vm3, %v10562_v58, %v1979_v61  ;;  %v1998_v39 = vsel %vm10674_vm5, %v10598_v56, %v1994_v25  ;;  %v8050_v61 = vld [vmem:[#allocation10 + $0xf4] sm:$0xf0]  ;;  %v8033_v25 = vld [vmem:[#allocation10 + $0x74] sm:$0xf] }
 0x288   : > { %2033 = vadd.xlane.f32.xlu0 %v2032_v14  ;;  %v1973_v62 = vsel %vm1970_vm6, %v1972_v53, %v1968_v60  ;;  %2039 = vadd.xlane.f32.xlu1 %v2038_v3  ;;  %v2029_v18 = vadd.f32 %v10537_v4, %v10523_v49  ;;  %v1987_v50 = vor.u32 1.1754944e-38, %v1986_v28  ;;  %v2002_v5 = vor.u32 1.1754944e-38, %v2001_v63  ;;  %v8049_v40 = vld [vmem:[#allocation10 + $0xf4] sm:$0xf]  ;;  %v7262_v27 = vld [vmem:[#allocation10 + $0xf8] sm:$0xf0] }
 0x289   : > { %vm1985_vm8 = vcmp.eq.f32.partialorder %v1984_v19, 8.507059e+37  ;;  %vm2000_vm10 = vcmp.eq.f32.partialorder %v1999_v44, 8.507059e+37  ;;  %v10687_v21 = vmul.f32 %v1958_v55, %v10442_v36  ;;  %v10690_v2 = vmul.f32 %v1973_v62, %v10477_v10  ;;  %v7188_v3 = vld [vmem:[#allocation10 + $0x60] sm:$0xf]  ;;  %v7190_v62 = vld [vmem:[#allocation10 + $0x68] sm:$0xf0] }
 0x28a   : > { %2030 = vadd.xlane.f32.xlu2 %v2029_v18  ;;  %v1988_v58 = vsel %vm1985_vm8, %v1987_v50, %v1983_v22  ;;  %v2003_v1 = vsel %vm2000_vm10, %v2002_v5, %v1998_v39  ;;  %v2035_v56 = vadd.f32 %v10668_v8, %v10517_v17  ;;  %v2061_v11 = vmul.f32 %v10626_v24, %v10626_v24  ;;  %v7252_v55 = vld [vmem:[#allocation10 + $0xe0] sm:$0xf]  ;;  %v8048_v22 = vld [vmem:[#allocation10 + $0xe4] sm:$0xf0]  ;;  %v8031_v39 = vld [vmem:[#allocation10 + $0x64] sm:$0xf] }
 0x28b   : > { %v2062_v59 = vmul.f32 %v10631_v47, %v10631_v47  ;;  %v10699_v33 = vmul.f32 %v1988_v58, %v10388_v32  ;;  %v10702_v36 = vmul.f32 %v2003_v1, %v10393_v43  ;;  %v2041_v10 = vadd.f32 %v10690_v2, %v10687_v21  ;;  %v8047_v58 = vld [vmem:[#allocation10 + $0xe4] sm:$0xf]  ;;  %v7254_v1 = vld [vmem:[#allocation10 + $0xe8] sm:$0xf0] }
 0x28c   : > { %v2065_v42 = vmul.f32 %v10617_v31, %v10617_v31  ;;  %v2066_v48 = vmul.f32 %v10621_v30, %v10621_v30  ;;  %v2063_v28 = vmul.f32 %v10517_v17, %v10517_v17  ;;  %v2064_v45 = vmul.f32 %v10668_v8, %v10668_v8 }
 0x28d   : > { %v2080_v29 = vadd.f32 %v2062_v59, %v2061_v11  ;;  %v2069_v32 = vmul.f32 %v10699_v33, %v10699_v33  ;;  %v2070_v43 = vmul.f32 %v10702_v36, %v10702_v36  ;;  %v2067_v38 = vmul.f32 %v10687_v21, %v10687_v21  ;;  %v7180_v11 = vld [vmem:[#allocation10 + $0x50] sm:$0xf]  ;;  %v8030_v59 = vld [vmem:[#allocation10 + $0x54] sm:$0xf0] }
 0x28e   : > { %v2086_v19 = vadd.f32 %v2066_v48, %v2065_v42  ;;  %v2083_v57 = vadd.f32 %v2064_v45, %v2063_v28  ;;  %v2068_v34 = vmul.f32 %v10690_v2, %v10690_v2  ;;  %v2044_v15 = vadd.f32 %v10702_v36, %v10699_v33  ;;  %v8046_v42 = vld [vmem:[#allocation10 + $0xd4] sm:$0xf0]  ;;  %v8029_v48 = vld [vmem:[#allocation10 + $0x54] sm:$0xf]  ;;  %v7246_v45 = vld [vmem:[#allocation10 + $0xd8] sm:$0xf0] }
 0x28f   : > { %v2092_v54 = vadd.f32 %v2070_v43, %v2069_v32  ;;  %v7197_v20 = vor.u32 %v8034_v12, %v7196_v7  ;;  %v7261_v9 = vor.u32 %v8050_v61, %v7260_v35  ;;  %v7201_v16 = vor.u32 %v8033_v25, %v7198_v37  ;;  %v7182_v32 = vld [vmem:[#allocation10 + $0x58] sm:$0xf0]  ;;  %v8045_v28 = vld [vmem:[#allocation10 + $0xd4] sm:$0xf]  ;;  %v7164_v37 = vld [vmem:[#allocation10 + $0x30] sm:$0xf] }
 0x290   : > { %2036 = vadd.xlane.f32.xlu0 %v2035_v56  ;;  %2042 = vadd.xlane.f32.xlu1 %v2041_v10  ;;  %v2089_v63 = vadd.f32 %v2068_v34, %v2067_v38  ;;  %v7265_v44 = vor.u32 %v8049_v40, %v7262_v27  ;;  %v7189_v60 = vor.u32 %v8032_v6, %v7188_v3  ;;  %v7244_v10 = vld [vmem:[#allocation10 + $0xd0] sm:$0xf]  ;;  %v8028_v38 = vld [vmem:[#allocation10 + $0x44] sm:$0xf0]  ;;  %v7236_v34 = vld [vmem:[#allocation10 + $0xc0] sm:$0xf] }
 0x291   : > { %2487 = vmatpush.bf16.msra.mxu0 %v7197_v20  ;;  %2516 = vmatpush.bf16.msra.mxu1 %v7261_v9  ;;  %v7253_v50 = vor.u32 %v8048_v22, %v7252_v55  ;;  %v7193_v5 = vor.u32 %v8031_v39, %v7190_v62  ;;  %v7257_v56 = vor.u32 %v8047_v58, %v7254_v1  ;;  %v7238_v20 = vld [vmem:[#allocation10 + $0xc8] sm:$0xf0]  ;;  %v8042_v40 = vld [vmem:[#allocation10 + $0xb4] sm:$0xf0]  ;;  %v8025_v27 = vld [vmem:[#allocation10 + $0x34] sm:$0xf] }
 0x292   : > { %2081 = vadd.xlane.f32.xlu2 %v2080_v29  ;;  %2545 = vmatpush.bf16.msra.mxu2 %v7201_v16  ;;  %v7181_v29 = vor.u32 %v8030_v59, %v7180_v11  ;;  %v7245_v43 = vor.u32 %v8046_v42, %v7244_v10  ;;  %v7228_v16 = vld [vmem:[#allocation10 + $0xb0] sm:$0xf]  ;;  %v7166_v3 = vld [vmem:[#allocation10 + $0x38] sm:$0xf0]  ;;  %v8041_v6 = vld [vmem:[#allocation10 + $0xb4] sm:$0xf] }
 0x293   : > { %2574 = vmatpush.bf16.msra.mxu3 %v7265_v44  ;;  %v7230_v55 = vld [vmem:[#allocation10 + $0xb8] sm:$0xf0]  ;;  %v7169_v39 = vor.u32 %v8025_v27, %v7166_v3  ;;  %v7220_v58 = vld [vmem:[#allocation10 + $0xa0] sm:$0xf]  ;;  %v8040_v1 = vld [vmem:[#allocation10 + $0xa4] sm:$0xf0] }
 0x294   : > { %v7233_v62 = vor.u32 %v8041_v6, %v7230_v55  ;;  %v7158_v42 = vld [vmem:[#allocation10 + $0x28] sm:$0xf0]  ;;  %v7204_v27 = vld [vmem:[#allocation10 + $0x80] sm:$0xf] }
 0x295   : > { %2488 = vmatpush.bf16.msra.mxu0 %v7189_v60  ;;  %2517 = vmatpush.bf16.msra.mxu1 %v7253_v50  ;;  %v7156_v50 = vld [vmem:[#allocation10 + $0x20] sm:$0xf]  ;;  %v7142_v3 = vld [vmem:[#allocation10 + $0x8] sm:$0xf0] }
 0x296   : > { %2546 = vmatpush.bf16.msra.mxu2 %v7193_v5  ;;  %v8024_v5 = vld [vmem:[#allocation10 + $0x24] sm:$0xf0] }
 0x297   : > { %2575 = vmatpush.bf16.msra.mxu3 %v7257_v56  ;;  %v8023_v56 = vld [vmem:[#allocation10 + $0x24] sm:$0xf]  ;;  %v7157_v10 = vor.u32 %v8024_v5, %v7156_v50 }
 0x298   : > { %2087 = vadd.xlane.f32.xlu0 %v2086_v19  ;;  %2093 = vadd.xlane.f32.xlu1 %v2092_v54  ;;  %v7185_v19 = vor.u32 %v8029_v48, %v7182_v32  ;;  %v7249_v54 = vor.u32 %v8045_v28, %v7246_v45  ;;  %v8039_v48 = vld [vmem:[#allocation10 + $0xa4] sm:$0xf]  ;;  %v7222_v32 = vld [vmem:[#allocation10 + $0xa8] sm:$0xf0]  ;;  %v7161_v45 = vor.u32 %v8023_v56, %v7158_v42 }
 0x299   : > { %2489 = vmatpush.bf16.msra.mxu0 %v7181_v29  ;;  %2518 = vmatpush.bf16.msra.mxu1 %v7245_v43  ;;  %v7221_v29 = vor.u32 %v8040_v1, %v7220_v58 }
 0x29a   : > { %2084 = vadd.xlane.f32.xlu2 %v2083_v57  ;;  %2547 = vmatpush.bf16.msra.mxu2 %v7185_v19  ;;  %v7172_v57 = vld [vmem:[#allocation10 + $0x40] sm:$0xf] }
 0x29b   : > { %2576 = vmatpush.bf16.msra.mxu3 %v7249_v54  ;;  %v7225_v54 = vor.u32 %v8039_v48, %v7222_v32 }
 0x2a0   : > { %2090 = vadd.xlane.f32.xlu0 %v2089_v63  ;;  %v7173_v63 = vor.u32 %v8028_v38, %v7172_v57  ;;  %v7148_v57 = vld [vmem:[#allocation10 + $0x10] sm:$0xf]  ;;  %v8022_v38 = vld [vmem:[#allocation10 + $0x14] sm:$0xf0] }
 0x2a2   : > { %2045 = vadd.xlane.f32.xlu2 %v2044_v15  ;;  %v8044_v15 = vld [vmem:[#allocation10 + $0xc4] sm:$0xf0]  ;;  %2490 = vmatpush.bf16.msra.mxu0 %v7173_v63 }
 0x2a3   : > { %v7237_v12 = vor.u32 %v8044_v15, %v7236_v34  ;;  %v7212_v34 = vld [vmem:[#allocation10 + $0x90] sm:$0xf]  ;;  %v7149_v15 = vor.u32 %v8022_v38, %v7148_v57 }
 0x2a5   : > { %2519 = vmatpush.bf16.msra.mxu1 %v7237_v12  ;;  %v7150_v12 = vld [vmem:[#allocation10 + $0x18] sm:$0xf0] }
 0x2da   : > { %v2025_v0 = vpop.xlane.xlu2 %2024 }
 0x2db   : > { %v10724_v46 = vmul.f32 0.00390625, %v2025_v0  ;;  %v8027_v0 = vld [vmem:[#allocation10 + $0x44] sm:$0xf] }
 0x2dd   : > { %v2103_v52 = vmul.f32 %v10724_v46, %v10724_v46 }
 0x2df   : > { %v2073_v51 = vpop.xlane.xlu1 %2072 }
 0x2e0   : > { %v2095_v14 = vmul.f32 0.00390625, %v2073_v51  ;;  %v8043_v51 = vld [vmem:[#allocation10 + $0xc4] sm:$0xf] }
 0x2e1   : > { %v7241_v25 = vor.u32 %v8043_v51, %v7238_v20 }
 0x2e2   : > { %v2111_v53 = vsub.f32 %v2095_v14, %v2103_v52  ;;  %v7174_v52 = vld [vmem:[#allocation10 + $0x48] sm:$0xf0]  ;;  %v8026_v14 = vld [vmem:[#allocation10 + $0x34] sm:$0xf0] }
 0x2e3   : > { %v7177_v35 = vor.u32 %v8027_v0, %v7174_v52  ;;  %v7165_v9 = vor.u32 %v8026_v14, %v7164_v37  ;;  %2577 = vmatpush.bf16.msra.mxu3 %v7241_v25  ;;  %v8038_v0 = vld [vmem:[#allocation10 + $0x94] sm:$0xf0]  ;;  %v8021_v52 = vld [vmem:[#allocation10 + $0x14] sm:$0xf]  ;;  %v7214_v25 = vld [vmem:[#allocation10 + $0x98] sm:$0xf0] }
 0x2e4   : > { %v10728_v18 = vadd.f32 0.1, %v2111_v53  ;;  %v7229_v53 = vor.u32 %v8042_v40, %v7228_v16  ;;  %v7213_v51 = vor.u32 %v8038_v0, %v7212_v34  ;;  %v7153_v20 = vor.u32 %v8021_v52, %v7150_v12  ;;  %v7140_v16 = vld [vmem:[#allocation10] sm:$0xf]  ;;  %v8020_v40 = vld [vmem:[#allocation10 + $0x4] sm:$0xf0] }
 0x2e5   : > { %2548 = vmatpush.bf16.msra.mxu2 %v7177_v35  ;;  %2491 = vmatpush.bf16.msra.mxu0 %v7165_v9  ;;  %v7141_v55 = vor.u32 %v8020_v40, %v7140_v16  ;;  %v2022_v12 = vld [vmem:[#allocation19] sm:$0x3] }
 0x2e6   : > { %8566 = vrsqrt.f32 %v10728_v18  ;;  %2520 = vmatpush.bf16.msra.mxu1 %v7229_v53  ;;  %v8019_v53 = vld [vmem:[#allocation10 + $0x4] sm:$0xf]  ;;  %vm2133_vm11 = vweird.f32 %v10728_v18 }
 0x2e7   : > { %2578 = vmatpush.bf16.msra.mxu3 %v7233_v62  ;;  %v7206_v62 = vld [vmem:[#allocation10 + $0x88] sm:$0xf0]  ;;  %v7145_v5 = vor.u32 %v8019_v53, %v7142_v3 }
 0x2e9   : > { %2549 = vmatpush.bf16.msra.mxu2 %v7169_v39  ;;  %2492 = vmatpush.bf16.msra.mxu0 %v7157_v10  ;;  %v8035_v39 = vld [vmem:[#allocation10 + $0x84] sm:$0xf] }
 0x2ea   : > { %2521 = vmatpush.bf16.msra.mxu1 %v7221_v29  ;;  %v7209_v58 = vor.u32 %v8035_v39, %v7206_v62 }
 0x2eb   : > { %2579 = vmatpush.bf16.msra.mxu3 %v7225_v54 }
 0x2ec   : > { %v10731_v7 = vpop.eup %8566 }
 0x2ed   : > { %v2128_v61 = vmul.f32 %v10731_v7, %v10728_v18  ;;  %2550 = vmatpush.bf16.msra.mxu2 %v7161_v45  ;;  %2493 = vmatpush.bf16.msra.mxu0 %v7149_v15  ;;  %vm2134_vm0 = vweird.f32 %v10731_v7 }
 0x2ee   : > { %2522 = vmatpush.bf16.msra.mxu1 %v7213_v51  ;;  %vm2135_vm12 = vmor %vm2133_vm11, %vm2134_vm0  ;;  %v2229_v51 = vsub.f32 %v10400_v13, %v10724_v46  ;;  %v10783_v13 = vperm.slane %v2022_v12, 0 }
 0x2ef   : > { %v2129_v60 = vmul.f32 %v10731_v7, %v2128_v61  ;;  %v8037_v61 = vld [vmem:[#allocation10 + $0x94] sm:$0xf] }
 0x2f0   : > { %v7217_v9 = vor.u32 %v8037_v61, %v7214_v25 }
 0x2f1   : > { %v2130_v43 = vmul.f32 0.5, %v2129_v60  ;;  %2551 = vmatpush.bf16.msra.mxu2 %v7153_v20  ;;  %2494 = vmatpush.bf16.msra.mxu0 %v7141_v55 }
 0x2f2   : > { %v2079_v19 = vpop.xlane.xlu1 %2078  ;;  %2580 = vmatpush.bf16.msra.mxu3 %v7217_v9 }
 0x2f3   : > { %v2028_v44 = vpop.xlane.xlu0 %2027  ;;  %v2131_v37 = vsub.f32 1.5, %v2130_v43  ;;  %v2097_v56 = vmul.f32 0.00390625, %v2079_v19 }
 0x2f4   : > { %v10736_v22 = vmul.f32 0.00390625, %v2028_v44  ;;  %v8036_v44 = vld [vmem:[#allocation10 + $0x84] sm:$0xf0] }
 0x2f5   : > { %v2076_v11 = vpop.xlane.xlu2 %2075  ;;  %v7205_v60 = vor.u32 %v8036_v44, %v7204_v27  ;;  %v2132_v1 = vmul.f32 %v10731_v7, %v2131_v37  ;;  %2552 = vmatpush.bf16.msra.mxu2 %v7145_v5 }
 0x2f6   : > { %v2104_v59 = vmul.f32 %v10736_v22, %v10736_v22  ;;  %v2096_v28 = vmul.f32 0.00390625, %v2076_v11  ;;  %2581 = vmatpush.bf16.msra.mxu3 %v7209_v58  ;;  %v2230_v37 = vsub.f32 %v10595_v26, %v10736_v22  ;;  %v10786_v26 = vperm.slane %v2022_v12, 1 }
 0x2f7   : > { %2523 = vmatpush.bf16.msra.mxu1 %v7205_v60 }
 0x2f8   : > { %v2112_v63 = vsub.f32 %v2096_v28, %v2104_v59  ;;  %v2021_v59 = vld [vmem:[%s14523_s0] sm:$0x3]  ;;  %v2136_v28 = vsel %vm2135_vm12, %v10731_v7, %v2132_v1  ;;  %v2228_v7 = vsub.f32 %v10397_v23, %v10724_v46 }
 0x2f9   : > { %v10756_v19 = vperm.slane %v2021_v59, 0  ;;  %v10759_v45 = vperm.slane %v2021_v59, 1 }
 0x2fa   : > { %v10740_v14 = vadd.f32 0.1, %v2112_v63 }
 0x2fb   : > { %v2034_v35 = vpop.xlane.xlu0 %2033  ;;  %v2040_v11 = vpop.xlane.xlu1 %2039  ;;  %v2212_v0 = vmul.f32 %v10756_v19, %v2136_v28 }
 0x2fc   : > { %8568 = vrsqrt.f32 %v10740_v14  ;;  %v10753_v48 = vmul.f32 0.00390625, %v2034_v35  ;;  %v10763_v34 = vmul.f32 0.00390625, %v2040_v11  ;;  %v2213_v35 = vmul.f32 %v10759_v45, %v2136_v28 }
 0x2fd   : > { %v2031_v6 = vpop.xlane.xlu2 %2030  ;;  %vm2143_vm14 = vweird.f32 %v10740_v14  ;;  %v2244_v44 = vmul.f32 %v2228_v7, %v2212_v0 }
 0x2fe   : > { %v10743_v50 = vmul.f32 0.00390625, %v2031_v6  ;;  %v2106_v63 = vmul.f32 %v10753_v48, %v10753_v48  ;;  %v2108_v23 = vmul.f32 %v10763_v34, %v10763_v34  ;;  %v2245_v3 = vmul.f32 %v2229_v51, %v2213_v35 }
 0x300   : > { %v2105_v10 = vmul.f32 %v10743_v50, %v10743_v50  ;;  %v10804_v28 = vadd.f32 %v10786_v26, %v2245_v3 }
 0x302   : > { %v8569_v42 = vpop.eup %8568  ;;  %v2113_v32 = vsub.f32 %v2097_v56, %v2105_v10  ;;  %v2231_v56 = vsub.f32 %v10601_v41, %v10736_v22 }
 0x303   : > { %v2037_v29 = vpop.xlane.xlu0 %2036  ;;  %v2138_v43 = vmul.f32 %v8569_v42, %v10740_v14  ;;  %vm2144_vm13 = vweird.f32 %v8569_v42  ;;  %v2043_v16 = vpop.xlane.xlu1 %2042 }
 0x304   : > { %v10761_v54 = vadd.f32 0.1, %v2113_v32  ;;  %v10774_v61 = vmul.f32 0.00390625, %v2037_v29  ;;  %vm2145_vm15 = vmor %vm2143_vm14, %vm2144_vm13  ;;  %v10789_v60 = vmul.f32 0.00390625, %v2043_v16  ;;  %v10801_v32 = vadd.f32 %v10783_v13, %v2244_v44 }
 0x305   : > { %v2139_v57 = vmul.f32 %v8569_v42, %v2138_v43  ;;  %v2082_v38 = vpop.xlane.xlu2 %2081 }
 0x306   : > { %8570 = vrsqrt.f32 %v10761_v54  ;;  %v2098_v18 = vmul.f32 0.00390625, %v2082_v38  ;;  %v2107_v14 = vmul.f32 %v10774_v61, %v10774_v61  ;;  %v2109_v41 = vmul.f32 %v10789_v60, %v10789_v60 }
 0x307   : > { %v2140_v15 = vmul.f32 0.5, %v2139_v57  ;;  %vm2153_vm2 = vweird.f32 %v10761_v54 }
 0x308   : > { %v2114_v52 = vsub.f32 %v2098_v18, %v2106_v63 }
 0x309   : > { %v2141_v20 = vsub.f32 1.5, %v2140_v15 }
 0x30a   : > { %v10778_v9 = vadd.f32 0.1, %v2114_v52 }
 0x30b   : > { %v2088_v25 = vpop.xlane.xlu0 %2087  ;;  %v2142_v27 = vmul.f32 %v8569_v42, %v2141_v20 }
 0x30c   : > { %v2100_v40 = vmul.f32 0.00390625, %v2088_v25  ;;  %v8571_v46 = vpop.eup %8570  ;;  %8572 = vrsqrt.f32 %v10778_v9  ;;  %vm2163_vm9 = vweird.f32 %v10778_v9 }
 0x30d   : > { %v2146_v6 = vsel %vm2145_vm15, %v8569_v42, %v2142_v27  ;;  %v2148_v55 = vmul.f32 %v8571_v46, %v10761_v54  ;;  %v2085_v39 = vpop.xlane.xlu2 %2084  ;;  %vm2154_vm1 = vweird.f32 %v8571_v46  ;;  %v2094_v54 = vpop.xlane.xlu1 %2093 }
 0x30e   : > { %v2116_v53 = vsub.f32 %v2100_v40, %v2108_v23  ;;  %v2099_v5 = vmul.f32 0.00390625, %v2085_v39  ;;  %v2214_v58 = vmul.f32 %v10756_v19, %v2146_v6  ;;  %v2215_v1 = vmul.f32 %v10759_v45, %v2146_v6  ;;  %vm2155_vm3 = vmor %vm2153_vm2, %vm2154_vm1 }
 0x30f   : > { %v2149_v11 = vmul.f32 %v8571_v46, %v2148_v55 }
 0x310   : > { %v10793_v62 = vadd.f32 0.1, %v2116_v53  ;;  %v2115_v59 = vsub.f32 %v2099_v5, %v2107_v14  ;;  %v2246_v10 = vmul.f32 %v2230_v37, %v2214_v58  ;;  %v2247_v43 = vmul.f32 %v2231_v56, %v2215_v1 }
 0x311   : > { %v2150_v29 = vmul.f32 0.5, %v2149_v11  ;;  %v2102_v14 = vmul.f32 0.00390625, %v2094_v54  ;;  %v2234_v56 = vsub.f32 %v10626_v24, %v10753_v48  ;;  %v2233_v11 = vsub.f32 %v10537_v4, %v10743_v50 }
 0x312   : > { %8574 = vrsqrt.f32 %v10793_v62  ;;  %v8573_v57 = vpop.eup %8572  ;;  %v10806_v38 = vadd.f32 0.1, %v2115_v59  ;;  %v10811_v18 = vadd.f32 %v10783_v13, %v2246_v10  ;;  %v10815_v0 = vadd.f32 %v10786_v26, %v2247_v43 }
 0x313   : > { %v2091_v42 = vpop.xlane.xlu0 %2090  ;;  %v2151_v63 = vsub.f32 1.5, %v2150_v29  ;;  %v2158_v15 = vmul.f32 %v8573_v57, %v10778_v9  ;;  %vm2164_vm7 = vweird.f32 %v8573_v57  ;;  %vm2183_vm0 = vweird.f32 %v10793_v62 }
 0x314   : > { %v2101_v22 = vmul.f32 0.00390625, %v2091_v42  ;;  %8576 = vrsqrt.f32 %v10806_v38  ;;  %v2281_v52 = vpack.c.bf16 %v10811_v18, %v10801_v32  ;;  %v2282_v20 = vpack.c.bf16 %v10815_v0, %v10804_v28  ;;  %vm2165_vm4 = vmor %vm2163_vm9, %vm2164_vm7 }
 0x315   : > { %v2152_v12 = vmul.f32 %v8571_v46, %v2151_v63  ;;  %v2159_v35 = vmul.f32 %v8573_v57, %v2158_v15  ;;  %v2046_v51 = vpop.xlane.xlu2 %2045  ;;  %vm2173_vm5 = vweird.f32 %v10806_v38 }
 0x316   : > { %v2117_v7 = vsub.f32 %v2101_v22, %v2109_v41  ;;  %v10827_v16 = vmul.f32 0.00390625, %v2046_v51  ;;  %2495 = vmatmul.bf16.vlgmr.msra.gmra.mxu0 %v2281_v52  ;;  %2553 = vmatmul.bf16.vlgmr.msra.gmra.mxu2 %v2281_v52 }
 0x317   : > { %v2156_v23 = vsel %vm2155_vm3, %v8571_v46, %v2152_v12  ;;  %v2160_v40 = vmul.f32 0.5, %v2159_v35  ;;  %2524 = vmatmul.bf16.vlgmr.msra.gmra.mxu1 %v2282_v20  ;;  %2582 = vmatmul.bf16.vlgmr.msra.gmra.mxu3 %v2282_v20  ;;  %v2232_v46 = vsub.f32 %v10523_v49, %v10743_v50  ;;  %v2235_v49 = vsub.f32 %v10631_v47, %v10753_v48 }
 0x318   : > { %v10823_v25 = vpop.eup %8574  ;;  %v10825_v37 = vadd.f32 0.1, %v2117_v7  ;;  %v2216_v44 = vmul.f32 %v10756_v19, %v2156_v23  ;;  %v2110_v6 = vmul.f32 %v10827_v16, %v10827_v16  ;;  %v2217_v39 = vmul.f32 %v10759_v45, %v2156_v23 }
 0x319   : > { %v2178_v27 = vmul.f32 %v10823_v25, %v10793_v62  ;;  %v2161_v53 = vsub.f32 1.5, %v2160_v40  ;;  %vm2184_vm8 = vweird.f32 %v10823_v25  ;;  %v2236_v62 = vsub.f32 %v10517_v17, %v10774_v61 }
 0x31a   : > { %v8577_v55 = vpop.eup %8576  ;;  %8578 = vrsqrt.f32 %v10825_v37  ;;  %v2118_v59 = vsub.f32 %v2102_v14, %v2110_v6  ;;  %v2248_v10 = vmul.f32 %v2232_v46, %v2216_v44  ;;  %v2249_v43 = vmul.f32 %v2233_v11, %v2217_v39  ;;  %vm2185_vm11 = vmor %vm2183_vm0, %vm2184_vm8 }
 0x31b   : > { %v2179_v3 = vmul.f32 %v10823_v25, %v2178_v27  ;;  %v2162_v5 = vmul.f32 %v8573_v57, %v2161_v53  ;;  %v2168_v1 = vmul.f32 %v8577_v55, %v10806_v38  ;;  %vm2174_vm6 = vweird.f32 %v8577_v55 }
 0x31c   : > { %v2126_v9 = vadd.f32 0.1, %v2118_v59  ;;  %v10854_v47 = vadd.f32 %v10783_v13, %v2248_v10  ;;  %vm2175_vm10 = vmor %vm2173_vm5, %vm2174_vm6  ;;  %v2237_v39 = vsub.f32 %v10668_v8, %v10774_v61  ;;  %vm2193_vm1 = vweird.f32 %v10825_v37 }
 0x31d   : > { %v2180_v58 = vmul.f32 0.5, %v2179_v3  ;;  %v2166_v29 = vsel %vm2165_vm4, %v8573_v57, %v2162_v5  ;;  %v2169_v42 = vmul.f32 %v8577_v55, %v2168_v1  ;;  %v10860_v57 = vadd.f32 %v10786_v26, %v2249_v43 }
 0x31e   : > { %v2218_v41 = vmul.f32 %v10756_v19, %v2166_v29  ;;  %v2219_v22 = vmul.f32 %v10759_v45, %v2166_v29  ;;  %8580 = vrsqrt.f32 %v2126_v9  ;;  %v2238_v5 = vsub.f32 %v10617_v31, %v10763_v34 }
 0x31f   : > { %v2181_v63 = vsub.f32 1.5, %v2180_v58  ;;  %v2170_v24 = vmul.f32 0.5, %v2169_v42  ;;  %v2239_v1 = vsub.f32 %v10621_v30, %v10763_v34  ;;  %vm2203_vm14 = vweird.f32 %v2126_v9 }
 0x320   : > { %v10850_v15 = vpop.eup %8578  ;;  %v2250_v4 = vmul.f32 %v2234_v56, %v2218_v41  ;;  %v2251_v50 = vmul.f32 %v2235_v49, %v2219_v22 }
 0x321   : > { %v2171_v7 = vsub.f32 1.5, %v2170_v24  ;;  %v2182_v12 = vmul.f32 %v10823_v25, %v2181_v63  ;;  %v2188_v38 = vmul.f32 %v10850_v15, %v10825_v37  ;;  %vm2194_vm13 = vweird.f32 %v10850_v15 }
 0x322   : > { %v10857_v48 = vadd.f32 %v10783_v13, %v2250_v4  ;;  %v10863_v52 = vadd.f32 %v10786_v26, %v2251_v50  ;;  %vm2195_vm2 = vmor %vm2193_vm1, %vm2194_vm13  ;;  %v2242_v63 = vsub.f32 %v10699_v33, %v10827_v16  ;;  %v2243_v24 = vsub.f32 %v10702_v36, %v10827_v16 }
 0x323   : > { %v2172_v35 = vmul.f32 %v8577_v55, %v2171_v7  ;;  %v2186_v27 = vsel %vm2185_vm11, %v10823_v25, %v2182_v12  ;;  %v2189_v54 = vmul.f32 %v10850_v15, %v2188_v38  ;;  %v2240_v50 = vsub.f32 %v10687_v21, %v10789_v60 }
 0x324   : > { %v2283_v51 = vpack.c.bf16 %v10857_v48, %v10854_v47  ;;  %v2284_v20 = vpack.c.bf16 %v10863_v52, %v10860_v57  ;;  %v8581_v40 = vpop.eup %8580  ;;  %v2223_v14 = vmul.f32 %v10759_v45, %v2186_v27  ;;  %v2241_v7 = vsub.f32 %v10690_v2, %v10789_v60 }
 0x325   : > { %v2176_v23 = vsel %vm2175_vm10, %v8577_v55, %v2172_v35  ;;  %v2198_v44 = vmul.f32 %v8581_v40, %v2126_v9  ;;  %v2222_v55 = vmul.f32 %v10756_v19, %v2186_v27  ;;  %v2190_v46 = vmul.f32 0.5, %v2189_v54 }
 0x326   : > { %2500 = vmatmul.bf16.gmra.mxu0 %v2283_v51  ;;  %2558 = vmatmul.bf16.gmra.mxu2 %v2283_v51  ;;  %v2220_v53 = vmul.f32 %v10756_v19, %v2176_v23  ;;  %v2221_v6 = vmul.f32 %v10759_v45, %v2176_v23  ;;  %v2255_v49 = vmul.f32 %v2239_v1, %v2223_v14  ;;  %vm2204_vm12 = vweird.f32 %v8581_v40 }
 0x327   : > { %2529 = vmatmul.bf16.gmra.mxu1 %v2284_v20  ;;  %2587 = vmatmul.bf16.gmra.mxu3 %v2284_v20  ;;  %v2199_v3 = vmul.f32 %v8581_v40, %v2198_v44  ;;  %v2254_v59 = vmul.f32 %v2238_v5, %v2222_v55  ;;  %v2191_v17 = vsub.f32 1.5, %v2190_v46  ;;  %vm2205_vm15 = vmor %vm2203_vm14, %vm2204_vm12 }
 0x328   : > { %v2252_v58 = vmul.f32 %v2236_v62, %v2220_v53  ;;  %v2253_v11 = vmul.f32 %v2237_v39, %v2221_v6  ;;  %v10900_v30 = vadd.f32 %v10786_v26, %v2255_v49 }
 0x329   : > { %v2200_v25 = vmul.f32 0.5, %v2199_v3  ;;  %v10895_v29 = vadd.f32 %v10783_v13, %v2254_v59  ;;  %v2192_v31 = vmul.f32 %v10850_v15, %v2191_v17 }
 0x32a   : > { %v10889_v10 = vadd.f32 %v10783_v13, %v2252_v58  ;;  %v10892_v61 = vadd.f32 %v10786_v26, %v2253_v11 }
 0x32b   : > { %v2201_v56 = vsub.f32 1.5, %v2200_v25  ;;  %v2196_v41 = vsel %vm2195_vm2, %v10850_v15, %v2192_v31 }
 0x32c   : > { %v2285_v34 = vpack.c.bf16 %v10895_v29, %v10889_v10  ;;  %v2286_v43 = vpack.c.bf16 %v10900_v30, %v10892_v61  ;;  %v2224_v37 = vmul.f32 %v10756_v19, %v2196_v41  ;;  %v2225_v4 = vmul.f32 %v10759_v45, %v2196_v41 }
 0x32d   : > { %v2202_v8 = vmul.f32 %v8581_v40, %v2201_v56 }
 0x32e   : > { %v2256_v35 = vmul.f32 %v2240_v50, %v2224_v37  ;;  %v2257_v38 = vmul.f32 %v2241_v7, %v2225_v4 }
 0x32f   : > { %v2206_v42 = vsel %vm2205_vm15, %v8581_v40, %v2202_v8 }
 0x330   : > { %v2226_v9 = vmul.f32 %v10756_v19, %v2206_v42  ;;  %v2227_v22 = vmul.f32 %v10759_v45, %v2206_v42  ;;  %v10927_v36 = vadd.f32 %v10783_v13, %v2256_v35  ;;  %v10930_v19 = vadd.f32 %v10786_v26, %v2257_v38  ;;  %v2321_v45 = vld [vmem:[%s14524_s4] sm:$0x3] }
 0x331   : > { %v10939_v60 = vperm.slane %v2321_v45, 0  ;;  %v10942_v23 = vperm.slane %v2321_v45, 1 }
 0x332   : > { %v2258_v15 = vmul.f32 %v2242_v63, %v2226_v9  ;;  %v2259_v12 = vmul.f32 %v2243_v24, %v2227_v22 }
 0x334   : > { %v10921_v51 = vadd.f32 %v10783_v13, %v2258_v15  ;;  %v10924_v33 = vadd.f32 %v10786_v26, %v2259_v12 }
 0x336   : > { %2505 = vmatmul.bf16.gmra.mxu0 %v2285_v34  ;;  %2563 = vmatmul.bf16.gmra.mxu2 %v2285_v34  ;;  %v2287_v21 = vpack.c.bf16 %v10921_v51, %v10927_v36  ;;  %v2288_v2 = vpack.c.bf16 %v10924_v33, %v10930_v19 }
 0x337   : > { %2534 = vmatmul.bf16.gmra.mxu1 %v2286_v43  ;;  %2592 = vmatmul.bf16.gmra.mxu3 %v2286_v43 }
 0x346   : > { %2510 = vmatmul.bf16.gmra.mxu0 %v2287_v21  ;;  %2568 = vmatmul.bf16.gmra.mxu2 %v2287_v21 }
 0x347   : > { %2539 = vmatmul.bf16.gmra.mxu1 %v2288_v2  ;;  %2597 = vmatmul.bf16.gmra.mxu3 %v2288_v2 }
 0x393   : > { %v2496_v13 = vpop.f32.mrf.mxu0 }
 0x394   : > { %v2497_v26 = vadd.f32 %v2496_v13, %v10939_v60  ;;  %v2525_v16 = vpop.f32.mrf.mxu1 }
 0x396   : > { %v2526_v20 = vadd.f32 %v2525_v16, %v2497_v26 }
 0x398   : > { %v10945_v40 = vadd.f32 %v2526_v20, %v10801_v32 }
 0x399   : > { %v2554_v27 = vpop.f32.mrf.mxu2 }
 0x39a   : > { %v7266_v54 = vmul.f32 -1.442695, %v10945_v40  ;;  %v2555_v44 = vadd.f32 %v2554_v27, %v10942_v23  ;;  %v2583_v53 = vpop.f32.mrf.mxu3 }
 0x39b   : > { %v2498_v3 = vpop.f32.mrf.mxu0 }
 0x39c   : > { %8582 = vpow2.f32 %v7266_v54  ;;  %v2584_v6 = vadd.f32 %v2583_v53, %v2555_v44  ;;  %v2499_v62 = vadd.f32 %v2498_v3, %v10939_v60  ;;  %v2527_v55 = vpop.f32.mrf.mxu1 }
 0x39e   : > { %v10951_v39 = vadd.f32 %v2584_v6, %v10804_v28  ;;  %v2528_v46 = vadd.f32 %v2527_v55, %v2499_v62 }
 0x3a0   : > { %v7267_v25 = vmul.f32 -1.442695, %v10951_v39  ;;  %v10955_v14 = vadd.f32 %v2528_v46, %v10811_v18 }
 0x3a1   : > { %v2556_v5 = vpop.f32.mrf.mxu2 }
 0x3a2   : > { %v8583_v58 = vpop.eup %8582  ;;  %8584 = vpow2.f32 %v7267_v25  ;;  %v7268_v1 = vmul.f32 -1.442695, %v10955_v14  ;;  %v2557_v56 = vadd.f32 %v2556_v5, %v10942_v23  ;;  %v2585_v11 = vpop.f32.mrf.mxu3 }
 0x3a3   : > { %v10959_v59 = vadd.f32 1.0, %v8583_v58  ;;  %v2501_v17 = vpop.f32.mrf.mxu0 }
 0x3a4   : > { %8586 = vpow2.f32 %v7268_v1  ;;  %v2586_v49 = vadd.f32 %v2585_v11, %v2557_v56  ;;  %v2502_v8 = vadd.f32 %v2501_v17, %v10939_v60  ;;  %v2530_v31 = vpop.f32.mrf.mxu1 }
 0x3a5   : > { %8588 = vrcp.f32 %v10959_v59  ;;  %v2692_v54 = vand.u32 2147483647, %v10959_v59  ;;  %v2694_v62 = vand.u32 2147483648, %v10959_v59  ;;  %vm2688_vm7 = vweird.f32 %v10959_v59 }
 0x3a6   : > { %v10964_v34 = vadd.f32 %v2586_v49, %v10815_v0  ;;  %v2531_v42 = vadd.f32 %v2530_v31, %v2502_v8 }
 0x3a7   : > { %vm11010_vm9 = vcmp.eq.f32.partialorder %v2692_v54, 8.507059e+37 }
 0x3a8   : > { %v8585_v43 = vpop.eup %8584  ;;  %v7269_v41 = vmul.f32 -1.442695, %v10964_v34  ;;  %v10968_v9 = vadd.f32 %v2531_v42, %v10854_v47 }
 0x3a9   : > { %v10970_v22 = vadd.f32 1.0, %v8585_v43  ;;  %v2559_v63 = vpop.f32.mrf.mxu2 }
 0x3aa   : > { %v8587_v37 = vpop.eup %8586  ;;  %8590 = vpow2.f32 %v7269_v41  ;;  %v7270_v24 = vmul.f32 -1.442695, %v10968_v9  ;;  %v2560_v4 = vadd.f32 %v2559_v63, %v10942_v23  ;;  %v2588_v15 = vpop.f32.mrf.mxu3  ;;  %v2695_v41 = vor.u32 1.1754944e-38, %v2694_v62 }
 0x3ab   : > { %v10974_v50 = vpop.eup %8588  ;;  %8592 = vrcp.f32 %v10970_v22  ;;  %v2503_v7 = vpop.f32.mrf.mxu0  ;;  %v10979_v35 = vadd.f32 1.0, %v8587_v37  ;;  %v2707_v46 = vand.u32 2147483647, %v10970_v22  ;;  %v2709_v25 = vand.u32 2147483648, %v10970_v22 }
 0x3ac   : > { %v2684_v12 = vmul.f32 %v10974_v50, %v10959_v59  ;;  %8594 = vpow2.f32 %v7270_v24  ;;  %v2589_v38 = vadd.f32 %v2588_v15, %v2560_v4  ;;  %v2504_v21 = vadd.f32 %v2503_v7, %v10939_v60  ;;  %v2532_v45 = vpop.f32.mrf.mxu1 }
 0x3ad   : > { %8596 = vrcp.f32 %v10979_v35  ;;  %vm2689_vm3 = vweird.f32 %v10974_v50  ;;  %v2724_v31 = vand.u32 2147483648, %v10979_v35  ;;  %vm2703_vm4 = vweird.f32 %v10970_v22 }
 0x3ae   : > { %v2685_v2 = vsub.f32 1.0, %v2684_v12  ;;  %v10984_v13 = vadd.f32 %v2589_v38, %v10860_v57  ;;  %v2533_v26 = vadd.f32 %v2532_v45, %v2504_v21  ;;  %vm11022_vm5 = vmor %vm2688_vm7, %vm2689_vm3  ;;  %vm11026_vm6 = vcmp.eq.f32.partialorder %v2707_v46, 8.507059e+37 }
 0x3af   : > { %v2710_v24 = vor.u32 1.1754944e-38, %v2709_v25  ;;  %vm2718_vm8 = vweird.f32 %v10979_v35  ;;  %v2722_v15 = vand.u32 2147483647, %v10979_v35 }
 0x3b0   : > { %v8591_v16 = vpop.eup %8590  ;;  %v2686_v20 = vmul.f32 %v10974_v50, %v2685_v2  ;;  %v7271_v53 = vmul.f32 -1.442695, %v10984_v13  ;;  %v11002_v58 = vadd.f32 %v2533_v26, %v10857_v48 }
 0x3b1   : > { %v10987_v27 = vpop.eup %8592  ;;  %v10990_v44 = vadd.f32 1.0, %v8591_v16  ;;  %v2561_v3 = vpop.f32.mrf.mxu2  ;;  %v2725_v16 = vor.u32 1.1754944e-38, %v2724_v31  ;;  %vm11045_vm11 = vcmp.eq.f32.partialorder %v2722_v15, 8.507059e+37 }
 0x3b2   : > { %v8595_v6 = vpop.eup %8594  ;;  %v2699_v55 = vmul.f32 %v10987_v27, %v10970_v22  ;;  %v2687_v5 = vadd.f32 %v10974_v50, %v2686_v20  ;;  %v2562_v17 = vadd.f32 %v2561_v3, %v10942_v23  ;;  %v2590_v42 = vpop.f32.mrf.mxu3  ;;  %v7272_v12 = vmul.f32 -1.442695, %v11002_v58 }
 0x3b3   : > { %8598 = vrcp.f32 %v10990_v44  ;;  %v11004_v1 = vpop.eup %8596  ;;  %v11006_v11 = vadd.f32 1.0, %v8595_v6  ;;  %v2506_v43 = vpop.f32.mrf.mxu0  ;;  %vm2704_vm10 = vweird.f32 %v10987_v27  ;;  %vm2733_vm0 = vweird.f32 %v10990_v44 }
 0x3b4   : > { %v2700_v56 = vsub.f32 1.0, %v2699_v55  ;;  %8600 = vpow2.f32 %v7271_v53  ;;  %v2714_v8 = vmul.f32 %v11004_v1, %v10979_v35  ;;  %v2691_v7 = vsel %vm11022_vm5, %v10974_v50, %v2687_v5  ;;  %v2535_v25 = vpop.f32.mrf.mxu1  ;;  %vm11061_vm12 = vmor %vm2703_vm4, %vm2704_vm10 }
 0x3b5   : > { %8602 = vrcp.f32 %v11006_v11  ;;  %v2591_v38 = vadd.f32 %v2590_v42, %v2562_v17  ;;  %v2507_v21 = vadd.f32 %v2506_v43, %v10939_v60  ;;  %v2737_v50 = vand.u32 2147483647, %v10990_v44 }
 0x3b6   : > { %v2701_v63 = vmul.f32 %v10987_v27, %v2700_v56  ;;  %v2715_v4 = vsub.f32 1.0, %v2714_v8  ;;  %8604 = vpow2.f32 %v7272_v12  ;;  %v2696_v3 = vsel %vm11010_vm9, %v2695_v41, %v2691_v7 }
 0x3b7   : > { %v2739_v62 = vand.u32 2147483648, %v10990_v44  ;;  %v11053_v46 = vadd.f32 %v2591_v38, %v10863_v52  ;;  %vm2719_vm13 = vweird.f32 %v11004_v1  ;;  %v2536_v49 = vadd.f32 %v2535_v25, %v2507_v21 }
 0x3b8   : > { %v2702_v45 = vadd.f32 %v10987_v27, %v2701_v63  ;;  %v2716_v26 = vmul.f32 %v11004_v1, %v2715_v4  ;;  %v11075_v22 = vmul.f32 %v2696_v3, %v10945_v40  ;;  %vm11077_vm15 = vcmp.eq.f32.partialorder %v2737_v50, 8.507059e+37  ;;  %vm11089_vm1 = vmor %vm2718_vm8, %vm2719_vm13 }
 0x3b9   : > { %v8599_v2 = vpop.eup %8598  ;;  %v2564_v20 = vpop.f32.mrf.mxu2  ;;  %v2740_v59 = vor.u32 1.1754944e-38, %v2739_v62  ;;  %v7273_v15 = vmul.f32 -1.442695, %v11053_v46  ;;  %v2752_v37 = vand.u32 2147483647, %v11006_v11  ;;  %vm2748_vm3 = vweird.f32 %v11006_v11 }
 0x3ba   : > { %v8601_v54 = vpop.eup %8600  ;;  %v2729_v53 = vmul.f32 %v8599_v2, %v10990_v44  ;;  %v2565_v8 = vadd.f32 %v2564_v20, %v10942_v23  ;;  %v2706_v31 = vsel %vm11061_vm12, %v10987_v27, %v2702_v45  ;;  %v2717_v42 = vadd.f32 %v11004_v1, %v2716_v26  ;;  %v2593_v7 = vpop.f32.mrf.mxu3 }
 0x3bb   : > { %v11050_v55 = vadd.f32 1.0, %v8601_v54  ;;  %v11055_v5 = vpop.eup %8602  ;;  %vm2734_vm14 = vweird.f32 %v8599_v2  ;;  %v2754_v27 = vand.u32 2147483648, %v11006_v11  ;;  %v2508_v12 = vpop.f32.mrf.mxu0  ;;  %v2711_v21 = vsel %vm11026_vm6, %v2710_v24, %v2706_v31 }
 0x3bc   : > { %v2730_v17 = vsub.f32 1.0, %v2729_v53  ;;  %v2744_v43 = vmul.f32 %v11055_v5, %v11006_v11  ;;  %v8605_v38 = vpop.eup %8604  ;;  %v11094_v26 = vadd.f32 %v2536_v49, %v10889_v10  ;;  %v2594_v20 = vadd.f32 %v2593_v7, %v2565_v8  ;;  %vm2735_vm2 = vmor %vm2733_vm0, %vm2734_vm14  ;;  %v2537_v6 = vpop.f32.mrf.mxu1 }
 0x3bd   : > { %8606 = vrcp.f32 %v11050_v55  ;;  %v2721_v54 = vsel %vm11089_vm1, %v11004_v1, %v2717_v42  ;;  %v11103_v35 = vadd.f32 1.0, %v8605_v38  ;;  %v2509_v3 = vadd.f32 %v2508_v12, %v10939_v60 }
 0x3be   : > { %v2731_v41 = vmul.f32 %v8599_v2, %v2730_v17  ;;  %v2745_v4 = vsub.f32 1.0, %v2744_v43  ;;  %8608 = vpow2.f32 %v7273_v15  ;;  %v7274_v53 = vmul.f32 -1.442695, %v11094_v26 }
 0x3bf   : > { %v11107_v50 = vadd.f32 %v2594_v20, %v10892_v61  ;;  %v11113_v1 = vmul.f32 %v2711_v21, %v10951_v39  ;;  %8610 = vrcp.f32 %v11103_v35  ;;  %v2755_v56 = vor.u32 1.1754944e-38, %v2754_v27 }
 0x3c0   : > { %v2732_v45 = vadd.f32 %v8599_v2, %v2731_v41  ;;  %v2746_v25 = vmul.f32 %v11055_v5, %v2745_v4  ;;  %vm11127_vm7 = vcmp.eq.f32.partialorder %v2752_v37, 8.507059e+37  ;;  %v2767_v8 = vand.u32 2147483647, %v11050_v55 }
 0x3c1   : > { %8612 = vpow2.f32 %v7274_v53  ;;  %v7275_v31 = vmul.f32 -1.442695, %v11107_v50  ;;  %vm2749_vm9 = vweird.f32 %v11055_v5  ;;  %v2769_v43 = vand.u32 2147483648, %v11050_v55 }
 0x3c2   : > { %v2736_v24 = vsel %vm2735_vm2, %v8599_v2, %v2732_v45  ;;  %v2726_v2 = vsel %vm11045_vm11, %v2725_v16, %v2721_v54  ;;  %v2566_v16 = vpop.f32.mrf.mxu2  ;;  %v2538_v41 = vadd.f32 %v2537_v6, %v2509_v3  ;;  %v2941_v4 = vadd.f32 %v11113_v1, %v11075_v22  ;;  %vm11163_vm6 = vmor %vm2748_vm3, %vm2749_vm9 }
 0x3c3   : > { %v11110_v62 = vpop.eup %8606  ;;  %v2741_v44 = vsel %vm11077_vm15, %v2740_v59, %v2736_v24  ;;  %v2747_v59 = vadd.f32 %v11055_v5, %v2746_v25  ;;  %8614 = vpow2.f32 %v7275_v31  ;;  %v2567_v12 = vadd.f32 %v2566_v16, %v10942_v23  ;;  %v2511_v40 = vpop.f32.mrf.mxu0 }
 0x3c4   : > { %v2759_v17 = vmul.f32 %v11110_v62, %v11050_v55  ;;  %v11125_v49 = vmul.f32 %v2741_v44, %v10964_v34  ;;  %v8609_v63 = vpop.eup %8608  ;;  %v11136_v34 = vmul.f32 %v2726_v2, %v10955_v14  ;;  %v11145_v7 = vadd.f32 %v2538_v41, %v10895_v29  ;;  %2942 = vadd.xlane.f32.xlu2 %v2941_v4  ;;  %v2595_v24 = vpop.f32.mrf.mxu3 }
 0x3c5   : > { %v11142_v15 = vadd.f32 1.0, %v8609_v63  ;;  %v11148_v38 = vpop.eup %8610  ;;  %vm2763_vm4 = vweird.f32 %v11050_v55  ;;  %vm11151_vm5 = vcmp.eq.f32.partialorder %v2767_v8, 8.507059e+37  ;;  %v2973_v21 = vmul.f32 %v11075_v22, %v11075_v22 }
 0x3c6   : > { %v2760_v42 = vsub.f32 1.0, %v2759_v17  ;;  %v2944_v45 = vadd.f32 %v11125_v49, %v11136_v34  ;;  %vm2764_vm8 = vweird.f32 %v11110_v62  ;;  %v2770_v54 = vor.u32 1.1754944e-38, %v2769_v43 }
 0x3c7   : > { %v2774_v37 = vmul.f32 %v11148_v38, %v11103_v35  ;;  %8616 = vrcp.f32 %v11142_v15  ;;  %v8613_v53 = vpop.eup %8612  ;;  %v2751_v3 = vsel %vm11163_vm6, %v11055_v5, %v2747_v59  ;;  %v7276_v44 = vmul.f32 -1.442695, %v11145_v7  ;;  %vm11190_vm0 = vmor %vm2763_vm4, %vm2764_vm8  ;;  %v2540_v59 = vpop.f32.mrf.mxu1 }
 0x3c8   : > { %v2761_v27 = vmul.f32 %v11110_v62, %v2760_v42  ;;  %v2974_v25 = vmul.f32 %v11113_v1, %v11113_v1  ;;  %2945 = vadd.xlane.f32.xlu0 %v2944_v45  ;;  %v11178_v17 = vadd.f32 1.0, %v8613_v53  ;;  %v2596_v8 = vadd.f32 %v2595_v24, %v2567_v12 }
 0x3c9   : > { %v2775_v2 = vsub.f32 1.0, %v2774_v37  ;;  %v2512_v31 = vadd.f32 %v2511_v40, %v10939_v60  ;;  %v8615_v6 = vpop.eup %8614  ;;  %vm2778_vm10 = vweird.f32 %v11103_v35  ;;  %v2782_v16 = vand.u32 2147483647, %v11103_v35 }
 0x3ca   : > { %v2762_v11 = vadd.f32 %v11110_v62, %v2761_v27  ;;  %v2784_v5 = vand.u32 2147483648, %v11103_v35  ;;  %8618 = vpow2.f32 %v7276_v44  ;;  %v2756_v42 = vsel %vm11127_vm7, %v2755_v56, %v2751_v3  ;;  %v2569_v4 = vpop.f32.mrf.mxu2 }
 0x3cb   : > { %v2776_v41 = vmul.f32 %v11148_v38, %v2775_v2  ;;  %vm2779_vm11 = vweird.f32 %v11148_v38  ;;  %8620 = vrcp.f32 %v11178_v17  ;;  %v2799_v56 = vand.u32 2147483648, %v11142_v15 }
 0x3cc   : > { %v2766_v63 = vsel %vm11190_vm0, %v11110_v62, %v2762_v11  ;;  %v11201_v39 = vadd.f32 1.0, %v8615_v6  ;;  %v11204_v55 = vadd.f32 %v2596_v8, %v10900_v30  ;;  %v2797_v40 = vand.u32 2147483647, %v11142_v15  ;;  %vm11225_vm13 = vmor %vm2778_vm10, %vm2779_vm11  ;;  %v2513_v62 = vpop.f32.mrf.mxu0 }
 0x3cd   : > { %v11206_v27 = vpop.eup %8616  ;;  %v2777_v12 = vadd.f32 %v11148_v38, %v2776_v41  ;;  %v2989_v45 = vadd.f32 %v2974_v25, %v2973_v21  ;;  %v2541_v20 = vadd.f32 %v2540_v59, %v2512_v31  ;;  %v11211_v37 = vmul.f32 %v2756_v42, %v10968_v9 }
 0x3ce   : > { %vm11213_vm12 = vcmp.eq.f32.partialorder %v2782_v16, 8.507059e+37  ;;  %v2785_v24 = vor.u32 1.1754944e-38, %v2784_v5  ;;  %v2789_v53 = vmul.f32 %v11206_v27, %v11142_v15  ;;  %v2771_v3 = vsel %vm11151_vm5, %v2770_v54, %v2766_v63 }
 0x3cf   : > { %vm2793_vm14 = vweird.f32 %v11142_v15  ;;  %8622 = vrcp.f32 %v11201_v39  ;;  %2990 = vadd.xlane.f32.xlu1 %v2989_v45  ;;  %v2975_v9 = vmul.f32 %v11136_v34, %v11136_v34  ;;  %v2781_v14 = vsel %vm11225_vm13, %v11148_v38, %v2777_v12  ;;  %v2598_v38 = vpop.f32.mrf.mxu3 }
 0x3d0   : > { %v8619_v11 = vpop.eup %8618  ;;  %v2790_v54 = vsub.f32 1.0, %v2789_v53  ;;  %v2800_v44 = vor.u32 1.1754944e-38, %v2799_v56  ;;  %v7277_v35 = vmul.f32 -1.442695, %v11204_v55  ;;  %vm11239_vm15 = vcmp.eq.f32.partialorder %v2797_v40, 8.507059e+37 }
 0x3d1   : > { %v11237_v25 = vpop.eup %8620  ;;  %v2814_v8 = vand.u32 2147483648, %v11178_v17  ;;  %v11244_v31 = vadd.f32 1.0, %v8619_v11  ;;  %v11247_v6 = vadd.f32 %v2541_v20, %v10927_v36  ;;  %v2570_v16 = vadd.f32 %v2569_v4, %v10942_v23 }
 0x3d2   : > { %v11251_v5 = vmul.f32 %v2771_v3, %v10984_v13  ;;  %v2791_v42 = vmul.f32 %v11206_v27, %v2790_v54  ;;  %v2804_v43 = vmul.f32 %v11237_v25, %v11178_v17  ;;  %v2812_v41 = vand.u32 2147483647, %v11178_v17 }
 0x3d3   : > { %v2786_v63 = vsel %vm11213_vm12, %v2785_v24, %v2781_v14  ;;  %vm2794_vm1 = vweird.f32 %v11206_v27  ;;  %vm2808_vm2 = vweird.f32 %v11178_v17  ;;  %v2827_v56 = vand.u32 2147483647, %v11201_v39  ;;  %v2571_v14 = vpop.f32.mrf.mxu2 }
 0x3d4   : > { %8624 = vrcp.f32 %v11244_v31  ;;  %v2792_v13 = vadd.f32 %v11206_v27, %v2791_v42  ;;  %v2805_v59 = vsub.f32 1.0, %v2804_v43  ;;  %v7278_v4 = vmul.f32 -1.442695, %v11247_v6  ;;  %vm11277_vm7 = vmor %vm2793_vm14, %vm2794_vm1 }
 0x3d5   : > { %8626 = vpow2.f32 %v7277_v35  ;;  %v11265_v12 = vpop.eup %8622  ;;  %v2815_v40 = vor.u32 1.1754944e-38, %v2814_v8  ;;  %vm2823_vm3 = vweird.f32 %v11201_v39  ;;  %v2599_v45 = vadd.f32 %v2598_v38, %v2570_v16 }
 0x3d6   : > { %v2976_v20 = vmul.f32 %v11125_v49, %v11125_v49  ;;  %v11271_v24 = vmul.f32 %v2786_v63, %v11002_v58  ;;  %v2806_v3 = vmul.f32 %v11237_v25, %v2805_v59  ;;  %v2819_v21 = vmul.f32 %v11265_v12, %v11201_v39 }
 0x3d7   : > { %v2829_v11 = vand.u32 2147483648, %v11201_v39  ;;  %v2796_v58 = vsel %vm11277_vm7, %v11206_v27, %v2792_v13  ;;  %vm11288_vm9 = vcmp.eq.f32.partialorder %v2812_v41, 8.507059e+37  ;;  %8628 = vpow2.f32 %v7278_v4  ;;  %v2542_v4 = vpop.f32.mrf.mxu1  ;;  %v8065_v39 = vld [vmem:[#allocation12 + $0x74] sm:$0xf] }
 0x3d8   : > { %v11293_v15 = vadd.f32 %v2599_v45, %v10930_v19  ;;  %v2992_v35 = vadd.f32 %v2976_v20, %v2975_v9  ;;  %vm2809_vm4 = vweird.f32 %v11237_v25  ;;  %v2820_v8 = vsub.f32 1.0, %v2819_v21 }
 0x3d9   : > { %vm11296_vm5 = vcmp.eq.f32.partialorder %v2827_v56, 8.507059e+37  ;;  %v2842_v38 = vand.u32 2147483647, %v11244_v31  ;;  %v2514_v27 = vadd.f32 %v2513_v62, %v10939_v60  ;;  %v2807_v43 = vadd.f32 %v11237_v25, %v2806_v3  ;;  %vm11322_vm8 = vmor %vm2808_vm2, %vm2809_vm4 }
 0x3da   : > { %v11302_v42 = vpop.eup %8624  ;;  %v7279_v41 = vmul.f32 -1.442695, %v11293_v15  ;;  %2993 = vadd.xlane.f32.xlu2 %v2992_v35  ;;  %v2947_v9 = vadd.f32 %v11251_v5, %v11211_v37  ;;  %v2572_v63 = vadd.f32 %v2571_v14, %v10942_v23  ;;  %v2801_v13 = vsel %vm11239_vm15, %v2800_v44, %v2796_v58  ;;  %v2600_v23 = vpop.f32.mrf.mxu3 }
 0x3db   : > { %v8627_v56 = vpop.eup %8626  ;;  %v2821_v59 = vmul.f32 %v11265_v12, %v2820_v8  ;;  %vm2824_vm6 = vweird.f32 %v11265_v12  ;;  %v2834_v60 = vmul.f32 %v11302_v42, %v11244_v31  ;;  %v2844_v45 = vand.u32 2147483648, %v11244_v31 }
 0x3dc   : > { %v11316_v20 = vadd.f32 1.0, %v8627_v56  ;;  %8630 = vpow2.f32 %v7279_v41  ;;  %v2543_v62 = vadd.f32 %v2542_v4, %v2514_v27  ;;  %2948 = vadd.xlane.f32.xlu0 %v2947_v9  ;;  %v2830_v53 = vor.u32 1.1754944e-38, %v2829_v11  ;;  %vm11337_vm10 = vmor %vm2823_vm3, %vm2824_vm6 }
 0x3dd   : > { %v2822_v2 = vadd.f32 %v11265_v12, %v2821_v59  ;;  %v2835_v3 = vsub.f32 1.0, %v2834_v60  ;;  %v2601_v21 = vadd.f32 %v2600_v23, %v2572_v63  ;;  %v8629_v14 = vpop.eup %8628  ;;  %v11328_v58 = vmul.f32 %v2801_v13, %v11053_v46 }
 0x3de   : > { %v2811_v35 = vsel %vm11322_vm8, %v11237_v25, %v2807_v43  ;;  %vm2839_vm0 = vweird.f32 %v11302_v42  ;;  %8632 = vrcp.f32 %v11316_v20  ;;  %v11347_v8 = vadd.f32 1.0, %v8629_v14 }
 0x3df   : > { %v2826_v46 = vsel %vm11337_vm10, %v11265_v12, %v2822_v2  ;;  %v2836_v11 = vmul.f32 %v11302_v42, %v2835_v3  ;;  %v11350_v25 = vadd.f32 %v2543_v62, %v10921_v51  ;;  %vm2838_vm11 = vweird.f32 %v11244_v31 }
 0x3e0   : > { %vm11353_vm12 = vcmp.eq.f32.partialorder %v2842_v38, 8.507059e+37  ;;  %v2845_v27 = vor.u32 1.1754944e-38, %v2844_v45  ;;  %v11358_v43 = vadd.f32 %v2601_v21, %v10924_v33  ;;  %v2816_v12 = vsel %vm11288_vm9, %v2815_v40, %v2811_v35  ;;  %vm11370_vm13 = vmor %vm2838_vm11, %vm2839_vm0 }
 0x3e1   : > { %v2837_v41 = vadd.f32 %v11302_v42, %v2836_v11  ;;  %8634 = vrcp.f32 %v11347_v8  ;;  %v2977_v9 = vmul.f32 %v11211_v37, %v11211_v37  ;;  %v2831_v31 = vsel %vm11296_vm5, %v2830_v53, %v2826_v46 }
 0x3e2   : > { %v8631_v63 = vpop.eup %8630  ;;  %v2857_v54 = vand.u32 2147483647, %v11316_v20  ;;  %v7280_v40 = vmul.f32 -1.442695, %v11350_v25  ;;  %v2978_v56 = vmul.f32 %v11251_v5, %v11251_v5  ;;  %v7281_v16 = vmul.f32 -1.442695, %v11358_v43 }
 0x3e3   : > { %v2841_v13 = vsel %vm11370_vm13, %v11302_v42, %v2837_v41  ;;  %v11381_v59 = vadd.f32 1.0, %v8631_v63  ;;  %v2950_v60 = vadd.f32 %v11328_v58, %v11271_v24  ;;  %v11389_v45 = vmul.f32 %v2816_v12, %v11094_v26  ;;  %v8081_v63 = vld [vmem:[#allocation12 + $0xf4] sm:$0xf] }
 0x3e4   : > { %v11386_v4 = vpop.eup %8632  ;;  %v2859_v62 = vand.u32 2147483648, %v11316_v20  ;;  %v2874_v23 = vand.u32 2147483648, %v11347_v8  ;;  %8636 = vpow2.f32 %v7280_v40  ;;  %v11394_v44 = vmul.f32 %v2831_v31, %v11107_v50  ;;  %v7406_v31 = vld [vmem:[#allocation12 + $0xf8] sm:$0xf0] }
 0x3e5   : > { %v2849_v42 = vmul.f32 %v11386_v4, %v11316_v20  ;;  %vm2853_vm14 = vweird.f32 %v11316_v20  ;;  %8638 = vrcp.f32 %v11381_v59  ;;  %2951 = vadd.xlane.f32.xlu1 %v2950_v60  ;;  %v2846_v26 = vsel %vm11353_vm12, %v2845_v27, %v2841_v13  ;;  %v7342_v27 = vld [vmem:[#allocation12 + $0x78] sm:$0xf0]  ;;  %v8066_v60 = vld [vmem:[#allocation12 + $0x74] sm:$0xf0] }
 0x3e6   : > { %vm11402_vm15 = vcmp.eq.f32.partialorder %v2857_v54, 8.507059e+37  ;;  %v2872_v53 = vand.u32 2147483647, %v11347_v8  ;;  %8640 = vpow2.f32 %v7281_v16  ;;  %v2995_v21 = vadd.f32 %v2978_v56, %v2977_v9  ;;  %v7340_v16 = vld [vmem:[#allocation12 + $0x70] sm:$0xf] }
 0x3e7   : > { %v11407_v50 = vpop.eup %8634  ;;  %v2850_v3 = vsub.f32 1.0, %v2849_v42  ;;  %v2979_v14 = vmul.f32 %v11271_v24, %v11271_v24  ;;  %v2980_v35 = vmul.f32 %v11328_v58, %v11328_v58  ;;  %v2860_v17 = vor.u32 1.1754944e-38, %v2859_v62 }
 0x3e8   : > { %v2864_v46 = vmul.f32 %v11407_v50, %v11347_v8  ;;  %vm2868_vm1 = vweird.f32 %v11347_v8  ;;  %v2875_v11 = vor.u32 1.1754944e-38, %v2874_v23  ;;  %vm2854_vm2 = vweird.f32 %v11386_v4  ;;  %2996 = vadd.xlane.f32.xlu2 %v2995_v21  ;;  %v7396_v8 = vld [vmem:[#allocation12 + $0xe0] sm:$0xf] }
 0x3e9   : > { %v2851_v12 = vmul.f32 %v11386_v4, %v2850_v3  ;;  %v2998_v41 = vadd.f32 %v2980_v35, %v2979_v14  ;;  %v2953_v9 = vadd.f32 %v11394_v44, %v11389_v45  ;;  %v11421_v54 = vmul.f32 %v2846_v26, %v11145_v7  ;;  %vm11434_vm3 = vmor %vm2853_vm14, %vm2854_vm2  ;;  %v7332_v7 = vld [vmem:[#allocation12 + $0x60] sm:$0xf] }
 0x3ea   : > { %v8637_v38 = vpop.eup %8636  ;;  %v2865_v40 = vsub.f32 1.0, %v2864_v46  ;;  %v2982_v56 = vmul.f32 %v11394_v44, %v11394_v44  ;;  %v7345_v13 = vor.u32 %v8065_v39, %v7342_v27  ;;  %v7409_v3 = vor.u32 %v8081_v63, %v7406_v31  ;;  %v7404_v39 = vld [vmem:[#allocation12 + $0xf0] sm:$0xf]  ;;  %v8082_v27 = vld [vmem:[#allocation12 + $0xf4] sm:$0xf0] }
 0x3eb   : > { %v11425_v62 = vpop.eup %8638  ;;  %v2852_v23 = vadd.f32 %v11386_v4, %v2851_v12  ;;  %v11428_v42 = vadd.f32 1.0, %v8637_v38  ;;  %2999 = vadd.xlane.f32.xlu0 %v2998_v41  ;;  %v7341_v21 = vor.u32 %v8066_v60, %v7340_v16  ;;  %vm2869_vm7 = vweird.f32 %v11407_v50  ;;  %v8063_v63 = vld [vmem:[#allocation12 + $0x64] sm:$0xf]  ;;  %v7334_v31 = vld [vmem:[#allocation12 + $0x68] sm:$0xf0] }
 0x3ec   : > { %v8641_v14 = vpop.eup %8640  ;;  %v2866_v26 = vmul.f32 %v11407_v50, %v2865_v40  ;;  %v2879_v35 = vmul.f32 %v11425_v62, %v11381_v59  ;;  %v2887_v46 = vand.u32 2147483647, %v11381_v59  ;;  %3479 = vmatpush.bf16.msrb.mxu2 %v7345_v13  ;;  %v2889_v12 = vand.u32 2147483648, %v11381_v59  ;;  %3508 = vmatpush.bf16.msrb.mxu3 %v7409_v3  ;;  %vm11461_vm4 = vmor %vm2868_vm1, %vm2869_vm7  ;;  %v8079_v60 = vld [vmem:[#allocation12 + $0xe4] sm:$0xf] }
 0x3ed   : > { %v2856_v20 = vsel %vm11434_vm3, %v11386_v4, %v2852_v23  ;;  %8642 = vrcp.f32 %v11428_v42  ;;  %2954 = vadd.xlane.f32.xlu1 %v2953_v9  ;;  %v2981_v41 = vmul.f32 %v11389_v45, %v11389_v45  ;;  %vm2884_vm9 = vweird.f32 %v11425_v62  ;;  %3421 = vmatpush.bf16.msrb.mxu0 %v7341_v21  ;;  %v7398_v21 = vld [vmem:[#allocation12 + $0xe8] sm:$0xf0] }
 0x3ee   : > { %v2861_v38 = vsel %vm11402_vm15, %v2860_v17, %v2856_v20  ;;  %v2867_v40 = vadd.f32 %v11407_v50, %v2866_v26  ;;  %v2880_v13 = vsub.f32 1.0, %v2879_v35  ;;  %v11465_v16 = vadd.f32 1.0, %v8641_v14  ;;  %v8064_v26 = vld [vmem:[#allocation12 + $0x64] sm:$0xf0] }
 0x3ef   : > { %v11455_v4 = vmul.f32 %v2861_v38, %v11204_v55  ;;  %v3001_v2 = vadd.f32 %v2982_v56, %v2981_v41  ;;  %v7405_v17 = vor.u32 %v8082_v27, %v7404_v39  ;;  %v7337_v3 = vor.u32 %v8063_v63, %v7334_v31  ;;  %v8080_v41 = vld [vmem:[#allocation12 + $0xe4] sm:$0xf0]  ;;  %v8061_v63 = vld [vmem:[#allocation12 + $0x54] sm:$0xf]  ;;  %v7326_v31 = vld [vmem:[#allocation12 + $0x58] sm:$0xf0] }
 0x3f0   : > { %v2871_v23 = vsel %vm11461_vm4, %v11407_v50, %v2867_v40  ;;  %v2881_v55 = vmul.f32 %v11425_v62, %v2880_v13  ;;  %vm2873_vm5 = vcmp.eq.f32.partialorder %v2872_v53, 8.507059e+37  ;;  %vm2883_vm6 = vweird.f32 %v11381_v59  ;;  %v8077_v40 = vld [vmem:[#allocation12 + $0xd4] sm:$0xf]  ;;  %v7390_v13 = vld [vmem:[#allocation12 + $0xd8] sm:$0xf0] }
 0x3f1   : > { %8644 = vrcp.f32 %v11465_v16  ;;  %3450 = vmatpush.bf16.msrb.mxu1 %v7405_v17  ;;  %v2876_v56 = vsel %vm2873_vm5, %v2875_v11, %v2871_v23  ;;  %vm11478_vm8 = vmor %vm2883_vm6, %vm2884_vm9  ;;  %v2890_v35 = vor.u32 1.1754944e-38, %v2889_v12  ;;  %v2956_v39 = vadd.f32 %v11455_v4, %v11421_v54  ;;  %3480 = vmatpush.bf16.msrb.mxu2 %v7337_v3 }
 0x3f2   : > { %v2882_v14 = vadd.f32 %v11425_v62, %v2881_v55  ;;  %v2983_v59 = vmul.f32 %v11421_v54, %v11421_v54  ;;  %v2984_v11 = vmul.f32 %v11455_v4, %v11455_v4  ;;  %v7401_v27 = vor.u32 %v8079_v60, %v7398_v21 }
 0x3f3   : > { %v8643_v53 = vpop.eup %8642  ;;  %3002 = vadd.xlane.f32.xlu0 %v3001_v2  ;;  %v7333_v20 = vor.u32 %v8064_v26, %v7332_v7  ;;  %vm2888_vm10 = vcmp.eq.f32.partialorder %v2887_v46, 8.507059e+37  ;;  %2957 = vadd.xlane.f32.xlu2 %v2956_v39  ;;  %v11493_v9 = vmul.f32 %v2876_v56, %v11247_v6  ;;  %v7397_v55 = vor.u32 %v8080_v41, %v7396_v8 }
 0x3f4   : > { %v2886_v12 = vsel %vm11478_vm8, %v11425_v62, %v2882_v14  ;;  %v2894_v38 = vmul.f32 %v8643_v53, %v11428_v42  ;;  %v3004_v17 = vadd.f32 %v2984_v11, %v2983_v59  ;;  %3509 = vmatpush.bf16.msrb.mxu3 %v7401_v27  ;;  %v7329_v3 = vor.u32 %v8061_v63, %v7326_v31 }
 0x3f5   : > { %v2891_v2 = vsel %vm2888_vm10, %v2890_v35, %v2886_v12  ;;  %3422 = vmatpush.bf16.msrb.mxu0 %v7333_v20  ;;  %v2902_v46 = vand.u32 2147483647, %v11428_v42  ;;  %v2904_v21 = vand.u32 2147483648, %v11428_v42  ;;  %v7393_v7 = vor.u32 %v8077_v40, %v7390_v13  ;;  %3451 = vmatpush.bf16.msrb.mxu1 %v7397_v55 }
 0x3f6   : > { %v11496_v60 = vmul.f32 %v2891_v2, %v11293_v15  ;;  %v2895_v23 = vsub.f32 1.0, %v2894_v38  ;;  %3005 = vadd.xlane.f32.xlu1 %v3004_v17  ;;  %vm2899_vm0 = vweird.f32 %v8643_v53  ;;  %3481 = vmatpush.bf16.msrb.mxu2 %v7329_v3  ;;  %v2985_v15 = vmul.f32 %v11493_v9, %v11493_v9  ;;  %v8062_v17 = vld [vmem:[#allocation12 + $0x54] sm:$0xf0]  ;;  %v7388_v3 = vld [vmem:[#allocation12 + $0xd0] sm:$0xf] }
 0x3f7   : > { %v8645_v62 = vpop.eup %8644  ;;  %vm2898_vm11 = vweird.f32 %v11428_v42  ;;  %vm2903_vm13 = vcmp.eq.f32.partialorder %v2902_v46, 8.507059e+37  ;;  %v2905_v39 = vor.u32 1.1754944e-38, %v2904_v21  ;;  %v2919_v8 = vand.u32 2147483648, %v11465_v16  ;;  %v8059_v46 = vld [vmem:[#allocation12 + $0x44] sm:$0xf] }
 0x3f8   : > { %v2896_v26 = vmul.f32 %v8643_v53, %v2895_v23  ;;  %v2909_v6 = vmul.f32 %v8645_v62, %v11465_v16  ;;  %v2959_v56 = vadd.f32 %v11496_v60, %v11493_v9  ;;  %v2986_v14 = vmul.f32 %v11496_v60, %v11496_v60  ;;  %3510 = vmatpush.bf16.msrb.mxu3 %v7393_v7  ;;  %vm2900_vm12 = vmor %vm2898_vm11, %vm2899_vm0  ;;  %v7318_v21 = vld [vmem:[#allocation12 + $0x48] sm:$0xf0]  ;;  %v8075_v7 = vld [vmem:[#allocation12 + $0xc4] sm:$0xf] }
 0x3f9   : > { %vm2914_vm14 = vweird.f32 %v8645_v62  ;;  %v2917_v20 = vand.u32 2147483647, %v11465_v16  ;;  %vm2913_vm15 = vweird.f32 %v11465_v16  ;;  %v2920_v31 = vor.u32 1.1754944e-38, %v2919_v8  ;;  %v8076_v8 = vld [vmem:[#allocation12 + $0xc4] sm:$0xf0] }
 0x3fa   : > { %v2897_v50 = vadd.f32 %v8643_v53, %v2896_v26  ;;  %v2910_v35 = vsub.f32 1.0, %v2909_v6  ;;  %v3007_v59 = vadd.f32 %v2986_v14, %v2985_v15  ;;  %vm2915_vm1 = vmor %vm2913_vm15, %vm2914_vm14  ;;  %v7321_v26 = vor.u32 %v8059_v46, %v7318_v21  ;;  %v7382_v6 = vld [vmem:[#allocation12 + $0xc8] sm:$0xf0]  ;;  %v8060_v15 = vld [vmem:[#allocation12 + $0x44] sm:$0xf0] }
 0x3fb   : > { %2960 = vadd.xlane.f32.xlu2 %v2959_v56  ;;  %vm2918_vm2 = vcmp.eq.f32.partialorder %v2917_v20, 8.507059e+37  ;;  %v7316_v56 = vld [vmem:[#allocation12 + $0x40] sm:$0xf]  ;;  %v7302_v46 = vld [vmem:[#allocation12 + $0x28] sm:$0xf0] }
 0x3fc   : > { %v2901_v11 = vsel %vm2900_vm12, %v8643_v53, %v2897_v50  ;;  %v2911_v27 = vmul.f32 %v8645_v62, %v2910_v35  ;;  %v7385_v50 = vor.u32 %v8075_v7, %v7382_v6  ;;  %v7317_v35 = vor.u32 %v8060_v15, %v7316_v56  ;;  %3482 = vmatpush.bf16.msrb.mxu2 %v7321_v26  ;;  %v8071_v21 = vld [vmem:[#allocation12 + $0xa4] sm:$0xf]  ;;  %v7366_v6 = vld [vmem:[#allocation12 + $0xa8] sm:$0xf0]  ;;  %v7300_v56 = vld [vmem:[#allocation12 + $0x20] sm:$0xf] }
 0x3fd   : > { %v2906_v41 = vsel %vm2903_vm13, %v2905_v39, %v2901_v11  ;;  %v7380_v39 = vld [vmem:[#allocation12 + $0xc0] sm:$0xf]  ;;  %v7369_v15 = vor.u32 %v8071_v21, %v7366_v6  ;;  %v7350_v6 = vld [vmem:[#allocation12 + $0x88] sm:$0xf0] }
 0x3fe   : > { %v2912_v63 = vadd.f32 %v8645_v62, %v2911_v27  ;;  %3008 = vadd.xlane.f32.xlu1 %v3007_v59  ;;  %v11512_v42 = vmul.f32 %v2906_v41, %v11350_v25  ;;  %v7324_v25 = vld [vmem:[#allocation12 + $0x50] sm:$0xf]  ;;  %3511 = vmatpush.bf16.msrb.mxu3 %v7385_v50  ;;  %v7381_v59 = vor.u32 %v8076_v8, %v7380_v39  ;;  %v8057_v41 = vld [vmem:[#allocation12 + $0x34] sm:$0xf]  ;;  %v8056_v50 = vld [vmem:[#allocation12 + $0x24] sm:$0xf0] }
 0x3ff   : > { %v7325_v23 = vor.u32 %v8062_v17, %v7324_v25  ;;  %v7372_v25 = vld [vmem:[#allocation12 + $0xb0] sm:$0xf]  ;;  %v8074_v17 = vld [vmem:[#allocation12 + $0xb4] sm:$0xf0]  ;;  %v8072_v39 = vld [vmem:[#allocation12 + $0xa4] sm:$0xf0]  ;;  %v7301_v8 = vor.u32 %v8056_v50, %v7300_v56 }
 0x400   : > { %v2916_v12 = vsel %vm2915_vm1, %v8645_v62, %v2912_v63  ;;  %v2987_v13 = vmul.f32 %v11512_v42, %v11512_v42  ;;  %v7310_v63 = vld [vmem:[#allocation12 + $0x38] sm:$0xf0]  ;;  %v7284_v56 = vld [vmem:[#allocation12] sm:$0xf] }
 0x401   : > { %v2921_v38 = vsel %vm2918_vm2, %v2920_v31, %v2916_v12  ;;  %3423 = vmatpush.bf16.msrb.mxu0 %v7325_v23  ;;  %v8073_v31 = vld [vmem:[#allocation12 + $0xb4] sm:$0xf] }
 0x402   : > { %v11515_v53 = vmul.f32 %v2921_v38, %v11358_v43  ;;  %v8078_v43 = vld [vmem:[#allocation12 + $0xd4] sm:$0xf0]  ;;  %v7313_v38 = vor.u32 %v8057_v41, %v7310_v63 }
 0x403   : > { %v7389_v62 = vor.u32 %v8078_v43, %v7388_v3  ;;  %v7373_v43 = vor.u32 %v8074_v17, %v7372_v25  ;;  %v8070_v25 = vld [vmem:[#allocation12 + $0x94] sm:$0xf0] }
 0x404   : > { %v2962_v40 = vadd.f32 %v11515_v53, %v11512_v42  ;;  %v2988_v16 = vmul.f32 %v11515_v53, %v11515_v53  ;;  %3483 = vmatpush.bf16.msrb.mxu2 %v7313_v38  ;;  %v8054_v38 = vld [vmem:[#allocation12 + $0x14] sm:$0xf0] }
 0x405   : > { %3452 = vmatpush.bf16.msrb.mxu1 %v7389_v62  ;;  %3424 = vmatpush.bf16.msrb.mxu0 %v7317_v35  ;;  %v8055_v62 = vld [vmem:[#allocation12 + $0x24] sm:$0xf]  ;;  %v7364_v35 = vld [vmem:[#allocation12 + $0xa0] sm:$0xf] }
 0x406   : > { %2963 = vadd.xlane.f32.xlu0 %v2962_v40  ;;  %v3010_v2 = vadd.f32 %v2988_v16, %v2987_v13  ;;  %v7374_v40 = vld [vmem:[#allocation12 + $0xb8] sm:$0xf0]  ;;  %v7308_v13 = vld [vmem:[#allocation12 + $0x30] sm:$0xf]  ;;  %v7305_v26 = vor.u32 %v8055_v62, %v7302_v46  ;;  %v8067_v62 = vld [vmem:[#allocation12 + $0x84] sm:$0xf] }
 0x407   : > { %v7377_v16 = vor.u32 %v8073_v31, %v7374_v40  ;;  %v7358_v31 = vld [vmem:[#allocation12 + $0x98] sm:$0xf0]  ;;  %v7353_v50 = vor.u32 %v8067_v62, %v7350_v6 }
 0x408   : > { %3011 = vadd.xlane.f32.xlu2 %v3010_v2  ;;  %v8058_v2 = vld [vmem:[#allocation12 + $0x34] sm:$0xf0]  ;;  %3484 = vmatpush.bf16.msrb.mxu2 %v7305_v26 }
 0x409   : > { %3453 = vmatpush.bf16.msrb.mxu1 %v7381_v59  ;;  %v7309_v3 = vor.u32 %v8058_v2, %v7308_v13  ;;  %3512 = vmatpush.bf16.msrb.mxu3 %v7377_v16  ;;  %v7365_v59 = vor.u32 %v8072_v39, %v7364_v35  ;;  %v7356_v2 = vld [vmem:[#allocation12 + $0x90] sm:$0xf]  ;;  %v8052_v35 = vld [vmem:[#allocation12 + $0x4] sm:$0xf0]  ;;  %v7348_v39 = vld [vmem:[#allocation12 + $0x80] sm:$0xf] }
 0x40b   : > { %3425 = vmatpush.bf16.msrb.mxu0 %v7309_v3  ;;  %v8051_v3 = vld [vmem:[#allocation12 + $0x4] sm:$0xf] }
 0x40d   : > { %3454 = vmatpush.bf16.msrb.mxu1 %v7373_v43  ;;  %3513 = vmatpush.bf16.msrb.mxu3 %v7369_v15  ;;  %v7286_v43 = vld [vmem:[#allocation12 + $0x8] sm:$0xf0] }
 0x40e   : > { %v7289_v26 = vor.u32 %v8051_v3, %v7286_v43 }
 0x40f   : > { %3426 = vmatpush.bf16.msrb.mxu0 %v7301_v8  ;;  %v8068_v8 = vld [vmem:[#allocation12 + $0x84] sm:$0xf0] }
 0x411   : > { %3455 = vmatpush.bf16.msrb.mxu1 %v7365_v59 }
 0x437   : > { %v2943_v55 = vpop.xlane.xlu2 %2942 }
 0x438   : > { %v11523_v14 = vmul.f32 0.00390625, %v2943_v55 }
 0x43a   : > { %v3021_v11 = vmul.f32 %v11523_v14, %v11523_v14 }
 0x43b   : > { %v2946_v20 = vpop.xlane.xlu0 %2945 }
 0x43c   : > { %v11527_v55 = vmul.f32 0.00390625, %v2946_v20  ;;  %v8069_v20 = vld [vmem:[#allocation12 + $0x94] sm:$0xf] }
 0x43d   : > { %v7361_v13 = vor.u32 %v8069_v20, %v7358_v31  ;;  %v7349_v20 = vor.u32 %v8068_v8, %v7348_v39 }
 0x43e   : > { %v3022_v41 = vmul.f32 %v11527_v55, %v11527_v55 }
 0x43f   : > { %3514 = vmatpush.bf16.msrb.mxu3 %v7361_v13 }
 0x442   : > { %v2991_v27 = vpop.xlane.xlu1 %2990 }
 0x443   : > { %v3013_v12 = vmul.f32 0.00390625, %v2991_v27  ;;  %v7294_v27 = vld [vmem:[#allocation12 + $0x18] sm:$0xf0]  ;;  %3515 = vmatpush.bf16.msrb.mxu3 %v7353_v50 }
 0x445   : > { %v3029_v23 = vsub.f32 %v3013_v12, %v3021_v11  ;;  %v8053_v11 = vld [vmem:[#allocation12 + $0x14] sm:$0xf]  ;;  %v7292_v12 = vld [vmem:[#allocation12 + $0x10] sm:$0xf] }
 0x446   : > { %v7297_v63 = vor.u32 %v8053_v11, %v7294_v27  ;;  %v7293_v16 = vor.u32 %v8054_v38, %v7292_v12  ;;  %v7285_v27 = vor.u32 %v8052_v35, %v7284_v56 }
 0x447   : > { %v11529_v7 = vadd.f32 0.1, %v3029_v23  ;;  %v7357_v23 = vor.u32 %v8070_v25, %v7356_v2 }
 0x448   : > { %3485 = vmatpush.bf16.msrb.mxu2 %v7297_v63  ;;  %3427 = vmatpush.bf16.msrb.mxu0 %v7293_v16 }
 0x449   : > { %8646 = vrsqrt.f32 %v11529_v7  ;;  %3456 = vmatpush.bf16.msrb.mxu1 %v7357_v23  ;;  %vm3051_vm7 = vweird.f32 %v11529_v7 }
 0x44c   : > { %3486 = vmatpush.bf16.msrb.mxu2 %v7289_v26  ;;  %3428 = vmatpush.bf16.msrb.mxu0 %v7285_v27 }
 0x44d   : > { %v2994_v40 = vpop.xlane.xlu2 %2993  ;;  %3457 = vmatpush.bf16.msrb.mxu1 %v7349_v20 }
 0x44e   : > { %v3014_v17 = vmul.f32 0.00390625, %v2994_v40 }
 0x44f   : > { %v8647_v46 = vpop.eup %8646  ;;  %v2949_v63 = vpop.xlane.xlu0 %2948 }
 0x450   : > { %v3030_v21 = vsub.f32 %v3014_v17, %v3022_v41  ;;  %v3046_v15 = vmul.f32 %v8647_v46, %v11529_v7  ;;  %v11535_v12 = vmul.f32 0.00390625, %v2949_v63  ;;  %vm3052_vm3 = vweird.f32 %v8647_v46  ;;  %v2939_v17 = vld [vmem:[%s14575_s14] sm:$0x3] }
 0x451   : > { %vm3053_vm9 = vmor %vm3051_vm7, %vm3052_vm3  ;;  %v11547_v26 = vperm.slane %v2939_v17, 0  ;;  %v11549_v39 = vperm.slane %v2939_v17, 1 }
 0x452   : > { %v3038_v59 = vadd.f32 0.1, %v3030_v21  ;;  %v3047_v11 = vmul.f32 %v8647_v46, %v3046_v15  ;;  %v3023_v25 = vmul.f32 %v11535_v12, %v11535_v12 }
 0x454   : > { %8648 = vrsqrt.f32 %v3038_v59  ;;  %v3048_v41 = vmul.f32 0.5, %v3047_v11  ;;  %vm3061_vm5 = vweird.f32 %v3038_v59 }
 0x456   : > { %v3049_v31 = vsub.f32 1.5, %v3048_v41  ;;  %v2940_v41 = vld [vmem:[#allocation21] sm:$0x3] }
 0x458   : > { %v2952_v38 = vpop.xlane.xlu1 %2951  ;;  %v3050_v16 = vmul.f32 %v8647_v46, %v3049_v31  ;;  %v3146_v31 = vsub.f32 %v11075_v22, %v11523_v14 }
 0x459   : > { %v11537_v40 = vmul.f32 0.00390625, %v2952_v38  ;;  %v3147_v38 = vsub.f32 %v11113_v1, %v11523_v14  ;;  %v11573_v14 = vperm.slane %v2940_v41, 0 }
 0x45a   : > { %v8649_v13 = vpop.eup %8648  ;;  %v3054_v6 = vsel %vm3053_vm9, %v8647_v46, %v3050_v16  ;;  %v3148_v16 = vsub.f32 %v11136_v34, %v11527_v55 }
 0x45b   : > { %v3056_v2 = vmul.f32 %v8649_v13, %v3038_v59  ;;  %v2997_v23 = vpop.xlane.xlu2 %2996  ;;  %v3024_v62 = vmul.f32 %v11537_v40, %v11537_v40  ;;  %vm3062_vm4 = vweird.f32 %v8649_v13  ;;  %v3130_v20 = vmul.f32 %v11547_v26, %v3054_v6 }
 0x45c   : > { %v3015_v43 = vmul.f32 0.00390625, %v2997_v23  ;;  %vm3063_vm6 = vmor %vm3061_vm5, %vm3062_vm4  ;;  %v3149_v59 = vsub.f32 %v11125_v49, %v11527_v55 }
 0x45d   : > { %v3057_v3 = vmul.f32 %v8649_v13, %v3056_v2  ;;  %v3131_v2 = vmul.f32 %v11549_v39, %v3054_v6  ;;  %v3162_v1 = vmul.f32 %v3146_v31, %v3130_v20 }
 0x45e   : > { %v3000_v21 = vpop.xlane.xlu0 %2999  ;;  %v3031_v15 = vsub.f32 %v3015_v43, %v3023_v25 }
 0x45f   : > { %v3058_v56 = vmul.f32 0.5, %v3057_v3  ;;  %v3016_v50 = vmul.f32 0.00390625, %v3000_v21  ;;  %v3163_v55 = vmul.f32 %v3147_v38, %v3131_v2 }
 0x460   : > { %v2955_v35 = vpop.xlane.xlu1 %2954  ;;  %v11551_v11 = vadd.f32 0.1, %v3031_v15 }
 0x461   : > { %v3059_v8 = vsub.f32 1.5, %v3058_v56  ;;  %v3032_v7 = vsub.f32 %v3016_v50, %v3024_v62  ;;  %v11553_v27 = vmul.f32 0.00390625, %v2955_v35  ;;  %v11576_v62 = vperm.slane %v2940_v41, 1 }
 0x462   : > { %8650 = vrsqrt.f32 %v11551_v11  ;;  %v11582_v35 = vadd.f32 %v11573_v14, %v3162_v1  ;;  %vm3071_vm10 = vweird.f32 %v11551_v11 }
 0x463   : > { %v3060_v63 = vmul.f32 %v8649_v13, %v3059_v8  ;;  %v11557_v46 = vadd.f32 0.1, %v3032_v7  ;;  %v3025_v17 = vmul.f32 %v11553_v27, %v11553_v27 }
 0x465   : > { %v3064_v25 = vsel %vm3063_vm6, %v8649_v13, %v3060_v63  ;;  %8652 = vrsqrt.f32 %v11557_v46  ;;  %vm3081_vm12 = vweird.f32 %v11557_v46 }
 0x466   : > { %v3003_v22 = vpop.xlane.xlu0 %3002  ;;  %v3132_v23 = vmul.f32 %v11547_v26, %v3064_v25  ;;  %v3133_v34 = vmul.f32 %v11549_v39, %v3064_v25  ;;  %v2958_v43 = vpop.xlane.xlu2 %2957 }
 0x467   : > { %v3017_v3 = vmul.f32 0.00390625, %v3003_v22  ;;  %v11578_v21 = vmul.f32 0.00390625, %v2958_v43 }
 0x468   : > { %v3164_v49 = vmul.f32 %v3148_v16, %v3132_v23  ;;  %v3165_v13 = vmul.f32 %v3149_v59, %v3133_v34  ;;  %v8651_v6 = vpop.eup %8650  ;;  %v11593_v16 = vadd.f32 %v11576_v62, %v3163_v55 }
 0x469   : > { %v3033_v56 = vsub.f32 %v3017_v3, %v3025_v17  ;;  %v3066_v15 = vmul.f32 %v8651_v6, %v11551_v11  ;;  %v3006_v50 = vpop.xlane.xlu1 %3005  ;;  %v3026_v20 = vmul.f32 %v11578_v21, %v11578_v21  ;;  %vm3072_vm8 = vweird.f32 %v8651_v6 }
 0x46a   : > { %v3018_v63 = vmul.f32 0.00390625, %v3006_v50  ;;  %v11589_v41 = vadd.f32 %v11573_v14, %v3164_v49  ;;  %v11596_v2 = vadd.f32 %v11576_v62, %v3165_v13  ;;  %vm3073_vm11 = vmor %vm3071_vm10, %vm3072_vm8 }
 0x46b   : > { %v8653_v8 = vpop.eup %8652  ;;  %v11584_v7 = vadd.f32 0.1, %v3033_v56  ;;  %v3067_v31 = vmul.f32 %v8651_v6, %v3066_v15 }
 0x46c   : > { %v3076_v38 = vmul.f32 %v8653_v8, %v11557_v46  ;;  %v3034_v59 = vsub.f32 %v3018_v63, %v3026_v20  ;;  %v3215_v25 = vpack.c.bf16 %v11589_v41, %v11582_v35  ;;  %v3216_v23 = vpack.c.bf16 %v11596_v2, %v11593_v16 }
 0x46d   : > { %8654 = vrsqrt.f32 %v11584_v7  ;;  %v3068_v17 = vmul.f32 0.5, %v3067_v31  ;;  %vm3082_vm0 = vweird.f32 %v8653_v8  ;;  %vm3091_vm15 = vweird.f32 %v11584_v7 }
 0x46e   : > { %v3077_v22 = vmul.f32 %v8653_v8, %v3076_v38  ;;  %v11603_v1 = vadd.f32 0.1, %v3034_v59  ;;  %3429 = vmatmul.bf16.vlgmr.msrb.gmra.mxu0 %v3215_v25  ;;  %3487 = vmatmul.bf16.vlgmr.msrb.gmra.mxu2 %v3215_v25  ;;  %v2961_v34 = vpop.xlane.xlu2 %2960  ;;  %v3150_v59 = vsub.f32 %v11211_v37, %v11535_v12  ;;  %vm3083_vm13 = vmor %vm3081_vm12, %vm3082_vm0  ;;  %v3153_v37 = vsub.f32 %v11328_v58, %v11537_v40 }
 0x46f   : > { %v3069_v3 = vsub.f32 1.5, %v3068_v17  ;;  %3458 = vmatmul.bf16.vlgmr.msrb.gmra.mxu1 %v3216_v23  ;;  %3516 = vmatmul.bf16.vlgmr.msrb.gmra.mxu3 %v3216_v23  ;;  %v11605_v49 = vmul.f32 0.00390625, %v2961_v34  ;;  %v3152_v17 = vsub.f32 %v11271_v24, %v11537_v40  ;;  %v3151_v24 = vsub.f32 %v11251_v5, %v11535_v12 }
 0x470   : > { %v3078_v43 = vmul.f32 0.5, %v3077_v22  ;;  %8656 = vrsqrt.f32 %v11603_v1  ;;  %vm3101_vm3 = vweird.f32 %v11603_v1 }
 0x471   : > { %v3070_v55 = vmul.f32 %v8651_v6, %v3069_v3  ;;  %v3009_v56 = vpop.xlane.xlu1 %3008  ;;  %v3027_v20 = vmul.f32 %v11605_v49, %v11605_v49 }
 0x472   : > { %v3079_v13 = vsub.f32 1.5, %v3078_v43  ;;  %v3019_v50 = vmul.f32 0.00390625, %v3009_v56 }
 0x473   : > { %v8655_v15 = vpop.eup %8654  ;;  %v3074_v38 = vsel %vm3073_vm11, %v8651_v6, %v3070_v55 }
 0x474   : > { %v3080_v63 = vmul.f32 %v8653_v8, %v3079_v13  ;;  %v3086_v31 = vmul.f32 %v8655_v15, %v11584_v7  ;;  %v3035_v11 = vsub.f32 %v3019_v50, %v3027_v20  ;;  %v3134_v25 = vmul.f32 %v11547_v26, %v3074_v38 }
 0x475   : > { %v3135_v34 = vmul.f32 %v11549_v39, %v3074_v38  ;;  %vm3092_vm14 = vweird.f32 %v8655_v15 }
 0x476   : > { %v3087_v22 = vmul.f32 %v8655_v15, %v3086_v31  ;;  %v3084_v23 = vsel %vm3083_vm13, %v8653_v8, %v3080_v63  ;;  %v8657_v3 = vpop.eup %8656  ;;  %v11619_v43 = vadd.f32 0.1, %v3035_v11  ;;  %v3166_v6 = vmul.f32 %v3150_v59, %v3134_v25  ;;  %vm3093_vm1 = vmor %vm3091_vm15, %vm3092_vm14 }
 0x477   : > { %v3136_v46 = vmul.f32 %v11547_v26, %v3084_v23  ;;  %v3137_v55 = vmul.f32 %v11549_v39, %v3084_v23  ;;  %v3096_v56 = vmul.f32 %v8657_v3, %v11603_v1  ;;  %v3167_v40 = vmul.f32 %v3151_v24, %v3135_v34 }
 0x478   : > { %v3088_v13 = vmul.f32 0.5, %v3087_v22  ;;  %8658 = vrsqrt.f32 %v11619_v43  ;;  %v11632_v11 = vadd.f32 %v11573_v14, %v3166_v6  ;;  %vm3102_vm2 = vweird.f32 %v8657_v3 }
 0x479   : > { %v2964_v8 = vpop.xlane.xlu0 %2963  ;;  %v3168_v50 = vmul.f32 %v3152_v17, %v3136_v46  ;;  %v3097_v63 = vmul.f32 %v8657_v3, %v3096_v56  ;;  %v3169_v38 = vmul.f32 %v3153_v37, %v3137_v55  ;;  %v11647_v7 = vadd.f32 %v11576_v62, %v3167_v40  ;;  %vm3103_vm7 = vmor %vm3101_vm3, %vm3102_vm2 }
 0x47a   : > { %v3089_v20 = vsub.f32 1.5, %v3088_v13  ;;  %v11629_v31 = vmul.f32 0.00390625, %v2964_v8  ;;  %v3157_v40 = vsub.f32 %v11455_v4, %v11578_v21  ;;  %vm3111_vm4 = vweird.f32 %v11619_v43 }
 0x47b   : > { %v3012_v59 = vpop.xlane.xlu2 %3011  ;;  %v11635_v58 = vadd.f32 %v11573_v14, %v3168_v50  ;;  %v3098_v5 = vmul.f32 0.5, %v3097_v63  ;;  %v11644_v46 = vadd.f32 %v11576_v62, %v3169_v38  ;;  %v3156_v63 = vsub.f32 %v11421_v54, %v11578_v21 }
 0x47c   : > { %v3090_v25 = vmul.f32 %v8655_v15, %v3089_v20  ;;  %v3020_v12 = vmul.f32 0.00390625, %v3012_v59  ;;  %v3028_v17 = vmul.f32 %v11629_v31, %v11629_v31  ;;  %v3154_v20 = vsub.f32 %v11389_v45, %v11553_v27 }
 0x47d   : > { %v3217_v22 = vpack.c.bf16 %v11635_v58, %v11632_v11  ;;  %v3099_v23 = vsub.f32 1.5, %v3098_v5  ;;  %v3218_v24 = vpack.c.bf16 %v11644_v46, %v11647_v7  ;;  %v3155_v45 = vsub.f32 %v11394_v44, %v11553_v27 }
 0x47e   : > { %v3094_v6 = vsel %vm3093_vm1, %v8655_v15, %v3090_v25  ;;  %v8659_v34 = vpop.eup %8658  ;;  %v3036_v55 = vsub.f32 %v3020_v12, %v3028_v17 }
 0x47f   : > { %3434 = vmatmul.bf16.gmra.mxu0 %v3217_v22  ;;  %3492 = vmatmul.bf16.gmra.mxu2 %v3217_v22  ;;  %v3100_v37 = vmul.f32 %v8657_v3, %v3099_v23  ;;  %v3106_v13 = vmul.f32 %v8659_v34, %v11619_v43  ;;  %v3138_v8 = vmul.f32 %v11547_v26, %v3094_v6  ;;  %vm3112_vm9 = vweird.f32 %v8659_v34 }
 0x480   : > { %v3044_v56 = vadd.f32 0.1, %v3036_v55  ;;  %3463 = vmatmul.bf16.gmra.mxu1 %v3218_v24  ;;  %3521 = vmatmul.bf16.gmra.mxu3 %v3218_v24  ;;  %vm3113_vm5 = vmor %vm3111_vm4, %vm3112_vm9  ;;  %v3158_v43 = vsub.f32 %v11493_v9, %v11605_v49  ;;  %v3159_v9 = vsub.f32 %v11496_v60, %v11605_v49  ;;  %v3255_v49 = vld [vmem:[#allocation13] sm:$0x3] }
 0x481   : > { %v3107_v15 = vmul.f32 %v8659_v34, %v3106_v13  ;;  %v3104_v50 = vsel %vm3103_vm7, %v8657_v3, %v3100_v37  ;;  %v3170_v25 = vmul.f32 %v3154_v20, %v3138_v8  ;;  %v3139_v3 = vmul.f32 %v11549_v39, %v3094_v6 }
 0x482   : > { %8660 = vrsqrt.f32 %v3044_v56  ;;  %v3140_v1 = vmul.f32 %v11547_v26, %v3104_v50  ;;  %v3141_v59 = vmul.f32 %v11549_v39, %v3104_v50  ;;  %vm3121_vm8 = vweird.f32 %v3044_v56 }
 0x483   : > { %v3108_v38 = vmul.f32 0.5, %v3107_v15  ;;  %v11669_v23 = vadd.f32 %v11573_v14, %v3170_v25  ;;  %v3171_v55 = vmul.f32 %v3155_v45, %v3139_v3 }
 0x484   : > { %v3172_v5 = vmul.f32 %v3156_v63, %v3140_v1  ;;  %v3173_v17 = vmul.f32 %v3157_v40, %v3141_v59  ;;  %v3161_v63 = vsub.f32 %v11515_v53, %v11629_v31 }
 0x485   : > { %v3109_v12 = vsub.f32 1.5, %v3108_v38  ;;  %v11678_v27 = vadd.f32 %v11576_v62, %v3171_v55  ;;  %v11717_v55 = vperm.slane %v3255_v49, 1 }
 0x486   : > { %v11666_v54 = vadd.f32 %v11573_v14, %v3172_v5  ;;  %v11674_v6 = vadd.f32 %v11576_v62, %v3173_v17 }
 0x487   : > { %v3110_v37 = vmul.f32 %v8659_v34, %v3109_v12 }
 0x488   : > { %v8661_v22 = vpop.eup %8660  ;;  %v3219_v21 = vpack.c.bf16 %v11666_v54, %v11669_v23  ;;  %v3220_v8 = vpack.c.bf16 %v11674_v6, %v11678_v27 }
 0x489   : > { %v3116_v4 = vmul.f32 %v8661_v22, %v3044_v56  ;;  %v3114_v24 = vsel %vm3113_vm5, %v8659_v34, %v3110_v37  ;;  %vm3122_vm6 = vweird.f32 %v8661_v22  ;;  %v3160_v34 = vsub.f32 %v11512_v42, %v11629_v31 }
 0x48a   : > { %v3142_v50 = vmul.f32 %v11547_v26, %v3114_v24  ;;  %vm3123_vm10 = vmor %vm3121_vm8, %vm3122_vm6  ;;  %v3143_v40 = vmul.f32 %v11549_v39, %v3114_v24 }
 0x48b   : > { %v3117_v44 = vmul.f32 %v8661_v22, %v3116_v4 }
 0x48c   : > { %v3174_v59 = vmul.f32 %v3158_v43, %v3142_v50  ;;  %v3175_v53 = vmul.f32 %v3159_v9, %v3143_v40 }
 0x48d   : > { %v3118_v13 = vmul.f32 0.5, %v3117_v44 }
 0x48e   : > { %v11695_v3 = vadd.f32 %v11573_v14, %v3174_v59 }
 0x48f   : > { %3439 = vmatmul.bf16.gmra.mxu0 %v3219_v21  ;;  %3497 = vmatmul.bf16.gmra.mxu2 %v3219_v21  ;;  %v3119_v15 = vsub.f32 1.5, %v3118_v13 }
 0x490   : > { %3468 = vmatmul.bf16.gmra.mxu1 %v3220_v8  ;;  %3526 = vmatmul.bf16.gmra.mxu3 %v3220_v8  ;;  %v11726_v8 = vadd.f32 %v11593_v16, %v10804_v28 }
 0x491   : > { %v3120_v20 = vmul.f32 %v8661_v22, %v3119_v15 }
 0x493   : > { %v3124_v1 = vsel %vm3123_vm10, %v8661_v22, %v3120_v20  ;;  %v11715_v22 = vadd.f32 %v11582_v35, %v10801_v32  ;;  %v11734_v20 = vadd.f32 %v11589_v41, %v10811_v18  ;;  %v11746_v18 = vadd.f32 %v11596_v2, %v10815_v0 }
 0x494   : > { %v3144_v38 = vmul.f32 %v11547_v26, %v3124_v1  ;;  %v3145_v56 = vmul.f32 %v11549_v39, %v3124_v1  ;;  %v11706_v39 = vadd.f32 %v11576_v62, %v3175_v53 }
 0x496   : > { %v3176_v25 = vmul.f32 %v3160_v34, %v3144_v38  ;;  %v3177_v5 = vmul.f32 %v3161_v63, %v3145_v56 }
 0x498   : > { %v11698_v42 = vadd.f32 %v11573_v14, %v3176_v25  ;;  %v11703_v31 = vadd.f32 %v11576_v62, %v3177_v5  ;;  %v11710_v14 = vperm.slane %v3255_v49, 0 }
 0x49a   : > { %v3221_v26 = vpack.c.bf16 %v11698_v42, %v11695_v3  ;;  %v3222_v60 = vpack.c.bf16 %v11703_v31, %v11706_v39 }
 0x49f   : > { %3444 = vmatmul.bf16.gmra.mxu0 %v3221_v26  ;;  %3502 = vmatmul.bf16.gmra.mxu2 %v3221_v26 }
 0x4a0   : > { %3473 = vmatmul.bf16.gmra.mxu1 %v3222_v60  ;;  %3531 = vmatmul.bf16.gmra.mxu3 %v3222_v60  ;;  %v11756_v60 = vadd.f32 %v11632_v11, %v10854_v47  ;;  %v11769_v47 = vadd.f32 %v11635_v58, %v10857_v48  ;;  %v11787_v48 = vadd.f32 %v11669_v23, %v10889_v10 }
 0x4a1   : > { %v11791_v58 = vadd.f32 %v11666_v54, %v10895_v29  ;;  %v11802_v23 = vadd.f32 %v11674_v6, %v10900_v30  ;;  %v11806_v54 = vadd.f32 %v11695_v3, %v10927_v36  ;;  %v11826_v36 = vadd.f32 %v11703_v31, %v10924_v33 }
 0x4a3   : > { %14576 = vst [vmem:[#allocation52_spill] sm:$0xff] %v11826_v36 }
 0x4eb   : > { %v3430_v12 = vpop.f32.mrf.mxu0 }
 0x4ec   : > { %v3431_v45 = vadd.f32 %v3430_v12, %v11710_v14  ;;  %v3459_v17 = vpop.f32.mrf.mxu1 }
 0x4ee   : > { %v3460_v62 = vadd.f32 %v3459_v17, %v3431_v45 }
 0x4f0   : > { %v11720_v37 = vadd.f32 %v3460_v62, %v11715_v22 }
 0x4f1   : > { %v3488_v4 = vpop.f32.mrf.mxu2 }
 0x4f2   : > { %v7410_v21 = vmul.f32 -1.442695, %v11720_v37  ;;  %v3489_v44 = vadd.f32 %v3488_v4, %v11717_v55  ;;  %v3517_v13 = vpop.f32.mrf.mxu3 }
 0x4f3   : > { %v3432_v24 = vpop.f32.mrf.mxu0 }
 0x4f4   : > { %8662 = vpow2.f32 %v7410_v21  ;;  %v3518_v32 = vadd.f32 %v3517_v13, %v3489_v44  ;;  %v3433_v35 = vadd.f32 %v3432_v24, %v11710_v14  ;;  %v3461_v15 = vpop.f32.mrf.mxu1  ;;  %v11778_v13 = vadd.f32 %v11644_v46, %v10863_v52 }
 0x4f5   : > { %v11782_v24 = vadd.f32 %v11647_v7, %v10860_v57  ;;  %v11796_v52 = vadd.f32 %v11678_v27, %v10892_v61  ;;  %v11810_v61 = vadd.f32 %v11706_v39, %v10930_v19 }
 0x4f6   : > { %v11730_v50 = vadd.f32 %v3518_v32, %v11726_v8  ;;  %v3462_v43 = vadd.f32 %v3461_v15, %v3433_v35 }
 0x4f8   : > { %v7411_v34 = vmul.f32 -1.442695, %v11730_v50  ;;  %v11738_v63 = vadd.f32 %v3462_v43, %v11734_v20 }
 0x4f9   : > { %v3490_v1 = vpop.f32.mrf.mxu2 }
 0x4fa   : > { %v8663_v28 = vpop.eup %8662  ;;  %8664 = vpow2.f32 %v7411_v34  ;;  %v7412_v16 = vmul.f32 -1.442695, %v11738_v63  ;;  %v3491_v38 = vadd.f32 %v3490_v1, %v11717_v55  ;;  %v3519_v40 = vpop.f32.mrf.mxu3  ;;  %v11816_v34 = vadd.f32 %v11698_v42, %v10921_v51 }
 0x4fb   : > { %v11742_v59 = vadd.f32 1.0, %v8663_v28 }
 0x4fc   : > { %v3435_v56 = vpop.f32.mrf.mxu0  ;;  %8666 = vpow2.f32 %v7412_v16  ;;  %v3520_v41 = vadd.f32 %v3519_v40, %v3491_v38 }
 0x4fd   : > { %v3436_v9 = vadd.f32 %v3435_v56, %v11710_v14  ;;  %8668 = vrcp.f32 %v11742_v59  ;;  %v3464_v5 = vpop.f32.mrf.mxu1  ;;  %v3626_v57 = vand.u32 2147483647, %v11742_v59  ;;  %v3628_v46 = vand.u32 2147483648, %v11742_v59 }
 0x4fe   : > { %v11751_v25 = vadd.f32 %v3520_v41, %v11746_v18  ;;  %vm3622_vm0 = vweird.f32 %v11742_v59 }
 0x4ff   : > { %v3465_v49 = vadd.f32 %v3464_v5, %v3436_v9  ;;  %vm11835_vm11 = vcmp.eq.f32.partialorder %v3626_v57, 8.507059e+37  ;;  %v3629_v39 = vor.u32 1.1754944e-38, %v3628_v46 }
 0x500   : > { %v8665_v53 = vpop.eup %8664  ;;  %v7413_v26 = vmul.f32 -1.442695, %v11751_v25 }
 0x501   : > { %v11758_v12 = vadd.f32 1.0, %v8665_v53  ;;  %v11761_v45 = vadd.f32 %v3465_v49, %v11756_v60 }
 0x502   : > { %v3493_v0 = vpop.f32.mrf.mxu2  ;;  %v8667_v2 = vpop.eup %8666  ;;  %8670 = vpow2.f32 %v7413_v26 }
 0x503   : > { %v11763_v17 = vpop.eup %8668  ;;  %8672 = vrcp.f32 %v11758_v12  ;;  %v3494_v62 = vadd.f32 %v3493_v0, %v11717_v55  ;;  %v11773_v21 = vadd.f32 1.0, %v8667_v2  ;;  %v7414_v44 = vmul.f32 -1.442695, %v11761_v45  ;;  %v3522_v32 = vpop.f32.mrf.mxu3 }
 0x504   : > { %v3437_v4 = vpop.f32.mrf.mxu0  ;;  %v3618_v11 = vmul.f32 %v11763_v17, %v11742_v59  ;;  %v3641_v3 = vand.u32 2147483647, %v11758_v12  ;;  %vm3637_vm12 = vweird.f32 %v11758_v12  ;;  %v3643_v38 = vand.u32 2147483648, %v11758_v12 }
 0x505   : > { %v3438_v35 = vadd.f32 %v3437_v4, %v11710_v14  ;;  %8674 = vrcp.f32 %v11773_v21  ;;  %v3523_v7 = vadd.f32 %v3522_v32, %v3494_v62  ;;  %v3466_v43 = vpop.f32.mrf.mxu1  ;;  %vm3623_vm13 = vweird.f32 %v11763_v17 }
 0x506   : > { %v3619_v15 = vsub.f32 1.0, %v3618_v11  ;;  %8676 = vpow2.f32 %v7414_v44  ;;  %vm11851_vm14 = vcmp.eq.f32.partialorder %v3641_v3, 8.507059e+37  ;;  %v3658_v49 = vand.u32 2147483648, %v11773_v21  ;;  %vm11862_vm15 = vmor %vm3622_vm0, %vm3623_vm13 }
 0x507   : > { %v3467_v29 = vadd.f32 %v3466_v43, %v3438_v35  ;;  %v11822_v30 = vadd.f32 %v3523_v7, %v11782_v24  ;;  %v3656_v4 = vand.u32 2147483647, %v11773_v21  ;;  %v3644_v43 = vor.u32 1.1754944e-38, %v3643_v38 }
 0x508   : > { %v8671_v10 = vpop.eup %8670  ;;  %v3620_v1 = vmul.f32 %v11763_v17, %v3619_v15  ;;  %vm3652_vm2 = vweird.f32 %v11773_v21 }
 0x509   : > { %v11812_v27 = vpop.eup %8672  ;;  %v11819_v28 = vadd.f32 1.0, %v8671_v10  ;;  %v11832_v51 = vadd.f32 %v3467_v29, %v11769_v47  ;;  %v7415_v40 = vmul.f32 -1.442695, %v11822_v30  ;;  %v3659_v10 = vor.u32 1.1754944e-38, %v3658_v49 }
 0x50a   : > { %v3495_v6 = vpop.f32.mrf.mxu2  ;;  %v3633_v19 = vmul.f32 %v11812_v27, %v11758_v12  ;;  %v3621_v41 = vadd.f32 %v11763_v17, %v3620_v1  ;;  %vm3638_vm1 = vweird.f32 %v11812_v27  ;;  %vm11885_vm7 = vcmp.eq.f32.partialorder %v3656_v4, 8.507059e+37 }
 0x50b   : > { %8678 = vrcp.f32 %v11819_v28  ;;  %v11840_v33 = vpop.eup %8674  ;;  %v7416_v5 = vmul.f32 -1.442695, %v11832_v51  ;;  %v3524_v2 = vpop.f32.mrf.mxu3  ;;  %v3496_v11 = vadd.f32 %v3495_v6, %v11717_v55  ;;  %vm11881_vm3 = vmor %vm3637_vm12, %vm3638_vm1  ;;  %vm3667_vm9 = vweird.f32 %v11819_v28 }
 0x50c   : > { %v3440_v16 = vpop.f32.mrf.mxu0  ;;  %v3634_v31 = vsub.f32 1.0, %v3633_v19  ;;  %v8677_v56 = vpop.eup %8676  ;;  %v3648_v9 = vmul.f32 %v11840_v33, %v11773_v21  ;;  %8680 = vpow2.f32 %v7415_v40  ;;  %v3625_v46 = vsel %vm11862_vm15, %v11763_v17, %v3621_v41 }
 0x50d   : > { %v11856_v0 = vadd.f32 1.0, %v8677_v56  ;;  %v3469_v44 = vpop.f32.mrf.mxu1  ;;  %v3441_v15 = vadd.f32 %v3440_v16, %v11710_v14  ;;  %v3525_v7 = vadd.f32 %v3524_v2, %v3496_v11  ;;  %v3671_v19 = vand.u32 2147483647, %v11819_v28 }
 0x50e   : > { %v3635_v53 = vmul.f32 %v11812_v27, %v3634_v31  ;;  %v3649_v62 = vsub.f32 1.0, %v3648_v9  ;;  %v3673_v3 = vand.u32 2147483648, %v11819_v28  ;;  %v3630_v12 = vsel %vm11835_vm11, %v3629_v39, %v3625_v46 }
 0x50f   : > { %8682 = vrcp.f32 %v11856_v0  ;;  %v11893_v16 = vadd.f32 %v3525_v7, %v11778_v13  ;;  %v3470_v56 = vadd.f32 %v3469_v44, %v3441_v15  ;;  %vm3653_vm4 = vweird.f32 %v11840_v33 }
 0x510   : > { %v3636_v35 = vadd.f32 %v11812_v27, %v3635_v53  ;;  %v3650_v59 = vmul.f32 %v11840_v33, %v3649_v62  ;;  %8684 = vpow2.f32 %v7416_v5  ;;  %vm11920_vm6 = vmor %vm3652_vm2, %vm3653_vm4  ;;  %vm11925_vm8 = vcmp.eq.f32.partialorder %v3671_v19, 8.507059e+37 }
 0x511   : > { %v11870_v57 = vpop.eup %8678  ;;  %v7417_v5 = vmul.f32 -1.442695, %v11893_v16  ;;  %v11910_v2 = vadd.f32 %v3470_v56, %v11787_v48  ;;  %v3688_v26 = vand.u32 2147483648, %v11856_v0  ;;  %v3686_v6 = vand.u32 2147483647, %v11856_v0 }
 0x512   : > { %v3663_v29 = vmul.f32 %v11870_v57, %v11819_v28  ;;  %v3498_v1 = vpop.f32.mrf.mxu2  ;;  %v3640_v38 = vsel %vm11881_vm3, %v11812_v27, %v3636_v35  ;;  %v8681_v41 = vpop.eup %8680  ;;  %v3651_v9 = vadd.f32 %v11840_v33, %v3650_v59  ;;  %vm3668_vm5 = vweird.f32 %v11870_v57 }
 0x513   : > { %v3499_v53 = vadd.f32 %v3498_v1, %v11717_v55  ;;  %v11907_v39 = vadd.f32 1.0, %v8681_v41  ;;  %v3645_v4 = vsel %vm11851_vm14, %v3644_v43, %v3640_v38  ;;  %8686 = vpow2.f32 %v7417_v5  ;;  %v3527_v15 = vpop.f32.mrf.mxu3  ;;  %vm11944_vm10 = vmor %vm3667_vm9, %vm3668_vm5 }
 0x514   : > { %v3442_v31 = vpop.f32.mrf.mxu0  ;;  %v3664_v40 = vsub.f32 1.0, %v3663_v29  ;;  %v3655_v46 = vsel %vm11920_vm6, %v11840_v33, %v3651_v9  ;;  %v7418_v7 = vmul.f32 -1.442695, %v11910_v2  ;;  %v11938_v29 = vmul.f32 %v3645_v4, %v11730_v50 }
 0x515   : > { %v11904_v49 = vpop.eup %8682  ;;  %v3443_v27 = vadd.f32 %v3442_v31, %v11710_v14  ;;  %8688 = vrcp.f32 %v11907_v39  ;;  %v3471_v43 = vpop.f32.mrf.mxu1  ;;  %v3528_v33 = vadd.f32 %v3527_v15, %v3499_v53  ;;  %v11950_v31 = vmul.f32 %v3630_v12, %v11720_v37 }
 0x516   : > { %v3665_v42 = vmul.f32 %v11870_v57, %v3664_v40  ;;  %v8685_v62 = vpop.eup %8684  ;;  %v3678_v11 = vmul.f32 %v11904_v49, %v11856_v0  ;;  %v3660_v28 = vsel %vm11885_vm7, %v3659_v10, %v3655_v46  ;;  %v3674_v40 = vor.u32 1.1754944e-38, %v3673_v3 }
 0x517   : > { %v11934_v59 = vadd.f32 1.0, %v8685_v62  ;;  %v3472_v19 = vadd.f32 %v3471_v43, %v3443_v27  ;;  %vm3682_vm0 = vweird.f32 %v11856_v0  ;;  %v3689_v56 = vor.u32 1.1754944e-38, %v3688_v26 }
 0x518   : > { %v3666_v32 = vadd.f32 %v11870_v57, %v3665_v42  ;;  %v3679_v21 = vsub.f32 1.0, %v3678_v11  ;;  %v3701_v9 = vand.u32 2147483647, %v11907_v39  ;;  %v3703_v37 = vand.u32 2147483648, %v11907_v39 }
 0x519   : > { %8690 = vrcp.f32 %v11934_v59  ;;  %v8687_v41 = vpop.eup %8686  ;;  %v11963_v12 = vadd.f32 %v3528_v33, %v11796_v52  ;;  %vm11969_vm11 = vcmp.eq.f32.partialorder %v3686_v6, 8.507059e+37  ;;  %v11976_v53 = vadd.f32 %v3472_v19, %v11791_v58 }
 0x51a   : > { %v3670_v50 = vsel %vm11944_vm10, %v11870_v57, %v3666_v32  ;;  %v3680_v38 = vmul.f32 %v11904_v49, %v3679_v21  ;;  %8692 = vpow2.f32 %v7418_v7  ;;  %v3500_v57 = vpop.f32.mrf.mxu2  ;;  %v11973_v3 = vadd.f32 1.0, %v8687_v41 }
 0x51b   : > { %v11965_v5 = vpop.eup %8688  ;;  %v3675_v17 = vsel %vm11925_vm8, %v3674_v40, %v3670_v50  ;;  %v3875_v42 = vadd.f32 %v11938_v29, %v11950_v31  ;;  %vm3683_vm12 = vweird.f32 %v11904_v49  ;;  %v7419_v4 = vmul.f32 -1.442695, %v11963_v12  ;;  %v3529_v1 = vpop.f32.mrf.mxu3 }
 0x51c   : > { %v3681_v27 = vadd.f32 %v11904_v49, %v3680_v38  ;;  %v3693_v62 = vmul.f32 %v11965_v5, %v11907_v39  ;;  %v11986_v11 = vmul.f32 %v3660_v28, %v11738_v63  ;;  %vm3697_vm13 = vweird.f32 %v11907_v39  ;;  %vm11999_vm14 = vmor %vm3682_vm0, %vm3683_vm12 }
 0x51d   : > { %8694 = vrcp.f32 %v11973_v3  ;;  %3876 = vadd.xlane.f32.xlu0 %v3875_v42  ;;  %v3907_v44 = vmul.f32 %v11950_v31, %v11950_v31  ;;  %v11995_v35 = vmul.f32 %v3675_v17, %v11751_v25  ;;  %v3704_v15 = vor.u32 1.1754944e-38, %v3703_v37  ;;  %v3445_v37 = vpop.f32.mrf.mxu0 }
 0x51e   : > { %v3694_v26 = vsub.f32 1.0, %v3693_v62  ;;  %8696 = vpow2.f32 %v7419_v4  ;;  %vm12003_vm15 = vcmp.eq.f32.partialorder %v3701_v9, 8.507059e+37  ;;  %v3716_v7 = vand.u32 2147483647, %v11934_v59 }
 0x51f   : > { %v11992_v32 = vpop.eup %8690  ;;  %v3718_v25 = vand.u32 2147483648, %v11934_v59  ;;  %v7420_v43 = vmul.f32 -1.442695, %v11976_v53  ;;  %v3685_v0 = vsel %vm11999_vm14, %v11904_v49, %v3681_v27  ;;  %v3501_v19 = vadd.f32 %v3500_v57, %v11717_v55 }
 0x520   : > { %v3708_v21 = vmul.f32 %v11992_v32, %v11934_v59  ;;  %v8693_v6 = vpop.eup %8692  ;;  %v3695_v33 = vmul.f32 %v11965_v5, %v3694_v26  ;;  %v3908_v50 = vmul.f32 %v11938_v29, %v11938_v29  ;;  %vm3698_vm1 = vweird.f32 %v11965_v5 }
 0x521   : > { %v12020_v28 = vadd.f32 1.0, %v8693_v6  ;;  %8698 = vpow2.f32 %v7420_v43  ;;  %v3530_v41 = vadd.f32 %v3529_v1, %v3501_v19  ;;  %v3878_v49 = vadd.f32 %v11995_v35, %v11986_v11  ;;  %vm12037_vm7 = vmor %vm3697_vm13, %vm3698_vm1 }
 0x522   : > { %v3709_v38 = vsub.f32 1.0, %v3708_v21  ;;  %v3696_v40 = vadd.f32 %v11965_v5, %v3695_v33  ;;  %v3923_v9 = vadd.f32 %v3908_v50, %v3907_v44  ;;  %vm3712_vm2 = vweird.f32 %v11934_v59  ;;  %v3503_v63 = vpop.f32.mrf.mxu2 }
 0x523   : > { %v12025_v17 = vpop.eup %8694  ;;  %vm3713_vm3 = vweird.f32 %v11992_v32  ;;  %8700 = vrcp.f32 %v12020_v28  ;;  %v3690_v27 = vsel %vm11969_vm11, %v3689_v56, %v3685_v0  ;;  %v3731_v44 = vand.u32 2147483647, %v11973_v3  ;;  %3879 = vadd.xlane.f32.xlu1 %v3878_v49 }
 0x524   : > { %v3710_v57 = vmul.f32 %v11992_v32, %v3709_v38  ;;  %v8697_v42 = vpop.eup %8696  ;;  %v3723_v4 = vmul.f32 %v12025_v17, %v11973_v3  ;;  %v3733_v26 = vand.u32 2147483648, %v11973_v3  ;;  %3924 = vadd.xlane.f32.xlu2 %v3923_v9  ;;  %v3700_v56 = vsel %vm12037_vm7, %v11965_v5, %v3696_v40  ;;  %vm12056_vm9 = vmor %vm3712_vm2, %vm3713_vm3  ;;  %v3474_v40 = vpop.f32.mrf.mxu1 }
 0x525   : > { %v12049_v10 = vadd.f32 1.0, %v8697_v42  ;;  %v3446_v21 = vadd.f32 %v3445_v37, %v11710_v14  ;;  %vm12060_vm4 = vcmp.eq.f32.partialorder %v3716_v7, 8.507059e+37  ;;  %v3719_v6 = vor.u32 1.1754944e-38, %v3718_v25  ;;  %v3447_v1 = vpop.f32.mrf.mxu0 }
 0x526   : > { %v3711_v39 = vadd.f32 %v11992_v32, %v3710_v57  ;;  %v3724_v5 = vsub.f32 1.0, %v3723_v4  ;;  %v12065_v0 = vadd.f32 %v3530_v41, %v11802_v23  ;;  %v12068_v19 = vmul.f32 %v3690_v27, %v11761_v45 }
 0x527   : > { %v8699_v33 = vpop.eup %8698  ;;  %vm3727_vm5 = vweird.f32 %v11973_v3  ;;  %8702 = vrcp.f32 %v12049_v10  ;;  %v3705_v7 = vsel %vm12003_vm15, %v3704_v15, %v3700_v56  ;;  %v3748_v50 = vand.u32 2147483648, %v12020_v28  ;;  %v3532_v15 = vpop.f32.mrf.mxu3 }
 0x528   : > { %v3715_v59 = vsel %vm12056_vm9, %v11992_v32, %v3711_v39  ;;  %v3725_v25 = vmul.f32 %v12025_v17, %v3724_v5  ;;  %v12079_v38 = vadd.f32 1.0, %v8699_v33  ;;  %vm12083_vm6 = vcmp.eq.f32.partialorder %v3731_v44, 8.507059e+37 }
 0x529   : > { %v12081_v45 = vpop.eup %8700  ;;  %v3734_v32 = vor.u32 1.1754944e-38, %v3733_v26  ;;  %v3746_v9 = vand.u32 2147483647, %v12020_v28  ;;  %v7421_v37 = vmul.f32 -1.442695, %v12065_v0  ;;  %v3475_v46 = vadd.f32 %v3474_v40, %v3446_v21 }
 0x52a   : > { %v3720_v49 = vsel %vm12060_vm4, %v3719_v6, %v3715_v59  ;;  %v3726_v57 = vadd.f32 %v12025_v17, %v3725_v25  ;;  %vm3728_vm8 = vweird.f32 %v12025_v17  ;;  %v3738_v42 = vmul.f32 %v12081_v45, %v12020_v28  ;;  %v3505_v33 = vpop.f32.mrf.mxu2 }
 0x52b   : > { %v12096_v27 = vmul.f32 %v3705_v7, %v11822_v30  ;;  %vm3742_vm10 = vweird.f32 %v12020_v28  ;;  %v3761_v62 = vand.u32 2147483647, %v12049_v10  ;;  %8704 = vrcp.f32 %v12079_v38  ;;  %vm12109_vm0 = vmor %vm3727_vm5, %vm3728_vm8 }
 0x52c   : > { %v3739_v4 = vsub.f32 1.0, %v3738_v42  ;;  %v3749_v44 = vor.u32 1.1754944e-38, %v3748_v50  ;;  %8706 = vpow2.f32 %v7421_v37  ;;  %v12102_v26 = vadd.f32 %v3475_v46, %v11806_v54  ;;  %v3476_v30 = vpop.f32.mrf.mxu1 }
 0x52d   : > { %v8703_v56 = vpop.eup %8702  ;;  %v12105_v39 = vmul.f32 %v3720_v49, %v11832_v51  ;;  %vm3757_vm11 = vweird.f32 %v12049_v10  ;;  %v3763_v21 = vand.u32 2147483648, %v12049_v10  ;;  %v3504_v43 = vadd.f32 %v3503_v63, %v11717_v55 }
 0x52e   : > { %v3730_v6 = vsel %vm12109_vm0, %v12025_v17, %v3726_v57  ;;  %v3740_v51 = vmul.f32 %v12081_v45, %v3739_v4  ;;  %vm3743_vm12 = vweird.f32 %v12081_v45  ;;  %vm12121_vm13 = vcmp.eq.f32.partialorder %v3746_v9, 8.507059e+37 }
 0x52f   : > { %v3753_v5 = vmul.f32 %v8703_v56, %v12049_v10  ;;  %vm12126_vm14 = vcmp.eq.f32.partialorder %v3761_v62, 8.507059e+37  ;;  %v7422_v63 = vmul.f32 -1.442695, %v12102_v26  ;;  %v3533_v7 = vadd.f32 %v3532_v15, %v3504_v43  ;;  %vm12153_vm1 = vmor %vm3742_vm10, %vm3743_vm12 }
 0x530   : > { %v3909_v17 = vmul.f32 %v11986_v11, %v11986_v11  ;;  %v3910_v25 = vmul.f32 %v11995_v35, %v11995_v35  ;;  %v3741_v50 = vadd.f32 %v12081_v45, %v3740_v51  ;;  %v3448_v9 = vadd.f32 %v3447_v1, %v11710_v14 }
 0x531   : > { %v3754_v40 = vsub.f32 1.0, %v3753_v5  ;;  %v3881_v37 = vadd.f32 %v12096_v27, %v12068_v19  ;;  %v12139_v46 = vpop.eup %8704  ;;  %8708 = vpow2.f32 %v7422_v63  ;;  %v12142_v49 = vadd.f32 %v3533_v7, %v11810_v61 }
 0x532   : > { %v3926_v15 = vadd.f32 %v3910_v25, %v3909_v17  ;;  %v3506_v57 = vadd.f32 %v3505_v33, %v11717_v55  ;;  %v8707_v42 = vpop.eup %8706  ;;  %v3735_v62 = vsel %vm12083_vm6, %v3734_v32, %v3730_v6  ;;  %vm3758_vm15 = vweird.f32 %v8703_v56  ;;  %v3534_v6 = vpop.f32.mrf.mxu3 }
 0x533   : > { %v3755_v4 = vmul.f32 %v8703_v56, %v3754_v40  ;;  %v3768_v14 = vmul.f32 %v12139_v46, %v12079_v38  ;;  %3882 = vadd.xlane.f32.xlu1 %v3881_v37  ;;  %v3764_v55 = vor.u32 1.1754944e-38, %v3763_v21  ;;  %v12157_v1 = vadd.f32 1.0, %v8707_v42  ;;  %vm3759_vm2 = vmor %vm3757_vm11, %vm3758_vm15 }
 0x534   : > { %v7423_v41 = vmul.f32 -1.442695, %v12142_v49  ;;  %3927 = vadd.xlane.f32.xlu0 %v3926_v15  ;;  %v3477_v32 = vadd.f32 %v3476_v30, %v3448_v9  ;;  %v3745_v51 = vsel %vm12153_vm1, %v12081_v45, %v3741_v50  ;;  %v3535_v63 = vadd.f32 %v3534_v6, %v3506_v57  ;;  %v7478_v6 = vld [vmem:[#allocation15 + $0x68] sm:$0xf0] }
 0x535   : > { %v3756_v5 = vadd.f32 %v8703_v56, %v3755_v4  ;;  %v3769_v33 = vsub.f32 1.0, %v3768_v14  ;;  %v12164_v28 = vmul.f32 %v3735_v62, %v11893_v16  ;;  %v3776_v21 = vand.u32 2147483647, %v12079_v38 }
 0x536   : > { %v3778_v7 = vand.u32 2147483648, %v12079_v38  ;;  %8710 = vrcp.f32 %v12157_v1  ;;  %v12174_v45 = vadd.f32 %v3477_v32, %v11816_v34  ;;  %v3750_v16 = vsel %vm12121_vm13, %v3749_v44, %v3745_v51 }
 0x537   : > { %v3760_v17 = vsel %vm3759_vm2, %v8703_v56, %v3756_v5  ;;  %v3770_v25 = vmul.f32 %v12139_v46, %v3769_v33  ;;  %8712 = vpow2.f32 %v7423_v41  ;;  %v8709_v50 = vpop.eup %8708  ;;  %vm3773_vm3 = vweird.f32 %v12139_v46 }
 0x538   : > { %v3791_v10 = vand.u32 2147483647, %v12157_v1  ;;  %v12181_v40 = vadd.f32 %v3535_v63, %v11826_v36  ;;  %v3765_v56 = vsel %vm12126_vm14, %v3764_v55, %v3760_v17  ;;  %v12186_v37 = vadd.f32 1.0, %v8709_v50  ;;  %v8113_v17 = vld [vmem:[#allocation15 + $0xf4] sm:$0xf] }
 0x539   : > { %v3771_v9 = vadd.f32 %v12139_v46, %v3770_v25  ;;  %v7424_v15 = vmul.f32 -1.442695, %v12174_v45  ;;  %v3911_v44 = vmul.f32 %v12068_v19, %v12068_v19  ;;  %v3912_v3 = vmul.f32 %v12096_v27, %v12096_v27 }
 0x53a   : > { %v7425_v57 = vmul.f32 -1.442695, %v12181_v40  ;;  %v3884_v42 = vadd.f32 %v12164_v28, %v12105_v39  ;;  %vm3772_vm7 = vweird.f32 %v12079_v38  ;;  %8714 = vrcp.f32 %v12186_v37 }
 0x53b   : > { %v12199_v62 = vmul.f32 %v3765_v56, %v11963_v12  ;;  %vm12201_vm9 = vcmp.eq.f32.partialorder %v3776_v21, 8.507059e+37  ;;  %8716 = vpow2.f32 %v7424_v15  ;;  %v3929_v14 = vadd.f32 %v3912_v3, %v3911_v44  ;;  %vm12210_vm4 = vmor %vm3772_vm7, %vm3773_vm3  ;;  %v8097_v21 = vld [vmem:[#allocation15 + $0x74] sm:$0xf]  ;;  %v7484_v56 = vld [vmem:[#allocation15 + $0x70] sm:$0xf] }
 0x53c   : > { %v8711_v59 = vpop.eup %8710  ;;  %3885 = vadd.xlane.f32.xlu2 %v3884_v42  ;;  %v12206_v43 = vmul.f32 %v3750_v16, %v11910_v2  ;;  %v3779_v55 = vor.u32 1.1754944e-38, %v3778_v7  ;;  %v3793_v41 = vand.u32 2147483648, %v12157_v1  ;;  %v3775_v32 = vsel %vm12210_vm4, %v12139_v46, %v3771_v9  ;;  %v7486_v7 = vld [vmem:[#allocation15 + $0x78] sm:$0xf0]  ;;  %v8098_v9 = vld [vmem:[#allocation15 + $0x74] sm:$0xf0] }
 0x53d   : > { %v8713_v30 = vpop.eup %8712  ;;  %v3783_v12 = vmul.f32 %v8711_v59, %v12157_v1  ;;  %vm12219_vm5 = vcmp.eq.f32.partialorder %v3791_v10, 8.507059e+37  ;;  %8718 = vpow2.f32 %v7425_v57  ;;  %3930 = vadd.xlane.f32.xlu0 %v3929_v14  ;;  %v3806_v5 = vand.u32 2147483647, %v12186_v37  ;;  %v7550_v10 = vld [vmem:[#allocation15 + $0xf8] sm:$0xf0] }
 0x53e   : > { %v12223_v2 = vadd.f32 1.0, %v8713_v30  ;;  %v3913_v33 = vmul.f32 %v12105_v39, %v12105_v39  ;;  %v3914_v63 = vmul.f32 %v12164_v28, %v12164_v28  ;;  %v3887_v46 = vadd.f32 %v12199_v62, %v12206_v43  ;;  %v7548_v14 = vld [vmem:[#allocation15 + $0xf0] sm:$0xf]  ;;  %v8114_v30 = vld [vmem:[#allocation15 + $0xf4] sm:$0xf0] }
 0x53f   : > { %v3784_v51 = vsub.f32 1.0, %v3783_v12  ;;  %vm3787_vm6 = vweird.f32 %v12157_v1  ;;  %vm3788_vm8 = vweird.f32 %v8711_v59  ;;  %v3780_v57 = vsel %vm12201_vm9, %v3779_v55, %v3775_v32 }
 0x540   : > { %8720 = vrcp.f32 %v12223_v2  ;;  %v12233_v25 = vpop.eup %8714  ;;  %v3932_v16 = vadd.f32 %v3914_v63, %v3913_v33  ;;  %v3794_v44 = vor.u32 1.1754944e-38, %v3793_v41  ;;  %v3808_v42 = vand.u32 2147483648, %v12186_v37  ;;  %vm3789_vm10 = vmor %vm3787_vm6, %vm3788_vm8 }
 0x541   : > { %v3785_v50 = vmul.f32 %v8711_v59, %v3784_v51  ;;  %v8717_v15 = vpop.eup %8716  ;;  %v3798_v3 = vmul.f32 %v12233_v25, %v12186_v37  ;;  %v3916_v51 = vmul.f32 %v12199_v62, %v12199_v62  ;;  %v7489_v33 = vor.u32 %v8097_v21, %v7486_v7 }
 0x542   : > { %v12241_v12 = vadd.f32 1.0, %v8717_v15  ;;  %3933 = vadd.xlane.f32.xlu1 %v3932_v16  ;;  %v7553_v55 = vor.u32 %v8113_v17, %v7550_v10  ;;  %v7485_v41 = vor.u32 %v8098_v9, %v7484_v56  ;;  %v7549_v32 = vor.u32 %v8114_v30, %v7548_v14  ;;  %v8111_v56 = vld [vmem:[#allocation15 + $0xe4] sm:$0xf]  ;;  %v7542_v9 = vld [vmem:[#allocation15 + $0xe8] sm:$0xf0] }
 0x543   : > { %v3786_v38 = vadd.f32 %v8711_v59, %v3785_v50  ;;  %v8719_v63 = vpop.eup %8718  ;;  %v3799_v4 = vsub.f32 1.0, %v3798_v3  ;;  %v12249_v36 = vmul.f32 %v3780_v57, %v11976_v53  ;;  %v3915_v16 = vmul.f32 %v12206_v43, %v12206_v43  ;;  %4413 = vmatpush.bf16.msra.mxu2 %v7489_v33  ;;  %v8095_v53 = vld [vmem:[#allocation15 + $0x64] sm:$0xf] }
 0x544   : > { %3888 = vadd.xlane.f32.xlu2 %v3887_v46  ;;  %8722 = vrcp.f32 %v12241_v12  ;;  %vm3803_vm0 = vweird.f32 %v12233_v25  ;;  %v12260_v7 = vadd.f32 1.0, %v8719_v63  ;;  %4442 = vmatpush.bf16.msra.mxu3 %v7553_v55  ;;  %vm3802_vm11 = vweird.f32 %v12186_v37  ;;  %v8112_v55 = vld [vmem:[#allocation15 + $0xe4] sm:$0xf0] }
 0x545   : > { %v3790_v50 = vsel %vm3789_vm10, %v8711_v59, %v3786_v38  ;;  %v3800_v46 = vmul.f32 %v12233_v25, %v3799_v4  ;;  %4355 = vmatpush.bf16.msra.mxu0 %v7485_v41  ;;  %v3935_v10 = vadd.f32 %v3916_v51, %v3915_v16  ;;  %4384 = vmatpush.bf16.msra.mxu1 %v7549_v32  ;;  %vm12269_vm12 = vcmp.eq.f32.partialorder %v3806_v5, 8.507059e+37  ;;  %vm12276_vm13 = vmor %vm3802_vm11, %vm3803_vm0  ;;  %v8096_v38 = vld [vmem:[#allocation15 + $0x64] sm:$0xf0]  ;;  %v8093_v41 = vld [vmem:[#allocation15 + $0x54] sm:$0xf] }
 0x546   : > { %v12254_v21 = vpop.eup %8720  ;;  %v3795_v1 = vsel %vm12219_vm5, %v3794_v44, %v3790_v50  ;;  %v3809_v44 = vor.u32 1.1754944e-38, %v3808_v42  ;;  %8724 = vrcp.f32 %v12260_v7  ;;  %v3823_v14 = vand.u32 2147483648, %v12223_v2  ;;  %v7540_v42 = vld [vmem:[#allocation15 + $0xe0] sm:$0xf]  ;;  %v7470_v32 = vld [vmem:[#allocation15 + $0x58] sm:$0xf0] }
 0x547   : > { %v12263_v59 = vmul.f32 %v3795_v1, %v12065_v0  ;;  %v3813_v17 = vmul.f32 %v12254_v21, %v12223_v2  ;;  %v3801_v15 = vadd.f32 %v12233_v25, %v3800_v46  ;;  %v7476_v0 = vld [vmem:[#allocation15 + $0x60] sm:$0xf]  ;;  %v3917_v5 = vmul.f32 %v12249_v36, %v12249_v36 }
 0x548   : > { %v7481_v63 = vor.u32 %v8095_v53, %v7478_v6  ;;  %v7545_v4 = vor.u32 %v8111_v56, %v7542_v9  ;;  %vm3818_vm14 = vweird.f32 %v12254_v21  ;;  %v3821_v46 = vand.u32 2147483647, %v12223_v2 }
 0x549   : > { %v3814_v3 = vsub.f32 1.0, %v3813_v17  ;;  %v3890_v30 = vadd.f32 %v12263_v59, %v12249_v36  ;;  %v3805_v51 = vsel %vm12276_vm13, %v12233_v25, %v3801_v15  ;;  %v3918_v33 = vmul.f32 %v12263_v59, %v12263_v59  ;;  %v8109_v25 = vld [vmem:[#allocation15 + $0xd4] sm:$0xf]  ;;  %v7534_v17 = vld [vmem:[#allocation15 + $0xd8] sm:$0xf0] }
 0x54a   : > { %v8723_v50 = vpop.eup %8722  ;;  %v3810_v16 = vsel %vm12269_vm12, %v3809_v44, %v3805_v51  ;;  %3936 = vadd.xlane.f32.xlu1 %v3935_v10  ;;  %vm3817_vm15 = vweird.f32 %v12223_v2  ;;  %v3838_v6 = vand.u32 2147483648, %v12241_v12  ;;  %4414 = vmatpush.bf16.msra.mxu2 %v7481_v63  ;;  %v7477_v15 = vor.u32 %v8096_v38, %v7476_v0 }
 0x54b   : > { %v3815_v1 = vmul.f32 %v12254_v21, %v3814_v3  ;;  %3891 = vadd.xlane.f32.xlu0 %v3890_v30  ;;  %v3828_v53 = vmul.f32 %v8723_v50, %v12241_v12  ;;  %v3938_v56 = vadd.f32 %v3918_v33, %v3917_v5  ;;  %4443 = vmatpush.bf16.msra.mxu3 %v7545_v4  ;;  %vm3819_vm1 = vmor %vm3817_vm15, %vm3818_vm14  ;;  %v3824_v2 = vor.u32 1.1754944e-38, %v3823_v14 }
 0x54c   : > { %v7541_v57 = vor.u32 %v8112_v55, %v7540_v42  ;;  %v7473_v44 = vor.u32 %v8093_v41, %v7470_v32  ;;  %v8725_v37 = vpop.eup %8724  ;;  %v12300_v10 = vmul.f32 %v3810_v16, %v12102_v26  ;;  %v7537_v30 = vor.u32 %v8109_v25, %v7534_v17  ;;  %4356 = vmatpush.bf16.msra.mxu0 %v7477_v15 }
 0x54d   : > { %v3816_v9 = vadd.f32 %v12254_v21, %v3815_v1  ;;  %v3829_v3 = vsub.f32 1.0, %v3828_v53  ;;  %3939 = vadd.xlane.f32.xlu2 %v3938_v56  ;;  %vm3822_vm2 = vcmp.eq.f32.partialorder %v3821_v46, 8.507059e+37  ;;  %v3843_v51 = vmul.f32 %v8725_v37, %v12260_v7 }
 0x54e   : > { %4385 = vmatpush.bf16.msra.mxu1 %v7541_v57  ;;  %vm3833_vm3 = vweird.f32 %v8723_v50  ;;  %v3836_v26 = vand.u32 2147483647, %v12241_v12  ;;  %4415 = vmatpush.bf16.msra.mxu2 %v7473_v44  ;;  %vm3832_vm7 = vweird.f32 %v12241_v12  ;;  %v3839_v14 = vor.u32 1.1754944e-38, %v3838_v6  ;;  %v8094_v57 = vld [vmem:[#allocation15 + $0x54] sm:$0xf0] }
 0x54f   : > { %v3820_v5 = vsel %vm3819_vm1, %v12254_v21, %v3816_v9  ;;  %v3830_v38 = vmul.f32 %v8723_v50, %v3829_v3  ;;  %4444 = vmatpush.bf16.msra.mxu3 %v7537_v30  ;;  %v3844_v33 = vsub.f32 1.0, %v3843_v51  ;;  %v3851_v63 = vand.u32 2147483647, %v12260_v7  ;;  %vm3834_vm9 = vmor %vm3832_vm7, %vm3833_vm3  ;;  %v8091_v3 = vld [vmem:[#allocation15 + $0x44] sm:$0xf] }
 0x550   : > { %v3825_v0 = vsel %vm3822_vm2, %v3824_v2, %v3820_v5  ;;  %v3853_v4 = vand.u32 2147483648, %v12260_v7  ;;  %v3919_v55 = vmul.f32 %v12300_v10, %v12300_v10  ;;  %vm3848_vm4 = vweird.f32 %v8725_v37  ;;  %v7532_v2 = vld [vmem:[#allocation15 + $0xd0] sm:$0xf]  ;;  %v7462_v51 = vld [vmem:[#allocation15 + $0x48] sm:$0xf0] }
 0x551   : > { %v12308_v42 = vmul.f32 %v3825_v0, %v12142_v49  ;;  %v3831_v21 = vadd.f32 %v8723_v50, %v3830_v38  ;;  %v3845_v41 = vmul.f32 %v8725_v37, %v3844_v33  ;;  %vm3837_vm5 = vcmp.eq.f32.partialorder %v3836_v26, 8.507059e+37  ;;  %v8107_v0 = vld [vmem:[#allocation15 + $0xc4] sm:$0xf]  ;;  %v7526_v26 = vld [vmem:[#allocation15 + $0xc8] sm:$0xf0] }
 0x552   : > { %vm3847_vm6 = vweird.f32 %v12260_v7  ;;  %v3854_v25 = vor.u32 1.1754944e-38, %v3853_v4  ;;  %vm3852_vm10 = vcmp.eq.f32.partialorder %v3851_v63, 8.507059e+37  ;;  %v7465_v38 = vor.u32 %v8091_v3, %v7462_v51  ;;  %v8092_v33 = vld [vmem:[#allocation15 + $0x44] sm:$0xf0]  ;;  %v8087_v3 = vld [vmem:[#allocation15 + $0x24] sm:$0xf] }
 0x553   : > { %v3893_v32 = vadd.f32 %v12308_v42, %v12300_v10  ;;  %v3920_v49 = vmul.f32 %v12308_v42, %v12308_v42  ;;  %v3835_v12 = vsel %vm3834_vm9, %v8723_v50, %v3831_v21  ;;  %v3846_v1 = vadd.f32 %v8725_v37, %v3845_v41  ;;  %vm3849_vm8 = vmor %vm3847_vm6, %vm3848_vm4  ;;  %v8103_v51 = vld [vmem:[#allocation15 + $0xa4] sm:$0xf] }
 0x554   : > { %v3840_v16 = vsel %vm3837_vm5, %v3839_v14, %v3835_v12  ;;  %v7460_v14 = vld [vmem:[#allocation15 + $0x40] sm:$0xf]  ;;  %v7529_v21 = vor.u32 %v8107_v0, %v7526_v26  ;;  %4416 = vmatpush.bf16.msra.mxu2 %v7465_v38  ;;  %v7510_v38 = vld [vmem:[#allocation15 + $0xa8] sm:$0xf0] }
 0x555   : > { %3894 = vadd.xlane.f32.xlu0 %v3893_v32  ;;  %v3941_v46 = vadd.f32 %v3920_v49, %v3919_v55  ;;  %v12321_v17 = vmul.f32 %v3840_v16, %v12174_v45  ;;  %v3850_v53 = vsel %vm3849_vm8, %v8725_v37, %v3846_v1  ;;  %v7468_v45 = vld [vmem:[#allocation15 + $0x50] sm:$0xf]  ;;  %v7461_v63 = vor.u32 %v8092_v33, %v7460_v14  ;;  %v7524_v32 = vld [vmem:[#allocation15 + $0xc0] sm:$0xf]  ;;  %v8108_v49 = vld [vmem:[#allocation15 + $0xc4] sm:$0xf0] }
 0x556   : > { %v3855_v6 = vsel %vm3852_vm10, %v3854_v25, %v3850_v53  ;;  %v7469_v44 = vor.u32 %v8094_v57, %v7468_v45  ;;  %4445 = vmatpush.bf16.msra.mxu3 %v7529_v21  ;;  %v7525_v16 = vor.u32 %v8108_v49, %v7524_v32  ;;  %v8089_v25 = vld [vmem:[#allocation15 + $0x34] sm:$0xf]  ;;  %v7454_v53 = vld [vmem:[#allocation15 + $0x38] sm:$0xf0]  ;;  %v7444_v26 = vld [vmem:[#allocation15 + $0x20] sm:$0xf]  ;;  %v7513_v33 = vor.u32 %v8103_v51, %v7510_v38 }
 0x557   : > { %3942 = vadd.xlane.f32.xlu2 %v3941_v46  ;;  %v12324_v56 = vmul.f32 %v3855_v6, %v12181_v40  ;;  %v3921_v7 = vmul.f32 %v12321_v17, %v12321_v17  ;;  %v8110_v40 = vld [vmem:[#allocation15 + $0xd4] sm:$0xf0]  ;;  %v8105_v6 = vld [vmem:[#allocation15 + $0xb4] sm:$0xf]  ;;  %v8088_v14 = vld [vmem:[#allocation15 + $0x24] sm:$0xf0] }
 0x558   : > { %4357 = vmatpush.bf16.msra.mxu0 %v7469_v44  ;;  %v7533_v5 = vor.u32 %v8110_v40, %v7532_v2  ;;  %v7516_v44 = vld [vmem:[#allocation15 + $0xb0] sm:$0xf]  ;;  %v7445_v21 = vor.u32 %v8088_v14, %v7444_v26  ;;  %v8083_v51 = vld [vmem:[#allocation15 + $0x4] sm:$0xf]  ;;  %v7494_v14 = vld [vmem:[#allocation15 + $0x88] sm:$0xf0] }
 0x559   : > { %v3896_v50 = vadd.f32 %v12324_v56, %v12321_v17  ;;  %v3922_v9 = vmul.f32 %v12324_v56, %v12324_v56  ;;  %v8099_v26 = vld [vmem:[#allocation15 + $0x84] sm:$0xf] }
 0x55a   : > { %4386 = vmatpush.bf16.msra.mxu1 %v7533_v5  ;;  %v7446_v5 = vld [vmem:[#allocation15 + $0x28] sm:$0xf0] }
 0x55b   : > { %3897 = vadd.xlane.f32.xlu1 %v3896_v50  ;;  %v3944_v15 = vadd.f32 %v3922_v9, %v3921_v7  ;;  %v7457_v50 = vor.u32 %v8089_v25, %v7454_v53  ;;  %v7518_v7 = vld [vmem:[#allocation15 + $0xb8] sm:$0xf0]  ;;  %v7452_v9 = vld [vmem:[#allocation15 + $0x30] sm:$0xf]  ;;  %v7449_v0 = vor.u32 %v8087_v3, %v7446_v5 }
 0x55c   : > { %4358 = vmatpush.bf16.msra.mxu0 %v7461_v63  ;;  %v7521_v45 = vor.u32 %v8105_v6, %v7518_v7  ;;  %v7508_v63 = vld [vmem:[#allocation15 + $0xa0] sm:$0xf]  ;;  %v7502_v6 = vld [vmem:[#allocation15 + $0x98] sm:$0xf0] }
 0x55d   : > { %3945 = vadd.xlane.f32.xlu0 %v3944_v15  ;;  %v8090_v15 = vld [vmem:[#allocation15 + $0x34] sm:$0xf0]  ;;  %4417 = vmatpush.bf16.msra.mxu2 %v7457_v50  ;;  %v7436_v50 = vld [vmem:[#allocation15 + $0x10] sm:$0xf] }
 0x55e   : > { %4387 = vmatpush.bf16.msra.mxu1 %v7525_v16  ;;  %v7453_v57 = vor.u32 %v8090_v15, %v7452_v9  ;;  %4446 = vmatpush.bf16.msra.mxu3 %v7521_v45  ;;  %v7438_v16 = vld [vmem:[#allocation15 + $0x18] sm:$0xf0]  ;;  %v8086_v15 = vld [vmem:[#allocation15 + $0x14] sm:$0xf0]  ;;  %v7500_v45 = vld [vmem:[#allocation15 + $0x90] sm:$0xf] }
 0x560   : > { %4359 = vmatpush.bf16.msra.mxu0 %v7453_v57 }
 0x561   : > { %4418 = vmatpush.bf16.msra.mxu2 %v7449_v0  ;;  %v7430_v0 = vld [vmem:[#allocation15 + $0x8] sm:$0xf0] }
 0x562   : > { %4447 = vmatpush.bf16.msra.mxu3 %v7513_v33  ;;  %v7433_v38 = vor.u32 %v8083_v51, %v7430_v0  ;;  %v7428_v33 = vld [vmem:[#allocation15] sm:$0xf] }
 0x564   : > { %4360 = vmatpush.bf16.msra.mxu0 %v7445_v21 }
 0x590   : > { %v3877_v37 = vpop.xlane.xlu0 %3876 }
 0x591   : > { %v12332_v30 = vmul.f32 0.00390625, %v3877_v37  ;;  %v8106_v37 = vld [vmem:[#allocation15 + $0xb4] sm:$0xf0] }
 0x592   : > { %v7517_v40 = vor.u32 %v8106_v37, %v7516_v44  ;;  %v7437_v37 = vor.u32 %v8086_v15, %v7436_v50 }
 0x593   : > { %v3955_v4 = vmul.f32 %v12332_v30, %v12332_v30 }
 0x594   : > { %4388 = vmatpush.bf16.msra.mxu1 %v7517_v40  ;;  %v8102_v40 = vld [vmem:[#allocation15 + $0x94] sm:$0xf0]  ;;  %4361 = vmatpush.bf16.msra.mxu0 %v7437_v37 }
 0x595   : > { %v7501_v5 = vor.u32 %v8102_v40, %v7500_v45 }
 0x596   : > { %v3880_v46 = vpop.xlane.xlu1 %3879 }
 0x597   : > { %v3925_v55 = vpop.xlane.xlu2 %3924  ;;  %v12339_v2 = vmul.f32 0.00390625, %v3880_v46  ;;  %v8101_v46 = vld [vmem:[#allocation15 + $0x94] sm:$0xf] }
 0x598   : > { %v3947_v41 = vmul.f32 0.00390625, %v3925_v55  ;;  %v7505_v9 = vor.u32 %v8101_v46, %v7502_v6 }
 0x599   : > { %v3956_v49 = vmul.f32 %v12339_v2, %v12339_v2 }
 0x59a   : > { %v3963_v12 = vsub.f32 %v3947_v41, %v3955_v4  ;;  %v8104_v4 = vld [vmem:[#allocation15 + $0xa4] sm:$0xf0]  ;;  %4448 = vmatpush.bf16.msra.mxu3 %v7505_v9 }
 0x59b   : > { %v7509_v41 = vor.u32 %v8104_v4, %v7508_v63  ;;  %v7497_v4 = vor.u32 %v8099_v26, %v7494_v14 }
 0x59c   : > { %v12336_v1 = vadd.f32 0.1, %v3963_v12  ;;  %v8085_v12 = vld [vmem:[#allocation15 + $0x14] sm:$0xf] }
 0x59d   : > { %4389 = vmatpush.bf16.msra.mxu1 %v7509_v41  ;;  %v7441_v53 = vor.u32 %v8085_v12, %v7438_v16  ;;  %v8084_v41 = vld [vmem:[#allocation15 + $0x4] sm:$0xf0]  ;;  %v7492_v16 = vld [vmem:[#allocation15 + $0x80] sm:$0xf] }
 0x59e   : > { %8726 = vrsqrt.f32 %v12336_v1  ;;  %v7429_v12 = vor.u32 %v8084_v41, %v7428_v33  ;;  %4449 = vmatpush.bf16.msra.mxu3 %v7497_v4  ;;  %vm3985_vm11 = vweird.f32 %v12336_v1 }
 0x59f   : > { %4419 = vmatpush.bf16.msra.mxu2 %v7441_v53 }
 0x5a0   : > { %4362 = vmatpush.bf16.msra.mxu0 %v7429_v12 }
 0x5a1   : > { %4390 = vmatpush.bf16.msra.mxu1 %v7501_v5 }
 0x5a3   : > { %4420 = vmatpush.bf16.msra.mxu2 %v7433_v38 }
 0x5a4   : > { %v12341_v55 = vpop.eup %8726 }
 0x5a5   : > { %v3980_v32 = vmul.f32 %v12341_v55, %v12336_v1  ;;  %vm3986_vm0 = vweird.f32 %v12341_v55 }
 0x5a6   : > { %v3883_v44 = vpop.xlane.xlu1 %3882  ;;  %vm3987_vm12 = vmor %vm3985_vm11, %vm3986_vm0 }
 0x5a7   : > { %v3928_v25 = vpop.xlane.xlu0 %3927  ;;  %v3981_v57 = vmul.f32 %v12341_v55, %v3980_v32  ;;  %v12348_v63 = vmul.f32 0.00390625, %v3883_v44 }
 0x5a8   : > { %v3948_v7 = vmul.f32 0.00390625, %v3928_v25 }
 0x5a9   : > { %v3982_v32 = vmul.f32 0.5, %v3981_v57  ;;  %v3957_v53 = vmul.f32 %v12348_v63, %v12348_v63  ;;  %v3873_v57 = vld [vmem:[%s14625_s18] sm:$0x3] }
 0x5aa   : > { %v3964_v3 = vsub.f32 %v3948_v7, %v3956_v49  ;;  %v8100_v49 = vld [vmem:[#allocation15 + $0x84] sm:$0xf0]  ;;  %v12364_v26 = vperm.slane %v3873_v57, 0 }
 0x5ab   : > { %v7493_v46 = vor.u32 %v8100_v49, %v7492_v16  ;;  %v3983_v6 = vsub.f32 1.5, %v3982_v32  ;;  %v12370_v32 = vperm.slane %v3873_v57, 1  ;;  %v3874_v49 = vld [vmem:[#allocation22] sm:$0x3] }
 0x5ac   : > { %v3972_v21 = vadd.f32 0.1, %v3964_v3 }
 0x5ad   : > { %4391 = vmatpush.bf16.msra.mxu1 %v7493_v46  ;;  %v3984_v44 = vmul.f32 %v12341_v55, %v3983_v6  ;;  %v4081_v6 = vsub.f32 %v11938_v29, %v12332_v30  ;;  %v4082_v29 = vsub.f32 %v11986_v11, %v12339_v2 }
 0x5ae   : > { %8728 = vrsqrt.f32 %v3972_v21  ;;  %vm3995_vm14 = vweird.f32 %v3972_v21 }
 0x5af   : > { %v3886_v25 = vpop.xlane.xlu2 %3885  ;;  %v3988_v14 = vsel %vm3987_vm12, %v12341_v55, %v3984_v44 }
 0x5b0   : > { %v3931_v50 = vpop.xlane.xlu0 %3930  ;;  %v12352_v7 = vmul.f32 0.00390625, %v3886_v25  ;;  %v4064_v1 = vmul.f32 %v12364_v26, %v3988_v14 }
 0x5b1   : > { %v3949_v9 = vmul.f32 0.00390625, %v3931_v50  ;;  %v4065_v50 = vmul.f32 %v12370_v32, %v3988_v14 }
 0x5b2   : > { %v3958_v40 = vmul.f32 %v12352_v7, %v12352_v7 }
 0x5b3   : > { %v3965_v45 = vsub.f32 %v3949_v9, %v3957_v53  ;;  %v4080_v53 = vsub.f32 %v11950_v31, %v12332_v30  ;;  %v4083_v30 = vsub.f32 %v11995_v35, %v12339_v2 }
 0x5b4   : > { %v8729_v15 = vpop.eup %8728 }
 0x5b5   : > { %v3990_v37 = vmul.f32 %v8729_v15, %v3972_v21  ;;  %v12361_v3 = vadd.f32 0.1, %v3965_v45  ;;  %v3934_v5 = vpop.xlane.xlu1 %3933  ;;  %vm3996_vm13 = vweird.f32 %v8729_v15  ;;  %v4096_v31 = vmul.f32 %v4080_v53, %v4064_v1 }
 0x5b6   : > { %v3950_v0 = vmul.f32 0.00390625, %v3934_v5  ;;  %vm3997_vm15 = vmor %vm3995_vm14, %vm3996_vm13 }
 0x5b7   : > { %v3991_v51 = vmul.f32 %v8729_v15, %v3990_v37  ;;  %v3889_v38 = vpop.xlane.xlu2 %3888  ;;  %8730 = vrsqrt.f32 %v12361_v3  ;;  %v12384_v37 = vperm.slane %v3874_v49, 0  ;;  %vm4005_vm2 = vweird.f32 %v12361_v3 }
 0x5b8   : > { %v3966_v4 = vsub.f32 %v3950_v0, %v3958_v40  ;;  %v12368_v41 = vmul.f32 0.00390625, %v3889_v38 }
 0x5b9   : > { %v3992_v33 = vmul.f32 0.5, %v3991_v51  ;;  %v12402_v35 = vadd.f32 %v12384_v37, %v4096_v31 }
 0x5ba   : > { %v12372_v16 = vadd.f32 0.1, %v3966_v4  ;;  %v3959_v55 = vmul.f32 %v12368_v41, %v12368_v41  ;;  %v4097_v4 = vmul.f32 %v4081_v6, %v4065_v50 }
 0x5bb   : > { %v3993_v12 = vsub.f32 1.5, %v3992_v33 }
 0x5bc   : > { %8732 = vrsqrt.f32 %v12372_v16  ;;  %vm4015_vm9 = vweird.f32 %v12372_v16 }
 0x5bd   : > { %v3994_v46 = vmul.f32 %v8729_v15, %v3993_v12  ;;  %v8731_v25 = vpop.eup %8730  ;;  %v3937_v9 = vpop.xlane.xlu1 %3936  ;;  %v12396_v12 = vperm.slane %v3874_v49, 1 }
 0x5be   : > { %v3892_v45 = vpop.xlane.xlu0 %3891  ;;  %v4000_v21 = vmul.f32 %v8731_v25, %v12361_v3  ;;  %v3951_v44 = vmul.f32 0.00390625, %v3937_v9  ;;  %vm4006_vm1 = vweird.f32 %v8731_v25 }
 0x5bf   : > { %v3998_v57 = vsel %vm3997_vm15, %v8729_v15, %v3994_v46  ;;  %v12388_v51 = vmul.f32 0.00390625, %v3892_v45  ;;  %v12411_v50 = vadd.f32 %v12396_v12, %v4097_v4  ;;  %vm4007_vm3 = vmor %vm4005_vm2, %vm4006_vm1 }
 0x5c0   : > { %v4066_v40 = vmul.f32 %v12364_v26, %v3998_v57  ;;  %v4067_v5 = vmul.f32 %v12370_v32, %v3998_v57  ;;  %v4001_v0 = vmul.f32 %v8731_v25, %v4000_v21  ;;  %v3967_v15 = vsub.f32 %v3951_v44, %v3959_v55  ;;  %v3940_v38 = vpop.xlane.xlu2 %3939 }
 0x5c1   : > { %v3952_v14 = vmul.f32 0.00390625, %v3940_v38  ;;  %v3960_v33 = vmul.f32 %v12388_v51, %v12388_v51 }
 0x5c2   : > { %v8733_v46 = vpop.eup %8732  ;;  %v4002_v9 = vmul.f32 0.5, %v4001_v0  ;;  %v12398_v45 = vadd.f32 0.1, %v3967_v15  ;;  %v4098_v1 = vmul.f32 %v4082_v29, %v4066_v40  ;;  %v4099_v53 = vmul.f32 %v4083_v30, %v4067_v5 }
 0x5c3   : > { %v4010_v11 = vmul.f32 %v8733_v46, %v12372_v16  ;;  %v3968_v57 = vsub.f32 %v3952_v14, %v3960_v33  ;;  %vm4016_vm7 = vweird.f32 %v8733_v46 }
 0x5c4   : > { %v4003_v2 = vsub.f32 1.5, %v4002_v9  ;;  %8734 = vrsqrt.f32 %v12398_v45  ;;  %v12406_v55 = vadd.f32 %v12384_v37, %v4098_v1  ;;  %v12414_v21 = vadd.f32 %v12396_v12, %v4099_v53  ;;  %vm4017_vm4 = vmor %vm4015_vm9, %vm4016_vm7 }
 0x5c5   : > { %v4011_v49 = vmul.f32 %v8733_v46, %v4010_v11  ;;  %v12408_v6 = vadd.f32 0.1, %v3968_v57  ;;  %vm4025_vm8 = vweird.f32 %v12398_v45 }
 0x5c6   : > { %v4004_v44 = vmul.f32 %v8731_v25, %v4003_v2  ;;  %v4149_v40 = vpack.c.bf16 %v12406_v55, %v12402_v35  ;;  %v4150_v31 = vpack.c.bf16 %v12414_v21, %v12411_v50  ;;  %v4085_v2 = vsub.f32 %v12096_v27, %v12348_v63 }
 0x5c7   : > { %v4012_v5 = vmul.f32 0.5, %v4011_v49  ;;  %8736 = vrsqrt.f32 %v12408_v6  ;;  %vm4035_vm0 = vweird.f32 %v12408_v6 }
 0x5c8   : > { %v3895_v29 = vpop.xlane.xlu0 %3894  ;;  %4363 = vmatmul.bf16.vlgmr.msra.gmra.mxu0 %v4149_v40  ;;  %4421 = vmatmul.bf16.vlgmr.msra.gmra.mxu2 %v4149_v40  ;;  %v4008_v0 = vsel %vm4007_vm3, %v8731_v25, %v4004_v44  ;;  %v4084_v25 = vsub.f32 %v12068_v19, %v12348_v63  ;;  %v4086_v19 = vsub.f32 %v12105_v39, %v12352_v7 }
 0x5c9   : > { %v12422_v30 = vmul.f32 0.00390625, %v3895_v29  ;;  %v4013_v15 = vsub.f32 1.5, %v4012_v5  ;;  %4392 = vmatmul.bf16.vlgmr.msra.gmra.mxu1 %v4150_v31  ;;  %4450 = vmatmul.bf16.vlgmr.msra.gmra.mxu3 %v4150_v31  ;;  %v4068_v4 = vmul.f32 %v12364_v26, %v4008_v0  ;;  %v4069_v11 = vmul.f32 %v12370_v32, %v4008_v0 }
 0x5ca   : > { %v3943_v3 = vpop.xlane.xlu2 %3942  ;;  %v8735_v38 = vpop.eup %8734  ;;  %v4087_v29 = vsub.f32 %v12164_v28, %v12352_v7 }
 0x5cb   : > { %v3953_v14 = vmul.f32 0.00390625, %v3943_v3  ;;  %v3961_v33 = vmul.f32 %v12422_v30, %v12422_v30  ;;  %v4014_v9 = vmul.f32 %v8733_v46, %v4013_v15  ;;  %v4020_v1 = vmul.f32 %v8735_v38, %v12398_v45 }
 0x5cc   : > { %v4100_v31 = vmul.f32 %v4084_v25, %v4068_v4  ;;  %vm4026_vm5 = vweird.f32 %v8735_v38 }
 0x5cd   : > { %v3969_v53 = vsub.f32 %v3953_v14, %v3961_v33  ;;  %v8737_v57 = vpop.eup %8736  ;;  %v4021_v49 = vmul.f32 %v8735_v38, %v4020_v1  ;;  %v4018_v44 = vsel %vm4017_vm4, %v8733_v46, %v4014_v9  ;;  %v4101_v46 = vmul.f32 %v4085_v2, %v4069_v11  ;;  %vm4027_vm10 = vmor %vm4025_vm8, %vm4026_vm5 }
 0x5ce   : > { %v4030_v40 = vmul.f32 %v8737_v57, %v12408_v6  ;;  %v4070_v16 = vmul.f32 %v12364_v26, %v4018_v44  ;;  %v3898_v15 = vpop.xlane.xlu1 %3897  ;;  %v4071_v3 = vmul.f32 %v12370_v32, %v4018_v44  ;;  %v12449_v28 = vadd.f32 %v12384_v37, %v4100_v31 }
 0x5cf   : > { %v12435_v5 = vadd.f32 0.1, %v3969_v53  ;;  %v4022_v0 = vmul.f32 0.5, %v4021_v49  ;;  %v12444_v63 = vmul.f32 0.00390625, %v3898_v15  ;;  %vm4036_vm6 = vweird.f32 %v8737_v57 }
 0x5d0   : > { %v4031_v27 = vmul.f32 %v8737_v57, %v4030_v40  ;;  %v3946_v33 = vpop.xlane.xlu0 %3945  ;;  %v4102_v9 = vmul.f32 %v4086_v19, %v4070_v16  ;;  %v4103_v4 = vmul.f32 %v4087_v29, %v4071_v3  ;;  %v12458_v2 = vadd.f32 %v12396_v12, %v4101_v46  ;;  %vm4037_vm11 = vmor %vm4035_vm0, %vm4036_vm6 }
 0x5d1   : > { %8738 = vrsqrt.f32 %v12435_v5  ;;  %v4023_v14 = vsub.f32 1.5, %v4022_v0  ;;  %v3962_v39 = vmul.f32 %v12444_v63, %v12444_v63  ;;  %v3954_v25 = vmul.f32 0.00390625, %v3946_v33 }
 0x5d2   : > { %v4032_v1 = vmul.f32 0.5, %v4031_v27  ;;  %v12452_v53 = vadd.f32 %v12384_v37, %v4102_v9  ;;  %v12455_v49 = vadd.f32 %v12396_v12, %v4103_v4  ;;  %v4090_v6 = vsub.f32 %v12249_v36, %v12388_v51 }
 0x5d3   : > { %v4024_v7 = vmul.f32 %v8735_v38, %v4023_v14  ;;  %v3970_v44 = vsub.f32 %v3954_v25, %v3962_v39  ;;  %v4091_v33 = vsub.f32 %v12263_v59, %v12388_v51  ;;  %vm4045_vm13 = vweird.f32 %v12435_v5 }
 0x5d4   : > { %v4033_v11 = vsub.f32 1.5, %v4032_v1  ;;  %v4151_v40 = vpack.c.bf16 %v12452_v53, %v12449_v28  ;;  %v4152_v19 = vpack.c.bf16 %v12455_v49, %v12458_v2  ;;  %v4089_v1 = vsub.f32 %v12199_v62, %v12368_v41 }
 0x5d5   : > { %v3978_v0 = vadd.f32 0.1, %v3970_v44  ;;  %v4028_v15 = vsel %vm4027_vm10, %v8735_v38, %v4024_v7 }
 0x5d6   : > { %v4034_v31 = vmul.f32 %v8737_v57, %v4033_v11  ;;  %v4072_v46 = vmul.f32 %v12364_v26, %v4028_v15  ;;  %v4073_v9 = vmul.f32 %v12370_v32, %v4028_v15 }
 0x5d7   : > { %v8739_v16 = vpop.eup %8738  ;;  %8740 = vrsqrt.f32 %v3978_v0  ;;  %vm4055_vm1 = vweird.f32 %v3978_v0 }
 0x5d8   : > { %v4040_v29 = vmul.f32 %v8739_v16, %v12435_v5  ;;  %4368 = vmatmul.bf16.gmra.mxu0 %v4151_v40  ;;  %4426 = vmatmul.bf16.gmra.mxu2 %v4151_v40  ;;  %v4038_v45 = vsel %vm4037_vm11, %v8737_v57, %v4034_v31  ;;  %v4088_v57 = vsub.f32 %v12206_v43, %v12368_v41  ;;  %vm4046_vm12 = vweird.f32 %v8739_v16 }
 0x5d9   : > { %4397 = vmatmul.bf16.gmra.mxu1 %v4152_v19  ;;  %4455 = vmatmul.bf16.gmra.mxu3 %v4152_v19  ;;  %v4074_v27 = vmul.f32 %v12364_v26, %v4038_v45  ;;  %v4075_v14 = vmul.f32 %v12370_v32, %v4038_v45  ;;  %v4105_v11 = vmul.f32 %v4089_v1, %v4073_v9  ;;  %vm4047_vm14 = vmor %vm4045_vm13, %vm4046_vm12 }
 0x5da   : > { %v4041_v3 = vmul.f32 %v8739_v16, %v4040_v29  ;;  %v4104_v7 = vmul.f32 %v4088_v57, %v4072_v46  ;;  %v4095_v46 = vsub.f32 %v12324_v56, %v12444_v63 }
 0x5db   : > { %v4106_v4 = vmul.f32 %v4090_v6, %v4074_v27  ;;  %v4107_v39 = vmul.f32 %v4091_v33, %v4075_v14  ;;  %v12490_v62 = vadd.f32 %v12396_v12, %v4105_v11  ;;  %v4094_v27 = vsub.f32 %v12321_v17, %v12444_v63 }
 0x5dc   : > { %v4042_v38 = vmul.f32 0.5, %v4041_v3  ;;  %v12487_v31 = vadd.f32 %v12384_v37, %v4104_v7  ;;  %v4092_v33 = vsub.f32 %v12300_v10, %v12422_v30 }
 0x5dd   : > { %v8741_v36 = vpop.eup %8740  ;;  %v12481_v40 = vadd.f32 %v12384_v37, %v4106_v4  ;;  %v12484_v59 = vadd.f32 %v12396_v12, %v4107_v39 }
 0x5de   : > { %v4043_v25 = vsub.f32 1.5, %v4042_v38  ;;  %v4050_v44 = vmul.f32 %v8741_v36, %v3978_v0  ;;  %vm4056_vm15 = vweird.f32 %v8741_v36  ;;  %v4093_v38 = vsub.f32 %v12308_v42, %v12422_v30  ;;  %v4189_v30 = vld [vmem:[#allocation16] sm:$0x3] }
 0x5df   : > { %v4153_v19 = vpack.c.bf16 %v12481_v40, %v12487_v31  ;;  %v4154_v29 = vpack.c.bf16 %v12484_v59, %v12490_v62  ;;  %vm4057_vm2 = vmor %vm4055_vm1, %vm4056_vm15  ;;  %v12525_v63 = vperm.slane %v4189_v30, 0 }
 0x5e0   : > { %v4051_v51 = vmul.f32 %v8741_v36, %v4050_v44  ;;  %v4044_v43 = vmul.f32 %v8739_v16, %v4043_v25  ;;  %v12532_v25 = vperm.slane %v4189_v30, 1 }
 0x5e2   : > { %v4052_v41 = vmul.f32 0.5, %v4051_v51  ;;  %v4048_v45 = vsel %vm4047_vm14, %v8739_v16, %v4044_v43 }
 0x5e3   : > { %v4076_v5 = vmul.f32 %v12364_v26, %v4048_v45  ;;  %v4077_v16 = vmul.f32 %v12370_v32, %v4048_v45 }
 0x5e4   : > { %v4053_v15 = vsub.f32 1.5, %v4052_v41 }
 0x5e5   : > { %v4108_v57 = vmul.f32 %v4092_v33, %v4076_v5  ;;  %v4109_v4 = vmul.f32 %v4093_v38, %v4077_v16 }
 0x5e6   : > { %v4054_v3 = vmul.f32 %v8741_v36, %v4053_v15 }
 0x5e8   : > { %4373 = vmatmul.bf16.gmra.mxu0 %v4153_v19  ;;  %4431 = vmatmul.bf16.gmra.mxu2 %v4153_v19  ;;  %v4058_v6 = vsel %vm4057_vm2, %v8741_v36, %v4054_v3  ;;  %v12549_v3 = vadd.f32 %v12406_v55, %v11734_v20  ;;  %v12561_v20 = vadd.f32 %v12414_v21, %v11746_v18 }
 0x5e9   : > { %4402 = vmatmul.bf16.gmra.mxu1 %v4154_v29  ;;  %4460 = vmatmul.bf16.gmra.mxu3 %v4154_v29  ;;  %v4078_v14 = vmul.f32 %v12364_v26, %v4058_v6  ;;  %v4079_v0 = vmul.f32 %v12370_v32, %v4058_v6  ;;  %v12516_v26 = vadd.f32 %v12384_v37, %v4108_v57 }
 0x5ea   : > { %v12519_v32 = vadd.f32 %v12396_v12, %v4109_v4  ;;  %v12541_v29 = vadd.f32 %v12411_v50, %v11726_v8  ;;  %v12570_v57 = vadd.f32 %v12449_v28, %v11756_v60 }
 0x5eb   : > { %v4110_v9 = vmul.f32 %v4094_v27, %v4078_v14  ;;  %v4111_v17 = vmul.f32 %v4095_v46, %v4079_v0 }
 0x5ed   : > { %v12510_v1 = vadd.f32 %v12384_v37, %v4110_v9  ;;  %v12513_v56 = vadd.f32 %v12396_v12, %v4111_v17  ;;  %v12530_v12 = vadd.f32 %v12402_v35, %v11715_v22 }
 0x5ef   : > { %v4155_v10 = vpack.c.bf16 %v12510_v1, %v12516_v26  ;;  %v4156_v42 = vpack.c.bf16 %v12513_v56, %v12519_v32 }
 0x5f8   : > { %4378 = vmatmul.bf16.gmra.mxu0 %v4155_v10  ;;  %4436 = vmatmul.bf16.gmra.mxu2 %v4155_v10 }
 0x5f9   : > { %4407 = vmatmul.bf16.gmra.mxu1 %v4156_v42  ;;  %4465 = vmatmul.bf16.gmra.mxu3 %v4156_v42 }
 0x645   : > { %v4364_v39 = vpop.f32.mrf.mxu0 }
 0x646   : > { %v4365_v37 = vadd.f32 %v4364_v39, %v12525_v63  ;;  %v4393_v7 = vpop.f32.mrf.mxu1 }
 0x648   : > { %v4394_v36 = vadd.f32 %v4393_v7, %v4365_v37 }
 0x64a   : > { %v12535_v11 = vadd.f32 %v4394_v36, %v12530_v12 }
 0x64b   : > { %v4422_v44 = vpop.f32.mrf.mxu2 }
 0x64c   : > { %v7554_v51 = vmul.f32 -1.442695, %v12535_v11  ;;  %v4423_v43 = vadd.f32 %v4422_v44, %v12532_v25  ;;  %v4451_v41 = vpop.f32.mrf.mxu3 }
 0x64d   : > { %v4366_v19 = vpop.f32.mrf.mxu0 }
 0x64e   : > { %8742 = vpow2.f32 %v7554_v51  ;;  %v4452_v22 = vadd.f32 %v4451_v41, %v4423_v43  ;;  %v4367_v35 = vadd.f32 %v4366_v19, %v12525_v63  ;;  %v4395_v15 = vpop.f32.mrf.mxu1  ;;  %v12589_v43 = vadd.f32 %v12458_v2, %v11782_v24 }
 0x64f   : > { %v12593_v41 = vadd.f32 %v12452_v53, %v11769_v47  ;;  %v12597_v19 = vadd.f32 %v12455_v49, %v11778_v13  ;;  %v12607_v24 = vadd.f32 %v12490_v62, %v11796_v52  ;;  %v12611_v47 = vadd.f32 %v12481_v40, %v11791_v58  ;;  %v14626_v40 = vld [vmem:[#allocation52_spill] sm:$0xff] }
 0x650   : > { %v12545_v45 = vadd.f32 %v4452_v22, %v12541_v29  ;;  %v4396_v27 = vadd.f32 %v4395_v15, %v4367_v35  ;;  %v12615_v13 = vadd.f32 %v12484_v59, %v11802_v23  ;;  %v12631_v58 = vadd.f32 %v12519_v32, %v11810_v61 }
 0x651   : > { %v12637_v59 = vadd.f32 %v12513_v56, %v14626_v40 }
 0x652   : > { %v7555_v6 = vmul.f32 -1.442695, %v12545_v45  ;;  %v12553_v5 = vadd.f32 %v4396_v27, %v12549_v3 }
 0x653   : > { %v4424_v46 = vpop.f32.mrf.mxu2 }
 0x654   : > { %v8743_v8 = vpop.eup %8742  ;;  %8744 = vpow2.f32 %v7555_v6  ;;  %v7556_v50 = vmul.f32 -1.442695, %v12553_v5  ;;  %v4425_v14 = vadd.f32 %v4424_v46, %v12532_v25  ;;  %v4453_v16 = vpop.f32.mrf.mxu3  ;;  %v12603_v6 = vadd.f32 %v12487_v31, %v11787_v48 }
 0x655   : > { %v12557_v0 = vadd.f32 1.0, %v8743_v8  ;;  %v4369_v33 = vpop.f32.mrf.mxu0  ;;  %v12622_v48 = vadd.f32 %v12510_v1, %v11816_v34  ;;  %v12627_v31 = vadd.f32 %v12516_v26, %v11806_v54 }
 0x656   : > { %8746 = vpow2.f32 %v7556_v50  ;;  %v4454_v55 = vadd.f32 %v4453_v16, %v4425_v14  ;;  %v4370_v38 = vadd.f32 %v4369_v33, %v12525_v63  ;;  %v4398_v9 = vpop.f32.mrf.mxu1 }
 0x657   : > { %8748 = vrcp.f32 %v12557_v0  ;;  %v4560_v62 = vand.u32 2147483647, %v12557_v0  ;;  %v4562_v54 = vand.u32 2147483648, %v12557_v0  ;;  %vm4556_vm7 = vweird.f32 %v12557_v0 }
 0x658   : > { %v12566_v17 = vadd.f32 %v4454_v55, %v12561_v20  ;;  %v4399_v4 = vadd.f32 %v4398_v9, %v4370_v38 }
 0x659   : > { %vm12660_vm9 = vcmp.eq.f32.partialorder %v4560_v62, 8.507059e+37 }
 0x65a   : > { %v8745_v10 = vpop.eup %8744  ;;  %v7557_v42 = vmul.f32 -1.442695, %v12566_v17  ;;  %v12574_v18 = vadd.f32 %v4399_v4, %v12570_v57 }
 0x65b   : > { %v12576_v21 = vadd.f32 1.0, %v8745_v10  ;;  %v4427_v30 = vpop.f32.mrf.mxu2 }
 0x65c   : > { %v8747_v39 = vpop.eup %8746  ;;  %8750 = vpow2.f32 %v7557_v42  ;;  %v7558_v37 = vmul.f32 -1.442695, %v12574_v18  ;;  %v4428_v7 = vadd.f32 %v4427_v30, %v12532_v25  ;;  %v4456_v60 = vpop.f32.mrf.mxu3  ;;  %v4563_v30 = vor.u32 1.1754944e-38, %v4562_v54 }
 0x65d   : > { %v12580_v36 = vpop.eup %8748  ;;  %8752 = vrcp.f32 %v12576_v21  ;;  %v4371_v28 = vpop.f32.mrf.mxu0  ;;  %v12585_v51 = vadd.f32 1.0, %v8747_v39  ;;  %v4575_v26 = vand.u32 2147483647, %v12576_v21  ;;  %v4577_v32 = vand.u32 2147483648, %v12576_v21 }
 0x65e   : > { %v4552_v44 = vmul.f32 %v12580_v36, %v12557_v0  ;;  %8754 = vpow2.f32 %v7558_v37  ;;  %v4457_v22 = vadd.f32 %v4456_v60, %v4428_v7  ;;  %v4372_v35 = vadd.f32 %v4371_v28, %v12525_v63  ;;  %v4400_v27 = vpop.f32.mrf.mxu1 }
 0x65f   : > { %8756 = vrcp.f32 %v12585_v51  ;;  %vm4557_vm3 = vweird.f32 %v12580_v36  ;;  %v4592_v4 = vand.u32 2147483648, %v12585_v51  ;;  %vm4571_vm4 = vweird.f32 %v12576_v21 }
 0x660   : > { %v4553_v15 = vsub.f32 1.0, %v4552_v44  ;;  %v12618_v53 = vadd.f32 %v4457_v22, %v12589_v43  ;;  %v4401_v49 = vadd.f32 %v4400_v27, %v4372_v35  ;;  %vm12672_vm5 = vmor %vm4556_vm7, %vm4557_vm3  ;;  %vm12676_vm6 = vcmp.eq.f32.partialorder %v4575_v26, 8.507059e+37 }
 0x661   : > { %v4578_v7 = vor.u32 1.1754944e-38, %v4577_v32  ;;  %vm4586_vm8 = vweird.f32 %v12585_v51  ;;  %v4590_v28 = vand.u32 2147483647, %v12585_v51 }
 0x662   : > { %v8751_v2 = vpop.eup %8750  ;;  %v4554_v52 = vmul.f32 %v12580_v36, %v4553_v15  ;;  %v7559_v1 = vmul.f32 -1.442695, %v12618_v53  ;;  %v12652_v50 = vadd.f32 %v4401_v49, %v12593_v41 }
 0x663   : > { %v12633_v23 = vpop.eup %8752  ;;  %v12640_v34 = vadd.f32 1.0, %v8751_v2  ;;  %v4429_v46 = vpop.f32.mrf.mxu2  ;;  %vm12695_vm11 = vcmp.eq.f32.partialorder %v4590_v28, 8.507059e+37 }
 0x664   : > { %v8755_v8 = vpop.eup %8754  ;;  %v4567_v61 = vmul.f32 %v12633_v23, %v12576_v21  ;;  %v4555_v56 = vadd.f32 %v12580_v36, %v4554_v52  ;;  %v4430_v55 = vadd.f32 %v4429_v46, %v12532_v25  ;;  %v4458_v10 = vpop.f32.mrf.mxu3  ;;  %v7560_v22 = vmul.f32 -1.442695, %v12652_v50 }
 0x665   : > { %8758 = vrcp.f32 %v12640_v34  ;;  %v12654_v14 = vpop.eup %8756  ;;  %v12656_v33 = vadd.f32 1.0, %v8755_v8  ;;  %v4374_v42 = vpop.f32.mrf.mxu0  ;;  %vm4572_vm10 = vweird.f32 %v12633_v23  ;;  %v4593_v52 = vor.u32 1.1754944e-38, %v4592_v4 }
 0x666   : > { %v4568_v16 = vsub.f32 1.0, %v4567_v61  ;;  %8760 = vpow2.f32 %v7559_v1  ;;  %v4582_v9 = vmul.f32 %v12654_v14, %v12585_v51  ;;  %v4559_v44 = vsel %vm12672_vm5, %v12580_v36, %v4555_v56  ;;  %v4403_v32 = vpop.f32.mrf.mxu1  ;;  %vm12711_vm12 = vmor %vm4571_vm4, %vm4572_vm10 }
 0x667   : > { %8762 = vrcp.f32 %v12656_v33  ;;  %v4459_v35 = vadd.f32 %v4458_v10, %v4430_v55  ;;  %v4375_v15 = vadd.f32 %v4374_v42, %v12525_v63  ;;  %vm4601_vm0 = vweird.f32 %v12640_v34 }
 0x668   : > { %v4569_v39 = vmul.f32 %v12633_v23, %v4568_v16  ;;  %v4583_v60 = vsub.f32 1.0, %v4582_v9  ;;  %v4605_v36 = vand.u32 2147483647, %v12640_v34  ;;  %8764 = vpow2.f32 %v7560_v22 }
 0x669   : > { %v4564_v46 = vsel %vm12660_vm9, %v4563_v30, %v4559_v44  ;;  %v4607_v54 = vand.u32 2147483648, %v12640_v34  ;;  %v12703_v26 = vadd.f32 %v4459_v35, %v12597_v19  ;;  %vm4587_vm13 = vweird.f32 %v12654_v14 }
 0x66a   : > { %v4570_v49 = vadd.f32 %v12633_v23, %v4569_v39  ;;  %v4584_v2 = vmul.f32 %v12654_v14, %v4583_v60  ;;  %v4404_v38 = vadd.f32 %v4403_v32, %v4375_v15  ;;  %v12725_v21 = vmul.f32 %v4564_v46, %v12535_v11  ;;  %vm12739_vm1 = vmor %vm4586_vm8, %vm4587_vm13 }
 0x66b   : > { %v8759_v27 = vpop.eup %8758  ;;  %v4432_v40 = vpop.f32.mrf.mxu2  ;;  %vm12727_vm15 = vcmp.eq.f32.partialorder %v4605_v36, 8.507059e+37  ;;  %v4608_v0 = vor.u32 1.1754944e-38, %v4607_v54  ;;  %v7561_v28 = vmul.f32 -1.442695, %v12703_v26  ;;  %v4620_v37 = vand.u32 2147483647, %v12656_v33 }
 0x66c   : > { %v8761_v62 = vpop.eup %8760  ;;  %v4597_v1 = vmul.f32 %v8759_v27, %v12640_v34  ;;  %v4433_v9 = vadd.f32 %v4432_v40, %v12532_v25  ;;  %v4574_v4 = vsel %vm12711_vm12, %v12633_v23, %v4570_v49  ;;  %v4585_v10 = vadd.f32 %v12654_v14, %v4584_v2  ;;  %v4461_v44 = vpop.f32.mrf.mxu3 }
 0x66d   : > { %v12700_v61 = vadd.f32 1.0, %v8761_v62  ;;  %v12705_v56 = vpop.eup %8762  ;;  %vm4602_vm14 = vweird.f32 %v8759_v27  ;;  %v4622_v23 = vand.u32 2147483648, %v12656_v33  ;;  %v4376_v22 = vpop.f32.mrf.mxu0  ;;  %v4579_v15 = vsel %vm12676_vm6, %v4578_v7, %v4574_v4 }
 0x66e   : > { %v4598_v55 = vsub.f32 1.0, %v4597_v1  ;;  %v4612_v42 = vmul.f32 %v12705_v56, %v12656_v33  ;;  %v8765_v35 = vpop.eup %8764  ;;  %v12744_v2 = vadd.f32 %v4404_v38, %v12603_v6  ;;  %v4462_v40 = vadd.f32 %v4461_v44, %v4433_v9  ;;  %vm4603_vm2 = vmor %vm4601_vm0, %vm4602_vm14  ;;  %v4405_v8 = vpop.f32.mrf.mxu1 }
 0x66f   : > { %8766 = vrcp.f32 %v12700_v61  ;;  %v4589_v62 = vsel %vm12739_vm1, %v12654_v14, %v4585_v10  ;;  %v12753_v51 = vadd.f32 1.0, %v8765_v35  ;;  %v4377_v46 = vadd.f32 %v4376_v22, %v12525_v63 }
 0x670   : > { %v4599_v30 = vmul.f32 %v8759_v27, %v4598_v55  ;;  %v4613_v60 = vsub.f32 1.0, %v4612_v42  ;;  %8768 = vpow2.f32 %v7561_v28  ;;  %v7562_v1 = vmul.f32 -1.442695, %v12744_v2 }
 0x671   : > { %v12757_v36 = vadd.f32 %v4462_v40, %v12607_v24  ;;  %v12763_v14 = vmul.f32 %v4579_v15, %v12545_v45  ;;  %8770 = vrcp.f32 %v12753_v51  ;;  %vm4616_vm3 = vweird.f32 %v12656_v33 }
 0x672   : > { %v4600_v49 = vadd.f32 %v8759_v27, %v4599_v30  ;;  %v4614_v32 = vmul.f32 %v12705_v56, %v4613_v60  ;;  %v4623_v16 = vor.u32 1.1754944e-38, %v4622_v23  ;;  %vm12777_vm7 = vcmp.eq.f32.partialorder %v4620_v37, 8.507059e+37 }
 0x673   : > { %v4635_v9 = vand.u32 2147483647, %v12700_v61  ;;  %8772 = vpow2.f32 %v7562_v1  ;;  %v7563_v4 = vmul.f32 -1.442695, %v12757_v36  ;;  %vm4617_vm9 = vweird.f32 %v12705_v56 }
 0x674   : > { %v4604_v7 = vsel %vm4603_vm2, %v8759_v27, %v4600_v49  ;;  %v4594_v27 = vsel %vm12695_vm11, %v4593_v52, %v4589_v62  ;;  %v4434_v52 = vpop.f32.mrf.mxu2  ;;  %v4637_v42 = vand.u32 2147483648, %v12700_v61  ;;  %v4406_v30 = vadd.f32 %v4405_v8, %v4377_v46  ;;  %vm12813_vm6 = vmor %vm4616_vm3, %vm4617_vm9 }
 0x675   : > { %v12760_v54 = vpop.eup %8766  ;;  %v4609_v34 = vsel %vm12727_vm15, %v4608_v0, %v4604_v7  ;;  %v4615_v0 = vadd.f32 %v12705_v56, %v4614_v32  ;;  %8774 = vpow2.f32 %v7563_v4  ;;  %v4809_v60 = vadd.f32 %v12763_v14, %v12725_v21  ;;  %v4379_v11 = vpop.f32.mrf.mxu0 }
 0x676   : > { %v4627_v55 = vmul.f32 %v12760_v54, %v12700_v61  ;;  %v12775_v38 = vmul.f32 %v4609_v34, %v12566_v17  ;;  %v8769_v39 = vpop.eup %8768  ;;  %v12786_v17 = vmul.f32 %v4594_v27, %v12553_v5  ;;  %v12795_v44 = vadd.f32 %v4406_v30, %v12611_v47  ;;  %v4463_v7 = vpop.f32.mrf.mxu3 }
 0x677   : > { %v12792_v28 = vadd.f32 1.0, %v8769_v39  ;;  %v4435_v22 = vadd.f32 %v4434_v52, %v12532_v25  ;;  %v12798_v35 = vpop.eup %8770  ;;  %vm4631_vm4 = vweird.f32 %v12700_v61  ;;  %vm12801_vm5 = vcmp.eq.f32.partialorder %v4635_v9, 8.507059e+37  ;;  %4810 = vadd.xlane.f32.xlu1 %v4809_v60 }
 0x678   : > { %v4628_v10 = vsub.f32 1.0, %v4627_v55  ;;  %v4841_v15 = vmul.f32 %v12725_v21, %v12725_v21  ;;  %v4812_v49 = vadd.f32 %v12775_v38, %v12786_v17  ;;  %vm4632_vm8 = vweird.f32 %v12760_v54 }
 0x679   : > { %v4638_v62 = vor.u32 1.1754944e-38, %v4637_v42  ;;  %v4642_v37 = vmul.f32 %v12798_v35, %v12753_v51  ;;  %8776 = vrcp.f32 %v12792_v28  ;;  %v8773_v1 = vpop.eup %8772  ;;  %v4619_v46 = vsel %vm12813_vm6, %v12705_v56, %v4615_v0  ;;  %vm12840_vm0 = vmor %vm4631_vm4, %vm4632_vm8  ;;  %v4408_v0 = vpop.f32.mrf.mxu1 }
 0x67a   : > { %v4629_v23 = vmul.f32 %v12760_v54, %v4628_v10  ;;  %v7564_v34 = vmul.f32 -1.442695, %v12795_v44  ;;  %v4842_v32 = vmul.f32 %v12763_v14, %v12763_v14  ;;  %4813 = vadd.xlane.f32.xlu2 %v4812_v49  ;;  %v12828_v55 = vadd.f32 1.0, %v8773_v1 }
 0x67b   : > { %v4643_v27 = vsub.f32 1.0, %v4642_v37  ;;  %v4464_v9 = vadd.f32 %v4463_v7, %v4435_v22  ;;  %v4380_v4 = vadd.f32 %v4379_v11, %v12525_v63  ;;  %v8775_v8 = vpop.eup %8774  ;;  %vm4646_vm10 = vweird.f32 %v12753_v51 }
 0x67c   : > { %v4630_v33 = vadd.f32 %v12760_v54, %v4629_v23  ;;  %v4650_v52 = vand.u32 2147483647, %v12753_v51  ;;  %v4652_v56 = vand.u32 2147483648, %v12753_v51  ;;  %8778 = vpow2.f32 %v7564_v34  ;;  %v4437_v60 = vpop.f32.mrf.mxu2 }
 0x67d   : > { %v4624_v10 = vsel %vm12777_vm7, %v4623_v16, %v4619_v46  ;;  %v4644_v30 = vmul.f32 %v12798_v35, %v4643_v27  ;;  %vm4647_vm11 = vweird.f32 %v12798_v35  ;;  %8780 = vrcp.f32 %v12828_v55 }
 0x67e   : > { %v4634_v39 = vsel %vm12840_vm0, %v12760_v54, %v4630_v33  ;;  %v4667_v16 = vand.u32 2147483648, %v12792_v28  ;;  %v12851_v45 = vadd.f32 1.0, %v8775_v8  ;;  %v12854_v61 = vadd.f32 %v4464_v9, %v12615_v13  ;;  %vm12875_vm13 = vmor %vm4646_vm10, %vm4647_vm11  ;;  %v4381_v54 = vpop.f32.mrf.mxu0 }
 0x67f   : > { %v12856_v23 = vpop.eup %8776  ;;  %v4645_v22 = vadd.f32 %v12798_v35, %v4644_v30  ;;  %v4665_v11 = vand.u32 2147483647, %v12792_v28  ;;  %v4857_v49 = vadd.f32 %v4842_v32, %v4841_v15  ;;  %v4409_v40 = vadd.f32 %v4408_v0, %v4380_v4 }
 0x680   : > { %v12861_v37 = vmul.f32 %v4624_v10, %v12574_v18  ;;  %vm12863_vm12 = vcmp.eq.f32.partialorder %v4650_v52, 8.507059e+37  ;;  %v4653_v7 = vor.u32 1.1754944e-38, %v4652_v56  ;;  %v4657_v1 = vmul.f32 %v12856_v23, %v12792_v28 }
 0x681   : > { %v4639_v46 = vsel %vm12801_vm5, %v4638_v62, %v4634_v39  ;;  %vm4661_vm14 = vweird.f32 %v12792_v28  ;;  %8782 = vrcp.f32 %v12851_v45  ;;  %4858 = vadd.xlane.f32.xlu0 %v4857_v49  ;;  %v4843_v18 = vmul.f32 %v12786_v17, %v12786_v17 }
 0x682   : > { %v8779_v33 = vpop.eup %8778  ;;  %v4649_v5 = vsel %vm12875_vm13, %v12798_v35, %v4645_v22  ;;  %v4658_v62 = vsub.f32 1.0, %v4657_v1  ;;  %v4668_v34 = vor.u32 1.1754944e-38, %v4667_v16  ;;  %v7565_v51 = vmul.f32 -1.442695, %v12854_v61  ;;  %v4466_v35 = vpop.f32.mrf.mxu3 }
 0x683   : > { %v12887_v32 = vpop.eup %8780  ;;  %vm12889_vm15 = vcmp.eq.f32.partialorder %v4665_v11, 8.507059e+37  ;;  %v4682_v9 = vand.u32 2147483648, %v12828_v55  ;;  %v12894_v4 = vadd.f32 1.0, %v8779_v33  ;;  %v12897_v8 = vadd.f32 %v4409_v40, %v12627_v31 }
 0x684   : > { %v4438_v52 = vadd.f32 %v4437_v60, %v12532_v25  ;;  %v12901_v56 = vmul.f32 %v4639_v46, %v12618_v53  ;;  %v4659_v10 = vmul.f32 %v12856_v23, %v4658_v62  ;;  %v4672_v42 = vmul.f32 %v12887_v32, %v12828_v55 }
 0x685   : > { %v4680_v30 = vand.u32 2147483647, %v12828_v55  ;;  %v4654_v39 = vsel %vm12863_vm12, %v4653_v7, %v4649_v5  ;;  %vm4662_vm1 = vweird.f32 %v12856_v23  ;;  %vm4676_vm2 = vweird.f32 %v12828_v55  ;;  %v4439_v5 = vpop.f32.mrf.mxu2 }
 0x686   : > { %v4695_v16 = vand.u32 2147483647, %v12851_v45  ;;  %8784 = vrcp.f32 %v12894_v4  ;;  %v4660_v53 = vadd.f32 %v12856_v23, %v4659_v10  ;;  %v4673_v0 = vsub.f32 1.0, %v4672_v42  ;;  %vm12927_vm7 = vmor %vm4661_vm14, %vm4662_vm1 }
 0x687   : > { %8786 = vpow2.f32 %v7565_v51  ;;  %v7566_v60 = vmul.f32 -1.442695, %v12897_v8  ;;  %v12915_v22 = vpop.eup %8782  ;;  %v4683_v11 = vor.u32 1.1754944e-38, %v4682_v9  ;;  %vm4691_vm3 = vweird.f32 %v12851_v45 }
 0x688   : > { %v4467_v49 = vadd.f32 %v4466_v35, %v4438_v52  ;;  %v4844_v40 = vmul.f32 %v12775_v38, %v12775_v38  ;;  %v12921_v7 = vmul.f32 %v4654_v39, %v12652_v50  ;;  %v4674_v46 = vmul.f32 %v12887_v32, %v4673_v0 }
 0x689   : > { %v4687_v15 = vmul.f32 %v12915_v22, %v12851_v45  ;;  %v4697_v33 = vand.u32 2147483648, %v12851_v45  ;;  %v4664_v50 = vsel %vm12927_vm7, %v12856_v23, %v4660_v53  ;;  %vm12938_vm9 = vcmp.eq.f32.partialorder %v4680_v30, 8.507059e+37  ;;  %v8129_v45 = vld [vmem:[#allocation18 + $0x74] sm:$0xf] }
 0x68a   : > { %8788 = vpow2.f32 %v7566_v60  ;;  %v12943_v28 = vadd.f32 %v4467_v49, %v12631_v58  ;;  %v4860_v51 = vadd.f32 %v4844_v40, %v4843_v18  ;;  %vm4677_vm4 = vweird.f32 %v12887_v32  ;;  %v4410_v60 = vpop.f32.mrf.mxu1 }
 0x68b   : > { %v4688_v9 = vsub.f32 1.0, %v4687_v15  ;;  %vm12946_vm5 = vcmp.eq.f32.partialorder %v4695_v16, 8.507059e+37  ;;  %v4710_v35 = vand.u32 2147483647, %v12894_v4  ;;  %v4382_v23 = vadd.f32 %v4381_v54, %v12525_v63  ;;  %vm12972_vm8 = vmor %vm4676_vm2, %vm4677_vm4 }
 0x68c   : > { %v12952_v10 = vpop.eup %8784  ;;  %v4675_v42 = vadd.f32 %v12887_v32, %v4674_v46  ;;  %v7567_v30 = vmul.f32 -1.442695, %v12943_v28  ;;  %4861 = vadd.xlane.f32.xlu1 %v4860_v51  ;;  %v4815_v18 = vadd.f32 %v12901_v56, %v12861_v37  ;;  %v4440_v39 = vadd.f32 %v4439_v5, %v12532_v25  ;;  %v4468_v25 = vpop.f32.mrf.mxu3 }
 0x68d   : > { %v8787_v16 = vpop.eup %8786  ;;  %v4669_v53 = vsel %vm12889_vm15, %v4668_v34, %v4664_v50  ;;  %v4689_v0 = vmul.f32 %v12915_v22, %v4688_v9  ;;  %vm4692_vm6 = vweird.f32 %v12915_v22  ;;  %v4702_v63 = vmul.f32 %v12952_v10, %v12894_v4 }
 0x68e   : > { %v4712_v49 = vand.u32 2147483648, %v12894_v4  ;;  %v12966_v40 = vadd.f32 1.0, %v8787_v16  ;;  %8790 = vpow2.f32 %v7567_v30  ;;  %v4411_v54 = vadd.f32 %v4410_v60, %v4382_v23  ;;  %4816 = vadd.xlane.f32.xlu2 %v4815_v18  ;;  %vm12987_vm10 = vmor %vm4691_vm3, %vm4692_vm6 }
 0x68f   : > { %v4690_v27 = vadd.f32 %v12915_v22, %v4689_v0  ;;  %v4698_v1 = vor.u32 1.1754944e-38, %v4697_v33  ;;  %v4703_v46 = vsub.f32 1.0, %v4702_v63  ;;  %v4469_v15 = vadd.f32 %v4468_v25, %v4440_v39 }
 0x690   : > { %v8789_v5 = vpop.eup %8788  ;;  %v12978_v50 = vmul.f32 %v4669_v53, %v12703_v26  ;;  %v4679_v51 = vsel %vm12972_vm8, %v12887_v32, %v4675_v42  ;;  %vm4707_vm0 = vweird.f32 %v12952_v10  ;;  %8792 = vrcp.f32 %v12966_v40 }
 0x691   : > { %v4694_v26 = vsel %vm12987_vm10, %v12915_v22, %v4690_v27  ;;  %v4704_v33 = vmul.f32 %v12952_v10, %v4703_v46  ;;  %v12997_v9 = vadd.f32 1.0, %v8789_v5  ;;  %v13000_v32 = vadd.f32 %v4411_v54, %v12622_v48 }
 0x692   : > { %vm4706_vm11 = vweird.f32 %v12894_v4  ;;  %vm13003_vm12 = vcmp.eq.f32.partialorder %v4710_v35, 8.507059e+37  ;;  %v4713_v23 = vor.u32 1.1754944e-38, %v4712_v49  ;;  %v13008_v42 = vadd.f32 %v4469_v15, %v12637_v59 }
 0x693   : > { %v4684_v22 = vsel %vm12938_vm9, %v4683_v11, %v4679_v51  ;;  %v4705_v30 = vadd.f32 %v12952_v10, %v4704_v33  ;;  %8794 = vrcp.f32 %v12997_v9  ;;  %v4845_v18 = vmul.f32 %v12861_v37, %v12861_v37  ;;  %vm13020_vm13 = vmor %vm4706_vm11, %vm4707_vm0 }
 0x694   : > { %v8791_v39 = vpop.eup %8790  ;;  %v4699_v4 = vsel %vm12946_vm5, %v4698_v1, %v4694_v26  ;;  %v4725_v62 = vand.u32 2147483647, %v12966_v40  ;;  %v7568_v11 = vmul.f32 -1.442695, %v13000_v32  ;;  %v4846_v16 = vmul.f32 %v12901_v56, %v12901_v56 }
 0x695   : > { %v4709_v53 = vsel %vm13020_vm13, %v12952_v10, %v4705_v30  ;;  %v13031_v0 = vadd.f32 1.0, %v8791_v39  ;;  %v7569_v52 = vmul.f32 -1.442695, %v13008_v42  ;;  %v4818_v63 = vadd.f32 %v12978_v50, %v12921_v7  ;;  %v8145_v39 = vld [vmem:[#allocation18 + $0xf4] sm:$0xf] }
 0x696   : > { %v13036_v60 = vpop.eup %8792  ;;  %v13039_v49 = vmul.f32 %v4684_v22, %v12744_v2  ;;  %v4727_v54 = vand.u32 2147483648, %v12966_v40  ;;  %v4742_v25 = vand.u32 2147483648, %v12997_v9  ;;  %8796 = vpow2.f32 %v7568_v11 }
 0x697   : > { %v13044_v34 = vmul.f32 %v4699_v4, %v12757_v36  ;;  %v4717_v10 = vmul.f32 %v13036_v60, %v12966_v40  ;;  %vm4721_vm14 = vweird.f32 %v12966_v40  ;;  %8798 = vrcp.f32 %v13031_v0  ;;  %4819 = vadd.xlane.f32.xlu0 %v4818_v63  ;;  %v7694_v4 = vld [vmem:[#allocation18 + $0xf8] sm:$0xf0]  ;;  %v8130_v63 = vld [vmem:[#allocation18 + $0x74] sm:$0xf0] }
 0x698   : > { %v4714_v2 = vsel %vm13003_vm12, %v4713_v23, %v4709_v53  ;;  %vm13052_vm15 = vcmp.eq.f32.partialorder %v4725_v62, 8.507059e+37  ;;  %v4740_v1 = vand.u32 2147483647, %v12997_v9  ;;  %8800 = vpow2.f32 %v7569_v52  ;;  %v7630_v23 = vld [vmem:[#allocation18 + $0x78] sm:$0xf0] }
 0x699   : > { %v13057_v36 = vpop.eup %8794  ;;  %v4718_v46 = vsub.f32 1.0, %v4717_v10  ;;  %v4863_v15 = vadd.f32 %v4846_v16, %v4845_v18  ;;  %v4847_v5 = vmul.f32 %v12921_v7, %v12921_v7  ;;  %v4848_v51 = vmul.f32 %v12978_v50, %v12978_v50  ;;  %v7628_v52 = vld [vmem:[#allocation18 + $0x70] sm:$0xf] }
 0x69a   : > { %v4728_v55 = vor.u32 1.1754944e-38, %v4727_v54  ;;  %v4732_v26 = vmul.f32 %v13057_v36, %v12997_v9  ;;  %vm4736_vm1 = vweird.f32 %v12997_v9  ;;  %v4743_v33 = vor.u32 1.1754944e-38, %v4742_v25  ;;  %v7684_v9 = vld [vmem:[#allocation18 + $0xe0] sm:$0xf] }
 0x69b   : > { %v4719_v22 = vmul.f32 %v13036_v60, %v4718_v46  ;;  %vm4722_vm2 = vweird.f32 %v13036_v60  ;;  %4864 = vadd.xlane.f32.xlu1 %v4863_v15  ;;  %v4866_v30 = vadd.f32 %v4848_v51, %v4847_v5  ;;  %v4821_v18 = vadd.f32 %v13044_v34, %v13039_v49 }
 0x69c   : > { %v8797_v35 = vpop.eup %8796  ;;  %v13071_v62 = vmul.f32 %v4714_v2, %v12795_v44  ;;  %v4733_v11 = vsub.f32 1.0, %v4732_v26  ;;  %v4850_v16 = vmul.f32 %v13044_v34, %v13044_v34  ;;  %v7633_v53 = vor.u32 %v8129_v45, %v7630_v23  ;;  %vm13084_vm3 = vmor %vm4721_vm14, %vm4722_vm2  ;;  %v7692_v45 = vld [vmem:[#allocation18 + $0xf0] sm:$0xf]  ;;  %v8146_v23 = vld [vmem:[#allocation18 + $0xf4] sm:$0xf0] }
 0x69d   : > { %v13075_v54 = vpop.eup %8798  ;;  %v4720_v25 = vadd.f32 %v13036_v60, %v4719_v22  ;;  %v13078_v10 = vadd.f32 1.0, %v8797_v35  ;;  %4867 = vadd.xlane.f32.xlu2 %v4866_v30  ;;  %v7697_v46 = vor.u32 %v8145_v39, %v7694_v4  ;;  %v7629_v15 = vor.u32 %v8130_v63, %v7628_v52  ;;  %v8127_v39 = vld [vmem:[#allocation18 + $0x64] sm:$0xf]  ;;  %v7622_v4 = vld [vmem:[#allocation18 + $0x68] sm:$0xf0] }
 0x69e   : > { %v8801_v5 = vpop.eup %8800  ;;  %v4734_v2 = vmul.f32 %v13057_v36, %v4733_v11  ;;  %vm4737_vm7 = vweird.f32 %v13057_v36  ;;  %v4747_v51 = vmul.f32 %v13075_v54, %v13031_v0  ;;  %v4755_v26 = vand.u32 2147483647, %v13031_v0  ;;  %5347 = vmatpush.bf16.msrb.mxu2 %v7633_v53  ;;  %v8143_v63 = vld [vmem:[#allocation18 + $0xe4] sm:$0xf]  ;;  %v7620_v44 = vld [vmem:[#allocation18 + $0x60] sm:$0xf] }
 0x69f   : > { %v4724_v40 = vsel %vm13084_vm3, %v13036_v60, %v4720_v25  ;;  %v4757_v22 = vand.u32 2147483648, %v13031_v0  ;;  %8802 = vrcp.f32 %v13078_v10  ;;  %4822 = vadd.xlane.f32.xlu0 %v4821_v18  ;;  %v4849_v30 = vmul.f32 %v13039_v49, %v13039_v49  ;;  %5376 = vmatpush.bf16.msrb.mxu3 %v7697_v46  ;;  %vm13111_vm4 = vmor %vm4736_vm1, %vm4737_vm7 }
 0x6a0   : > { %v4729_v35 = vsel %vm13052_vm15, %v4728_v55, %v4724_v40  ;;  %v4735_v11 = vadd.f32 %v13057_v36, %v4734_v2  ;;  %v4748_v53 = vsub.f32 1.0, %v4747_v51  ;;  %vm4752_vm9 = vweird.f32 %v13075_v54  ;;  %5289 = vmatpush.bf16.msrb.mxu0 %v7629_v15  ;;  %v7686_v15 = vld [vmem:[#allocation18 + $0xe8] sm:$0xf0]  ;;  %v8128_v2 = vld [vmem:[#allocation18 + $0x64] sm:$0xf0] }
 0x6a1   : > { %v13105_v60 = vmul.f32 %v4729_v35, %v12854_v61  ;;  %v13115_v52 = vadd.f32 1.0, %v8801_v5  ;;  %v4869_v27 = vadd.f32 %v4850_v16, %v4849_v30  ;;  %v7693_v55 = vor.u32 %v8146_v23, %v7692_v45  ;;  %v8144_v30 = vld [vmem:[#allocation18 + $0xe4] sm:$0xf0] }
 0x6a2   : > { %v4739_v25 = vsel %vm13111_vm4, %v13057_v36, %v4735_v11  ;;  %v4749_v61 = vmul.f32 %v13075_v54, %v4748_v53  ;;  %v7625_v46 = vor.u32 %v8127_v39, %v7622_v4  ;;  %vm4741_vm5 = vcmp.eq.f32.partialorder %v4740_v1, 8.507059e+37  ;;  %v8125_v39 = vld [vmem:[#allocation18 + $0x54] sm:$0xf]  ;;  %v7614_v4 = vld [vmem:[#allocation18 + $0x58] sm:$0xf0] }
 0x6a3   : > { %vm4751_vm6 = vweird.f32 %v13031_v0  ;;  %8804 = vrcp.f32 %v13115_v52  ;;  %5318 = vmatpush.bf16.msrb.mxu1 %v7693_v55  ;;  %v4744_v16 = vsel %vm4741_vm5, %v4743_v33, %v4739_v25  ;;  %v4758_v51 = vor.u32 1.1754944e-38, %v4757_v22  ;;  %v8141_v11 = vld [vmem:[#allocation18 + $0xd4] sm:$0xf]  ;;  %v7678_v53 = vld [vmem:[#allocation18 + $0xd8] sm:$0xf0] }
 0x6a4   : > { %v4750_v5 = vadd.f32 %v13075_v54, %v4749_v61  ;;  %vm13128_vm8 = vmor %vm4751_vm6, %vm4752_vm9  ;;  %v4824_v45 = vadd.f32 %v13105_v60, %v13071_v62  ;;  %5348 = vmatpush.bf16.msrb.mxu2 %v7625_v46  ;;  %v4851_v0 = vmul.f32 %v13071_v62, %v13071_v62  ;;  %v4852_v33 = vmul.f32 %v13105_v60, %v13105_v60 }
 0x6a5   : > { %v8803_v1 = vpop.eup %8802  ;;  %4870 = vadd.xlane.f32.xlu2 %v4869_v27  ;;  %v7689_v23 = vor.u32 %v8143_v63, %v7686_v15  ;;  %v7621_v40 = vor.u32 %v8128_v2, %v7620_v44  ;;  %vm4756_vm10 = vcmp.eq.f32.partialorder %v4755_v26, 8.507059e+37  ;;  %v13143_v18 = vmul.f32 %v4744_v16, %v12897_v8 }
 0x6a6   : > { %v4754_v22 = vsel %vm13128_vm8, %v13075_v54, %v4750_v5  ;;  %v4762_v35 = vmul.f32 %v8803_v1, %v13078_v10  ;;  %4825 = vadd.xlane.f32.xlu1 %v4824_v45  ;;  %v4872_v55 = vadd.f32 %v4852_v33, %v4851_v0  ;;  %v7685_v61 = vor.u32 %v8144_v30, %v7684_v9 }
 0x6a7   : > { %v4759_v27 = vsel %vm4756_vm10, %v4758_v51, %v4754_v22  ;;  %5377 = vmatpush.bf16.msrb.mxu3 %v7689_v23  ;;  %5290 = vmatpush.bf16.msrb.mxu0 %v7621_v40  ;;  %v7617_v46 = vor.u32 %v8125_v39, %v7614_v4  ;;  %v4770_v26 = vand.u32 2147483647, %v13078_v10  ;;  %v4772_v15 = vand.u32 2147483648, %v13078_v10 }
 0x6a8   : > { %v13146_v63 = vmul.f32 %v4759_v27, %v12943_v28  ;;  %v4763_v25 = vsub.f32 1.0, %v4762_v35  ;;  %4873 = vadd.xlane.f32.xlu0 %v4872_v55  ;;  %v7681_v44 = vor.u32 %v8141_v11, %v7678_v53  ;;  %vm4767_vm0 = vweird.f32 %v8803_v1  ;;  %5319 = vmatpush.bf16.msrb.mxu1 %v7685_v61  ;;  %v8126_v55 = vld [vmem:[#allocation18 + $0x54] sm:$0xf0] }
 0x6a9   : > { %v8805_v54 = vpop.eup %8804  ;;  %5349 = vmatpush.bf16.msrb.mxu2 %v7617_v46  ;;  %v4853_v28 = vmul.f32 %v13143_v18, %v13143_v18  ;;  %vm4766_vm11 = vweird.f32 %v13078_v10  ;;  %vm4771_vm13 = vcmp.eq.f32.partialorder %v4770_v26, 8.507059e+37  ;;  %v4773_v45 = vor.u32 1.1754944e-38, %v4772_v15  ;;  %v7676_v46 = vld [vmem:[#allocation18 + $0xd0] sm:$0xf]  ;;  %v8123_v15 = vld [vmem:[#allocation18 + $0x44] sm:$0xf] }
 0x6aa   : > { %v4764_v2 = vmul.f32 %v8803_v1, %v4763_v25  ;;  %v4777_v8 = vmul.f32 %v8805_v54, %v13115_v52  ;;  %v4827_v16 = vadd.f32 %v13146_v63, %v13143_v18  ;;  %v4854_v5 = vmul.f32 %v13146_v63, %v13146_v63  ;;  %vm4768_vm12 = vmor %vm4766_vm11, %vm4767_vm0 }
 0x6ab   : > { %5378 = vmatpush.bf16.msrb.mxu3 %v7681_v44  ;;  %v4787_v9 = vand.u32 2147483648, %v13115_v52  ;;  %vm4782_vm14 = vweird.f32 %v8805_v54  ;;  %v4785_v40 = vand.u32 2147483647, %v13115_v52  ;;  %vm4781_vm15 = vweird.f32 %v13115_v52  ;;  %v7606_v44 = vld [vmem:[#allocation18 + $0x48] sm:$0xf0] }
 0x6ac   : > { %v4765_v36 = vadd.f32 %v8803_v1, %v4764_v2  ;;  %v4778_v51 = vsub.f32 1.0, %v4777_v8  ;;  %v4875_v0 = vadd.f32 %v4854_v5, %v4853_v28  ;;  %vm4783_vm1 = vmor %vm4781_vm15, %vm4782_vm14  ;;  %v8139_v2 = vld [vmem:[#allocation18 + $0xc4] sm:$0xf]  ;;  %v7609_v8 = vor.u32 %v8123_v15, %v7606_v44  ;;  %v7604_v28 = vld [vmem:[#allocation18 + $0x40] sm:$0xf] }
 0x6ad   : > { %v4788_v4 = vor.u32 1.1754944e-38, %v4787_v9  ;;  %vm4786_vm2 = vcmp.eq.f32.partialorder %v4785_v40, 8.507059e+37  ;;  %v8124_v5 = vld [vmem:[#allocation18 + $0x44] sm:$0xf0]  ;;  %v7590_v15 = vld [vmem:[#allocation18 + $0x28] sm:$0xf0] }
 0x6ae   : > { %v4769_v33 = vsel %vm4768_vm12, %v8803_v1, %v4765_v36  ;;  %v4779_v23 = vmul.f32 %v8805_v54, %v4778_v51  ;;  %4828 = vadd.xlane.f32.xlu1 %v4827_v16  ;;  %v7670_v16 = vld [vmem:[#allocation18 + $0xc8] sm:$0xf0]  ;;  %v7605_v51 = vor.u32 %v8124_v5, %v7604_v28  ;;  %v8140_v9 = vld [vmem:[#allocation18 + $0xc4] sm:$0xf0]  ;;  %5350 = vmatpush.bf16.msrb.mxu2 %v7609_v8  ;;  %v8135_v44 = vld [vmem:[#allocation18 + $0xa4] sm:$0xf] }
 0x6af   : > { %v4774_v30 = vsel %vm4771_vm13, %v4773_v45, %v4769_v33  ;;  %v7673_v36 = vor.u32 %v8139_v2, %v7670_v16  ;;  %v7668_v45 = vld [vmem:[#allocation18 + $0xc0] sm:$0xf]  ;;  %v7654_v16 = vld [vmem:[#allocation18 + $0xa8] sm:$0xf0] }
 0x6b0   : > { %v4780_v39 = vadd.f32 %v8805_v54, %v4779_v23  ;;  %4876 = vadd.xlane.f32.xlu0 %v4875_v0  ;;  %v13162_v10 = vmul.f32 %v4774_v30, %v13000_v32  ;;  %v7612_v32 = vld [vmem:[#allocation18 + $0x50] sm:$0xf]  ;;  %v7669_v0 = vor.u32 %v8140_v9, %v7668_v45  ;;  %v8121_v30 = vld [vmem:[#allocation18 + $0x34] sm:$0xf]  ;;  %v7588_v28 = vld [vmem:[#allocation18 + $0x20] sm:$0xf]  ;;  %v7657_v5 = vor.u32 %v8135_v44, %v7654_v16 }
 0x6b1   : > { %v7613_v25 = vor.u32 %v8126_v55, %v7612_v32  ;;  %5379 = vmatpush.bf16.msrb.mxu3 %v7673_v36  ;;  %v7660_v32 = vld [vmem:[#allocation18 + $0xb0] sm:$0xf]  ;;  %v8138_v55 = vld [vmem:[#allocation18 + $0xb4] sm:$0xf0]  ;;  %v8120_v36 = vld [vmem:[#allocation18 + $0x24] sm:$0xf0] }
 0x6b2   : > { %v4784_v22 = vsel %vm4783_vm1, %v8805_v54, %v4780_v39  ;;  %v4855_v53 = vmul.f32 %v13162_v10, %v13162_v10  ;;  %v7598_v39 = vld [vmem:[#allocation18 + $0x38] sm:$0xf0]  ;;  %v8136_v45 = vld [vmem:[#allocation18 + $0xa4] sm:$0xf0]  ;;  %v7589_v9 = vor.u32 %v8120_v36, %v7588_v28  ;;  %v7638_v16 = vld [vmem:[#allocation18 + $0x88] sm:$0xf0] }
 0x6b3   : > { %v4789_v35 = vsel %vm4786_vm2, %v4788_v4, %v4784_v22  ;;  %5291 = vmatpush.bf16.msrb.mxu0 %v7613_v25  ;;  %v8137_v4 = vld [vmem:[#allocation18 + $0xb4] sm:$0xf]  ;;  %v7572_v28 = vld [vmem:[#allocation18] sm:$0xf] }
 0x6b4   : > { %v13165_v1 = vmul.f32 %v4789_v35, %v13008_v42  ;;  %v8142_v42 = vld [vmem:[#allocation18 + $0xd4] sm:$0xf0]  ;;  %v7601_v35 = vor.u32 %v8121_v30, %v7598_v39 }
 0x6b5   : > { %v7677_v54 = vor.u32 %v8142_v42, %v7676_v46  ;;  %v7661_v42 = vor.u32 %v8138_v55, %v7660_v32  ;;  %v8134_v32 = vld [vmem:[#allocation18 + $0x94] sm:$0xf0] }
 0x6b6   : > { %v4830_v11 = vadd.f32 %v13165_v1, %v13162_v10  ;;  %v4856_v52 = vmul.f32 %v13165_v1, %v13165_v1  ;;  %5351 = vmatpush.bf16.msrb.mxu2 %v7601_v35  ;;  %v8118_v35 = vld [vmem:[#allocation18 + $0x14] sm:$0xf0] }
 0x6b7   : > { %5320 = vmatpush.bf16.msrb.mxu1 %v7677_v54  ;;  %5292 = vmatpush.bf16.msrb.mxu0 %v7605_v51  ;;  %v8119_v54 = vld [vmem:[#allocation18 + $0x24] sm:$0xf]  ;;  %v7652_v51 = vld [vmem:[#allocation18 + $0xa0] sm:$0xf] }
 0x6b8   : > { %4831 = vadd.xlane.f32.xlu2 %v4830_v11  ;;  %v4878_v27 = vadd.f32 %v4856_v52, %v4855_v53  ;;  %v7662_v11 = vld [vmem:[#allocation18 + $0xb8] sm:$0xf0]  ;;  %v7596_v53 = vld [vmem:[#allocation18 + $0x30] sm:$0xf]  ;;  %v7593_v8 = vor.u32 %v8119_v54, %v7590_v15  ;;  %v8131_v54 = vld [vmem:[#allocation18 + $0x84] sm:$0xf] }
 0x6b9   : > { %v7665_v52 = vor.u32 %v8137_v4, %v7662_v11  ;;  %v7646_v4 = vld [vmem:[#allocation18 + $0x98] sm:$0xf0]  ;;  %v7641_v36 = vor.u32 %v8131_v54, %v7638_v16 }
 0x6ba   : > { %4879 = vadd.xlane.f32.xlu1 %v4878_v27  ;;  %v8122_v27 = vld [vmem:[#allocation18 + $0x34] sm:$0xf0]  ;;  %5352 = vmatpush.bf16.msrb.mxu2 %v7593_v8 }
 0x6bb   : > { %5321 = vmatpush.bf16.msrb.mxu1 %v7669_v0  ;;  %v7597_v46 = vor.u32 %v8122_v27, %v7596_v53  ;;  %5380 = vmatpush.bf16.msrb.mxu3 %v7665_v52  ;;  %v7653_v0 = vor.u32 %v8136_v45, %v7652_v51  ;;  %v7644_v27 = vld [vmem:[#allocation18 + $0x90] sm:$0xf]  ;;  %v8116_v51 = vld [vmem:[#allocation18 + $0x4] sm:$0xf0]  ;;  %v7636_v45 = vld [vmem:[#allocation18 + $0x80] sm:$0xf] }
 0x6bd   : > { %5293 = vmatpush.bf16.msrb.mxu0 %v7597_v46  ;;  %v8115_v46 = vld [vmem:[#allocation18 + $0x4] sm:$0xf] }
 0x6bf   : > { %5322 = vmatpush.bf16.msrb.mxu1 %v7661_v42  ;;  %5381 = vmatpush.bf16.msrb.mxu3 %v7657_v5  ;;  %v7574_v42 = vld [vmem:[#allocation18 + $0x8] sm:$0xf0] }
 0x6c0   : > { %v7577_v8 = vor.u32 %v8115_v46, %v7574_v42 }
 0x6c1   : > { %5294 = vmatpush.bf16.msrb.mxu0 %v7589_v9  ;;  %v8132_v9 = vld [vmem:[#allocation18 + $0x84] sm:$0xf0] }
 0x6c3   : > { %5323 = vmatpush.bf16.msrb.mxu1 %v7653_v0 }
 0x6ea   : > { %v4811_v61 = vpop.xlane.xlu1 %4810 }
 0x6eb   : > { %v13173_v26 = vmul.f32 0.00390625, %v4811_v61 }
 0x6ed   : > { %v4889_v33 = vmul.f32 %v13173_v26, %v13173_v26  ;;  %v4814_v40 = vpop.xlane.xlu2 %4813 }
 0x6ee   : > { %v13177_v61 = vmul.f32 0.00390625, %v4814_v40  ;;  %v8133_v40 = vld [vmem:[#allocation18 + $0x94] sm:$0xf] }
 0x6ef   : > { %v7649_v53 = vor.u32 %v8133_v40, %v7646_v4  ;;  %v7637_v40 = vor.u32 %v8132_v9, %v7636_v45 }
 0x6f0   : > { %v4890_v30 = vmul.f32 %v13177_v61, %v13177_v61 }
 0x6f1   : > { %5382 = vmatpush.bf16.msrb.mxu3 %v7649_v53 }
 0x6f4   : > { %v4859_v23 = vpop.xlane.xlu0 %4858 }
 0x6f5   : > { %v4881_v22 = vmul.f32 0.00390625, %v4859_v23  ;;  %v7582_v23 = vld [vmem:[#allocation18 + $0x18] sm:$0xf0]  ;;  %5383 = vmatpush.bf16.msrb.mxu3 %v7641_v36 }
 0x6f7   : > { %v4897_v25 = vsub.f32 %v4881_v22, %v4889_v33  ;;  %v8117_v33 = vld [vmem:[#allocation18 + $0x14] sm:$0xf]  ;;  %v7580_v22 = vld [vmem:[#allocation18 + $0x10] sm:$0xf] }
 0x6f8   : > { %v7585_v39 = vor.u32 %v8117_v33, %v7582_v23  ;;  %v7581_v52 = vor.u32 %v8118_v35, %v7580_v22  ;;  %v7573_v23 = vor.u32 %v8116_v51, %v7572_v28 }
 0x6f9   : > { %v13179_v2 = vadd.f32 0.1, %v4897_v25  ;;  %v7645_v25 = vor.u32 %v8134_v32, %v7644_v27 }
 0x6fa   : > { %5353 = vmatpush.bf16.msrb.mxu2 %v7585_v39  ;;  %5295 = vmatpush.bf16.msrb.mxu0 %v7581_v52  ;;  %v4807_v52 = vld [vmem:[%s14677_s21] sm:$0x3] }
 0x6fb   : > { %8806 = vrsqrt.f32 %v13179_v2  ;;  %5324 = vmatpush.bf16.msrb.mxu1 %v7645_v25  ;;  %vm4919_vm7 = vweird.f32 %v13179_v2  ;;  %v13199_v51 = vperm.slane %v4807_v52, 1 }
 0x6fe   : > { %5354 = vmatpush.bf16.msrb.mxu2 %v7577_v8  ;;  %5296 = vmatpush.bf16.msrb.mxu0 %v7573_v23 }
 0x6ff   : > { %v4862_v11 = vpop.xlane.xlu1 %4861  ;;  %5325 = vmatpush.bf16.msrb.mxu1 %v7637_v40 }
 0x700   : > { %v4882_v55 = vmul.f32 0.00390625, %v4862_v11 }
 0x701   : > { %v8807_v15 = vpop.eup %8806  ;;  %v4817_v39 = vpop.xlane.xlu2 %4816 }
 0x702   : > { %v4898_v44 = vsub.f32 %v4882_v55, %v4890_v30  ;;  %v4914_v5 = vmul.f32 %v8807_v15, %v13179_v2  ;;  %v13185_v22 = vmul.f32 0.00390625, %v4817_v39  ;;  %vm4920_vm3 = vweird.f32 %v8807_v15 }
 0x703   : > { %vm4921_vm9 = vmor %vm4919_vm7, %vm4920_vm3 }
 0x704   : > { %v4906_v0 = vadd.f32 0.1, %v4898_v44  ;;  %v4915_v33 = vmul.f32 %v8807_v15, %v4914_v5  ;;  %v4891_v55 = vmul.f32 %v13185_v22, %v13185_v22  ;;  %v13197_v44 = vperm.slane %v4807_v52, 0 }
 0x706   : > { %8808 = vrsqrt.f32 %v4906_v0  ;;  %v4916_v30 = vmul.f32 0.5, %v4915_v33  ;;  %vm4929_vm5 = vweird.f32 %v4906_v0 }
 0x708   : > { %v4917_v4 = vsub.f32 1.5, %v4916_v30  ;;  %v4808_v30 = vld [vmem:[#allocation24] sm:$0x3] }
 0x70a   : > { %v4820_v35 = vpop.xlane.xlu0 %4819  ;;  %v4918_v27 = vmul.f32 %v8807_v15, %v4917_v4  ;;  %v5014_v4 = vsub.f32 %v12725_v21, %v13173_v26 }
 0x70b   : > { %v13187_v11 = vmul.f32 0.00390625, %v4820_v35  ;;  %v5015_v35 = vsub.f32 %v12763_v14, %v13173_v26 }
 0x70c   : > { %v8809_v53 = vpop.eup %8808  ;;  %v4922_v16 = vsel %vm4921_vm9, %v8807_v15, %v4918_v27  ;;  %v5016_v27 = vsub.f32 %v12786_v17, %v13177_v61 }
 0x70d   : > { %v4924_v32 = vmul.f32 %v8809_v53, %v4906_v0  ;;  %v4892_v54 = vmul.f32 %v13187_v11, %v13187_v11  ;;  %vm4930_vm4 = vweird.f32 %v8809_v53  ;;  %v4998_v40 = vmul.f32 %v13197_v44, %v4922_v16 }
 0x70e   : > { %v4865_v25 = vpop.xlane.xlu1 %4864  ;;  %v4999_v52 = vmul.f32 %v13199_v51, %v4922_v16  ;;  %vm4931_vm6 = vmor %vm4929_vm5, %vm4930_vm4  ;;  %v5017_v0 = vsub.f32 %v12775_v38, %v13177_v61 }
 0x70f   : > { %v4925_v46 = vmul.f32 %v8809_v53, %v4924_v32  ;;  %v4883_v42 = vmul.f32 0.00390625, %v4865_v25  ;;  %v5030_v21 = vmul.f32 %v5014_v4, %v4998_v40 }
 0x710   : > { %v4868_v8 = vpop.xlane.xlu2 %4867 }
 0x711   : > { %v4926_v28 = vmul.f32 0.5, %v4925_v46  ;;  %v4899_v5 = vsub.f32 %v4883_v42, %v4891_v55  ;;  %v4884_v36 = vmul.f32 0.00390625, %v4868_v8  ;;  %v13224_v46 = vperm.slane %v4808_v30, 0 }
 0x712   : > { %v4823_v45 = vpop.xlane.xlu0 %4822  ;;  %v5031_v8 = vmul.f32 %v5015_v35, %v4999_v52 }
 0x713   : > { %v4927_v9 = vsub.f32 1.5, %v4926_v28  ;;  %v13201_v33 = vadd.f32 0.1, %v4899_v5  ;;  %v4900_v2 = vsub.f32 %v4884_v36, %v4892_v54  ;;  %v13203_v23 = vmul.f32 0.00390625, %v4823_v45 }
 0x714   : > { %v13226_v54 = vperm.slane %v4808_v30, 1  ;;  %v13232_v45 = vadd.f32 %v13224_v46, %v5030_v21 }
 0x715   : > { %v4928_v39 = vmul.f32 %v8809_v53, %v4927_v9  ;;  %8810 = vrsqrt.f32 %v13201_v33  ;;  %v13207_v15 = vadd.f32 0.1, %v4900_v2  ;;  %v4893_v55 = vmul.f32 %v13203_v23, %v13203_v23 }
 0x716   : > { %v13243_v52 = vadd.f32 %v13226_v54, %v5031_v8  ;;  %vm4939_vm10 = vweird.f32 %v13201_v33 }
 0x717   : > { %v4932_v32 = vsel %vm4931_vm6, %v8809_v53, %v4928_v39  ;;  %8812 = vrsqrt.f32 %v13207_v15  ;;  %vm4949_vm12 = vweird.f32 %v13207_v15 }
 0x718   : > { %v5000_v25 = vmul.f32 %v13197_v44, %v4932_v32  ;;  %v5001_v14 = vmul.f32 %v13199_v51, %v4932_v32  ;;  %v4871_v26 = vpop.xlane.xlu2 %4870 }
 0x719   : > { %v4885_v17 = vmul.f32 0.00390625, %v4871_v26  ;;  %v4826_v42 = vpop.xlane.xlu1 %4825 }
 0x71a   : > { %v5032_v38 = vmul.f32 %v5016_v27, %v5000_v25  ;;  %v5033_v61 = vmul.f32 %v5017_v0, %v5001_v14  ;;  %v13228_v53 = vmul.f32 0.00390625, %v4826_v42 }
 0x71b   : > { %v8811_v16 = vpop.eup %8810  ;;  %v4901_v28 = vsub.f32 %v4885_v17, %v4893_v55  ;;  %v4874_v36 = vpop.xlane.xlu0 %4873 }
 0x71c   : > { %v4934_v5 = vmul.f32 %v8811_v16, %v13201_v33  ;;  %v4894_v40 = vmul.f32 %v13228_v53, %v13228_v53  ;;  %v4886_v39 = vmul.f32 0.00390625, %v4874_v36  ;;  %v13239_v30 = vadd.f32 %v13224_v46, %v5032_v38 }
 0x71d   : > { %v8813_v9 = vpop.eup %8812  ;;  %v13234_v2 = vadd.f32 0.1, %v4901_v28  ;;  %v13246_v27 = vadd.f32 %v13226_v54, %v5033_v61  ;;  %vm4940_vm8 = vweird.f32 %v8811_v16 }
 0x71e   : > { %v4935_v4 = vmul.f32 %v8811_v16, %v4934_v5  ;;  %v4944_v35 = vmul.f32 %v8813_v9, %v13207_v15  ;;  %v4902_v0 = vsub.f32 %v4886_v39, %v4894_v40  ;;  %v5083_v32 = vpack.c.bf16 %v13239_v30, %v13232_v45  ;;  %vm4941_vm11 = vmor %vm4939_vm10, %vm4940_vm8 }
 0x71f   : > { %8814 = vrsqrt.f32 %v13234_v2  ;;  %v5084_v25 = vpack.c.bf16 %v13246_v27, %v13243_v52  ;;  %vm4950_vm0 = vweird.f32 %v8813_v9  ;;  %vm4959_vm15 = vweird.f32 %v13234_v2 }
 0x720   : > { %v4936_v55 = vmul.f32 0.5, %v4935_v4  ;;  %v4945_v21 = vmul.f32 %v8813_v9, %v4944_v35  ;;  %v13253_v14 = vadd.f32 0.1, %v4902_v0  ;;  %5297 = vmatmul.bf16.vlgmr.msrb.gmra.mxu0 %v5083_v32  ;;  %5355 = vmatmul.bf16.vlgmr.msrb.gmra.mxu2 %v5083_v32  ;;  %v5018_v0 = vsub.f32 %v12861_v37, %v13185_v22  ;;  %vm4951_vm13 = vmor %vm4949_vm12, %vm4950_vm0 }
 0x721   : > { %v4829_v26 = vpop.xlane.xlu1 %4828  ;;  %5326 = vmatmul.bf16.vlgmr.msrb.gmra.mxu1 %v5084_v25  ;;  %5384 = vmatmul.bf16.vlgmr.msrb.gmra.mxu3 %v5084_v25 }
 0x722   : > { %v4937_v17 = vsub.f32 1.5, %v4936_v55  ;;  %v4946_v42 = vmul.f32 0.5, %v4945_v21  ;;  %v13255_v8 = vmul.f32 0.00390625, %v4829_v26  ;;  %8816 = vrsqrt.f32 %v13253_v14 }
 0x723   : > { %v4877_v28 = vpop.xlane.xlu0 %4876  ;;  %v5019_v21 = vsub.f32 %v12901_v56, %v13185_v22  ;;  %vm4969_vm3 = vweird.f32 %v13253_v14 }
 0x724   : > { %v4938_v38 = vmul.f32 %v8811_v16, %v4937_v17  ;;  %v4947_v61 = vsub.f32 1.5, %v4946_v42  ;;  %v4895_v36 = vmul.f32 %v13255_v8, %v13255_v8  ;;  %v4887_v40 = vmul.f32 0.00390625, %v4877_v28 }
 0x725   : > { %v8815_v5 = vpop.eup %8814 }
 0x726   : > { %v4942_v39 = vsel %vm4941_vm11, %v8811_v16, %v4938_v38  ;;  %v4948_v4 = vmul.f32 %v8813_v9, %v4947_v61  ;;  %v4954_v35 = vmul.f32 %v8815_v5, %v13234_v2  ;;  %v4903_v33 = vsub.f32 %v4887_v40, %v4895_v36 }
 0x727   : > { %v5002_v32 = vmul.f32 %v13197_v44, %v4942_v39  ;;  %v5003_v55 = vmul.f32 %v13199_v51, %v4942_v39  ;;  %v5020_v16 = vsub.f32 %v12921_v7, %v13187_v11  ;;  %v5021_v61 = vsub.f32 %v12978_v50, %v13187_v11 }
 0x728   : > { %v4952_v25 = vsel %vm4951_vm13, %v8813_v9, %v4948_v4  ;;  %v4955_v26 = vmul.f32 %v8815_v5, %v4954_v35  ;;  %v8817_v15 = vpop.eup %8816  ;;  %v13271_v17 = vadd.f32 0.1, %v4903_v33  ;;  %vm4960_vm14 = vweird.f32 %v8815_v5 }
 0x729   : > { %v5004_v42 = vmul.f32 %v13197_v44, %v4952_v25  ;;  %v5034_v37 = vmul.f32 %v5018_v0, %v5002_v32  ;;  %v5005_v38 = vmul.f32 %v13199_v51, %v4952_v25  ;;  %v4964_v36 = vmul.f32 %v8817_v15, %v13253_v14  ;;  %vm4961_vm1 = vmor %vm4959_vm15, %vm4960_vm14 }
 0x72a   : > { %v4956_v28 = vmul.f32 0.5, %v4955_v26  ;;  %v5035_v56 = vmul.f32 %v5019_v21, %v5003_v55  ;;  %8818 = vrsqrt.f32 %v13271_v17  ;;  %vm4970_vm2 = vweird.f32 %v8817_v15 }
 0x72b   : > { %v4832_v7 = vpop.xlane.xlu2 %4831  ;;  %v5036_v22 = vmul.f32 %v5020_v16, %v5004_v42  ;;  %v4965_v40 = vmul.f32 %v8817_v15, %v4964_v36  ;;  %v5037_v4 = vmul.f32 %v5021_v61, %v5005_v38  ;;  %v13282_v0 = vadd.f32 %v13224_v46, %v5034_v37  ;;  %vm4971_vm7 = vmor %vm4969_vm3, %vm4970_vm2 }
 0x72c   : > { %v4957_v9 = vsub.f32 1.5, %v4956_v28  ;;  %v13279_v39 = vmul.f32 0.00390625, %v4832_v7  ;;  %v13289_v32 = vadd.f32 %v13226_v54, %v5035_v56  ;;  %v5022_v56 = vsub.f32 %v13039_v49, %v13203_v23 }
 0x72d   : > { %v4880_v35 = vpop.xlane.xlu1 %4879  ;;  %v13285_v50 = vadd.f32 %v13224_v46, %v5036_v22  ;;  %v4966_v33 = vmul.f32 0.5, %v4965_v40  ;;  %v13297_v25 = vadd.f32 %v13226_v54, %v5037_v4  ;;  %v5025_v4 = vsub.f32 %v13105_v60, %v13228_v53 }
 0x72e   : > { %v4958_v11 = vmul.f32 %v8815_v5, %v4957_v9  ;;  %v4888_v55 = vmul.f32 0.00390625, %v4880_v35  ;;  %v4896_v21 = vmul.f32 %v13279_v39, %v13279_v39  ;;  %v5024_v9 = vsub.f32 %v13071_v62, %v13228_v53 }
 0x72f   : > { %v5085_v16 = vpack.c.bf16 %v13285_v50, %v13282_v0  ;;  %v4967_v42 = vsub.f32 1.5, %v4966_v33  ;;  %v5086_v38 = vpack.c.bf16 %v13297_v25, %v13289_v32  ;;  %v5023_v33 = vsub.f32 %v13044_v34, %v13203_v23 }
 0x730   : > { %v4962_v26 = vsel %vm4961_vm1, %v8815_v5, %v4958_v11  ;;  %v8819_v2 = vpop.eup %8818  ;;  %v4904_v37 = vsub.f32 %v4888_v55, %v4896_v21  ;;  %vm4979_vm4 = vweird.f32 %v13271_v17 }
 0x731   : > { %5302 = vmatmul.bf16.gmra.mxu0 %v5085_v16  ;;  %5360 = vmatmul.bf16.gmra.mxu2 %v5085_v16  ;;  %v4968_v61 = vmul.f32 %v8817_v15, %v4967_v42  ;;  %v4974_v28 = vmul.f32 %v8819_v2, %v13271_v17  ;;  %v5006_v5 = vmul.f32 %v13197_v44, %v4962_v26  ;;  %vm4980_vm9 = vweird.f32 %v8819_v2 }
 0x732   : > { %v4912_v36 = vadd.f32 0.1, %v4904_v37  ;;  %5331 = vmatmul.bf16.gmra.mxu1 %v5086_v38  ;;  %5389 = vmatmul.bf16.gmra.mxu3 %v5086_v38  ;;  %v5007_v14 = vmul.f32 %v13199_v51, %v4962_v26  ;;  %vm4981_vm5 = vmor %vm4979_vm4, %vm4980_vm9  ;;  %v5026_v17 = vsub.f32 %v13143_v18, %v13255_v8 }
 0x733   : > { %v4972_v7 = vsel %vm4971_vm7, %v8817_v15, %v4968_v61  ;;  %v4975_v22 = vmul.f32 %v8819_v2, %v4974_v28  ;;  %v5038_v49 = vmul.f32 %v5022_v56, %v5006_v5 }
 0x734   : > { %8820 = vrsqrt.f32 %v4912_v36  ;;  %v5008_v40 = vmul.f32 %v13197_v44, %v4972_v7  ;;  %v5009_v11 = vmul.f32 %v13199_v51, %v4972_v7  ;;  %v5039_v16 = vmul.f32 %v5023_v33, %v5007_v14 }
 0x735   : > { %v4976_v35 = vmul.f32 0.5, %v4975_v22  ;;  %v13319_v26 = vadd.f32 %v13224_v46, %v5038_v49  ;;  %vm4989_vm8 = vweird.f32 %v4912_v36 }
 0x736   : > { %v5040_v15 = vmul.f32 %v5024_v9, %v5008_v40  ;;  %v5041_v21 = vmul.f32 %v5025_v4, %v5009_v11  ;;  %v13327_v23 = vadd.f32 %v13226_v54, %v5039_v16  ;;  %v5028_v40 = vsub.f32 %v13162_v10, %v13279_v39 }
 0x737   : > { %v4977_v55 = vsub.f32 1.5, %v4976_v35  ;;  %v5029_v4 = vsub.f32 %v13165_v1, %v13279_v39 }
 0x738   : > { %v13316_v62 = vadd.f32 %v13224_v46, %v5040_v15  ;;  %v13322_v60 = vadd.f32 %v13226_v54, %v5041_v21 }
 0x739   : > { %v4978_v53 = vmul.f32 %v8819_v2, %v4977_v55 }
 0x73a   : > { %v8821_v42 = vpop.eup %8820  ;;  %v5087_v34 = vpack.c.bf16 %v13316_v62, %v13319_v26  ;;  %v5088_v61 = vpack.c.bf16 %v13322_v60, %v13327_v23 }
 0x73b   : > { %v4984_v37 = vmul.f32 %v8821_v42, %v4912_v36  ;;  %v4982_v28 = vsel %vm4981_vm5, %v8819_v2, %v4978_v53  ;;  %vm4990_vm6 = vweird.f32 %v8821_v42  ;;  %v5027_v2 = vsub.f32 %v13146_v63, %v13255_v8 }
 0x73c   : > { %v5010_v7 = vmul.f32 %v13197_v44, %v4982_v28  ;;  %vm4991_vm10 = vmor %vm4989_vm8, %vm4990_vm6  ;;  %v5011_v9 = vmul.f32 %v13199_v51, %v4982_v28 }
 0x73d   : > { %v4985_v38 = vmul.f32 %v8821_v42, %v4984_v37 }
 0x73e   : > { %v5042_v11 = vmul.f32 %v5026_v17, %v5010_v7  ;;  %v5043_v18 = vmul.f32 %v5027_v2, %v5011_v9 }
 0x73f   : > { %v4986_v5 = vmul.f32 0.5, %v4985_v38 }
 0x740   : > { %v13345_v15 = vadd.f32 %v13224_v46, %v5042_v11 }
 0x741   : > { %5307 = vmatmul.bf16.gmra.mxu0 %v5087_v34  ;;  %5365 = vmatmul.bf16.gmra.mxu2 %v5087_v34  ;;  %v4987_v56 = vsub.f32 1.5, %v4986_v5  ;;  %v5068_v5 = vadd.f32 %v13243_v52, %v12541_v29 }
 0x742   : > { %5336 = vmatmul.bf16.gmra.mxu1 %v5088_v61  ;;  %5394 = vmatmul.bf16.gmra.mxu3 %v5088_v61 }
 0x743   : > { %v4988_v22 = vmul.f32 %v8821_v42, %v4987_v56 }
 0x745   : > { %v4992_v14 = vsel %vm4991_vm10, %v8821_v42, %v4988_v22  ;;  %v5069_v22 = vadd.f32 %v13239_v30, %v12549_v3  ;;  %v5070_v3 = vadd.f32 %v13246_v27, %v12561_v20 }
 0x746   : > { %v5012_v35 = vmul.f32 %v13197_v44, %v4992_v14  ;;  %v5013_v36 = vmul.f32 %v13199_v51, %v4992_v14  ;;  %v13356_v44 = vadd.f32 %v13226_v54, %v5043_v18 }
 0x748   : > { %v5044_v33 = vmul.f32 %v5028_v40, %v5012_v35  ;;  %v5045_v49 = vmul.f32 %v5029_v4, %v5013_v36 }
 0x74a   : > { %v13348_v63 = vadd.f32 %v13224_v46, %v5044_v33  ;;  %v13351_v10 = vadd.f32 %v13226_v54, %v5045_v49  ;;  %v5123_v46 = vld [vmem:[%s14678_s15] sm:$0x3]  ;;  %v5067_v54 = vadd.f32 %v13232_v45, %v12530_v12  ;;  %v5071_v49 = vadd.f32 %v13282_v0, %v12570_v57 }
 0x74b   : > { %v13363_v8 = vperm.slane %v5123_v46, 0  ;;  %v13368_v42 = vperm.slane %v5123_v46, 1 }
 0x74c   : > { %v5089_v1 = vpack.c.bf16 %v13348_v63, %v13345_v15  ;;  %v5090_v51 = vpack.c.bf16 %v13351_v10, %v13356_v44 }
 0x751   : > { %5312 = vmatmul.bf16.gmra.mxu0 %v5089_v1  ;;  %5370 = vmatmul.bf16.gmra.mxu2 %v5089_v1 }
 0x752   : > { %5341 = vmatmul.bf16.gmra.mxu1 %v5090_v51  ;;  %5399 = vmatmul.bf16.gmra.mxu3 %v5090_v51 }
 0x79d   : > { %v5298_v39 = vpop.f32.mrf.mxu0 }
 0x79e   : > { %v5299_v55 = vadd.f32 %v5298_v39, %v13363_v8  ;;  %v5327_v21 = vpop.f32.mrf.mxu1 }
 0x7a0   : > { %v5328_v16 = vadd.f32 %v5327_v21, %v5299_v55 }
 0x7a2   : > { %v13370_v53 = vadd.f32 %v5328_v16, %v5067_v54 }
 0x7a3   : > { %v5356_v37 = vpop.f32.mrf.mxu2 }
 0x7a4   : > { %v7698_v34 = vmul.f32 -1.442695, %v13370_v53  ;;  %v5357_v38 = vadd.f32 %v5356_v37, %v13368_v42  ;;  %v5385_v61 = vpop.f32.mrf.mxu3 }
 0x7a5   : > { %v5300_v28 = vpop.f32.mrf.mxu0 }
 0x7a6   : > { %8822 = vpow2.f32 %v7698_v34  ;;  %v5386_v56 = vadd.f32 %v5385_v61, %v5357_v38  ;;  %v5301_v7 = vadd.f32 %v5300_v28, %v13363_v8  ;;  %v5329_v12 = vpop.f32.mrf.mxu1  ;;  %v5072_v38 = vadd.f32 %v13289_v32, %v12589_v43 }
 0x7a7   : > { %v13426_v43 = vadd.f32 %v13327_v23, %v12607_v24  ;;  %v13445_v24 = vadd.f32 %v13356_v44, %v12631_v58 }
 0x7a8   : > { %v13377_v45 = vadd.f32 %v5386_v56, %v5068_v5  ;;  %v5330_v17 = vadd.f32 %v5329_v12, %v5301_v7  ;;  %v5073_v5 = vadd.f32 %v13285_v50, %v12593_v41  ;;  %v13417_v56 = vadd.f32 %v13297_v25, %v12597_v19 }
 0x7a9   : > { %v13432_v41 = vadd.f32 %v13316_v62, %v12611_v47  ;;  %v13436_v19 = vadd.f32 %v13322_v60, %v12615_v13 }
 0x7aa   : > { %v7699_v9 = vmul.f32 -1.442695, %v13377_v45  ;;  %v13382_v2 = vadd.f32 %v5330_v17, %v5069_v22  ;;  %v13422_v22 = vadd.f32 %v13319_v26, %v12603_v6  ;;  %v13441_v6 = vadd.f32 %v13345_v15, %v12627_v31 }
 0x7ab   : > { %v5358_v40 = vpop.f32.mrf.mxu2  ;;  %v13449_v26 = vadd.f32 %v13348_v63, %v12622_v48  ;;  %v13459_v31 = vadd.f32 %v13351_v10, %v12637_v59 }
 0x7ac   : > { %v8823_v14 = vpop.eup %8822  ;;  %8824 = vpow2.f32 %v7699_v9  ;;  %v7700_v4 = vmul.f32 -1.442695, %v13382_v2  ;;  %v5359_v29 = vadd.f32 %v5358_v40, %v13368_v42  ;;  %v5387_v52 = vpop.f32.mrf.mxu3 }
 0x7ad   : > { %v13386_v35 = vadd.f32 1.0, %v8823_v14 }
 0x7ae   : > { %v5303_v11 = vpop.f32.mrf.mxu0  ;;  %8826 = vpow2.f32 %v7700_v4  ;;  %v5388_v30 = vadd.f32 %v5387_v52, %v5359_v29 }
 0x7af   : > { %v5304_v36 = vadd.f32 %v5303_v11, %v13363_v8  ;;  %8828 = vrcp.f32 %v13386_v35  ;;  %v5332_v33 = vpop.f32.mrf.mxu1  ;;  %v5494_v13 = vand.u32 2147483647, %v13386_v35  ;;  %v5496_v58 = vand.u32 2147483648, %v13386_v35 }
 0x7b0   : > { %v13392_v18 = vadd.f32 %v5388_v30, %v5070_v3  ;;  %vm5490_vm11 = vweird.f32 %v13386_v35 }
 0x7b1   : > { %v5333_v1 = vadd.f32 %v5332_v33, %v5304_v36  ;;  %vm13477_vm12 = vcmp.eq.f32.partialorder %v5494_v13, 8.507059e+37  ;;  %v5497_v36 = vor.u32 1.1754944e-38, %v5496_v58 }
 0x7b2   : > { %v8825_v51 = vpop.eup %8824  ;;  %v7701_v46 = vmul.f32 -1.442695, %v13392_v18 }
 0x7b3   : > { %v13397_v39 = vadd.f32 %v5333_v1, %v5071_v49  ;;  %v13399_v55 = vadd.f32 1.0, %v8825_v51 }
 0x7b4   : > { %v5361_v20 = vpop.f32.mrf.mxu2  ;;  %v8827_v27 = vpop.eup %8826  ;;  %8830 = vpow2.f32 %v7701_v46 }
 0x7b5   : > { %v7702_v21 = vmul.f32 -1.442695, %v13397_v39  ;;  %v5362_v54 = vadd.f32 %v5361_v20, %v13368_v42  ;;  %v13403_v16 = vpop.eup %8828  ;;  %8832 = vrcp.f32 %v13399_v55  ;;  %v5390_v57 = vpop.f32.mrf.mxu3  ;;  %v13408_v34 = vadd.f32 1.0, %v8827_v27 }
 0x7b6   : > { %v5305_v0 = vpop.f32.mrf.mxu0  ;;  %v5486_v37 = vmul.f32 %v13403_v16, %v13386_v35  ;;  %v5509_v63 = vand.u32 2147483647, %v13399_v55  ;;  %v5511_v44 = vand.u32 2147483648, %v13399_v55  ;;  %vm5491_vm0 = vweird.f32 %v13403_v16 }
 0x7b7   : > { %8834 = vpow2.f32 %v7702_v21  ;;  %v5391_v61 = vadd.f32 %v5390_v57, %v5362_v54  ;;  %v5306_v28 = vadd.f32 %v5305_v0, %v13363_v8  ;;  %v5334_v12 = vpop.f32.mrf.mxu1  ;;  %v5526_v11 = vand.u32 2147483648, %v13408_v34  ;;  %vm13489_vm14 = vmor %vm5490_vm11, %vm5491_vm0 }
 0x7b8   : > { %v5487_v7 = vsub.f32 1.0, %v5486_v37  ;;  %8836 = vrcp.f32 %v13408_v34  ;;  %vm5505_vm13 = vweird.f32 %v13399_v55  ;;  %vm13493_vm15 = vcmp.eq.f32.partialorder %v5509_v63, 8.507059e+37 }
 0x7b9   : > { %v13428_v32 = vadd.f32 %v5391_v61, %v5072_v38  ;;  %v5335_v17 = vadd.f32 %v5334_v12, %v5306_v28  ;;  %v5512_v1 = vor.u32 1.1754944e-38, %v5511_v44  ;;  %vm5520_vm1 = vweird.f32 %v13408_v34 }
 0x7ba   : > { %v8831_v50 = vpop.eup %8830  ;;  %v5488_v25 = vmul.f32 %v13403_v16, %v5487_v7  ;;  %v5524_v46 = vand.u32 2147483647, %v13408_v34  ;;  %v5527_v38 = vor.u32 1.1754944e-38, %v5526_v11 }
 0x7bb   : > { %v13451_v47 = vpop.eup %8832  ;;  %v13454_v62 = vadd.f32 1.0, %v8831_v50  ;;  %v7703_v60 = vmul.f32 -1.442695, %v13428_v32  ;;  %v13469_v40 = vadd.f32 %v5335_v17, %v5073_v5 }
 0x7bc   : > { %v5363_v23 = vpop.f32.mrf.mxu2  ;;  %v5501_v48 = vmul.f32 %v13451_v47, %v13399_v55  ;;  %v5489_v9 = vadd.f32 %v13403_v16, %v5488_v25  ;;  %vm5506_vm2 = vweird.f32 %v13451_v47  ;;  %vm13512_vm7 = vcmp.eq.f32.partialorder %v5524_v46, 8.507059e+37 }
 0x7bd   : > { %v8835_v15 = vpop.eup %8834  ;;  %8838 = vrcp.f32 %v13454_v62  ;;  %v5364_v4 = vadd.f32 %v5363_v23, %v13368_v42  ;;  %v5392_v3 = vpop.f32.mrf.mxu3  ;;  %v7704_v27 = vmul.f32 -1.442695, %v13469_v40  ;;  %vm5535_vm3 = vweird.f32 %v13454_v62  ;;  %vm13528_vm9 = vmor %vm5505_vm13, %vm5506_vm2 }
 0x7be   : > { %v13471_v59 = vpop.eup %8836  ;;  %v5502_v10 = vsub.f32 1.0, %v5501_v48  ;;  %v13473_v14 = vadd.f32 1.0, %v8835_v15  ;;  %8840 = vpow2.f32 %v7703_v60  ;;  %v5308_v30 = vpop.f32.mrf.mxu0  ;;  %v5493_v20 = vsel %vm13489_vm14, %v13403_v16, %v5489_v9 }
 0x7bf   : > { %v5516_v52 = vmul.f32 %v13471_v59, %v13408_v34  ;;  %v5393_v21 = vadd.f32 %v5392_v3, %v5364_v4  ;;  %v5309_v54 = vadd.f32 %v5308_v30, %v13363_v8  ;;  %v5539_v16 = vand.u32 2147483647, %v13454_v62  ;;  %v5337_v13 = vpop.f32.mrf.mxu1 }
 0x7c0   : > { %v5503_v33 = vmul.f32 %v13451_v47, %v5502_v10  ;;  %8842 = vrcp.f32 %v13473_v14  ;;  %v5498_v7 = vsel %vm13477_vm12, %v5497_v36, %v5493_v20  ;;  %v5541_v17 = vand.u32 2147483648, %v13454_v62 }
 0x7c1   : > { %v5517_v51 = vsub.f32 1.0, %v5516_v52  ;;  %8844 = vpow2.f32 %v7704_v27  ;;  %v13520_v25 = vadd.f32 %v5393_v21, %v13417_v56  ;;  %vm5521_vm4 = vweird.f32 %v13471_v59 }
 0x7c2   : > { %v5504_v0 = vadd.f32 %v13451_v47, %v5503_v33  ;;  %v5338_v58 = vadd.f32 %v5337_v13, %v5309_v54  ;;  %v13542_v55 = vmul.f32 %v5498_v7, %v13370_v53  ;;  %vm13544_vm6 = vcmp.eq.f32.partialorder %v5539_v16, 8.507059e+37  ;;  %vm13556_vm8 = vmor %vm5520_vm1, %vm5521_vm4 }
 0x7c3   : > { %v8839_v57 = vpop.eup %8838  ;;  %v5518_v37 = vmul.f32 %v13471_v59, %v5517_v51  ;;  %v5542_v4 = vor.u32 1.1754944e-38, %v5541_v17  ;;  %v7705_v52 = vmul.f32 -1.442695, %v13520_v25  ;;  %v5554_v49 = vand.u32 2147483647, %v13473_v14 }
 0x7c4   : > { %v5366_v61 = vpop.f32.mrf.mxu2  ;;  %v8841_v28 = vpop.eup %8840  ;;  %v5531_v5 = vmul.f32 %v8839_v57, %v13454_v62  ;;  %v5508_v56 = vsel %vm13528_vm9, %v13451_v47, %v5504_v0  ;;  %vm5536_vm5 = vweird.f32 %v8839_v57  ;;  %v5556_v47 = vand.u32 2147483648, %v13473_v14 }
 0x7c5   : > { %v13517_v50 = vadd.f32 1.0, %v8841_v28  ;;  %v5367_v48 = vadd.f32 %v5366_v61, %v13368_v42  ;;  %v5519_v63 = vadd.f32 %v13471_v59, %v5518_v37  ;;  %v5395_v11 = vpop.f32.mrf.mxu3  ;;  %v5513_v36 = vsel %vm13493_vm15, %v5512_v1, %v5508_v56  ;;  %vm5537_vm10 = vmor %vm5535_vm3, %vm5536_vm5 }
 0x7c6   : > { %v13522_v60 = vpop.eup %8842  ;;  %v5532_v15 = vsub.f32 1.0, %v5531_v5  ;;  %v5310_v3 = vpop.f32.mrf.mxu0  ;;  %v13561_v35 = vadd.f32 %v5338_v58, %v13422_v22  ;;  %vm5550_vm0 = vweird.f32 %v13473_v14  ;;  %vm13594_vm11 = vcmp.eq.f32.partialorder %v5554_v49, 8.507059e+37 }
 0x7c7   : > { %v5546_v44 = vmul.f32 %v13522_v60, %v13473_v14  ;;  %8846 = vrcp.f32 %v13517_v50  ;;  %v8845_v30 = vpop.eup %8844  ;;  %v5396_v51 = vadd.f32 %v5395_v11, %v5367_v48  ;;  %v5523_v46 = vsel %vm13556_vm8, %v13471_v59, %v5519_v63  ;;  %v5339_v5 = vpop.f32.mrf.mxu1 }
 0x7c8   : > { %v5533_v9 = vmul.f32 %v8839_v57, %v5532_v15  ;;  %v13570_v34 = vadd.f32 1.0, %v8845_v30  ;;  %8848 = vpow2.f32 %v7705_v52  ;;  %v7706_v20 = vmul.f32 -1.442695, %v13561_v35 }
 0x7c9   : > { %v5547_v29 = vsub.f32 1.0, %v5546_v44  ;;  %v13574_v22 = vadd.f32 %v5396_v51, %v13426_v43  ;;  %v5311_v27 = vadd.f32 %v5310_v3, %v13363_v8  ;;  %v13580_v59 = vmul.f32 %v5513_v36, %v13377_v45 }
 0x7ca   : > { %v5534_v33 = vadd.f32 %v8839_v57, %v5533_v9  ;;  %8850 = vrcp.f32 %v13570_v34  ;;  %v5557_v43 = vor.u32 1.1754944e-38, %v5556_v47  ;;  %v5569_v61 = vand.u32 2147483647, %v13517_v50 }
 0x7cb   : > { %v5548_v54 = vmul.f32 %v13522_v60, %v5547_v29  ;;  %8852 = vpow2.f32 %v7706_v20  ;;  %v7707_v28 = vmul.f32 -1.442695, %v13574_v22  ;;  %vm5551_vm12 = vweird.f32 %v13522_v60 }
 0x7cc   : > { %v5538_v1 = vsel %vm5537_vm10, %v8839_v57, %v5534_v33  ;;  %v5528_v57 = vsel %vm13512_vm7, %v5527_v38, %v5523_v46  ;;  %v5368_v38 = vpop.f32.mrf.mxu2  ;;  %v5571_v7 = vand.u32 2147483648, %v13517_v50  ;;  %v5340_v12 = vadd.f32 %v5339_v5, %v5311_v27  ;;  %vm13630_vm15 = vmor %vm5550_vm0, %vm5551_vm12 }
 0x7cd   : > { %v13577_v21 = vpop.eup %8846  ;;  %v5543_v62 = vsel %vm13544_vm6, %v5542_v4, %v5538_v1  ;;  %v5549_v13 = vadd.f32 %v13522_v60, %v5548_v54  ;;  %8854 = vpow2.f32 %v7707_v28  ;;  %v5743_v23 = vadd.f32 %v13580_v59, %v13542_v55  ;;  %v5397_v47 = vpop.f32.mrf.mxu3 }
 0x7ce   : > { %v5561_v0 = vmul.f32 %v13577_v21, %v13517_v50  ;;  %v13592_v37 = vmul.f32 %v5543_v62, %v13392_v18  ;;  %v8849_v17 = vpop.eup %8848  ;;  %v13603_v18 = vmul.f32 %v5528_v57, %v13382_v2  ;;  %v13612_v48 = vadd.f32 %v5340_v12, %v13432_v41  ;;  %v5313_v9 = vpop.f32.mrf.mxu0 }
 0x7cf   : > { %v13609_v58 = vadd.f32 1.0, %v8849_v17  ;;  %v5369_v56 = vadd.f32 %v5368_v38, %v13368_v42  ;;  %vm5565_vm13 = vweird.f32 %v13517_v50  ;;  %vm13618_vm14 = vcmp.eq.f32.partialorder %v5569_v61, 8.507059e+37  ;;  %5744 = vadd.xlane.f32.xlu2 %v5743_v23 }
 0x7d0   : > { %v5562_v16 = vsub.f32 1.0, %v5561_v0  ;;  %v13615_v63 = vpop.eup %8850  ;;  %v5775_v44 = vmul.f32 %v13542_v55, %v13542_v55  ;;  %v5746_v10 = vadd.f32 %v13592_v37, %v13603_v18  ;;  %vm5566_vm1 = vweird.f32 %v13577_v21 }
 0x7d1   : > { %v5572_v4 = vor.u32 1.1754944e-38, %v5571_v7  ;;  %v5576_v29 = vmul.f32 %v13615_v63, %v13570_v34  ;;  %8856 = vrcp.f32 %v13609_v58  ;;  %v8853_v52 = vpop.eup %8852  ;;  %v5553_v11 = vsel %vm13630_vm15, %v13522_v60, %v5549_v13  ;;  %vm13657_vm3 = vmor %vm5565_vm13, %vm5566_vm1 }
 0x7d2   : > { %v5563_v15 = vmul.f32 %v13577_v21, %v5562_v16  ;;  %v7708_v3 = vmul.f32 -1.442695, %v13612_v48  ;;  %v5776_v30 = vmul.f32 %v13580_v59, %v13580_v59  ;;  %5747 = vadd.xlane.f32.xlu0 %v5746_v10  ;;  %v13645_v53 = vadd.f32 1.0, %v8853_v52 }
 0x7d3   : > { %v5577_v36 = vsub.f32 1.0, %v5576_v29  ;;  %v5398_v33 = vadd.f32 %v5397_v47, %v5369_v56  ;;  %v5314_v51 = vadd.f32 %v5313_v9, %v13363_v8  ;;  %v8855_v46 = vpop.eup %8854  ;;  %vm5580_vm2 = vweird.f32 %v13570_v34 }
 0x7d4   : > { %v5564_v14 = vadd.f32 %v13577_v21, %v5563_v15  ;;  %v5584_v49 = vand.u32 2147483647, %v13570_v34  ;;  %v5586_v60 = vand.u32 2147483648, %v13570_v34  ;;  %8858 = vpow2.f32 %v7708_v3  ;;  %v5371_v0 = vpop.f32.mrf.mxu2 }
 0x7d5   : > { %v5558_v1 = vsel %vm13594_vm11, %v5557_v43, %v5553_v11  ;;  %v5578_v27 = vmul.f32 %v13615_v63, %v5577_v36  ;;  %vm5581_vm7 = vweird.f32 %v13615_v63  ;;  %8860 = vrcp.f32 %v13645_v53  ;;  %v5342_v43 = vpop.f32.mrf.mxu1 }
 0x7d6   : > { %v5568_v62 = vsel %vm13657_vm3, %v13577_v21, %v5564_v14  ;;  %v5601_v54 = vand.u32 2147483648, %v13609_v58  ;;  %v13668_v57 = vadd.f32 1.0, %v8855_v46  ;;  %v13671_v50 = vadd.f32 %v5398_v33, %v13436_v19  ;;  %vm13692_vm4 = vmor %vm5580_vm2, %vm5581_vm7 }
 0x7d7   : > { %v13673_v45 = vpop.eup %8856  ;;  %v5579_v61 = vadd.f32 %v13615_v63, %v5578_v27  ;;  %v5599_v28 = vand.u32 2147483647, %v13609_v58  ;;  %v5791_v5 = vadd.f32 %v5776_v30, %v5775_v44  ;;  %v5343_v38 = vadd.f32 %v5342_v43, %v5314_v51 }
 0x7d8   : > { %v13678_v16 = vmul.f32 %v5558_v1, %v13397_v39  ;;  %vm13680_vm9 = vcmp.eq.f32.partialorder %v5584_v49, 8.507059e+37  ;;  %v5587_v7 = vor.u32 1.1754944e-38, %v5586_v60  ;;  %v5591_v19 = vmul.f32 %v13673_v45, %v13609_v58  ;;  %v5315_v49 = vpop.f32.mrf.mxu0 }
 0x7d9   : > { %v5573_v12 = vsel %vm13618_vm14, %v5572_v4, %v5568_v62  ;;  %vm5595_vm5 = vweird.f32 %v13609_v58  ;;  %8862 = vrcp.f32 %v13668_v57  ;;  %5792 = vadd.xlane.f32.xlu1 %v5791_v5  ;;  %v5777_v39 = vmul.f32 %v13603_v18, %v13603_v18 }
 0x7da   : > { %v8859_v13 = vpop.eup %8858  ;;  %v5583_v23 = vsel %vm13692_vm4, %v13615_v63, %v5579_v61  ;;  %v5592_v15 = vsub.f32 1.0, %v5591_v19  ;;  %v5602_v56 = vor.u32 1.1754944e-38, %v5601_v54  ;;  %v7709_v34 = vmul.f32 -1.442695, %v13671_v50  ;;  %v5400_v63 = vpop.f32.mrf.mxu3 }
 0x7db   : > { %v13704_v2 = vpop.eup %8860  ;;  %vm13706_vm6 = vcmp.eq.f32.partialorder %v5599_v28, 8.507059e+37  ;;  %v5616_v9 = vand.u32 2147483648, %v13645_v53  ;;  %v13711_v10 = vadd.f32 1.0, %v8859_v13  ;;  %v13714_v41 = vadd.f32 %v5343_v38, %v13441_v6 }
 0x7dc   : > { %v5372_v4 = vadd.f32 %v5371_v0, %v13368_v42  ;;  %v13718_v29 = vmul.f32 %v5573_v12, %v13428_v32  ;;  %v5593_v47 = vmul.f32 %v13673_v45, %v5592_v15  ;;  %v5606_v52 = vmul.f32 %v13704_v2, %v13645_v53  ;;  %v5373_v54 = vpop.f32.mrf.mxu2 }
 0x7dd   : > { %v5614_v11 = vand.u32 2147483647, %v13645_v53  ;;  %v5588_v14 = vsel %vm13680_vm9, %v5587_v7, %v5583_v23  ;;  %vm5596_vm8 = vweird.f32 %v13673_v45  ;;  %vm5610_vm10 = vweird.f32 %v13645_v53  ;;  %v5344_v13 = vpop.f32.mrf.mxu1  ;;  %v8177_v53 = vld [vmem:[#allocation27 + $0xec] sm:$0xf0] }
 0x7de   : > { %v5629_v6 = vand.u32 2147483647, %v13668_v57  ;;  %8864 = vrcp.f32 %v13711_v10  ;;  %v5594_v32 = vadd.f32 %v13673_v45, %v5593_v47  ;;  %v5607_v3 = vsub.f32 1.0, %v5606_v52  ;;  %vm13744_vm11 = vmor %vm5595_vm5, %vm5596_vm8 }
 0x7df   : > { %8866 = vpow2.f32 %v7709_v34  ;;  %v7710_v30 = vmul.f32 -1.442695, %v13714_v41  ;;  %v13732_v36 = vpop.eup %8862  ;;  %v5617_v33 = vor.u32 1.1754944e-38, %v5616_v9  ;;  %vm5625_vm0 = vweird.f32 %v13668_v57 }
 0x7e0   : > { %v5401_v51 = vadd.f32 %v5400_v63, %v5372_v4  ;;  %v5778_v46 = vmul.f32 %v13592_v37, %v13592_v37  ;;  %v13738_v60 = vmul.f32 %v5588_v14, %v13469_v40  ;;  %v5608_v20 = vmul.f32 %v13704_v2, %v5607_v3 }
 0x7e1   : > { %v5621_v27 = vmul.f32 %v13732_v36, %v13668_v57  ;;  %v5631_v62 = vand.u32 2147483648, %v13668_v57  ;;  %v5598_v40 = vsel %vm13744_vm11, %v13673_v45, %v5594_v32  ;;  %vm13755_vm12 = vcmp.eq.f32.partialorder %v5614_v11, 8.507059e+37 }
 0x7e2   : > { %8868 = vpow2.f32 %v7710_v30  ;;  %v13760_v58 = vadd.f32 %v5401_v51, %v13445_v24  ;;  %v5794_v0 = vadd.f32 %v5778_v46, %v5777_v39  ;;  %vm5611_vm13 = vweird.f32 %v13704_v2  ;;  %v7956_v46 = vld [vmem:[#allocation27 + $0x1e0] sm:$0xf] }
 0x7e3   : > { %v5622_v61 = vsub.f32 1.0, %v5621_v27  ;;  %vm13763_vm14 = vcmp.eq.f32.partialorder %v5629_v6, 8.507059e+37  ;;  %v5644_v5 = vand.u32 2147483647, %v13711_v10  ;;  %v5316_v45 = vadd.f32 %v5315_v49, %v13363_v8  ;;  %vm13789_vm1 = vmor %vm5610_vm10, %vm5611_vm13 }
 0x7e4   : > { %v13769_v38 = vpop.eup %8864  ;;  %v5609_v21 = vadd.f32 %v13704_v2, %v5608_v20  ;;  %v7711_v7 = vmul.f32 -1.442695, %v13760_v58  ;;  %5795 = vadd.xlane.f32.xlu2 %v5794_v0  ;;  %v5749_v24 = vadd.f32 %v13718_v29, %v13678_v16  ;;  %v5374_v19 = vadd.f32 %v5373_v54, %v13368_v42  ;;  %v5402_v42 = vpop.f32.mrf.mxu3 }
 0x7e5   : > { %v8867_v12 = vpop.eup %8866  ;;  %v5603_v17 = vsel %vm13706_vm6, %v5602_v56, %v5598_v40  ;;  %v5623_v39 = vmul.f32 %v13732_v36, %v5622_v61  ;;  %vm5626_vm15 = vweird.f32 %v13732_v36  ;;  %v5636_v8 = vmul.f32 %v13769_v38, %v13711_v10  ;;  %v7958_v56 = vld [vmem:[#allocation27 + $0x1f0] sm:$0xf0] }
 0x7e6   : > { %v5646_v23 = vand.u32 2147483648, %v13711_v10  ;;  %v13783_v15 = vadd.f32 1.0, %v8867_v12  ;;  %8870 = vpow2.f32 %v7711_v7  ;;  %v5345_v34 = vadd.f32 %v5344_v13, %v5316_v45  ;;  %5750 = vadd.xlane.f32.xlu0 %v5749_v24  ;;  %vm13804_vm2 = vmor %vm5625_vm0, %vm5626_vm15 }
 0x7e7   : > { %v5624_v44 = vadd.f32 %v13732_v36, %v5623_v39  ;;  %v5632_v9 = vor.u32 1.1754944e-38, %v5631_v62  ;;  %v5637_v4 = vsub.f32 1.0, %v5636_v8  ;;  %v5403_v63 = vadd.f32 %v5402_v42, %v5374_v19  ;;  %v8175_v39 = vld [vmem:[#allocation27 + $0xe4] sm:$0xf]  ;;  %v7830_v8 = vld [vmem:[#allocation27 + $0xf0] sm:$0xf0] }
 0x7e8   : > { %v8869_v47 = vpop.eup %8868  ;;  %v13795_v52 = vmul.f32 %v5603_v17, %v13520_v25  ;;  %v5613_v11 = vsel %vm13789_vm1, %v13704_v2, %v5609_v21  ;;  %vm5641_vm3 = vweird.f32 %v13769_v38  ;;  %8872 = vrcp.f32 %v13783_v15  ;;  %v8207_v42 = vld [vmem:[#allocation27 + $0x1e4] sm:$0xf] }
 0x7e9   : > { %v5628_v25 = vsel %vm13804_vm2, %v13732_v36, %v5624_v44  ;;  %v5638_v14 = vmul.f32 %v13769_v38, %v5637_v4  ;;  %v13814_v6 = vadd.f32 1.0, %v8869_v47  ;;  %v13817_v2 = vadd.f32 %v5345_v34, %v13449_v26 }
 0x7ea   : > { %vm5640_vm7 = vweird.f32 %v13711_v10  ;;  %vm13820_vm9 = vcmp.eq.f32.partialorder %v5644_v5, 8.507059e+37  ;;  %v5647_v32 = vor.u32 1.1754944e-38, %v5646_v23  ;;  %v13825_v3 = vadd.f32 %v5403_v63, %v13459_v31 }
 0x7eb   : > { %v5618_v30 = vsel %vm13755_vm12, %v5617_v33, %v5613_v11  ;;  %v5639_v36 = vadd.f32 %v13769_v38, %v5638_v14  ;;  %8874 = vrcp.f32 %v13814_v6  ;;  %v5779_v26 = vmul.f32 %v13678_v16, %v13678_v16  ;;  %vm13837_vm4 = vmor %vm5640_vm7, %vm5641_vm3  ;;  %v7828_v11 = vld [vmem:[#allocation27 + $0xe0] sm:$0xf] }
 0x7ec   : > { %v8871_v51 = vpop.eup %8870  ;;  %v5633_v10 = vsel %vm13763_vm14, %v5632_v9, %v5628_v25  ;;  %v5659_v31 = vand.u32 2147483647, %v13783_v15  ;;  %v7712_v33 = vmul.f32 -1.442695, %v13817_v2  ;;  %v5780_v49 = vmul.f32 %v13718_v29, %v13718_v29 }
 0x7ed   : > { %v5643_v1 = vsel %vm13837_vm4, %v13769_v38, %v5639_v36  ;;  %v13848_v20 = vadd.f32 1.0, %v8871_v51  ;;  %v7713_v27 = vmul.f32 -1.442695, %v13825_v3  ;;  %v5752_v62 = vadd.f32 %v13795_v52, %v13738_v60 }
 0x7ee   : > { %v13853_v54 = vpop.eup %8872  ;;  %v13856_v40 = vmul.f32 %v5618_v30, %v13561_v35  ;;  %v5661_v43 = vand.u32 2147483648, %v13783_v15  ;;  %v5676_v0 = vand.u32 2147483648, %v13814_v6  ;;  %8876 = vpow2.f32 %v7712_v33 }
 0x7ef   : > { %v13861_v61 = vmul.f32 %v5633_v10, %v13574_v22  ;;  %v5651_v28 = vmul.f32 %v13853_v54, %v13783_v15  ;;  %vm5655_vm5 = vweird.f32 %v13783_v15  ;;  %8878 = vrcp.f32 %v13848_v20  ;;  %5753 = vadd.xlane.f32.xlu1 %v5752_v62 }
 0x7f0   : > { %v5648_v35 = vsel %vm13820_vm9, %v5647_v32, %v5643_v1  ;;  %vm13869_vm6 = vcmp.eq.f32.partialorder %v5659_v31, 8.507059e+37  ;;  %v5674_v45 = vand.u32 2147483647, %v13814_v6  ;;  %8880 = vpow2.f32 %v7713_v27  ;;  %v8209_v31 = vld [vmem:[#allocation27 + $0x1ec] sm:$0xf0] }
 0x7f1   : > { %v13874_v22 = vpop.eup %8874  ;;  %v5652_v38 = vsub.f32 1.0, %v5651_v28  ;;  %v5797_v21 = vadd.f32 %v5780_v49, %v5779_v26  ;;  %v5781_v7 = vmul.f32 %v13738_v60, %v13738_v60  ;;  %v5782_v24 = vmul.f32 %v13795_v52, %v13795_v52  ;;  %v8171_v1 = vld [vmem:[#allocation27 + $0xc4] sm:$0xf]  ;;  %v7814_v27 = vld [vmem:[#allocation27 + $0xd0] sm:$0xf0] }
 0x7f2   : > { %v5662_v19 = vor.u32 1.1754944e-38, %v5661_v43  ;;  %v5666_v12 = vmul.f32 %v13874_v22, %v13814_v6  ;;  %vm5670_vm8 = vweird.f32 %v13814_v6  ;;  %v5677_v17 = vor.u32 1.1754944e-38, %v5676_v0  ;;  %v7940_v6 = vld [vmem:[#allocation27 + $0x1c0] sm:$0xf] }
 0x7f3   : > { %v5653_v13 = vmul.f32 %v13853_v54, %v5652_v38  ;;  %vm5656_vm10 = vweird.f32 %v13853_v54  ;;  %5798 = vadd.xlane.f32.xlu2 %v5797_v21  ;;  %v5800_v23 = vadd.f32 %v5782_v24, %v5781_v7  ;;  %v5755_v34 = vadd.f32 %v13861_v61, %v13856_v40  ;;  %v8203_v21 = vld [vmem:[#allocation27 + $0x1c4] sm:$0xf] }
 0x7f4   : > { %v8877_v44 = vpop.eup %8876  ;;  %v13888_v9 = vmul.f32 %v5648_v35, %v13612_v48  ;;  %v5667_v4 = vsub.f32 1.0, %v5666_v12  ;;  %v5784_v63 = vmul.f32 %v13861_v61, %v13861_v61  ;;  %v7833_v47 = vor.u32 %v8175_v39, %v7830_v8  ;;  %vm13901_vm0 = vmor %vm5655_vm5, %vm5656_vm10  ;;  %v7812_v12 = vld [vmem:[#allocation27 + $0xc0] sm:$0xf]  ;;  %v8173_v39 = vld [vmem:[#allocation27 + $0xcc] sm:$0xf0] }
 0x7f5   : > { %v13892_v25 = vpop.eup %8878  ;;  %v5654_v14 = vadd.f32 %v13853_v54, %v5653_v13  ;;  %v13895_v57 = vadd.f32 1.0, %v8877_v44  ;;  %5801 = vadd.xlane.f32.xlu0 %v5800_v23  ;;  %v7961_v32 = vor.u32 %v8207_v42, %v7958_v56  ;;  %v7829_v30 = vor.u32 %v8177_v53, %v7828_v11  ;;  %v8205_v44 = vld [vmem:[#allocation27 + $0x1cc] sm:$0xf0]  ;;  %v8199_v53 = vld [vmem:[#allocation27 + $0x1a4] sm:$0xf] }
 0x7f6   : > { %v8881_v36 = vpop.eup %8880  ;;  %v5668_v26 = vmul.f32 %v13874_v22, %v5667_v4  ;;  %vm5671_vm11 = vweird.f32 %v13874_v22  ;;  %v5681_v51 = vmul.f32 %v13892_v25, %v13848_v20  ;;  %v5689_v10 = vand.u32 2147483647, %v13848_v20  ;;  %6461 = vmatpush.bf16.msra.mxu2 %v7833_v47  ;;  %v8167_v4 = vld [vmem:[#allocation27 + $0xa4] sm:$0xf] }
 0x7f7   : > { %v5658_v15 = vsel %vm13901_vm0, %v13853_v54, %v5654_v14  ;;  %v5691_v33 = vand.u32 2147483648, %v13848_v20  ;;  %8882 = vrcp.f32 %v13895_v57  ;;  %5756 = vadd.xlane.f32.xlu1 %v5755_v34  ;;  %v5783_v49 = vmul.f32 %v13856_v40, %v13856_v40  ;;  %6490 = vmatpush.bf16.msra.mxu3 %v7961_v32  ;;  %vm13928_vm13 = vmor %vm5670_vm8, %vm5671_vm11  ;;  %v7926_v14 = vld [vmem:[#allocation27 + $0x1b0] sm:$0xf0] }
 0x7f8   : > { %v5663_v62 = vsel %vm13869_vm6, %v5662_v19, %v5658_v15  ;;  %v5669_v43 = vadd.f32 %v13874_v22, %v5668_v26  ;;  %v5682_v0 = vsub.f32 1.0, %v5681_v51  ;;  %vm5686_vm12 = vweird.f32 %v13892_v25  ;;  %6403 = vmatpush.bf16.msra.mxu0 %v7829_v30  ;;  %v7942_v19 = vld [vmem:[#allocation27 + $0x1d0] sm:$0xf0] }
 0x7f9   : > { %v13922_v54 = vmul.f32 %v5663_v62, %v13671_v50  ;;  %v13932_v35 = vadd.f32 1.0, %v8881_v36  ;;  %v5803_v5 = vadd.f32 %v5784_v63, %v5783_v49  ;;  %v7957_v38 = vor.u32 %v8209_v31, %v7956_v46  ;;  %v7798_v63 = vld [vmem:[#allocation27 + $0xb0] sm:$0xf0] }
 0x7fa   : > { %v5673_v7 = vsel %vm13928_vm13, %v13874_v22, %v5669_v43  ;;  %v5683_v50 = vmul.f32 %v13892_v25, %v5682_v0  ;;  %v7817_v24 = vor.u32 %v8171_v1, %v7814_v27  ;;  %vm5675_vm14 = vcmp.eq.f32.partialorder %v5674_v45, 8.507059e+37 }
 0x7fb   : > { %vm5685_vm15 = vweird.f32 %v13848_v20  ;;  %8884 = vrcp.f32 %v13932_v35  ;;  %6432 = vmatpush.bf16.msra.mxu1 %v7957_v38  ;;  %v5678_v8 = vsel %vm5675_vm14, %v5677_v17, %v5673_v7  ;;  %v5692_v23 = vor.u32 1.1754944e-38, %v5691_v33 }
 0x7fc   : > { %v5684_v13 = vadd.f32 %v13892_v25, %v5683_v50  ;;  %vm13945_vm1 = vmor %vm5685_vm15, %vm5686_vm12  ;;  %v5758_v34 = vadd.f32 %v13922_v54, %v13888_v9  ;;  %6462 = vmatpush.bf16.msra.mxu2 %v7817_v24  ;;  %v5785_v20 = vmul.f32 %v13888_v9, %v13888_v9  ;;  %v5786_v17 = vmul.f32 %v13922_v54, %v13922_v54 }
 0x7fd   : > { %v8883_v45 = vpop.eup %8882  ;;  %5804 = vadd.xlane.f32.xlu0 %v5803_v5  ;;  %v7945_v42 = vor.u32 %v8203_v21, %v7942_v19  ;;  %v7813_v56 = vor.u32 %v8173_v39, %v7812_v12  ;;  %vm5690_vm2 = vcmp.eq.f32.partialorder %v5689_v10, 8.507059e+37  ;;  %v13960_v32 = vmul.f32 %v5678_v8, %v13714_v41 }
 0x7fe   : > { %v5688_v47 = vsel %vm13945_vm1, %v13892_v25, %v5684_v13  ;;  %v5696_v11 = vmul.f32 %v8883_v45, %v13895_v57  ;;  %5759 = vadd.xlane.f32.xlu2 %v5758_v34  ;;  %v5806_v36 = vadd.f32 %v5786_v17, %v5785_v20  ;;  %v7941_v51 = vor.u32 %v8205_v44, %v7940_v6  ;;  %v8195_v44 = vld [vmem:[#allocation27 + $0x184] sm:$0xf] }
 0x7ff   : > { %v5693_v30 = vsel %vm5690_vm2, %v5692_v23, %v5688_v47  ;;  %6491 = vmatpush.bf16.msra.mxu3 %v7945_v42  ;;  %6404 = vmatpush.bf16.msra.mxu0 %v7813_v56  ;;  %v7801_v46 = vor.u32 %v8167_v4, %v7798_v63  ;;  %v5704_v10 = vand.u32 2147483647, %v13895_v57  ;;  %v5706_v31 = vand.u32 2147483648, %v13895_v57  ;;  %v8169_v23 = vld [vmem:[#allocation27 + $0xac] sm:$0xf0] }
 0x800   : > { %v13963_v48 = vmul.f32 %v5693_v30, %v13760_v58  ;;  %v5697_v26 = vsub.f32 1.0, %v5696_v11  ;;  %5807 = vadd.xlane.f32.xlu1 %v5806_v36  ;;  %v7929_v15 = vor.u32 %v8199_v53, %v7926_v14  ;;  %vm5701_vm3 = vweird.f32 %v8883_v45  ;;  %6433 = vmatpush.bf16.msra.mxu1 %v7941_v51  ;;  %v8163_v42 = vld [vmem:[#allocation27 + $0x84] sm:$0xf]  ;;  %v7782_v56 = vld [vmem:[#allocation27 + $0x90] sm:$0xf0] }
 0x801   : > { %v8885_v25 = vpop.eup %8884  ;;  %6463 = vmatpush.bf16.msra.mxu2 %v7801_v46  ;;  %v5787_v58 = vmul.f32 %v13960_v32, %v13960_v32  ;;  %vm5700_vm7 = vweird.f32 %v13895_v57  ;;  %vm5705_vm4 = vcmp.eq.f32.partialorder %v5704_v10, 8.507059e+37  ;;  %v5707_v43 = vor.u32 1.1754944e-38, %v5706_v31  ;;  %v7910_v63 = vld [vmem:[#allocation27 + $0x190] sm:$0xf0]  ;;  %v7780_v47 = vld [vmem:[#allocation27 + $0x80] sm:$0xf] }
 0x802   : > { %v5698_v33 = vmul.f32 %v8883_v45, %v5697_v26  ;;  %v5711_v41 = vmul.f32 %v8885_v25, %v13932_v35  ;;  %v5761_v49 = vadd.f32 %v13963_v48, %v13960_v32  ;;  %v5788_v1 = vmul.f32 %v13963_v48, %v13963_v48  ;;  %vm5702_vm9 = vmor %vm5700_vm7, %vm5701_vm3  ;;  %v8165_v11 = vld [vmem:[#allocation27 + $0x8c] sm:$0xf0]  ;;  %v7908_v30 = vld [vmem:[#allocation27 + $0x180] sm:$0xf] }
 0x803   : > { %6492 = vmatpush.bf16.msra.mxu3 %v7929_v15  ;;  %v5721_v0 = vand.u32 2147483648, %v13932_v35  ;;  %vm5716_vm5 = vweird.f32 %v8885_v25  ;;  %v5719_v21 = vand.u32 2147483647, %v13932_v35  ;;  %vm5715_vm6 = vweird.f32 %v13932_v35  ;;  %v8197_v36 = vld [vmem:[#allocation27 + $0x18c] sm:$0xf0] }
 0x804   : > { %v5699_v27 = vadd.f32 %v8883_v45, %v5698_v33  ;;  %v5712_v62 = vsub.f32 1.0, %v5711_v41  ;;  %v5809_v28 = vadd.f32 %v5788_v1, %v5787_v58  ;;  %vm5717_vm8 = vmor %vm5715_vm6, %vm5716_vm5  ;;  %v7785_v4 = vor.u32 %v8163_v42, %v7782_v56  ;;  %v8159_v10 = vld [vmem:[#allocation27 + $0x64] sm:$0xf]  ;;  %v7766_v31 = vld [vmem:[#allocation27 + $0x70] sm:$0xf0] }
 0x805   : > { %v5722_v24 = vor.u32 1.1754944e-38, %v5721_v0  ;;  %vm5720_vm10 = vcmp.eq.f32.partialorder %v5719_v21, 8.507059e+37  ;;  %v7913_v53 = vor.u32 %v8195_v44, %v7910_v63  ;;  %v7781_v14 = vor.u32 %v8165_v11, %v7780_v47  ;;  %v8191_v15 = vld [vmem:[#allocation27 + $0x164] sm:$0xf]  ;;  %v7764_v58 = vld [vmem:[#allocation27 + $0x60] sm:$0xf] }
 0x806   : > { %v5703_v5 = vsel %vm5702_vm9, %v8883_v45, %v5699_v27  ;;  %v5713_v38 = vmul.f32 %v8885_v25, %v5712_v62  ;;  %5762 = vadd.xlane.f32.xlu2 %v5761_v49  ;;  %v7924_v45 = vld [vmem:[#allocation27 + $0x1a0] sm:$0xf]  ;;  %6464 = vmatpush.bf16.msra.mxu2 %v7785_v4  ;;  %v7909_v26 = vor.u32 %v8197_v36, %v7908_v30  ;;  %v7894_v49 = vld [vmem:[#allocation27 + $0x170] sm:$0xf0]  ;;  %v8161_v27 = vld [vmem:[#allocation27 + $0x6c] sm:$0xf0] }
 0x807   : > { %v5708_v7 = vsel %vm5705_vm4, %v5707_v43, %v5703_v5  ;;  %6493 = vmatpush.bf16.msra.mxu3 %v7913_v53  ;;  %v7769_v41 = vor.u32 %v8159_v10, %v7766_v31  ;;  %v7897_v1 = vor.u32 %v8191_v15, %v7894_v49  ;;  %v7892_v62 = vld [vmem:[#allocation27 + $0x160] sm:$0xf]  ;;  %v8193_v43 = vld [vmem:[#allocation27 + $0x16c] sm:$0xf0]  ;;  %v7765_v5 = vor.u32 %v8161_v27, %v7764_v58  ;;  %v8155_v21 = vld [vmem:[#allocation27 + $0x44] sm:$0xf] }
 0x808   : > { %v5714_v50 = vadd.f32 %v8885_v25, %v5713_v38  ;;  %5810 = vadd.xlane.f32.xlu1 %v5809_v28  ;;  %v13979_v57 = vmul.f32 %v5708_v7, %v13817_v2  ;;  %v7796_v2 = vld [vmem:[#allocation27 + $0xa0] sm:$0xf]  ;;  %v7893_v38 = vor.u32 %v8193_v43, %v7892_v62  ;;  %v7750_v7 = vld [vmem:[#allocation27 + $0x50] sm:$0xf0]  ;;  %v8153_v4 = vld [vmem:[#allocation27 + $0x2c] sm:$0xf0] }
 0x809   : > { %v7797_v34 = vor.u32 %v8169_v23, %v7796_v2  ;;  %v8189_v2 = vld [vmem:[#allocation27 + $0x14c] sm:$0xf0]  ;;  %v7862_v56 = vld [vmem:[#allocation27 + $0x130] sm:$0xf0]  ;;  %v7732_v44 = vld [vmem:[#allocation27 + $0x20] sm:$0xf] }
 0x80a   : > { %v5718_v19 = vsel %vm5717_vm8, %v8885_v25, %v5714_v50  ;;  %v5789_v13 = vmul.f32 %v13979_v57, %v13979_v57  ;;  %6465 = vmatpush.bf16.msra.mxu2 %v7769_v41  ;;  %v8187_v50 = vld [vmem:[#allocation27 + $0x144] sm:$0xf]  ;;  %v7733_v11 = vor.u32 %v8153_v4, %v7732_v44  ;;  %v7860_v53 = vld [vmem:[#allocation27 + $0x120] sm:$0xf]  ;;  %v7846_v15 = vld [vmem:[#allocation27 + $0x110] sm:$0xf0] }
 0x80b   : > { %v5723_v12 = vsel %vm5720_vm10, %v5722_v24, %v5718_v19  ;;  %6405 = vmatpush.bf16.msra.mxu0 %v7797_v34  ;;  %6494 = vmatpush.bf16.msra.mxu3 %v7897_v1  ;;  %v7753_v19 = vor.u32 %v8155_v21, %v7750_v7  ;;  %v8149_v58 = vld [vmem:[#allocation27 + $0xc] sm:$0xf0]  ;;  %v7844_v1 = vld [vmem:[#allocation27 + $0x100] sm:$0xf] }
 0x80c   : > { %v13982_v39 = vmul.f32 %v5723_v12, %v13825_v3  ;;  %v8201_v3 = vld [vmem:[#allocation27 + $0x1ac] sm:$0xf0]  ;;  %v7878_v12 = vld [vmem:[#allocation27 + $0x150] sm:$0xf0] }
 0x80d   : > { %v7925_v20 = vor.u32 %v8201_v3, %v7924_v45  ;;  %v7734_v45 = vld [vmem:[#allocation27 + $0x30] sm:$0xf0]  ;;  %v8183_v3 = vld [vmem:[#allocation27 + $0x124] sm:$0xf]  ;;  %v8181_v27 = vld [vmem:[#allocation27 + $0x10c] sm:$0xf0] }
 0x80e   : > { %v5764_v8 = vadd.f32 %v13982_v39, %v13979_v57  ;;  %v5790_v35 = vmul.f32 %v13982_v39, %v13982_v39  ;;  %6466 = vmatpush.bf16.msra.mxu2 %v7753_v19  ;;  %v7865_v47 = vor.u32 %v8183_v3, %v7862_v56 }
 0x80f   : > { %6434 = vmatpush.bf16.msra.mxu1 %v7925_v20  ;;  %6406 = vmatpush.bf16.msra.mxu0 %v7781_v14  ;;  %v8185_v14 = vld [vmem:[#allocation27 + $0x12c] sm:$0xf0] }
 0x810   : > { %5765 = vadd.xlane.f32.xlu0 %v5764_v8  ;;  %v5812_v22 = vadd.f32 %v5790_v35, %v5789_v13  ;;  %v7748_v8 = vld [vmem:[#allocation27 + $0x40] sm:$0xf]  ;;  %v7881_v13 = vor.u32 %v8187_v50, %v7878_v12  ;;  %v8157_v35 = vld [vmem:[#allocation27 + $0x4c] sm:$0xf0]  ;;  %v7861_v36 = vor.u32 %v8185_v14, %v7860_v53 }
 0x811   : > { %v7749_v23 = vor.u32 %v8157_v35, %v7748_v8 }
 0x812   : > { %5813 = vadd.xlane.f32.xlu2 %v5812_v22  ;;  %v7876_v22 = vld [vmem:[#allocation27 + $0x140] sm:$0xf]  ;;  %6495 = vmatpush.bf16.msra.mxu3 %v7881_v13  ;;  %v5741_v13 = vld [vmem:[%s14729_s25] sm:$0x3] }
 0x813   : > { %6435 = vmatpush.bf16.msra.mxu1 %v7909_v26  ;;  %6407 = vmatpush.bf16.msra.mxu0 %v7765_v5  ;;  %v7877_v34 = vor.u32 %v8189_v2, %v7876_v22  ;;  %v8147_v26 = vld [vmem:[#allocation27 + $0x4] sm:$0xf]  ;;  %v7845_v5 = vor.u32 %v8181_v27, %v7844_v1  ;;  %v14014_v3 = vperm.slane %v5741_v13, 0  ;;  %v7966_v1 = vld [vmem:[#allocation27 + $0x1f8] sm:$0xf0] }
 0x816   : > { %6496 = vmatpush.bf16.msra.mxu3 %v7865_v47  ;;  %v14016_v47 = vperm.slane %v5741_v13, 1 }
 0x817   : > { %6436 = vmatpush.bf16.msra.mxu1 %v7893_v38  ;;  %6408 = vmatpush.bf16.msra.mxu0 %v7749_v23 }
 0x81b   : > { %6437 = vmatpush.bf16.msra.mxu1 %v7877_v34  ;;  %6409 = vmatpush.bf16.msra.mxu0 %v7733_v11 }
 0x81f   : > { %6438 = vmatpush.bf16.msra.mxu1 %v7861_v36 }
 0x823   : > { %6439 = vmatpush.bf16.msra.mxu1 %v7845_v5 }
 0x842   : > { %v5745_v6 = vpop.xlane.xlu2 %5744 }
 0x843   : > { %v13990_v17 = vmul.f32 0.00390625, %v5745_v6  ;;  %v8151_v6 = vld [vmem:[#allocation27 + $0x24] sm:$0xf] }
 0x844   : > { %v7737_v42 = vor.u32 %v8151_v6, %v7734_v45 }
 0x845   : > { %v5823_v51 = vmul.f32 %v13990_v17, %v13990_v17  ;;  %v5748_v25 = vpop.xlane.xlu0 %5747  ;;  %v5948_v36 = vsub.f32 %v13542_v55, %v13990_v17 }
 0x846   : > { %v13994_v28 = vmul.f32 0.00390625, %v5748_v25  ;;  %6467 = vmatpush.bf16.msra.mxu2 %v7737_v42 }
 0x848   : > { %v5824_v20 = vmul.f32 %v13994_v28, %v13994_v28  ;;  %v5950_v55 = vsub.f32 %v13603_v18, %v13994_v28 }
 0x84c   : > { %v5793_v46 = vpop.xlane.xlu1 %5792 }
 0x84d   : > { %v5815_v33 = vmul.f32 0.00390625, %v5793_v46  ;;  %v8179_v46 = vld [vmem:[#allocation27 + $0x104] sm:$0xf] }
 0x84e   : > { %v7849_v49 = vor.u32 %v8179_v46, %v7846_v15  ;;  %v5949_v46 = vsub.f32 %v13580_v59, %v13990_v17  ;;  %v7838_v15 = vld [vmem:[#allocation27 + $0xf8] sm:$0xf0]  ;;  %v7836_v59 = vld [vmem:[#allocation27 + $0xe8] sm:$0xf] }
 0x84f   : > { %v5831_v0 = vsub.f32 %v5815_v33, %v5823_v51  ;;  %v7718_v51 = vld [vmem:[#allocation27 + $0x10] sm:$0xf0]  ;;  %v7716_v33 = vld [vmem:[#allocation27] sm:$0xf] }
 0x850   : > { %v7721_v31 = vor.u32 %v8147_v26, %v7718_v51  ;;  %6497 = vmatpush.bf16.msra.mxu3 %v7849_v49 }
 0x851   : > { %v13996_v24 = vadd.f32 0.1, %v5831_v0  ;;  %v7717_v0 = vor.u32 %v8149_v58, %v7716_v33  ;;  %v8208_v58 = vld [vmem:[#allocation27 + $0x1ec] sm:$0xf] }
 0x852   : > { %6468 = vmatpush.bf16.msra.mxu2 %v7721_v31  ;;  %v8176_v31 = vld [vmem:[#allocation27 + $0xec] sm:$0xf] }
 0x853   : > { %8886 = vrsqrt.f32 %v13996_v24  ;;  %6410 = vmatpush.bf16.msra.mxu0 %v7717_v0  ;;  %vm5853_vm11 = vweird.f32 %v13996_v24  ;;  %v7841_v49 = vor.u32 %v8176_v31, %v7838_v15  ;;  %v8204_v15 = vld [vmem:[#allocation27 + $0x1cc] sm:$0xf] }
 0x856   : > { %6577 = vmatpush.bf16.msrb.mxu2 %v7841_v49 }
 0x857   : > { %v5796_v63 = vpop.xlane.xlu2 %5795 }
 0x858   : > { %v5816_v30 = vmul.f32 0.00390625, %v5796_v63  ;;  %v5742_v63 = vld [vmem:[#allocation25] sm:$0x3] }
 0x859   : > { %v8887_v25 = vpop.eup %8886  ;;  %v5751_v38 = vpop.xlane.xlu0 %5750  ;;  %v14025_v51 = vperm.slane %v5742_v63, 0 }
 0x85a   : > { %v5832_v10 = vsub.f32 %v5816_v30, %v5824_v20  ;;  %v5848_v41 = vmul.f32 %v8887_v25, %v13996_v24  ;;  %v14002_v50 = vmul.f32 0.00390625, %v5751_v38  ;;  %vm5854_vm0 = vweird.f32 %v8887_v25 }
 0x85b   : > { %vm5855_vm12 = vmor %vm5853_vm11, %vm5854_vm0 }
 0x85c   : > { %v5840_v62 = vadd.f32 0.1, %v5832_v10  ;;  %v5849_v43 = vmul.f32 %v8887_v25, %v5848_v41  ;;  %v5825_v2 = vmul.f32 %v14002_v50, %v14002_v50  ;;  %v5951_v41 = vsub.f32 %v13592_v37, %v13994_v28 }
 0x85e   : > { %8888 = vrsqrt.f32 %v5840_v62  ;;  %v5850_v21 = vmul.f32 0.5, %v5849_v43  ;;  %vm5863_vm14 = vweird.f32 %v5840_v62  ;;  %v8178_v43 = vld [vmem:[#allocation27 + $0xf4] sm:$0xf0] }
 0x85f   : > { %v7837_v37 = vor.u32 %v8178_v43, %v7836_v59  ;;  %v8174_v59 = vld [vmem:[#allocation27 + $0xd4] sm:$0xf0] }
 0x860   : > { %v5851_v7 = vsub.f32 1.5, %v5850_v21 }
 0x861   : > { %6519 = vmatpush.bf16.msrb.mxu0 %v7837_v37 }
 0x862   : > { %v5754_v19 = vpop.xlane.xlu1 %5753  ;;  %v5852_v35 = vmul.f32 %v8887_v25, %v5851_v7  ;;  %v14042_v7 = vperm.slane %v5742_v63, 1 }
 0x863   : > { %v14004_v12 = vmul.f32 0.00390625, %v5754_v19 }
 0x864   : > { %v8889_v8 = vpop.eup %8888  ;;  %v5856_v42 = vsel %vm5855_vm12, %v8887_v25, %v5852_v35 }
 0x865   : > { %v5858_v22 = vmul.f32 %v8889_v8, %v5840_v62  ;;  %v5826_v45 = vmul.f32 %v14004_v12, %v14004_v12  ;;  %vm5864_vm13 = vweird.f32 %v8889_v8  ;;  %v5932_v26 = vmul.f32 %v14014_v3, %v5856_v42 }
 0x866   : > { %v5799_v23 = vpop.xlane.xlu2 %5798  ;;  %vm5865_vm15 = vmor %vm5863_vm14, %vm5864_vm13  ;;  %v5933_v33 = vmul.f32 %v14016_v47, %v5856_v42  ;;  %v7969_v62 = vor.u32 %v8208_v58, %v7966_v1  ;;  %v7820_v1 = vld [vmem:[#allocation27 + $0xc8] sm:$0xf] }
 0x867   : > { %v5859_v34 = vmul.f32 %v8889_v8, %v5858_v22  ;;  %v5817_v6 = vmul.f32 0.00390625, %v5799_v23  ;;  %v5964_v0 = vmul.f32 %v5948_v36, %v5932_v26  ;;  %v8210_v36 = vld [vmem:[#allocation27 + $0x1f4] sm:$0xf0]  ;;  %v8172_v26 = vld [vmem:[#allocation27 + $0xcc] sm:$0xf] }
 0x868   : > { %v5802_v20 = vpop.xlane.xlu0 %5801  ;;  %6606 = vmatpush.bf16.msrb.mxu3 %v7969_v62  ;;  %v5965_v19 = vmul.f32 %v5949_v46, %v5933_v33  ;;  %v7822_v46 = vld [vmem:[#allocation27 + $0xd8] sm:$0xf0] }
 0x869   : > { %v5860_v56 = vmul.f32 0.5, %v5859_v34  ;;  %v5833_v44 = vsub.f32 %v5817_v6, %v5825_v2  ;;  %v5818_v4 = vmul.f32 0.00390625, %v5802_v20  ;;  %v5985_v6 = vadd.f32 %v14025_v51, %v5964_v0  ;;  %v7950_v33 = vld [vmem:[#allocation27 + $0x1d8] sm:$0xf0] }
 0x86a   : > { %v5757_v11 = vpop.xlane.xlu1 %5756  ;;  %v7825_v62 = vor.u32 %v8172_v26, %v7822_v46  ;;  %v7953_v43 = vor.u32 %v8204_v15, %v7950_v33  ;;  %v7821_v0 = vor.u32 %v8174_v59, %v7820_v1  ;;  %v8168_v26 = vld [vmem:[#allocation27 + $0xac] sm:$0xf]  ;;  %v7806_v46 = vld [vmem:[#allocation27 + $0xb8] sm:$0xf0] }
 0x86b   : > { %v5861_v53 = vsub.f32 1.5, %v5860_v56  ;;  %v14018_v24 = vadd.f32 0.1, %v5833_v44  ;;  %v5834_v14 = vsub.f32 %v5818_v4, %v5826_v45  ;;  %v14020_v30 = vmul.f32 0.00390625, %v5757_v11  ;;  %v7964_v4 = vld [vmem:[#allocation27 + $0x1e8] sm:$0xf] }
 0x86c   : > { %v7965_v58 = vor.u32 %v8210_v36, %v7964_v4  ;;  %6578 = vmatpush.bf16.msrb.mxu2 %v7825_v62  ;;  %6607 = vmatpush.bf16.msrb.mxu3 %v7953_v43  ;;  %v5954_v4 = vsub.f32 %v13738_v60, %v14004_v12  ;;  %v8200_v33 = vld [vmem:[#allocation27 + $0x1ac] sm:$0xf] }
 0x86d   : > { %v5862_v25 = vmul.f32 %v8889_v8, %v5861_v53  ;;  %8890 = vrsqrt.f32 %v14018_v24  ;;  %v14030_v10 = vadd.f32 0.1, %v5834_v14  ;;  %v5827_v27 = vmul.f32 %v14020_v30, %v14020_v30  ;;  %6520 = vmatpush.bf16.msrb.mxu0 %v7821_v0 }
 0x86e   : > { %v5986_v53 = vadd.f32 %v14042_v7, %v5965_v19  ;;  %6548 = vmatpush.bf16.msrb.mxu1 %v7965_v58  ;;  %vm5873_vm2 = vweird.f32 %v14018_v24 }
 0x86f   : > { %v5866_v17 = vsel %vm5865_vm15, %v8889_v8, %v5862_v25  ;;  %8892 = vrsqrt.f32 %v14030_v10  ;;  %vm5883_vm9 = vweird.f32 %v14030_v10 }
 0x870   : > { %v5934_v5 = vmul.f32 %v14014_v3, %v5866_v17  ;;  %v5935_v18 = vmul.f32 %v14016_v47, %v5866_v17  ;;  %v5805_v38 = vpop.xlane.xlu0 %5804 }
 0x871   : > { %v5819_v28 = vmul.f32 0.00390625, %v5805_v38  ;;  %v5760_v21 = vpop.xlane.xlu2 %5759 }
 0x872   : > { %v5966_v8 = vmul.f32 %v5950_v55, %v5934_v5  ;;  %v5967_v13 = vmul.f32 %v5951_v41, %v5935_v18  ;;  %v14044_v35 = vmul.f32 0.00390625, %v5760_v21 }
 0x873   : > { %v8891_v22 = vpop.eup %8890  ;;  %v5835_v2 = vsub.f32 %v5819_v28, %v5827_v27  ;;  %v5808_v34 = vpop.xlane.xlu1 %5807 }
 0x874   : > { %v5868_v23 = vmul.f32 %v8891_v22, %v14018_v24  ;;  %v5820_v42 = vmul.f32 0.00390625, %v5808_v34  ;;  %v5828_v56 = vmul.f32 %v14044_v35, %v14044_v35  ;;  %v5987_v44 = vadd.f32 %v14025_v51, %v5966_v8 }
 0x875   : > { %v14048_v45 = vpop.eup %8892  ;;  %v14050_v20 = vadd.f32 0.1, %v5835_v2  ;;  %v5988_v14 = vadd.f32 %v14042_v7, %v5967_v13  ;;  %vm5874_vm1 = vweird.f32 %v8891_v22  ;;  %v5952_v8 = vsub.f32 %v13678_v16, %v14002_v50 }
 0x876   : > { %v5869_v63 = vmul.f32 %v8891_v22, %v5868_v23  ;;  %v5878_v11 = vmul.f32 %v14048_v45, %v14030_v10  ;;  %v5836_v25 = vsub.f32 %v5820_v42, %v5828_v56  ;;  %v14060_v31 = vpack.c.bf16 %v5987_v44, %v5985_v6  ;;  %vm5875_vm7 = vmor %vm5873_vm2, %vm5874_vm1  ;;  %v7948_v44 = vld [vmem:[#allocation27 + $0x1c8] sm:$0xf] }
 0x877   : > { %8894 = vrsqrt.f32 %v14050_v20  ;;  %v14063_v49 = vpack.c.bf16 %v5988_v14, %v5986_v53  ;;  %vm5884_vm3 = vweird.f32 %v14048_v45  ;;  %v5953_v6 = vsub.f32 %v13718_v29, %v14002_v50 }
 0x878   : > { %v5870_v55 = vmul.f32 0.5, %v5869_v63  ;;  %v5879_v41 = vmul.f32 %v14048_v45, %v5878_v11  ;;  %v14065_v17 = vadd.f32 0.1, %v5836_v25  ;;  %6411 = vmatmul.bf16.vlgmr.msra.gmra.mxu0 %v14060_v31  ;;  %6469 = vmatmul.bf16.vlgmr.msra.gmra.mxu2 %v14060_v31  ;;  %vm5885_vm4 = vmor %vm5883_vm9, %vm5884_vm3  ;;  %v5955_v25 = vsub.f32 %v13795_v52, %v14004_v12 }
 0x879   : > { %v5763_v27 = vpop.xlane.xlu2 %5762  ;;  %6440 = vmatmul.bf16.vlgmr.msra.gmra.mxu1 %v14063_v49  ;;  %6498 = vmatmul.bf16.vlgmr.msra.gmra.mxu3 %v14063_v49  ;;  %vm5893_vm5 = vweird.f32 %v14050_v20 }
 0x87a   : > { %v5871_v5 = vsub.f32 1.5, %v5870_v55  ;;  %v5880_v18 = vmul.f32 0.5, %v5879_v41  ;;  %v14071_v38 = vmul.f32 0.00390625, %v5763_v27  ;;  %8896 = vrsqrt.f32 %v14065_v17  ;;  %v7934_v55 = vld [vmem:[#allocation27 + $0x1b8] sm:$0xf0] }
 0x87b   : > { %v5811_v21 = vpop.xlane.xlu1 %5810  ;;  %v7804_v27 = vld [vmem:[#allocation27 + $0xa8] sm:$0xf]  ;;  %vm5903_vm0 = vweird.f32 %v14065_v17 }
 0x87c   : > { %v5872_v37 = vmul.f32 %v8891_v22, %v5871_v5  ;;  %v5881_v28 = vsub.f32 1.5, %v5880_v18  ;;  %v5821_v13 = vmul.f32 0.00390625, %v5811_v21  ;;  %v5829_v2 = vmul.f32 %v14071_v38, %v14071_v38  ;;  %v8202_v21 = vld [vmem:[#allocation27 + $0x1b4] sm:$0xf0] }
 0x87d   : > { %v14076_v19 = vpop.eup %8894  ;;  %v7809_v5 = vor.u32 %v8168_v26, %v7806_v46  ;;  %v7937_v18 = vor.u32 %v8200_v33, %v7934_v55  ;;  %v7774_v33 = vld [vmem:[#allocation27 + $0x78] sm:$0xf0]  ;;  %v5958_v55 = vsub.f32 %v13888_v9, %v14044_v35  ;;  %v7772_v9 = vld [vmem:[#allocation27 + $0x68] sm:$0xf] }
 0x87e   : > { %v5876_v23 = vsel %vm5875_vm7, %v8891_v22, %v5872_v37  ;;  %v5882_v24 = vmul.f32 %v14048_v45, %v5881_v28  ;;  %v5888_v34 = vmul.f32 %v14076_v19, %v14050_v20  ;;  %v5837_v56 = vsub.f32 %v5821_v13, %v5829_v2  ;;  %v8206_v22 = vld [vmem:[#allocation27 + $0x1d4] sm:$0xf0]  ;;  %v7932_v28 = vld [vmem:[#allocation27 + $0x1a8] sm:$0xf] }
 0x87f   : > { %v5936_v42 = vmul.f32 %v14014_v3, %v5876_v23  ;;  %v5937_v16 = vmul.f32 %v14016_v47, %v5876_v23  ;;  %v7949_v11 = vor.u32 %v8206_v22, %v7948_v44  ;;  %vm5894_vm6 = vweird.f32 %v14076_v19  ;;  %v8170_v37 = vld [vmem:[#allocation27 + $0xb4] sm:$0xf0]  ;;  %v8164_v23 = vld [vmem:[#allocation27 + $0x8c] sm:$0xf]  ;;  %6579 = vmatpush.bf16.msrb.mxu2 %v7809_v5  ;;  %6608 = vmatpush.bf16.msrb.mxu3 %v7937_v18  ;;  %v7918_v44 = vld [vmem:[#allocation27 + $0x198] sm:$0xf0] }
 0x880   : > { %v5886_v10 = vsel %vm5885_vm4, %v14048_v45, %v5882_v24  ;;  %v5889_v63 = vmul.f32 %v14076_v19, %v5888_v34  ;;  %v14097_v53 = vpop.eup %8896  ;;  %v14101_v14 = vadd.f32 0.1, %v5837_v56  ;;  %v7790_v24 = vld [vmem:[#allocation27 + $0x98] sm:$0xf0]  ;;  %vm5895_vm10 = vmor %vm5893_vm5, %vm5894_vm6  ;;  %v8196_v56 = vld [vmem:[#allocation27 + $0x18c] sm:$0xf]  ;;  %v5959_v5 = vsub.f32 %v13922_v54, %v14044_v35 }
 0x881   : > { %v5938_v29 = vmul.f32 %v14014_v3, %v5886_v10  ;;  %v5939_v50 = vmul.f32 %v14016_v47, %v5886_v10  ;;  %v5968_v36 = vmul.f32 %v5952_v8, %v5936_v42  ;;  %v5898_v45 = vmul.f32 %v14097_v53, %v14065_v17  ;;  %6549 = vmatpush.bf16.msrb.mxu1 %v7949_v11  ;;  %v7788_v11 = vld [vmem:[#allocation27 + $0x88] sm:$0xf]  ;;  %v8166_v20 = vld [vmem:[#allocation27 + $0x94] sm:$0xf0] }
 0x882   : > { %v5890_v60 = vmul.f32 0.5, %v5889_v63  ;;  %v5969_v15 = vmul.f32 %v5953_v6, %v5937_v16  ;;  %8898 = vrsqrt.f32 %v14101_v14  ;;  %vm5904_vm8 = vweird.f32 %v14097_v53 }
 0x883   : > { %v5766_v41 = vpop.xlane.xlu0 %5765  ;;  %v5970_v58 = vmul.f32 %v5954_v4, %v5938_v29  ;;  %v5899_v59 = vmul.f32 %v14097_v53, %v5898_v45  ;;  %v5971_v12 = vmul.f32 %v5955_v25, %v5939_v50  ;;  %v5989_v43 = vadd.f32 %v14025_v51, %v5968_v36  ;;  %v7916_v25 = vld [vmem:[#allocation27 + $0x188] sm:$0xf]  ;;  %vm5905_vm11 = vmor %vm5903_vm0, %vm5904_vm8 }
 0x884   : > { %v5891_v1 = vsub.f32 1.5, %v5890_v60  ;;  %v14111_v52 = vmul.f32 0.00390625, %v5766_v41  ;;  %v5990_v2 = vadd.f32 %v14042_v7, %v5969_v15  ;;  %v7805_v10 = vor.u32 %v8170_v37, %v7804_v27  ;;  %v8160_v15 = vld [vmem:[#allocation27 + $0x6c] sm:$0xf] }
 0x885   : > { %v5814_v62 = vpop.xlane.xlu2 %5813  ;;  %v5991_v0 = vadd.f32 %v14025_v51, %v5970_v58  ;;  %v5900_v13 = vmul.f32 0.5, %v5899_v59  ;;  %v5992_v16 = vadd.f32 %v14042_v7, %v5971_v12  ;;  %v7933_v63 = vor.u32 %v8202_v21, %v7932_v28  ;;  %v7902_v59 = vld [vmem:[#allocation27 + $0x178] sm:$0xf0]  ;;  %v8194_v28 = vld [vmem:[#allocation27 + $0x174] sm:$0xf0] }
 0x886   : > { %v5892_v8 = vmul.f32 %v14076_v19, %v5891_v1  ;;  %v5822_v34 = vmul.f32 0.00390625, %v5814_v62  ;;  %v5830_v6 = vmul.f32 %v14111_v52, %v14111_v52  ;;  %v5956_v50 = vsub.f32 %v13856_v40, %v14020_v30  ;;  %6521 = vmatpush.bf16.msrb.mxu0 %v7805_v10  ;;  %v8198_v40 = vld [vmem:[#allocation27 + $0x194] sm:$0xf0]  ;;  %v8192_v1 = vld [vmem:[#allocation27 + $0x16c] sm:$0xf] }
 0x887   : > { %v14124_v42 = vpack.c.bf16 %v5991_v0, %v5989_v43  ;;  %v5901_v4 = vsub.f32 1.5, %v5900_v13  ;;  %v14134_v46 = vpack.c.bf16 %v5992_v16, %v5990_v2  ;;  %v7793_v45 = vor.u32 %v8164_v23, %v7790_v24  ;;  %6550 = vmatpush.bf16.msrb.mxu1 %v7933_v63  ;;  %v8162_v43 = vld [vmem:[#allocation27 + $0x74] sm:$0xf0]  ;;  %v7900_v0 = vld [vmem:[#allocation27 + $0x168] sm:$0xf] }
 0x888   : > { %v5896_v22 = vsel %vm5895_vm10, %v14076_v19, %v5892_v8  ;;  %v14128_v29 = vpop.eup %8898  ;;  %v5838_v26 = vsub.f32 %v5822_v34, %v5830_v6  ;;  %v7921_v17 = vor.u32 %v8196_v56, %v7918_v44  ;;  %v7789_v58 = vor.u32 %v8166_v20, %v7788_v11  ;;  %v8156_v21 = vld [vmem:[#allocation27 + $0x4c] sm:$0xf]  ;;  %v7886_v34 = vld [vmem:[#allocation27 + $0x158] sm:$0xf0]  ;;  %v7756_v56 = vld [vmem:[#allocation27 + $0x48] sm:$0xf] }
 0x889   : > { %v5940_v36 = vmul.f32 %v14014_v3, %v5896_v22  ;;  %6416 = vmatmul.bf16.gmra.mxu0 %v14124_v42  ;;  %v5902_v19 = vmul.f32 %v14097_v53, %v5901_v4  ;;  %v5908_v60 = vmul.f32 %v14128_v29, %v14101_v14  ;;  %6474 = vmatmul.bf16.gmra.mxu2 %v14124_v42  ;;  %v8188_v24 = vld [vmem:[#allocation27 + $0x14c] sm:$0xf]  ;;  %v8158_v44 = vld [vmem:[#allocation27 + $0x54] sm:$0xf0]  ;;  %v7884_v20 = vld [vmem:[#allocation27 + $0x148] sm:$0xf]  ;;  %vm5914_vm12 = vweird.f32 %v14128_v29 }
 0x88a   : > { %v14145_v41 = vadd.f32 0.1, %v5838_v26  ;;  %6445 = vmatmul.bf16.gmra.mxu1 %v14134_v46  ;;  %6503 = vmatmul.bf16.gmra.mxu3 %v14134_v46  ;;  %v5941_v12 = vmul.f32 %v14016_v47, %v5896_v22  ;;  %v5957_v8 = vsub.f32 %v13861_v61, %v14020_v30  ;;  %v7917_v23 = vor.u32 %v8198_v40, %v7916_v25  ;;  %v8152_v26 = vld [vmem:[#allocation27 + $0x2c] sm:$0xf]  ;;  %v7742_v25 = vld [vmem:[#allocation27 + $0x38] sm:$0xf0] }
 0x88b   : > { %v5906_v27 = vsel %vm5905_vm11, %v14097_v53, %v5902_v19  ;;  %v5909_v62 = vmul.f32 %v14128_v29, %v5908_v60  ;;  %6580 = vmatpush.bf16.msrb.mxu2 %v7793_v45  ;;  %6609 = vmatpush.bf16.msrb.mxu3 %v7921_v17  ;;  %v7758_v53 = vld [vmem:[#allocation27 + $0x58] sm:$0xf0]  ;;  %v5972_v2 = vmul.f32 %v5956_v50, %v5940_v36  ;;  %v8190_v50 = vld [vmem:[#allocation27 + $0x154] sm:$0xf0]  ;;  %v8184_v40 = vld [vmem:[#allocation27 + $0x12c] sm:$0xf]  ;;  %vm5913_vm13 = vweird.f32 %v14101_v14 }
 0x88c   : > { %v5942_v18 = vmul.f32 %v14014_v3, %v5906_v27  ;;  %v5943_v37 = vmul.f32 %v14016_v47, %v5906_v27  ;;  %8900 = vrsqrt.f32 %v14145_v41  ;;  %6522 = vmatpush.bf16.msrb.mxu0 %v7789_v58  ;;  %v7777_v6 = vor.u32 %v8160_v15, %v7774_v33  ;;  %6551 = vmatpush.bf16.msrb.mxu1 %v7917_v23  ;;  %v7870_v15 = vld [vmem:[#allocation27 + $0x138] sm:$0xf0]  ;;  %v7740_v58 = vld [vmem:[#allocation27 + $0x28] sm:$0xf]  ;;  %v8154_v27 = vld [vmem:[#allocation27 + $0x34] sm:$0xf0] }
 0x88d   : > { %v5910_v13 = vmul.f32 0.5, %v5909_v62  ;;  %v7905_v16 = vor.u32 %v8192_v1, %v7902_v59  ;;  %v5973_v4 = vmul.f32 %v5957_v8, %v5941_v12  ;;  %v7773_v10 = vor.u32 %v8162_v43, %v7772_v9  ;;  %v7868_v62 = vld [vmem:[#allocation27 + $0x128] sm:$0xf]  ;;  %v8186_v9 = vld [vmem:[#allocation27 + $0x134] sm:$0xf0]  ;;  %vm5915_vm14 = vmor %vm5913_vm13, %vm5914_vm12 }
 0x88e   : > { %v5974_v54 = vmul.f32 %v5958_v55, %v5942_v18  ;;  %v5975_v35 = vmul.f32 %v5959_v5, %v5943_v37  ;;  %v7901_v63 = vor.u32 %v8194_v28, %v7900_v0  ;;  %v7761_v61 = vor.u32 %v8156_v21, %v7758_v53  ;;  %v8148_v5 = vld [vmem:[#allocation27 + $0xc] sm:$0xf]  ;;  %v7726_v18 = vld [vmem:[#allocation27 + $0x18] sm:$0xf0]  ;;  %v7724_v23 = vld [vmem:[#allocation27 + $0x8] sm:$0xf] }
 0x88f   : > { %v5911_v22 = vsub.f32 1.5, %v5910_v13  ;;  %6581 = vmatpush.bf16.msrb.mxu2 %v7777_v6  ;;  %6610 = vmatpush.bf16.msrb.mxu3 %v7905_v16  ;;  %v7889_v30 = vor.u32 %v8188_v24, %v7886_v34  ;;  %v7757_v36 = vor.u32 %v8158_v44, %v7756_v56  ;;  %v5993_v60 = vadd.f32 %v14025_v51, %v5972_v2  ;;  %v8180_v28 = vld [vmem:[#allocation27 + $0x10c] sm:$0xf]  ;;  %v7854_v21 = vld [vmem:[#allocation27 + $0x118] sm:$0xf0] }
 0x890   : > { %v5995_v11 = vadd.f32 %v14025_v51, %v5974_v54  ;;  %6523 = vmatpush.bf16.msrb.mxu0 %v7773_v10  ;;  %v5996_v45 = vadd.f32 %v14042_v7, %v5975_v35  ;;  %6552 = vmatpush.bf16.msrb.mxu1 %v7901_v63  ;;  %v7885_v17 = vor.u32 %v8190_v50, %v7884_v20  ;;  %v8150_v24 = vld [vmem:[#allocation27 + $0x14] sm:$0xf0]  ;;  %v7852_v34 = vld [vmem:[#allocation27 + $0x108] sm:$0xf]  ;;  %vm5923_vm1 = vweird.f32 %v14145_v41 }
 0x891   : > { %v5912_v33 = vmul.f32 %v14128_v29, %v5911_v22  ;;  %v5994_v59 = vadd.f32 %v14042_v7, %v5973_v4  ;;  %v7745_v12 = vor.u32 %v8152_v26, %v7742_v25  ;;  %v7873_v0 = vor.u32 %v8184_v40, %v7870_v15  ;;  %v8182_v54 = vld [vmem:[#allocation27 + $0x114] sm:$0xf0] }
 0x892   : > { %v8901_v19 = vpop.eup %8900  ;;  %v14165_v1 = vpack.c.bf16 %v5995_v11, %v5993_v60  ;;  %v7741_v13 = vor.u32 %v8154_v27, %v7740_v58  ;;  %v7869_v2 = vor.u32 %v8186_v9, %v7868_v62  ;;  %v7729_v14 = vor.u32 %v8148_v5, %v7726_v18 }
 0x893   : > { %v5918_v55 = vmul.f32 %v8901_v19, %v14145_v41  ;;  %6582 = vmatpush.bf16.msrb.mxu2 %v7761_v61  ;;  %6611 = vmatpush.bf16.msrb.mxu3 %v7889_v30  ;;  %v14171_v37 = vpack.c.bf16 %v5996_v45, %v5994_v59  ;;  %v5916_v53 = vsel %vm5915_vm14, %v14128_v29, %v5912_v33  ;;  %vm5924_vm15 = vweird.f32 %v8901_v19 }
 0x894   : > { %6524 = vmatpush.bf16.msrb.mxu0 %v7757_v36  ;;  %6553 = vmatpush.bf16.msrb.mxu1 %v7885_v17  ;;  %v7857_v6 = vor.u32 %v8180_v28, %v7854_v21  ;;  %v5944_v29 = vmul.f32 %v14014_v3, %v5916_v53  ;;  %v7725_v56 = vor.u32 %v8150_v24, %v7724_v23  ;;  %vm5925_vm2 = vmor %vm5923_vm1, %vm5924_vm15 }
 0x895   : > { %v5919_v43 = vmul.f32 %v8901_v19, %v5918_v55  ;;  %v7853_v44 = vor.u32 %v8182_v54, %v7852_v34  ;;  %v5960_v22 = vsub.f32 %v13960_v32, %v14071_v38  ;;  %v5945_v4 = vmul.f32 %v14016_v47, %v5916_v53 }
 0x896   : > { %v5961_v10 = vsub.f32 %v13963_v48, %v14071_v38  ;;  %v5962_v63 = vsub.f32 %v13979_v57, %v14111_v52  ;;  %v5963_v41 = vsub.f32 %v13982_v39, %v14111_v52 }
 0x897   : > { %v5920_v8 = vmul.f32 0.5, %v5919_v43  ;;  %6583 = vmatpush.bf16.msrb.mxu2 %v7745_v12  ;;  %6612 = vmatpush.bf16.msrb.mxu3 %v7873_v0  ;;  %v5976_v30 = vmul.f32 %v5960_v22, %v5944_v29 }
 0x898   : > { %6525 = vmatpush.bf16.msrb.mxu0 %v7741_v13  ;;  %6554 = vmatpush.bf16.msrb.mxu1 %v7869_v2  ;;  %v5977_v50 = vmul.f32 %v5961_v10, %v5945_v4 }
 0x899   : > { %6421 = vmatmul.bf16.gmra.mxu0 %v14165_v1  ;;  %v5921_v35 = vsub.f32 1.5, %v5920_v8  ;;  %6479 = vmatmul.bf16.gmra.mxu2 %v14165_v1  ;;  %v5997_v48 = vadd.f32 %v14025_v51, %v5976_v30 }
 0x89a   : > { %6450 = vmatmul.bf16.gmra.mxu1 %v14171_v37  ;;  %6508 = vmatmul.bf16.gmra.mxu3 %v14171_v37  ;;  %v5998_v25 = vadd.f32 %v14042_v7, %v5977_v50 }
 0x89b   : > { %v5922_v16 = vmul.f32 %v8901_v19, %v5921_v35  ;;  %6584 = vmatpush.bf16.msrb.mxu2 %v7729_v14  ;;  %6613 = vmatpush.bf16.msrb.mxu3 %v7857_v6 }
 0x89c   : > { %6526 = vmatpush.bf16.msrb.mxu0 %v7725_v56  ;;  %6555 = vmatpush.bf16.msrb.mxu1 %v7853_v44 }
 0x89d   : > { %v5926_v11 = vsel %vm5925_vm2, %v8901_v19, %v5922_v16 }
 0x89e   : > { %v5946_v61 = vmul.f32 %v14014_v3, %v5926_v11  ;;  %v5947_v32 = vmul.f32 %v14016_v47, %v5926_v11  ;;  %v14211_v3 = vld [vmem:[%s14730_s8] sm:$0xf] }
 0x8a0   : > { %v5978_v20 = vmul.f32 %v5962_v63, %v5946_v61  ;;  %v5979_v36 = vmul.f32 %v5963_v41, %v5947_v32 }
 0x8a2   : > { %v5999_v38 = vadd.f32 %v14025_v51, %v5978_v20  ;;  %v6000_v57 = vadd.f32 %v14042_v7, %v5979_v36  ;;  %v14214_v51 = vperm.slane %v14211_v3, 0 }
 0x8a4   : > { %v6007_v26 = vpack.c.bf16 %v5999_v38, %v5997_v48  ;;  %v6008_v39 = vpack.c.bf16 %v6000_v57, %v5998_v25 }
 0x8a9   : > { %6426 = vmatmul.bf16.gmra.mxu0 %v6007_v26  ;;  %6484 = vmatmul.bf16.gmra.mxu2 %v6007_v26 }
 0x8aa   : > { %6455 = vmatmul.bf16.gmra.mxu1 %v6008_v39  ;;  %6513 = vmatmul.bf16.gmra.mxu3 %v6008_v39 }
 0x8b9   : > { %6527 = vmatmul.bf16.vlgmr.msrb.gmra.mxu0 %v14060_v31  ;;  %6585 = vmatmul.bf16.vlgmr.msrb.gmra.mxu2 %v14060_v31  ;;  %v14217_v31 = vperm.slane %v14211_v3, 1 }
 0x8ba   : > { %6556 = vmatmul.bf16.vlgmr.msrb.gmra.mxu1 %v14063_v49  ;;  %6614 = vmatmul.bf16.vlgmr.msrb.gmra.mxu3 %v14063_v49 }
 0x8c9   : > { %6532 = vmatmul.bf16.gmra.mxu0 %v14124_v42  ;;  %6590 = vmatmul.bf16.gmra.mxu2 %v14124_v42 }
 0x8ca   : > { %6561 = vmatmul.bf16.gmra.mxu1 %v14134_v46  ;;  %6619 = vmatmul.bf16.gmra.mxu3 %v14134_v46 }
 0x8d9   : > { %6537 = vmatmul.bf16.gmra.mxu0 %v14165_v1  ;;  %6595 = vmatmul.bf16.gmra.mxu2 %v14165_v1 }
 0x8da   : > { %6566 = vmatmul.bf16.gmra.mxu1 %v14171_v37  ;;  %6624 = vmatmul.bf16.gmra.mxu3 %v14171_v37 }
 0x8e9   : > { %6542 = vmatmul.bf16.gmra.mxu0 %v6007_v26  ;;  %6600 = vmatmul.bf16.gmra.mxu2 %v6007_v26 }
 0x8ea   : > { %6571 = vmatmul.bf16.gmra.mxu1 %v6008_v39  ;;  %6629 = vmatmul.bf16.gmra.mxu3 %v6008_v39 }
 0x8f5   : > { %v6412_v47 = vpop.f32.mrf.mxu0 }
 0x8f6   : > { %v6441_v7 = vpop.f32.mrf.mxu1  ;;  %v6413_v49 = vadd.f32 %v6412_v47, %v14214_v51 }
 0x8f8   : > { %v6442_v60 = vadd.f32 %v6441_v7, %v6413_v49 }
 0x8fb   : > { %v6470_v52 = vpop.f32.mrf.mxu2 }
 0x8fc   : > { %v6471_v42 = vadd.f32 %v6470_v52, %v14217_v31  ;;  %v6499_v46 = vpop.f32.mrf.mxu3 }
 0x8fd   : > { %v6414_v19 = vpop.f32.mrf.mxu0 }
 0x8fe   : > { %v6500_v45 = vadd.f32 %v6499_v46, %v6471_v42  ;;  %v6443_v40 = vpop.f32.mrf.mxu1  ;;  %v6415_v33 = vadd.f32 %v6414_v19, %v14214_v51 }
 0x900   : > { %v6635_v15 = vpack.c.bf16 %v6500_v45, %v6442_v60  ;;  %v6444_v59 = vadd.f32 %v6443_v40, %v6415_v33  ;;  %v14243_v33 = vperm.slane %v14211_v3, 2 }
 0x902   : > { %6651 = vst [vmem:[%s9985_s17] sm:$0xff] %v6635_v15 }
 0x903   : > { %v6472_v55 = vpop.f32.mrf.mxu2 }
 0x904   : > { %v6473_v17 = vadd.f32 %v6472_v55, %v14217_v31  ;;  %v6501_v58 = vpop.f32.mrf.mxu3 }
 0x906   : > { %v6417_v1 = vpop.f32.mrf.mxu0  ;;  %v6502_v12 = vadd.f32 %v6501_v58, %v6473_v17  ;;  %v14246_v58 = vperm.slane %v14211_v3, 3 }
 0x907   : > { %v6446_v27 = vpop.f32.mrf.mxu1  ;;  %v6418_v9 = vadd.f32 %v6417_v1, %v14214_v51 }
 0x908   : > { %v6637_v62 = vpack.c.bf16 %v6502_v12, %v6444_v59 }
 0x909   : > { %v6447_v37 = vadd.f32 %v6446_v27, %v6418_v9 }
 0x90a   : > { %6653 = vst [vmem:[%s9985_s17 + $0x10] sm:$0xff] %v6637_v62 }
 0x90c   : > { %v6475_v43 = vpop.f32.mrf.mxu2 }
 0x90d   : > { %v6476_v0 = vadd.f32 %v6475_v43, %v14217_v31  ;;  %v6504_v5 = vpop.f32.mrf.mxu3 }
 0x90e   : > { %v6419_v18 = vpop.f32.mrf.mxu0 }
 0x90f   : > { %v6505_v28 = vadd.f32 %v6504_v5, %v6476_v0  ;;  %v6448_v21 = vpop.f32.mrf.mxu1  ;;  %v6420_v8 = vadd.f32 %v6419_v18, %v14214_v51 }
 0x911   : > { %v6639_v53 = vpack.c.bf16 %v6505_v28, %v6447_v37  ;;  %v6449_v24 = vadd.f32 %v6448_v21, %v6420_v8 }
 0x913   : > { %6655 = vst [vmem:[%s9985_s17 + $0x20] sm:$0xff] %v6639_v53 }
 0x914   : > { %v6477_v13 = vpop.f32.mrf.mxu2 }
 0x915   : > { %v6478_v2 = vadd.f32 %v6477_v13, %v14217_v31  ;;  %v6506_v23 = vpop.f32.mrf.mxu3 }
 0x916   : > { %v6422_v14 = vpop.f32.mrf.mxu0 }
 0x917   : > { %v6507_v34 = vadd.f32 %v6506_v23, %v6478_v2  ;;  %v6451_v54 = vpop.f32.mrf.mxu1  ;;  %v6423_v6 = vadd.f32 %v6422_v14, %v14214_v51 }
 0x919   : > { %v6641_v35 = vpack.c.bf16 %v6507_v34, %v6449_v24  ;;  %v6452_v22 = vadd.f32 %v6451_v54, %v6423_v6 }
 0x91b   : > { %6657 = vst [vmem:[%s9985_s17 + $0x30] sm:$0xff] %v6641_v35 }
 0x91c   : > { %v6480_v29 = vpop.f32.mrf.mxu2 }
 0x91d   : > { %v6481_v16 = vadd.f32 %v6480_v29, %v14217_v31  ;;  %v6509_v56 = vpop.f32.mrf.mxu3 }
 0x91e   : > { %v6424_v44 = vpop.f32.mrf.mxu0 }
 0x91f   : > { %v6510_v4 = vadd.f32 %v6509_v56, %v6481_v16  ;;  %v6453_v10 = vpop.f32.mrf.mxu1  ;;  %v6425_v11 = vadd.f32 %v6424_v44, %v14214_v51 }
 0x921   : > { %v6643_v63 = vpack.c.bf16 %v6510_v4, %v6452_v22  ;;  %v6454_v20 = vadd.f32 %v6453_v10, %v6425_v11 }
 0x923   : > { %6659 = vst [vmem:[%s9985_s17 + $0x40] sm:$0xff] %v6643_v63 }
 0x924   : > { %v6482_v41 = vpop.f32.mrf.mxu2 }
 0x925   : > { %v6483_v61 = vadd.f32 %v6482_v41, %v14217_v31  ;;  %v6511_v32 = vpop.f32.mrf.mxu3 }
 0x926   : > { %v6427_v30 = vpop.f32.mrf.mxu0 }
 0x927   : > { %v6512_v50 = vadd.f32 %v6511_v32, %v6483_v61  ;;  %v6456_v36 = vpop.f32.mrf.mxu1  ;;  %v6428_v38 = vadd.f32 %v6427_v30, %v14214_v51 }
 0x929   : > { %v6645_v48 = vpack.c.bf16 %v6512_v50, %v6454_v20  ;;  %v6457_v47 = vadd.f32 %v6456_v36, %v6428_v38 }
 0x92b   : > { %6661 = vst [vmem:[%s9985_s17 + $0x50] sm:$0xff] %v6645_v48 }
 0x92c   : > { %v6485_v57 = vpop.f32.mrf.mxu2 }
 0x92d   : > { %v6486_v26 = vadd.f32 %v6485_v57, %v14217_v31  ;;  %v6514_v25 = vpop.f32.mrf.mxu3 }
 0x92e   : > { %v6429_v39 = vpop.f32.mrf.mxu0 }
 0x92f   : > { %v6515_v7 = vadd.f32 %v6514_v25, %v6486_v26  ;;  %v6458_v49 = vpop.f32.mrf.mxu1  ;;  %v6430_v42 = vadd.f32 %v6429_v39, %v14214_v51 }
 0x931   : > { %v6647_v52 = vpack.c.bf16 %v6515_v7, %v6457_v47  ;;  %v6459_v40 = vadd.f32 %v6458_v49, %v6430_v42 }
 0x933   : > { %6663 = vst [vmem:[%s9985_s17 + $0x60] sm:$0xff] %v6647_v52 }
 0x934   : > { %v6487_v46 = vpop.f32.mrf.mxu2 }
 0x935   : > { %v6488_v19 = vadd.f32 %v6487_v46, %v14217_v31  ;;  %v6516_v60 = vpop.f32.mrf.mxu3 }
 0x936   : > { %v6528_v45 = vpop.f32.mrf.mxu0 }
 0x937   : > { %v6517_v15 = vadd.f32 %v6516_v60, %v6488_v19  ;;  %v6557_v55 = vpop.f32.mrf.mxu1  ;;  %v6529_v1 = vadd.f32 %v6528_v45, %v14243_v33 }
 0x939   : > { %v6649_v17 = vpack.c.bf16 %v6517_v15, %v6459_v40  ;;  %v6558_v27 = vadd.f32 %v6557_v55, %v6529_v1 }
 0x93b   : > { %6665 = vst [vmem:[%s9985_s17 + $0x70] sm:$0xff] %v6649_v17 }
 0x93c   : > { %v6586_v51 = vpop.f32.mrf.mxu2 }
 0x93d   : > { %v6587_v59 = vadd.f32 %v6586_v51, %v14246_v58  ;;  %v6615_v31 = vpop.f32.mrf.mxu3 }
 0x93e   : > { %v6530_v12 = vpop.f32.mrf.mxu0 }
 0x93f   : > { %v6616_v62 = vadd.f32 %v6615_v31, %v6587_v59  ;;  %v6559_v9 = vpop.f32.mrf.mxu1  ;;  %v6531_v0 = vadd.f32 %v6530_v12, %v14243_v33 }
 0x941   : > { %v6636_v43 = vpack.c.bf16 %v6616_v62, %v6558_v27  ;;  %v6560_v28 = vadd.f32 %v6559_v9, %v6531_v0 }
 0x943   : > { %6652 = vst [vmem:[%s9985_s17 + $0x8] sm:$0xff] %v6636_v43 }
 0x944   : > { %v6588_v5 = vpop.f32.mrf.mxu2 }
 0x945   : > { %v6589_v3 = vadd.f32 %v6588_v5, %v14246_v58  ;;  %v6617_v18 = vpop.f32.mrf.mxu3 }
 0x946   : > { %v6533_v37 = vpop.f32.mrf.mxu0 }
 0x947   : > { %v6618_v21 = vadd.f32 %v6617_v18, %v6589_v3  ;;  %v6562_v53 = vpop.f32.mrf.mxu1  ;;  %v6534_v13 = vadd.f32 %v6533_v37, %v14243_v33 }
 0x949   : > { %v6638_v8 = vpack.c.bf16 %v6618_v21, %v6560_v28  ;;  %v6563_v34 = vadd.f32 %v6562_v53, %v6534_v13 }
 0x94b   : > { %6654 = vst [vmem:[%s9985_s17 + $0x18] sm:$0xff] %v6638_v8 }
 0x94c   : > { %v6591_v2 = vpop.f32.mrf.mxu2 }
 0x94d   : > { %v6592_v23 = vadd.f32 %v6591_v2, %v14246_v58  ;;  %v6620_v14 = vpop.f32.mrf.mxu3 }
 0x94e   : > { %v6535_v24 = vpop.f32.mrf.mxu0 }
 0x94f   : > { %v6621_v54 = vadd.f32 %v6620_v14, %v6592_v23  ;;  %v6564_v35 = vpop.f32.mrf.mxu1  ;;  %v6536_v29 = vadd.f32 %v6535_v24, %v14243_v33 }
 0x951   : > { %v6640_v6 = vpack.c.bf16 %v6621_v54, %v6563_v34  ;;  %v6565_v4 = vadd.f32 %v6564_v35, %v6536_v29 }
 0x953   : > { %6656 = vst [vmem:[%s9985_s17 + $0x28] sm:$0xff] %v6640_v6 }
 0x954   : > { %v6593_v16 = vpop.f32.mrf.mxu2 }
 0x955   : > { %v6594_v56 = vadd.f32 %v6593_v16, %v14246_v58  ;;  %v6622_v44 = vpop.f32.mrf.mxu3 }
 0x956   : > { %v6538_v22 = vpop.f32.mrf.mxu0 }
 0x957   : > { %v6623_v10 = vadd.f32 %v6622_v44, %v6594_v56  ;;  %v6567_v63 = vpop.f32.mrf.mxu1  ;;  %v6539_v41 = vadd.f32 %v6538_v22, %v14243_v33 }
 0x959   : > { %v6642_v11 = vpack.c.bf16 %v6623_v10, %v6565_v4  ;;  %v6568_v50 = vadd.f32 %v6567_v63, %v6539_v41 }
 0x95b   : > { %6658 = vst [vmem:[%s9985_s17 + $0x38] sm:$0xff] %v6642_v11 }
 0x95c   : > { %v6596_v61 = vpop.f32.mrf.mxu2 }
 0x95d   : > { %v6597_v32 = vadd.f32 %v6596_v61, %v14246_v58  ;;  %v6625_v30 = vpop.f32.mrf.mxu3 }
 0x95e   : > { %v6540_v20 = vpop.f32.mrf.mxu0 }
 0x95f   : > { %v6626_v36 = vadd.f32 %v6625_v30, %v6597_v32  ;;  %v6569_v38 = vpop.f32.mrf.mxu1  ;;  %v6541_v57 = vadd.f32 %v6540_v20, %v14243_v33 }
 0x961   : > { %v6644_v48 = vpack.c.bf16 %v6626_v36, %v6568_v50  ;;  %v6570_v7 = vadd.f32 %v6569_v38, %v6541_v57 }
 0x963   : > { %6660 = vst [vmem:[%s9985_s17 + $0x48] sm:$0xff] %v6644_v48 }
 0x964   : > { %v6598_v26 = vpop.f32.mrf.mxu2 }
 0x965   : > { %v6599_v25 = vadd.f32 %v6598_v26, %v14246_v58  ;;  %v6627_v39 = vpop.f32.mrf.mxu3 }
 0x966   : > { %v6543_v47 = vpop.f32.mrf.mxu0 }
 0x967   : > { %v6628_v49 = vadd.f32 %v6627_v39, %v6599_v25  ;;  %v6544_v42 = vadd.f32 %v6543_v47, %v14243_v33  ;;  %v6572_v46 = vpop.f32.mrf.mxu1 }
 0x969   : > { %v6646_v52 = vpack.c.bf16 %v6628_v49, %v6570_v7  ;;  %v6573_v40 = vadd.f32 %v6572_v46, %v6544_v42 }
 0x96b   : > { %6662 = vst [vmem:[%s9985_s17 + $0x58] sm:$0xff] %v6646_v52 }
 0x96c   : > { %v6601_v19 = vpop.f32.mrf.mxu2 }
 0x96d   : > { %v6602_v60 = vadd.f32 %v6601_v19, %v14246_v58  ;;  %v6630_v45 = vpop.f32.mrf.mxu3 }
 0x96e   : > { %v6545_v55 = vpop.f32.mrf.mxu0 }
 0x96f   : > { %v6631_v15 = vadd.f32 %v6630_v45, %v6602_v60  ;;  %v6546_v1 = vadd.f32 %v6545_v55, %v14243_v33  ;;  %v6574_v31 = vpop.f32.mrf.mxu1 }
 0x971   : > { %v6648_v17 = vpack.c.bf16 %v6631_v15, %v6573_v40  ;;  %v6575_v27 = vadd.f32 %v6574_v31, %v6546_v1 }
 0x973   : > { %6664 = vst [vmem:[%s9985_s17 + $0x68] sm:$0xff] %v6648_v17 }
 0x974   : > { %v6603_v51 = vpop.f32.mrf.mxu2 }
 0x975   : > { %v6604_v59 = vadd.f32 %v6603_v51, %v14246_v58  ;;  %v6632_v12 = vpop.f32.mrf.mxu3 }
 0x977   : > { %v6633_v62 = vadd.f32 %v6632_v12, %v6604_v59 }
 0x979   : > { %v6650_v9 = vpack.c.bf16 %v6633_v62, %v6575_v27 }
 0x97b   : > { %6666 = vst [vmem:[%s9985_s17 + $0x78] sm:$0xff] %v6650_v9 }
 0x97c PF: > { %s14731_s12 = sld [smem:[#allocation46_spill]]  ;;  %s6681_s18 = sshll.u32 %s9985_s17, 4  ;;  %s6682_s18 = int_to_ptr.vmem [resolvable:$true] %s6681_s18 }
 0x97d   : > { %s14733_s22 = sld [smem:[#allocation76_spill]]  ;;  %s6668_s13 = scalar_lea.sflag [#allocation6], %s986_s20 }
 0x982   : > { %s8212_s1 = sshll.u32 %s14731_s12, 7 }
 0x983   : > { %s6680_s16 = scalar_lea.hbm %s14733_s22, %s8212_s1  ;;  %s9372_s24 = scalar_lea.hbm %s14733_s22, 512 }
 0x984   : > { %s6683_s29 = sshll.u32 %s6680_s16, 4  ;;  %s6684_s29 = int_to_ptr.hbm [resolvable:$true] %s6683_s29 }
 0x985   : > { %s9366_s21 = sshra.s32 %s6684_s29, 4  ;;  %s9367_s21 = int_to_ptr.hbm [resolvable:$true] %s9366_s21 }
 0x986   : > { %s9368_s23 = scalar_lea.hbm %s9367_s21, 128  ;;  %p9373_p4 = scmp.lt.s32.totalorder %s9367_s21, %s14733_s22 }
 0x987   : > { %p9369_p11 = scmp.ne.s32.totalorder %s9367_s21, %s9368_s23  ;;  %p9374_p5 = scmp.lt.s32.totalorder %s9372_s24, %s9368_s23 }
 0x989   : > { %p9370_p0 = pnand %p9369_p11, %p9878_p6  ;;  %p9375_p7 = por %p9374_p5, %p9373_p4 }
 0x98b   : > { %p9371_p2 = pneg %p9370_p0 }
 0x98d   : > { %p9376_p9 = pnand %p9375_p7, %p9371_p2 }
 0x98f   : > { %9379 = shalt.err (!%p9376_p9)
}
 0x990   : > { %s9551_s20 = smov 256   ;;  %s9552_s17 = smov 16  }
 0x991   : > { %8269 = dma.vmem_to_hbm [thread:$0]  (%p9878_p6), %s6682_s18, 2048, %s6684_s29, %s6668_s13, %s9551_s20, %s9551_s20, %s9552_s17  }
 0x992 PF: > { %s14734_s30 = sld [smem:[#allocation39_spill]]  ;;  %p8349_p12 = scmp.ge.s32.totalorder %s9530_s3, 2 }
 0x994   : > { %p8319_p3 = pnand %p8349_p12, %p9892_p1 }
 0x996   : > { %p8320_p8 = pneg %p8319_p3 }
 0x998   : > { %s6698_s0 = sand.u32 1, %s14734_s30  }
 0x999   : > { %s6699_s8 = scalar_lea.sflag [#allocation6], %s6698_s0 }
 0x99a   : > { %9473 = dma.done.wait (%p8320_p8), %s6699_s8, 2048  }
 0x99b   : > { %9475 = vsyncadd (%p8320_p8), %s6699_s8, 4294965248  ;;  %s48_s3 = sadd.s32 1, %s9530_s3   ;;  %s14736_s4 = sld [smem:[#allocation40_spill]] }
 0x99c   : > { %p14295_p13 = scmp.ge.s32.totalorder %s48_s3, 10   ;;  %s14737_s30 = sld [smem:[#allocation41_spill]] }
 0x99d   : > { %s14738_s25 = sld [smem:[#allocation43_spill]]  ;;  %s14743_s24 = smov %s14758_s19 }
 0x99e   : > { %s14739_s5 = sld [smem:[#allocation44_spill]]  ;;  %s14744_s1 = smov %s9912_s7 }
 0x99f   : > { %s14740_s9 = sld [smem:[#allocation47_spill]]  ;;  %s14745_s26 = smov %s9506_s2 }
 0x9a0   : > { %s14741_s11 = sld [smem:[#allocation50_spill]]  ;;  %s14746_s2 = smov %s9510_s6 }
 0x9a1   : > { %s14742_s29 = sld [smem:[#allocation51_spill]]  ;;  %s14747_s6 = smov %s9886_s10 }
 0x9a2   : > { %s14748_s27 = smov %s9522_s28  ;;  %47 = sbr.rel (!%p14295_p13) target bundleno = 43 (0x2b), region = 230 }
 0x9a5   : > { %s14749_s7 = smov %s14740_s9 }
 0x9a6   : > { %s14750_s28 = smov %s14741_s11 }
 0x9a7   :  { %6705 = vsyncpa [#allocation5], 1 }
 0x9a8   :  { %6707 = vsyncpa [#allocation5 + $0x1], 1 }
 0x9a9   :  { %6708 = vsyncpa [#allocation8], 1 }
 0x9aa   :  { %6710 = vsyncpa [#allocation8 + $0x1], 1 }
 0x9ab   :  { %6711 = vsyncpa [#allocation11], 1 }
 0x9ac   :  { %6712 = vsyncpa [#allocation14], 1 }
 0x9ad   :  { %6713 = vsyncpa [#allocation17], 1 }
 0x9ae   :  { %6714 = vsyncpa [#allocation20], 1 }
 0x9af   :  { %6715 = vsyncpa [#allocation23], 1 }
 0x9b0   :  { %6716 = vsyncpa [#allocation26], 1 }
 0x9b1   :  { %6717 = vsyncpa [#allocation6], 1 }
 0x9b2   :  { %6719 = vsyncpa [#allocation6 + $0x1], 1 }

</bundles_post_ra>
